<compile_context>
chip_gen: v7x
topology: tpu7x:2x2x1
jax: 0.10.0
libtpu: 0.0.40
codegen_flags: <defaults>
</compile_context>

<pallas_src>
import functools
import math

import jax
import jax.numpy as jnp
from jax import lax
from jax.experimental import pallas as pl
from jax.experimental.pallas import tpu as pltpu

# Accurate f32 matmuls on both the Pallas (MXU multi-pass) and XLA-reference
# sides so the numerical check below is tight.
jax.config.update("jax_default_matmul_precision", "highest")


def _round_up(x, m):
    return (x + m - 1) // m * m


# ---------------------------------------------------------------------------
# Kernel 1: tiled matmul with fused bias + activation epilogue.
#   Used for every convolution (1x1 directly, 3x3 via im2col), the CAB
#   squeeze/excite 1x1 convs and the bilinear-upsample interpolation matmul.
# ---------------------------------------------------------------------------
def _matmul_kernel(x_ref, w_ref, b_ref, o_ref, acc_ref, *, activation):
    k = pl.program_id(2)

    @pl.when(k == 0)
    def _():
        acc_ref[...] = jnp.zeros_like(acc_ref)

    acc_ref[...] += jnp.dot(
        x_ref[...], w_ref[...], preferred_element_type=jnp.float32
    )

    @pl.when(k == pl.num_programs(2) - 1)
    def _():
        y = acc_ref[...] + b_ref[...].astype(jnp.float32)
        if activation == "relu":
            y = jnp.maximum(y, 0.0)
        elif activation == "sigmoid":
            y = 1.0 / (1.0 + jnp.exp(-y))
        o_ref[...] = y.astype(o_ref.dtype)


def matmul_bias_act(x, w, b=None, activation="none", *, tm=128, tn=128, tk=128):
    """y = act(x @ w + b); x:(M,K), w:(K,Ncols), b:(Ncols,)."""
    M, K = x.shape
    K2, Ncols = w.shape
    assert K == K2
    if b is None:
        b = jnp.zeros((Ncols,), x.dtype)
    Mp, Kp, Np = _round_up(M, tm), _round_up(K, tk), _round_up(Ncols, tn)
    xp = jnp.pad(x, ((0, Mp - M), (0, Kp - K)))
    wp = jnp.pad(w, ((0, Kp - K), (0, Np - Ncols)))
    bp = jnp.pad(b.reshape(1, Ncols), ((0, 0), (0, Np - Ncols)))

    out = pl.pallas_call(
        functools.partial(_matmul_kernel, activation=activation),
        out_shape=jax.ShapeDtypeStruct((Mp, Np), x.dtype),
        grid_spec=pltpu.PrefetchScalarGridSpec(
            num_scalar_prefetch=0,
            grid=(Mp // tm, Np // tn, Kp // tk),
            in_specs=[
                pl.BlockSpec((tm, tk), lambda i, j, k: (i, k)),
                pl.BlockSpec((tk, tn), lambda i, j, k: (k, j)),
                pl.BlockSpec((1, tn), lambda i, j, k: (0, j)),
            ],
            out_specs=pl.BlockSpec((tm, tn), lambda i, j, k: (i, j)),
            scratch_shapes=[pltpu.VMEM((tm, tn), jnp.float32)],
        ),
        compiler_params=pltpu.CompilerParams(
            dimension_semantics=("parallel", "parallel", "arbitrary")
        ),
    )(xp, wp, bp)
    return out[:M, :Ncols]


# ---------------------------------------------------------------------------
# Kernel 2: BatchNorm2d (training-mode batch stats) + ReLU, fused.
#   x is (M, C) with M = N*H*W; per-channel stats over all rows, single pass
#   sum / sum-of-squares, biased (1/n) variance, affine folded to scale/shift.
# ---------------------------------------------------------------------------
def _bn_relu_kernel(x_ref, g_ref, b_ref, o_ref, *, eps):
    x = x_ref[...].astype(jnp.float32)                    # (M, cb)
    m = x.shape[0]
    s = jnp.sum(x, axis=0, keepdims=True)
    ss = jnp.sum(x * x, axis=0, keepdims=True)
    mean = s / m
    var = ss / m - mean * mean                            # biased, like F.batch_norm
    inv = lax.rsqrt(var + eps)
    scale = g_ref[...].astype(jnp.float32) * inv          # (1, cb)
    shift = b_ref[...].astype(jnp.float32) - mean * scale
    o_ref[...] = jnp.maximum(x * scale + shift, 0.0).astype(o_ref.dtype)


def batchnorm_relu(x, gamma, beta, *, eps=1e-5, cb=128):
    # TODO(synk): for very large N*H*W, chunk the reduction over an "arbitrary"
    # grid axis (partial sum/sumsq scratch) to bound VMEM on v7x.
    M, C = x.shape
    Cp = _round_up(C, cb)
    xp = jnp.pad(x, ((0, 0), (0, Cp - C)))
    gp = jnp.pad(gamma.reshape(1, C), ((0, 0), (0, Cp - C)))
    bp = jnp.pad(beta.reshape(1, C), ((0, 0), (0, Cp - C)))
    out = pl.pallas_call(
        functools.partial(_bn_relu_kernel, eps=eps),
        out_shape=jax.ShapeDtypeStruct((M, Cp), x.dtype),
        grid_spec=pltpu.PrefetchScalarGridSpec(
            num_scalar_prefetch=0,
            grid=(Cp // cb,),
            in_specs=[
                pl.BlockSpec((M, cb), lambda c: (0, c)),
                pl.BlockSpec((1, cb), lambda c: (0, c)),
                pl.BlockSpec((1, cb), lambda c: (0, c)),
            ],
            out_specs=pl.BlockSpec((M, cb), lambda c: (0, c)),
        ),
        compiler_params=pltpu.CompilerParams(dimension_semantics=("parallel",)),
    )(xp, gp, bp)
    return out[:, :C]


# ---------------------------------------------------------------------------
# Kernel 3: residual add + ReLU (RRB tail).
# ---------------------------------------------------------------------------
def _add_relu_kernel(a_ref, b_ref, o_ref):
    o_ref[0] = jnp.maximum(a_ref[0] + b_ref[0], 0.0).astype(o_ref.dtype)


def add_relu(a, b, n_batch):
    M, C = a.shape
    hw = M // n_batch
    out = pl.pallas_call(
        _add_relu_kernel,
        out_shape=jax.ShapeDtypeStruct((n_batch, hw, C), a.dtype),
        grid_spec=pltpu.PrefetchScalarGridSpec(
            num_scalar_prefetch=0,
            grid=(n_batch,),
            in_specs=[
                pl.BlockSpec((1, hw, C), lambda n: (n, 0, 0)),
                pl.BlockSpec((1, hw, C), lambda n: (n, 0, 0)),
            ],
            out_specs=pl.BlockSpec((1, hw, C), lambda n: (n, 0, 0)),
        ),
        compiler_params=pltpu.CompilerParams(dimension_semantics=("parallel",)),
    )(a.reshape(n_batch, hw, C), b.reshape(n_batch, hw, C))
    return out.reshape(M, C)


# ---------------------------------------------------------------------------
# Kernel 4: adaptive average pool to 1x1 (per-batch spatial mean).
# ---------------------------------------------------------------------------
def _spatial_mean_kernel(x_ref, o_ref):
    x = x_ref[0].astype(jnp.float32)                      # (HW, C)
    o_ref[0] = jnp.mean(x, axis=0, keepdims=True).astype(o_ref.dtype)


def spatial_mean(x, n_batch):
    M, C = x.shape
    hw = M // n_batch
    out = pl.pallas_call(
        _spatial_mean_kernel,
        out_shape=jax.ShapeDtypeStruct((n_batch, 1, C), x.dtype),
        grid_spec=pltpu.PrefetchScalarGridSpec(
            num_scalar_prefetch=0,
            grid=(n_batch,),
            in_specs=[pl.BlockSpec((1, hw, C), lambda n: (n, 0, 0))],
            out_specs=pl.BlockSpec((1, 1, C), lambda n: (n, 0, 0)),
        ),
        compiler_params=pltpu.CompilerParams(dimension_semantics=("parallel",)),
    )(x.reshape(n_batch, hw, C))
    return out.reshape(n_batch, C)


# ---------------------------------------------------------------------------
# Kernel 5: channel-attention gate: out = sigmoid_gate * x1 + x2.
# ---------------------------------------------------------------------------
def _gate_apply_kernel(g_ref, a_ref, b_ref, o_ref):
    g = g_ref[0].astype(jnp.float32)                      # (1, C)
    a = a_ref[0].astype(jnp.float32)                      # (HW, C)
    b = b_ref[0].astype(jnp.float32)                      # (HW, C)
    o_ref[0] = (g * a + b).astype(o_ref.dtype)


def gate_apply(gate, x1, x2, n_batch):
    M, C = x1.shape
    hw = M // n_batch
    out = pl.pallas_call(
        _gate_apply_kernel,
        out_shape=jax.ShapeDtypeStruct((n_batch, hw, C), x1.dtype),
        grid_spec=pltpu.PrefetchScalarGridSpec(
            num_scalar_prefetch=0,
            grid=(n_batch,),
            in_specs=[
                pl.BlockSpec((1, 1, C), lambda n: (n, 0, 0)),
                pl.BlockSpec((1, hw, C), lambda n: (n, 0, 0)),
                pl.BlockSpec((1, hw, C), lambda n: (n, 0, 0)),
            ],
            out_specs=pl.BlockSpec((1, hw, C), lambda n: (n, 0, 0)),
        ),
        compiler_params=pltpu.CompilerParams(dimension_semantics=("parallel",)),
    )(gate.reshape(n_batch, 1, C), x1.reshape(n_batch, hw, C),
      x2.reshape(n_batch, hw, C))
    return out.reshape(M, C)


# ---------------------------------------------------------------------------
# Module composition (ConvLayer / RRB / CAB / StageBlock forward).
# ---------------------------------------------------------------------------
def _conv1x1(x_flat, w, b, activation="none"):
    return matmul_bias_act(x_flat, w, b, activation)


def _conv3x3(x_nhwc, w, b, activation="none"):
    """ReflectionPad2d(1) + Conv2d(k=3, stride=1).  w: (9*Cin, Cout)."""
    N, H, W, Cin = x_nhwc.shape
    xp = jnp.pad(x_nhwc, ((0, 0), (1, 1), (1, 1), (0, 0)), mode="reflect")
    cols = jnp.concatenate(
        [xp[:, dy:dy + H, dx:dx + W, :] for dy in range(3) for dx in range(3)],
        axis=-1,
    )                                                     # (N, H, W, 9*Cin)
    return matmul_bias_act(cols.reshape(N * H * W, 9 * Cin), w, b, activation)


def _rrb(x_flat, p, N, H, W):
    cout = p["w1"].shape[1]
    x = _conv1x1(x_flat, p["w1"], p["b1"])
    residual = x
    x = _conv3x3(x.reshape(N, H, W, cout), p["w3a"], p["b3a"])
    x = batchnorm_relu(x, p["bn_gamma"], p["bn_beta"], eps=1e-5)
    x = _conv3x3(x.reshape(N, H, W, cout), p["w3b"], p["b3b"])
    return add_relu(residual, x, N)


def _cab(x1_flat, x2_flat, p, N):
    m1 = spatial_mean(x1_flat, N)                         # (N, C)
    m2 = spatial_mean(x2_flat, N)                         # (N, C)
    pooled = jnp.concatenate([m1, m2], axis=-1)           # cat([x1, x2], dim=1) order
    g = matmul_bias_act(pooled, p["w1"], p["b1"], activation="relu")
    g = matmul_bias_act(g, p["w2"], p["b2"], activation="sigmoid")
    return gate_apply(g, x1_flat, x2_flat, N)             # g * x1 + x2


def _interp_matrix(out_size, in_size):
    """Bilinear interpolation matrix, align_corners=True (F.upsample_bilinear)."""
    i = jnp.arange(out_size, dtype=jnp.float32)
    if out_size > 1:
        src = i * float(in_size - 1) / float(out_size - 1)
    else:
        src = jnp.zeros_like(i)
    i0 = jnp.clip(jnp.floor(src), 0, in_size - 1).astype(jnp.int32)
    i1 = jnp.clip(i0 + 1, 0, in_size - 1)
    frac = src - i0.astype(jnp.float32)
    e0 = jax.nn.one_hot(i0, in_size, dtype=jnp.float32)
    e1 = jax.nn.one_hot(i1, in_size, dtype=jnp.float32)
    return (1.0 - frac)[:, None] * e0 + frac[:, None] * e1


def _upsample_bilinear(x_nchw, H, W):
    """F.upsample_bilinear(x, (H, W)) returned as (N*H*W, C) channels-last."""
    N, C, h, w = x_nchw.shape
    A2 = jnp.kron(_interp_matrix(H, h), _interp_matrix(W, w))  # (H*W, h*w)
    y = matmul_bias_act(x_nchw.reshape(N * C, h * w), A2.T)    # (N*C, H*W)
    return y.reshape(N, C, H, W).transpose(0, 2, 3, 1).reshape(N * H * W, C)


def stage_block_forward(params, x1_nchw, x2_nchw):
    N, Cin, H, W = x1_nchw.shape
    width = params["rrb1"]["w1"].shape[1]
    x1 = x1_nchw.transpose(0, 2, 3, 1).reshape(N * H * W, Cin)

    x1 = _rrb(x1, params["rrb1"], N, H, W)                # RRB_1
    x2 = _upsample_bilinear(x2_nchw, H, W)                # bilinear to x1's size
    x1 = _cab(x1, x2, params["cab"], N)                   # CAB
    x1 = _rrb(x1, params["rrb2"], N, H, W)                # RRB_2

    return x1.reshape(N, H, W, width).transpose(0, 3, 1, 2)


# ---------------------------------------------------------------------------
# Parameters + pure-JAX reference.
# ---------------------------------------------------------------------------
def init_params(key, in_channels, width):
    ks = jax.random.split(key, 16)

    def conv_w(k, cin, cout, ksize):
        fan_in = cin * ksize * ksize
        return (jax.random.normal(k, (ksize * ksize * cin, cout), jnp.float32)
                / math.sqrt(fan_in))

    def conv_b(k, cout):
        return 0.1 * jax.random.normal(k, (cout,), jnp.float32)

    def rrb_params(k1, k2, k3, k4, k5, k6, cin, cout):
        return {
            "w1": conv_w(k1, cin, cout, 1), "b1": conv_b(k2, cout),
            "w3a": conv_w(k3, cout, cout, 3), "b3a": conv_b(k4, cout),
            "bn_gamma": jnp.ones((cout,), jnp.float32),
            "bn_beta": jnp.zeros((cout,), jnp.float32),
            "w3b": conv_w(k5, cout, cout, 3), "b3b": conv_b(k6, cout),
        }

    squeeze = max(width // 6, 1)
    return {
        "rrb1": rrb_params(*ks[0:6], in_channels, width),
        "cab": {
            "w1": conv_w(ks[6], 2 * width, squeeze, 1), "b1": conv_b(ks[7], squeeze),
            "w2": conv_w(ks[8], squeeze, width, 1), "b2": conv_b(ks[9], width),
        },
        "rrb2": rrb_params(*ks[10:16], width, width),
    }


def stage_block_forward_ref(params, x1_nchw, x2_nchw):
    hp = lax.Precision.HIGHEST

    def conv1x1(x, w, b):
        return jnp.einsum("nhwc,cd->nhwd", x, w, precision=hp) + b

    def conv3x3(x, w, b):
        cin, cout = x.shape[-1], w.shape[-1]
        xp = jnp.pad(x, ((0, 0), (1, 1), (1, 1), (0, 0)), mode="reflect")
        y = lax.conv_general_dilated(
            xp, w.reshape(3, 3, cin, cout), (1, 1), "VALID",
            dimension_numbers=("NHWC", "HWIO", "NHWC"), precision=hp)
        return y + b

    def bn_relu(x, gamma, beta, eps=1e-5):
        mean = jnp.mean(x, axis=(0, 1, 2))
        var = jnp.mean(jnp.square(x - mean), axis=(0, 1, 2))  # biased (1/n)
        return jnp.maximum((x - mean) / jnp.sqrt(var + eps) * gamma + beta, 0.0)

    def rrb(x, p):
        x = conv1x1(x, p["w1"], p["b1"])
        res = x
        x = conv3x3(x, p["w3a"], p["b3a"])
        x = bn_relu(x, p["bn_gamma"], p["bn_beta"])
        x = conv3x3(x, p["w3b"], p["b3b"])
        return jnp.maximum(res + x, 0.0)

    def upsample(x, H, W):
        _, _, h, w = x.shape
        Ah, Aw = _interp_matrix(H, h), _interp_matrix(W, w)
        y = jnp.einsum("Hh,Ww,nchw->ncHW", Ah, Aw, x, precision=hp)
        return y.transpose(0, 2, 3, 1)

    def cab(x1, x2, p):
        pooled = jnp.concatenate(
            [jnp.mean(x1, axis=(1, 2)), jnp.mean(x2, axis=(1, 2))], axis=-1)
        g = jnp.maximum(
            jnp.einsum("nc,cd->nd", pooled, p["w1"], precision=hp) + p["b1"], 0.0)
        g = jax.nn.sigmoid(
            jnp.einsum("nc,cd->nd", g, p["w2"], precision=hp) + p["b2"])
        return g[:, None, None, :] * x1 + x2

    _, _, H, W = x1_nchw.shape
    x1 = x1_nchw.transpose(0, 2, 3, 1)
    x1 = rrb(x1, params["rrb1"])
    x2 = upsample(x2_nchw, H, W)
    x1 = cab(x1, x2, params["cab"])
    x1 = rrb(x1, params["rrb2"])
    return x1.transpose(0, 3, 1, 2)


if __name__ == "__main__":
    key = jax.random.PRNGKey(0)
    kp, k1, k2 = jax.random.split(key, 3)

    # Small stand-in shapes with the StageBlock structure (stage-1 channel
    # ratio 256:512 scaled down to 32:64).  x2 has half the spatial size and
    # is bilinearly upsampled to x1's (H, W) inside the forward pass.
    N, Cin, H, W = 2, 32, 16, 16
    width = 64
    h2, w2 = H // 2, W // 2

    params = init_params(kp, Cin, width)
    x1 = jax.random.normal(k1, (N, Cin, H, W), dtype=jnp.float32)
    x2 = jax.random.normal(k2, (N, width, h2, w2), dtype=jnp.float32)

    fwd = jax.jit(stage_block_forward)
    out = jax.block_until_ready(fwd(params, x1, x2))

    ref = stage_block_forward_ref(params, x1, x2)
    assert out.shape == (N, width, H, W)
    assert bool(jnp.all(jnp.isfinite(out)))
    assert jnp.allclose(out, ref, atol=2e-3, rtol=2e-3), float(
        jnp.max(jnp.abs(out - ref)))

    print("KERNEL_OK")
</pallas_src>

<mosaic_0001>
module attributes {stable_mosaic.version = 11 : i64} {
  func.func @_matmul_kernel(%arg0: i32, %arg1: i32, %arg2: i32, %arg3: memref<128x128xf32, #tpu.memory_space<vmem>>, %arg4: memref<128x128xf32, #tpu.memory_space<vmem>>, %arg5: memref<1x128xf32, #tpu.memory_space<vmem>>, %arg6: memref<128x128xf32, #tpu.memory_space<vmem>>, %arg7: memref<128x128xf32, #tpu.memory_space<vmem>>) attributes {dimension_semantics = [#tpu.dimension_semantics<parallel>, #tpu.dimension_semantics<parallel>, #tpu.dimension_semantics<arbitrary>], iteration_bounds = array<i64: 4, 1, 1>, scalar_prefetch = 0 : i64, scratch_operands = 1 : i64, tpu.core_type = #tpu.core_type<tc>, window_params = [{transform_indices = @transform_0, window_bounds = array<i64: 128, 128>}, {transform_indices = @transform_1, window_bounds = array<i64: 128, 128>}, {transform_indices = @transform_2, window_bounds = array<i64: 1, 128>}, {transform_indices = @transform_3, window_bounds = array<i64: 128, 128>}]} {
    %c0_i32 = arith.constant 0 : i32
    %0 = arith.cmpi eq, %arg2, %c0_i32 : i32
    %1 = arith.extui %0 : i1 to i32
    %c0_i32_0 = arith.constant 0 : i32
    %2 = arith.cmpi ne, %1, %c0_i32_0 : i32
    scf.if %2 {
      %cst_10 = arith.constant 0.000000e+00 : f32
      %12 = vector.broadcast %cst_10 : f32 to vector<128x128xf32>
      %c0_11 = arith.constant 0 : index
      %c0_12 = arith.constant 0 : index
      %13 = vector.load %arg7[%c0_11, %c0_12] : memref<128x128xf32, #tpu.memory_space<vmem>>, vector<128x128xf32>
      tpu.vector_store %arg7[%c0_11, %c0_12], %12 {strides = array<i32>} : memref<128x128xf32, #tpu.memory_space<vmem>>, vector<128x128xf32>,
    } else {
    }
    %c0 = arith.constant 0 : index
    %c0_1 = arith.constant 0 : index
    %3 = vector.load %arg7[%c0, %c0_1] : memref<128x128xf32, #tpu.memory_space<vmem>>, vector<128x128xf32>
    %c0_2 = arith.constant 0 : index
    %c0_3 = arith.constant 0 : index
    %4 = vector.load %arg3[%c0_2, %c0_3] : memref<128x128xf32, #tpu.memory_space<vmem>>, vector<128x128xf32>
    %c0_4 = arith.constant 0 : index
    %c0_5 = arith.constant 0 : index
    %5 = vector.load %arg4[%c0_4, %c0_5] : memref<128x128xf32, #tpu.memory_space<vmem>>, vector<128x128xf32>
    %cst = arith.constant dense<0.000000e+00> : vector<128x128xf32>
    %6 = tpu.matmul %4, %5, %cst {dimension_numbers = #tpu.dot_dimension_numbers<[1], [0], [0], [1], [0, 0, 1, 1], [], []>, precision = #tpu.contract_precision<fp32>} : vector<128x128xf32>, vector<128x128xf32>, vector<128x128xf32> -> vector<128x128xf32>
    %7 = arith.addf %3, %6 : vector<128x128xf32>
    %c0_6 = arith.constant 0 : index
    %c0_7 = arith.constant 0 : index
    %8 = vector.load %arg7[%c0_6, %c0_7] : memref<128x128xf32, #tpu.memory_space<vmem>>, vector<128x128xf32>
    tpu.vector_store %arg7[%c0_6, %c0_7], %7 {strides = array<i32>} : memref<128x128xf32, #tpu.memory_space<vmem>>, vector<128x128xf32>,
    %c0_i32_8 = arith.constant 0 : i32
    %9 = arith.cmpi eq, %arg2, %c0_i32_8 : i32
    %10 = arith.extui %9 : i1 to i32
    %c0_i32_9 = arith.constant 0 : i32
    %11 = arith.cmpi ne, %10, %c0_i32_9 : i32
    scf.if %11 {
      %c0_10 = arith.constant 0 : index
      %c0_11 = arith.constant 0 : index
      %12 = vector.load %arg7[%c0_10, %c0_11] : memref<128x128xf32, #tpu.memory_space<vmem>>, vector<128x128xf32>
      %c0_12 = arith.constant 0 : index
      %c0_13 = arith.constant 0 : index
      %13 = vector.load %arg5[%c0_12, %c0_13] : memref<1x128xf32, #tpu.memory_space<vmem>>, vector<1x128xf32>
      %14 = vector.broadcast %13 : vector<1x128xf32> to vector<128x128xf32>
      %15 = arith.addf %12, %14 : vector<128x128xf32>
      %c0_14 = arith.constant 0 : index
      %c0_15 = arith.constant 0 : index
      %16 = vector.load %arg6[%c0_14, %c0_15] : memref<128x128xf32, #tpu.memory_space<vmem>>, vector<128x128xf32>
      tpu.vector_store %arg6[%c0_14, %c0_15], %15 {strides = array<i32>} : memref<128x128xf32, #tpu.memory_space<vmem>>, vector<128x128xf32>,
    } else {
    }
    return
  }
  func.func @transform_0(%arg0: i32, %arg1: i32, %arg2: i32) -> (i32, i32) {
    %c0_i32 = arith.constant 0 : i32
    return %arg0, %arg2 : i32, i32
  }
  func.func @transform_1(%arg0: i32, %arg1: i32, %arg2: i32) -> (i32, i32) {
    %c0_i32 = arith.constant 0 : i32
    return %arg2, %arg1 : i32, i32
  }
  func.func @transform_2(%arg0: i32, %arg1: i32, %arg2: i32) -> (i32, i32) {
    %c0_i32 = arith.constant 0 : i32
    %c0_i32_0 = arith.constant 0 : i32
    return %c0_i32, %arg1 : i32, i32
  }
  func.func @transform_3(%arg0: i32, %arg1: i32, %arg2: i32) -> (i32, i32) {
    %c0_i32 = arith.constant 0 : i32
    return %arg0, %arg1 : i32, i32
  }
}

module attributes {stable_mosaic.version = 11 : i64} {
  func.func @_matmul_kernel(%arg0: i32, %arg1: i32, %arg2: i32, %arg3: memref<128x128xf32, #tpu.memory_space<vmem>>, %arg4: memref<128x128xf32, #tpu.memory_space<vmem>>, %arg5: memref<1x128xf32, #tpu.memory_space<vmem>>, %arg6: memref<128x128xf32, #tpu.memory_space<vmem>>, %arg7: memref<128x128xf32, #tpu.memory_space<vmem>>) attributes {dimension_semantics = [#tpu.dimension_semantics<parallel>, #tpu.dimension_semantics<parallel>, #tpu.dimension_semantics<arbitrary>], iteration_bounds = array<i64: 4, 1, 5>, scalar_prefetch = 0 : i64, scratch_operands = 1 : i64, tpu.core_type = #tpu.core_type<tc>, window_params = [{transform_indices = @transform_0, window_bounds = array<i64: 128, 128>}, {transform_indices = @transform_1, window_bounds = array<i64: 128, 128>}, {transform_indices = @transform_2, window_bounds = array<i64: 1, 128>}, {transform_indices = @transform_3, window_bounds = array<i64: 128, 128>}]} {
    %c0_i32 = arith.constant 0 : i32
    %0 = arith.cmpi eq, %arg2, %c0_i32 : i32
    %1 = arith.extui %0 : i1 to i32
    %c0_i32_0 = arith.constant 0 : i32
    %2 = arith.cmpi ne, %1, %c0_i32_0 : i32
    scf.if %2 {
      %cst_9 = arith.constant 0.000000e+00 : f32
      %12 = vector.broadcast %cst_9 : f32 to vector<128x128xf32>
      %c0_10 = arith.constant 0 : index
      %c0_11 = arith.constant 0 : index
      %13 = vector.load %arg7[%c0_10, %c0_11] : memref<128x128xf32, #tpu.memory_space<vmem>>, vector<128x128xf32>
      tpu.vector_store %arg7[%c0_10, %c0_11], %12 {strides = array<i32>} : memref<128x128xf32, #tpu.memory_space<vmem>>, vector<128x128xf32>,
    } else {
    }
    %c0 = arith.constant 0 : index
    %c0_1 = arith.constant 0 : index
    %3 = vector.load %arg7[%c0, %c0_1] : memref<128x128xf32, #tpu.memory_space<vmem>>, vector<128x128xf32>
    %c0_2 = arith.constant 0 : index
    %c0_3 = arith.constant 0 : index
    %4 = vector.load %arg3[%c0_2, %c0_3] : memref<128x128xf32, #tpu.memory_space<vmem>>, vector<128x128xf32>
    %c0_4 = arith.constant 0 : index
    %c0_5 = arith.constant 0 : index
    %5 = vector.load %arg4[%c0_4, %c0_5] : memref<128x128xf32, #tpu.memory_space<vmem>>, vector<128x128xf32>
    %cst = arith.constant dense<0.000000e+00> : vector<128x128xf32>
    %6 = tpu.matmul %4, %5, %cst {dimension_numbers = #tpu.dot_dimension_numbers<[1], [0], [0], [1], [0, 0, 1, 1], [], []>, precision = #tpu.contract_precision<fp32>} : vector<128x128xf32>, vector<128x128xf32>, vector<128x128xf32> -> vector<128x128xf32>
    %7 = arith.addf %3, %6 : vector<128x128xf32>
    %c0_6 = arith.constant 0 : index
    %c0_7 = arith.constant 0 : index
    %8 = vector.load %arg7[%c0_6, %c0_7] : memref<128x128xf32, #tpu.memory_space<vmem>>, vector<128x128xf32>
    tpu.vector_store %arg7[%c0_6, %c0_7], %7 {strides = array<i32>} : memref<128x128xf32, #tpu.memory_space<vmem>>, vector<128x128xf32>,
    %c4_i32 = arith.constant 4 : i32
    %9 = arith.cmpi eq, %arg2, %c4_i32 : i32
    %10 = arith.extui %9 : i1 to i32
    %c0_i32_8 = arith.constant 0 : i32
    %11 = arith.cmpi ne, %10, %c0_i32_8 : i32
    scf.if %11 {
      %c0_9 = arith.constant 0 : index
      %c0_10 = arith.constant 0 : index
      %12 = vector.load %arg7[%c0_9, %c0_10] : memref<128x128xf32, #tpu.memory_space<vmem>>, vector<128x128xf32>
      %c0_11 = arith.constant 0 : index
      %c0_12 = arith.constant 0 : index
      %13 = vector.load %arg5[%c0_11, %c0_12] : memref<1x128xf32, #tpu.memory_space<vmem>>, vector<1x128xf32>
      %14 = vector.broadcast %13 : vector<1x128xf32> to vector<128x128xf32>
      %15 = arith.addf %12, %14 : vector<128x128xf32>
      %c0_13 = arith.constant 0 : index
      %c0_14 = arith.constant 0 : index
      %16 = vector.load %arg6[%c0_13, %c0_14] : memref<128x128xf32, #tpu.memory_space<vmem>>, vector<128x128xf32>
      tpu.vector_store %arg6[%c0_13, %c0_14], %15 {strides = array<i32>} : memref<128x128xf32, #tpu.memory_space<vmem>>, vector<128x128xf32>,
    } else {
    }
    return
  }
  func.func @transform_0(%arg0: i32, %arg1: i32, %arg2: i32) -> (i32, i32) {
    %c0_i32 = arith.constant 0 : i32
    return %arg0, %arg2 : i32, i32
  }
  func.func @transform_1(%arg0: i32, %arg1: i32, %arg2: i32) -> (i32, i32) {
    %c0_i32 = arith.constant 0 : i32
    return %arg2, %arg1 : i32, i32
  }
  func.func @transform_2(%arg0: i32, %arg1: i32, %arg2: i32) -> (i32, i32) {
    %c0_i32 = arith.constant 0 : i32
    %c0_i32_0 = arith.constant 0 : i32
    return %c0_i32, %arg1 : i32, i32
  }
  func.func @transform_3(%arg0: i32, %arg1: i32, %arg2: i32) -> (i32, i32) {
    %c0_i32 = arith.constant 0 : i32
    return %arg0, %arg1 : i32, i32
  }
}

module attributes {stable_mosaic.version = 11 : i64} {
  func.func @_bn_relu_kernel(%arg0: i32, %arg1: memref<512x128xf32, #tpu.memory_space<vmem>>, %arg2: memref<1x128xf32, #tpu.memory_space<vmem>>, %arg3: memref<1x128xf32, #tpu.memory_space<vmem>>, %arg4: memref<512x128xf32, #tpu.memory_space<vmem>>) attributes {dimension_semantics = [#tpu.dimension_semantics<parallel>], iteration_bounds = array<i64: 1>, scalar_prefetch = 0 : i64, scratch_operands = 0 : i64, tpu.core_type = #tpu.core_type<tc>, window_params = [{transform_indices = @transform_0, window_bounds = array<i64: 512, 128>}, {transform_indices = @transform_1, window_bounds = array<i64: 1, 128>}, {transform_indices = @transform_2, window_bounds = array<i64: 1, 128>}, {transform_indices = @transform_3, window_bounds = array<i64: 512, 128>}]} {
    %c0 = arith.constant 0 : index
    %c0_0 = arith.constant 0 : index
    %0 = vector.load %arg1[%c0, %c0_0] : memref<512x128xf32, #tpu.memory_space<vmem>>, vector<512x128xf32>
    %cst = arith.constant dense<0.000000e+00> : vector<128xf32>
    %1 = vector.multi_reduction <add>, %0, %cst [0] : vector<512x128xf32> to vector<128xf32>
    %2 = vector.shape_cast %1 : vector<128xf32> to vector<1x128xf32>
    %3 = arith.mulf %0, %0 : vector<512x128xf32>
    %cst_1 = arith.constant dense<0.000000e+00> : vector<128xf32>
    %4 = vector.multi_reduction <add>, %3, %cst_1 [0] : vector<512x128xf32> to vector<128xf32>
    %5 = vector.shape_cast %4 : vector<128xf32> to vector<1x128xf32>
    %cst_2 = arith.constant 5.120000e+02 : f32
    %6 = vector.broadcast %cst_2 : f32 to vector<1x128xf32>
    %7 = arith.divf %2, %6 : vector<1x128xf32>
    %cst_3 = arith.constant 5.120000e+02 : f32
    %8 = vector.broadcast %cst_3 : f32 to vector<1x128xf32>
    %9 = arith.divf %5, %8 : vector<1x128xf32>
    %10 = arith.mulf %7, %7 : vector<1x128xf32>
    %11 = arith.subf %9, %10 : vector<1x128xf32>
    %cst_4 = arith.constant 9.99999974E-6 : f32
    %12 = vector.broadcast %cst_4 : f32 to vector<1x128xf32>
    %13 = arith.addf %11, %12 : vector<1x128xf32>
    %14 = math.rsqrt %13 : vector<1x128xf32>
    %c0_5 = arith.constant 0 : index
    %c0_6 = arith.constant 0 : index
    %15 = vector.load %arg2[%c0_5, %c0_6] : memref<1x128xf32, #tpu.memory_space<vmem>>, vector<1x128xf32>
    %16 = arith.mulf %15, %14 : vector<1x128xf32>
    %c0_7 = arith.constant 0 : index
    %c0_8 = arith.constant 0 : index
    %17 = vector.load %arg3[%c0_7, %c0_8] : memref<1x128xf32, #tpu.memory_space<vmem>>, vector<1x128xf32>
    %18 = arith.mulf %7, %16 : vector<1x128xf32>
    %19 = arith.subf %17, %18 : vector<1x128xf32>
    %20 = vector.broadcast %16 : vector<1x128xf32> to vector<512x128xf32>
    %21 = arith.mulf %0, %20 : vector<512x128xf32>
    %22 = vector.broadcast %19 : vector<1x128xf32> to vector<512x128xf32>
    %23 = arith.addf %21, %22 : vector<512x128xf32>
    %cst_9 = arith.constant 0.000000e+00 : f32
    %24 = vector.broadcast %cst_9 : f32 to vector<512x128xf32>
    %25 = arith.maximumf %23, %24 : vector<512x128xf32>
    %c0_10 = arith.constant 0 : index
    %c0_11 = arith.constant 0 : index
    %26 = vector.load %arg4[%c0_10, %c0_11] : memref<512x128xf32, #tpu.memory_space<vmem>>, vector<512x128xf32>
    tpu.vector_store %arg4[%c0_10, %c0_11], %25 {strides = array<i32>} : memref<512x128xf32, #tpu.memory_space<vmem>>, vector<512x128xf32>,
    return
  }
  func.func @transform_0(%arg0: i32) -> (i32, i32) {
    %c0_i32 = arith.constant 0 : i32
    %c0_i32_0 = arith.constant 0 : i32
    return %c0_i32, %arg0 : i32, i32
  }
  func.func @transform_1(%arg0: i32) -> (i32, i32) {
    %c0_i32 = arith.constant 0 : i32
    %c0_i32_0 = arith.constant 0 : i32
    return %c0_i32, %arg0 : i32, i32
  }
  func.func @transform_2(%arg0: i32) -> (i32, i32) {
    %c0_i32 = arith.constant 0 : i32
    %c0_i32_0 = arith.constant 0 : i32
    return %c0_i32, %arg0 : i32, i32
  }
  func.func @transform_3(%arg0: i32) -> (i32, i32) {
    %c0_i32 = arith.constant 0 : i32
    %c0_i32_0 = arith.constant 0 : i32
    return %c0_i32, %arg0 : i32, i32
  }
}

module attributes {stable_mosaic.version = 11 : i64} {
  func.func @_spatial_mean_kernel(%arg0: i32, %arg1: memref<1x256x64xf32, #tpu.memory_space<vmem>>, %arg2: memref<1x1x64xf32, #tpu.memory_space<vmem>>) attributes {dimension_semantics = [#tpu.dimension_semantics<parallel>], iteration_bounds = array<i64: 2>, scalar_prefetch = 0 : i64, scratch_operands = 0 : i64, tpu.core_type = #tpu.core_type<tc>, window_params = [{transform_indices = @transform_0, window_bounds = array<i64: 1, 256, 64>}, {transform_indices = @transform_1, window_bounds = array<i64: 1, 1, 64>}]} {
    %c0 = arith.constant 0 : index
    %c0_0 = arith.constant 0 : index
    %c0_1 = arith.constant 0 : index
    %0 = vector.load %arg1[%c0, %c0_0, %c0_1] : memref<1x256x64xf32, #tpu.memory_space<vmem>>, vector<1x256x64xf32>
    %1 = vector.shape_cast %0 : vector<1x256x64xf32> to vector<256x64xf32>
    %cst = arith.constant dense<0.000000e+00> : vector<64xf32>
    %2 = vector.multi_reduction <add>, %1, %cst [0] : vector<256x64xf32> to vector<64xf32>
    %3 = vector.shape_cast %2 : vector<64xf32> to vector<1x64xf32>
    %cst_2 = arith.constant 2.560000e+02 : f32
    %4 = vector.broadcast %cst_2 : f32 to vector<1x64xf32>
    %5 = arith.divf %3, %4 : vector<1x64xf32>
    %c0_3 = arith.constant 0 : index
    %c0_4 = arith.constant 0 : index
    %c0_5 = arith.constant 0 : index
    %6 = vector.load %arg2[%c0_3, %c0_4, %c0_5] : memref<1x1x64xf32, #tpu.memory_space<vmem>>, vector<1x1x64xf32>
    %7 = vector.shape_cast %6 : vector<1x1x64xf32> to vector<1x64xf32>
    %8 = vector.shape_cast %5 : vector<1x64xf32> to vector<1x1x64xf32>
    tpu.vector_store %arg2[%c0_3, %c0_4, %c0_5], %8 {strides = array<i32>} : memref<1x1x64xf32, #tpu.memory_space<vmem>>, vector<1x1x64xf32>,
    return
  }
  func.func @transform_0(%arg0: i32) -> (i32, i32, i32) {
    %c0_i32 = arith.constant 0 : i32
    %c0_i32_0 = arith.constant 0 : i32
    %c0_i32_1 = arith.constant 0 : i32
    return %arg0, %c0_i32, %c0_i32_0 : i32, i32, i32
  }
  func.func @transform_1(%arg0: i32) -> (i32, i32, i32) {
    %c0_i32 = arith.constant 0 : i32
    %c0_i32_0 = arith.constant 0 : i32
    %c0_i32_1 = arith.constant 0 : i32
    return %arg0, %c0_i32, %c0_i32_0 : i32, i32, i32
  }
}

module attributes {stable_mosaic.version = 11 : i64} {
  func.func @_add_relu_kernel(%arg0: i32, %arg1: memref<1x256x64xf32, #tpu.memory_space<vmem>>, %arg2: memref<1x256x64xf32, #tpu.memory_space<vmem>>, %arg3: memref<1x256x64xf32, #tpu.memory_space<vmem>>) attributes {dimension_semantics = [#tpu.dimension_semantics<parallel>], iteration_bounds = array<i64: 2>, scalar_prefetch = 0 : i64, scratch_operands = 0 : i64, tpu.core_type = #tpu.core_type<tc>, window_params = [{transform_indices = @transform_0, window_bounds = array<i64: 1, 256, 64>}, {transform_indices = @transform_1, window_bounds = array<i64: 1, 256, 64>}, {transform_indices = @transform_2, window_bounds = array<i64: 1, 256, 64>}]} {
    %c0 = arith.constant 0 : index
    %c0_0 = arith.constant 0 : index
    %c0_1 = arith.constant 0 : index
    %0 = vector.load %arg1[%c0, %c0_0, %c0_1] : memref<1x256x64xf32, #tpu.memory_space<vmem>>, vector<1x256x64xf32>
    %1 = vector.shape_cast %0 : vector<1x256x64xf32> to vector<256x64xf32>
    %c0_2 = arith.constant 0 : index
    %c0_3 = arith.constant 0 : index
    %c0_4 = arith.constant 0 : index
    %2 = vector.load %arg2[%c0_2, %c0_3, %c0_4] : memref<1x256x64xf32, #tpu.memory_space<vmem>>, vector<1x256x64xf32>
    %3 = vector.shape_cast %2 : vector<1x256x64xf32> to vector<256x64xf32>
    %4 = arith.addf %1, %3 : vector<256x64xf32>
    %cst = arith.constant 0.000000e+00 : f32
    %5 = vector.broadcast %cst : f32 to vector<256x64xf32>
    %6 = arith.maximumf %4, %5 : vector<256x64xf32>
    %c0_5 = arith.constant 0 : index
    %c0_6 = arith.constant 0 : index
    %c0_7 = arith.constant 0 : index
    %7 = vector.load %arg3[%c0_5, %c0_6, %c0_7] : memref<1x256x64xf32, #tpu.memory_space<vmem>>, vector<1x256x64xf32>
    %8 = vector.shape_cast %7 : vector<1x256x64xf32> to vector<256x64xf32>
    %9 = vector.shape_cast %6 : vector<256x64xf32> to vector<1x256x64xf32>
    tpu.vector_store %arg3[%c0_5, %c0_6, %c0_7], %9 {strides = array<i32>} : memref<1x256x64xf32, #tpu.memory_space<vmem>>, vector<1x256x64xf32>,
    return
  }
  func.func @transform_0(%arg0: i32) -> (i32, i32, i32) {
    %c0_i32 = arith.constant 0 : i32
    %c0_i32_0 = arith.constant 0 : i32
    %c0_i32_1 = arith.constant 0 : i32
    return %arg0, %c0_i32, %c0_i32_0 : i32, i32, i32
  }
  func.func @transform_1(%arg0: i32) -> (i32, i32, i32) {
    %c0_i32 = arith.constant 0 : i32
    %c0_i32_0 = arith.constant 0 : i32
    %c0_i32_1 = arith.constant 0 : i32
    return %arg0, %c0_i32, %c0_i32_0 : i32, i32, i32
  }
  func.func @transform_2(%arg0: i32) -> (i32, i32, i32) {
    %c0_i32 = arith.constant 0 : i32
    %c0_i32_0 = arith.constant 0 : i32
    %c0_i32_1 = arith.constant 0 : i32
    return %arg0, %c0_i32, %c0_i32_0 : i32, i32, i32
  }
}

module attributes {stable_mosaic.version = 11 : i64} {
  func.func @_matmul_kernel(%arg0: i32, %arg1: i32, %arg2: i32, %arg3: memref<128x128xf32, #tpu.memory_space<vmem>>, %arg4: memref<128x128xf32, #tpu.memory_space<vmem>>, %arg5: memref<1x128xf32, #tpu.memory_space<vmem>>, %arg6: memref<128x128xf32, #tpu.memory_space<vmem>>, %arg7: memref<128x128xf32, #tpu.memory_space<vmem>>) attributes {dimension_semantics = [#tpu.dimension_semantics<parallel>, #tpu.dimension_semantics<parallel>, #tpu.dimension_semantics<arbitrary>], iteration_bounds = array<i64: 1, 2, 1>, scalar_prefetch = 0 : i64, scratch_operands = 1 : i64, tpu.core_type = #tpu.core_type<tc>, window_params = [{transform_indices = @transform_0, window_bounds = array<i64: 128, 128>}, {transform_indices = @transform_1, window_bounds = array<i64: 128, 128>}, {transform_indices = @transform_2, window_bounds = array<i64: 1, 128>}, {transform_indices = @transform_3, window_bounds = array<i64: 128, 128>}]} {
    %c0_i32 = arith.constant 0 : i32
    %0 = arith.cmpi eq, %arg2, %c0_i32 : i32
    %1 = arith.extui %0 : i1 to i32
    %c0_i32_0 = arith.constant 0 : i32
    %2 = arith.cmpi ne, %1, %c0_i32_0 : i32
    scf.if %2 {
      %cst_10 = arith.constant 0.000000e+00 : f32
      %12 = vector.broadcast %cst_10 : f32 to vector<128x128xf32>
      %c0_11 = arith.constant 0 : index
      %c0_12 = arith.constant 0 : index
      %13 = vector.load %arg7[%c0_11, %c0_12] : memref<128x128xf32, #tpu.memory_space<vmem>>, vector<128x128xf32>
      tpu.vector_store %arg7[%c0_11, %c0_12], %12 {strides = array<i32>} : memref<128x128xf32, #tpu.memory_space<vmem>>, vector<128x128xf32>,
    } else {
    }
    %c0 = arith.constant 0 : index
    %c0_1 = arith.constant 0 : index
    %3 = vector.load %arg7[%c0, %c0_1] : memref<128x128xf32, #tpu.memory_space<vmem>>, vector<128x128xf32>
    %c0_2 = arith.constant 0 : index
    %c0_3 = arith.constant 0 : index
    %4 = vector.load %arg3[%c0_2, %c0_3] : memref<128x128xf32, #tpu.memory_space<vmem>>, vector<128x128xf32>
    %c0_4 = arith.constant 0 : index
    %c0_5 = arith.constant 0 : index
    %5 = vector.load %arg4[%c0_4, %c0_5] : memref<128x128xf32, #tpu.memory_space<vmem>>, vector<128x128xf32>
    %cst = arith.constant dense<0.000000e+00> : vector<128x128xf32>
    %6 = tpu.matmul %4, %5, %cst {dimension_numbers = #tpu.dot_dimension_numbers<[1], [0], [0], [1], [0, 0, 1, 1], [], []>, precision = #tpu.contract_precision<fp32>} : vector<128x128xf32>, vector<128x128xf32>, vector<128x128xf32> -> vector<128x128xf32>
    %7 = arith.addf %3, %6 : vector<128x128xf32>
    %c0_6 = arith.constant 0 : index
    %c0_7 = arith.constant 0 : index
    %8 = vector.load %arg7[%c0_6, %c0_7] : memref<128x128xf32, #tpu.memory_space<vmem>>, vector<128x128xf32>
    tpu.vector_store %arg7[%c0_6, %c0_7], %7 {strides = array<i32>} : memref<128x128xf32, #tpu.memory_space<vmem>>, vector<128x128xf32>,
    %c0_i32_8 = arith.constant 0 : i32
    %9 = arith.cmpi eq, %arg2, %c0_i32_8 : i32
    %10 = arith.extui %9 : i1 to i32
    %c0_i32_9 = arith.constant 0 : i32
    %11 = arith.cmpi ne, %10, %c0_i32_9 : i32
    scf.if %11 {
      %c0_10 = arith.constant 0 : index
      %c0_11 = arith.constant 0 : index
      %12 = vector.load %arg7[%c0_10, %c0_11] : memref<128x128xf32, #tpu.memory_space<vmem>>, vector<128x128xf32>
      %c0_12 = arith.constant 0 : index
      %c0_13 = arith.constant 0 : index
      %13 = vector.load %arg5[%c0_12, %c0_13] : memref<1x128xf32, #tpu.memory_space<vmem>>, vector<1x128xf32>
      %14 = vector.broadcast %13 : vector<1x128xf32> to vector<128x128xf32>
      %15 = arith.addf %12, %14 : vector<128x128xf32>
      %c0_14 = arith.constant 0 : index
      %c0_15 = arith.constant 0 : index
      %16 = vector.load %arg6[%c0_14, %c0_15] : memref<128x128xf32, #tpu.memory_space<vmem>>, vector<128x128xf32>
      tpu.vector_store %arg6[%c0_14, %c0_15], %15 {strides = array<i32>} : memref<128x128xf32, #tpu.memory_space<vmem>>, vector<128x128xf32>,
    } else {
    }
    return
  }
  func.func @transform_0(%arg0: i32, %arg1: i32, %arg2: i32) -> (i32, i32) {
    %c0_i32 = arith.constant 0 : i32
    return %arg0, %arg2 : i32, i32
  }
  func.func @transform_1(%arg0: i32, %arg1: i32, %arg2: i32) -> (i32, i32) {
    %c0_i32 = arith.constant 0 : i32
    return %arg2, %arg1 : i32, i32
  }
  func.func @transform_2(%arg0: i32, %arg1: i32, %arg2: i32) -> (i32, i32) {
    %c0_i32 = arith.constant 0 : i32
    %c0_i32_0 = arith.constant 0 : i32
    return %c0_i32, %arg1 : i32, i32
  }
  func.func @transform_3(%arg0: i32, %arg1: i32, %arg2: i32) -> (i32, i32) {
    %c0_i32 = arith.constant 0 : i32
    return %arg0, %arg1 : i32, i32
  }
}

module attributes {stable_mosaic.version = 11 : i64} {
  func.func @_matmul_kernel(%arg0: i32, %arg1: i32, %arg2: i32, %arg3: memref<128x128xf32, #tpu.memory_space<vmem>>, %arg4: memref<128x128xf32, #tpu.memory_space<vmem>>, %arg5: memref<1x128xf32, #tpu.memory_space<vmem>>, %arg6: memref<128x128xf32, #tpu.memory_space<vmem>>, %arg7: memref<128x128xf32, #tpu.memory_space<vmem>>) attributes {dimension_semantics = [#tpu.dimension_semantics<parallel>, #tpu.dimension_semantics<parallel>, #tpu.dimension_semantics<arbitrary>], iteration_bounds = array<i64: 1, 1, 1>, scalar_prefetch = 0 : i64, scratch_operands = 1 : i64, tpu.core_type = #tpu.core_type<tc>, window_params = [{transform_indices = @transform_0, window_bounds = array<i64: 128, 128>}, {transform_indices = @transform_1, window_bounds = array<i64: 128, 128>}, {transform_indices = @transform_2, window_bounds = array<i64: 1, 128>}, {transform_indices = @transform_3, window_bounds = array<i64: 128, 128>}]} {
    %c0_i32 = arith.constant 0 : i32
    %0 = arith.cmpi eq, %arg2, %c0_i32 : i32
    %1 = arith.extui %0 : i1 to i32
    %c0_i32_0 = arith.constant 0 : i32
    %2 = arith.cmpi ne, %1, %c0_i32_0 : i32
    scf.if %2 {
      %cst_10 = arith.constant 0.000000e+00 : f32
      %12 = vector.broadcast %cst_10 : f32 to vector<128x128xf32>
      %c0_11 = arith.constant 0 : index
      %c0_12 = arith.constant 0 : index
      %13 = vector.load %arg7[%c0_11, %c0_12] : memref<128x128xf32, #tpu.memory_space<vmem>>, vector<128x128xf32>
      tpu.vector_store %arg7[%c0_11, %c0_12], %12 {strides = array<i32>} : memref<128x128xf32, #tpu.memory_space<vmem>>, vector<128x128xf32>,
    } else {
    }
    %c0 = arith.constant 0 : index
    %c0_1 = arith.constant 0 : index
    %3 = vector.load %arg7[%c0, %c0_1] : memref<128x128xf32, #tpu.memory_space<vmem>>, vector<128x128xf32>
    %c0_2 = arith.constant 0 : index
    %c0_3 = arith.constant 0 : index
    %4 = vector.load %arg3[%c0_2, %c0_3] : memref<128x128xf32, #tpu.memory_space<vmem>>, vector<128x128xf32>
    %c0_4 = arith.constant 0 : index
    %c0_5 = arith.constant 0 : index
    %5 = vector.load %arg4[%c0_4, %c0_5] : memref<128x128xf32, #tpu.memory_space<vmem>>, vector<128x128xf32>
    %cst = arith.constant dense<0.000000e+00> : vector<128x128xf32>
    %6 = tpu.matmul %4, %5, %cst {dimension_numbers = #tpu.dot_dimension_numbers<[1], [0], [0], [1], [0, 0, 1, 1], [], []>, precision = #tpu.contract_precision<fp32>} : vector<128x128xf32>, vector<128x128xf32>, vector<128x128xf32> -> vector<128x128xf32>
    %7 = arith.addf %3, %6 : vector<128x128xf32>
    %c0_6 = arith.constant 0 : index
    %c0_7 = arith.constant 0 : index
    %8 = vector.load %arg7[%c0_6, %c0_7] : memref<128x128xf32, #tpu.memory_space<vmem>>, vector<128x128xf32>
    tpu.vector_store %arg7[%c0_6, %c0_7], %7 {strides = array<i32>} : memref<128x128xf32, #tpu.memory_space<vmem>>, vector<128x128xf32>,
    %c0_i32_8 = arith.constant 0 : i32
    %9 = arith.cmpi eq, %arg2, %c0_i32_8 : i32
    %10 = arith.extui %9 : i1 to i32
    %c0_i32_9 = arith.constant 0 : i32
    %11 = arith.cmpi ne, %10, %c0_i32_9 : i32
    scf.if %11 {
      %c0_10 = arith.constant 0 : index
      %c0_11 = arith.constant 0 : index
      %12 = vector.load %arg7[%c0_10, %c0_11] : memref<128x128xf32, #tpu.memory_space<vmem>>, vector<128x128xf32>
      %c0_12 = arith.constant 0 : index
      %c0_13 = arith.constant 0 : index
      %13 = vector.load %arg5[%c0_12, %c0_13] : memref<1x128xf32, #tpu.memory_space<vmem>>, vector<1x128xf32>
      %14 = vector.broadcast %13 : vector<1x128xf32> to vector<128x128xf32>
      %15 = arith.addf %12, %14 : vector<128x128xf32>
      %cst_14 = arith.constant 0.000000e+00 : f32
      %16 = vector.broadcast %cst_14 : f32 to vector<128x128xf32>
      %17 = arith.maximumf %15, %16 : vector<128x128xf32>
      %c0_15 = arith.constant 0 : index
      %c0_16 = arith.constant 0 : index
      %18 = vector.load %arg6[%c0_15, %c0_16] : memref<128x128xf32, #tpu.memory_space<vmem>>, vector<128x128xf32>
      tpu.vector_store %arg6[%c0_15, %c0_16], %17 {strides = array<i32>} : memref<128x128xf32, #tpu.memory_space<vmem>>, vector<128x128xf32>,
    } else {
    }
    return
  }
  func.func @transform_0(%arg0: i32, %arg1: i32, %arg2: i32) -> (i32, i32) {
    %c0_i32 = arith.constant 0 : i32
    return %arg0, %arg2 : i32, i32
  }
  func.func @transform_1(%arg0: i32, %arg1: i32, %arg2: i32) -> (i32, i32) {
    %c0_i32 = arith.constant 0 : i32
    return %arg2, %arg1 : i32, i32
  }
  func.func @transform_2(%arg0: i32, %arg1: i32, %arg2: i32) -> (i32, i32) {
    %c0_i32 = arith.constant 0 : i32
    %c0_i32_0 = arith.constant 0 : i32
    return %c0_i32, %arg1 : i32, i32
  }
  func.func @transform_3(%arg0: i32, %arg1: i32, %arg2: i32) -> (i32, i32) {
    %c0_i32 = arith.constant 0 : i32
    return %arg0, %arg1 : i32, i32
  }
}

module attributes {stable_mosaic.version = 11 : i64} {
  func.func @_matmul_kernel(%arg0: i32, %arg1: i32, %arg2: i32, %arg3: memref<128x128xf32, #tpu.memory_space<vmem>>, %arg4: memref<128x128xf32, #tpu.memory_space<vmem>>, %arg5: memref<1x128xf32, #tpu.memory_space<vmem>>, %arg6: memref<128x128xf32, #tpu.memory_space<vmem>>, %arg7: memref<128x128xf32, #tpu.memory_space<vmem>>) attributes {dimension_semantics = [#tpu.dimension_semantics<parallel>, #tpu.dimension_semantics<parallel>, #tpu.dimension_semantics<arbitrary>], iteration_bounds = array<i64: 1, 1, 1>, scalar_prefetch = 0 : i64, scratch_operands = 1 : i64, tpu.core_type = #tpu.core_type<tc>, window_params = [{transform_indices = @transform_0, window_bounds = array<i64: 128, 128>}, {transform_indices = @transform_1, window_bounds = array<i64: 128, 128>}, {transform_indices = @transform_2, window_bounds = array<i64: 1, 128>}, {transform_indices = @transform_3, window_bounds = array<i64: 128, 128>}]} {
    %c0_i32 = arith.constant 0 : i32
    %0 = arith.cmpi eq, %arg2, %c0_i32 : i32
    %1 = arith.extui %0 : i1 to i32
    %c0_i32_0 = arith.constant 0 : i32
    %2 = arith.cmpi ne, %1, %c0_i32_0 : i32
    scf.if %2 {
      %cst_10 = arith.constant 0.000000e+00 : f32
      %12 = vector.broadcast %cst_10 : f32 to vector<128x128xf32>
      %c0_11 = arith.constant 0 : index
      %c0_12 = arith.constant 0 : index
      %13 = vector.load %arg7[%c0_11, %c0_12] : memref<128x128xf32, #tpu.memory_space<vmem>>, vector<128x128xf32>
      tpu.vector_store %arg7[%c0_11, %c0_12], %12 {strides = array<i32>} : memref<128x128xf32, #tpu.memory_space<vmem>>, vector<128x128xf32>,
    } else {
    }
    %c0 = arith.constant 0 : index
    %c0_1 = arith.constant 0 : index
    %3 = vector.load %arg7[%c0, %c0_1] : memref<128x128xf32, #tpu.memory_space<vmem>>, vector<128x128xf32>
    %c0_2 = arith.constant 0 : index
    %c0_3 = arith.constant 0 : index
    %4 = vector.load %arg3[%c0_2, %c0_3] : memref<128x128xf32, #tpu.memory_space<vmem>>, vector<128x128xf32>
    %c0_4 = arith.constant 0 : index
    %c0_5 = arith.constant 0 : index
    %5 = vector.load %arg4[%c0_4, %c0_5] : memref<128x128xf32, #tpu.memory_space<vmem>>, vector<128x128xf32>
    %cst = arith.constant dense<0.000000e+00> : vector<128x128xf32>
    %6 = tpu.matmul %4, %5, %cst {dimension_numbers = #tpu.dot_dimension_numbers<[1], [0], [0], [1], [0, 0, 1, 1], [], []>, precision = #tpu.contract_precision<fp32>} : vector<128x128xf32>, vector<128x128xf32>, vector<128x128xf32> -> vector<128x128xf32>
    %7 = arith.addf %3, %6 : vector<128x128xf32>
    %c0_6 = arith.constant 0 : index
    %c0_7 = arith.constant 0 : index
    %8 = vector.load %arg7[%c0_6, %c0_7] : memref<128x128xf32, #tpu.memory_space<vmem>>, vector<128x128xf32>
    tpu.vector_store %arg7[%c0_6, %c0_7], %7 {strides = array<i32>} : memref<128x128xf32, #tpu.memory_space<vmem>>, vector<128x128xf32>,
    %c0_i32_8 = arith.constant 0 : i32
    %9 = arith.cmpi eq, %arg2, %c0_i32_8 : i32
    %10 = arith.extui %9 : i1 to i32
    %c0_i32_9 = arith.constant 0 : i32
    %11 = arith.cmpi ne, %10, %c0_i32_9 : i32
    scf.if %11 {
      %c0_10 = arith.constant 0 : index
      %c0_11 = arith.constant 0 : index
      %12 = vector.load %arg7[%c0_10, %c0_11] : memref<128x128xf32, #tpu.memory_space<vmem>>, vector<128x128xf32>
      %c0_12 = arith.constant 0 : index
      %c0_13 = arith.constant 0 : index
      %13 = vector.load %arg5[%c0_12, %c0_13] : memref<1x128xf32, #tpu.memory_space<vmem>>, vector<1x128xf32>
      %14 = vector.broadcast %13 : vector<1x128xf32> to vector<128x128xf32>
      %15 = arith.addf %12, %14 : vector<128x128xf32>
      %cst_14 = arith.constant 0.000000e+00 : f32
      %16 = vector.broadcast %cst_14 : f32 to vector<128x128xf32>
      %17 = arith.subf %16, %15 : vector<128x128xf32>
      %18 = math.exp %17 : vector<128x128xf32>
      %cst_15 = arith.constant 1.000000e+00 : f32
      %19 = vector.broadcast %cst_15 : f32 to vector<128x128xf32>
      %20 = arith.addf %19, %18 : vector<128x128xf32>
      %cst_16 = arith.constant 1.000000e+00 : f32
      %21 = vector.broadcast %cst_16 : f32 to vector<128x128xf32>
      %22 = arith.divf %21, %20 : vector<128x128xf32>
      %c0_17 = arith.constant 0 : index
      %c0_18 = arith.constant 0 : index
      %23 = vector.load %arg6[%c0_17, %c0_18] : memref<128x128xf32, #tpu.memory_space<vmem>>, vector<128x128xf32>
      tpu.vector_store %arg6[%c0_17, %c0_18], %22 {strides = array<i32>} : memref<128x128xf32, #tpu.memory_space<vmem>>, vector<128x128xf32>,
    } else {
    }
    return
  }
  func.func @transform_0(%arg0: i32, %arg1: i32, %arg2: i32) -> (i32, i32) {
    %c0_i32 = arith.constant 0 : i32
    return %arg0, %arg2 : i32, i32
  }
  func.func @transform_1(%arg0: i32, %arg1: i32, %arg2: i32) -> (i32, i32) {
    %c0_i32 = arith.constant 0 : i32
    return %arg2, %arg1 : i32, i32
  }
  func.func @transform_2(%arg0: i32, %arg1: i32, %arg2: i32) -> (i32, i32) {
    %c0_i32 = arith.constant 0 : i32
    %c0_i32_0 = arith.constant 0 : i32
    return %c0_i32, %arg1 : i32, i32
  }
  func.func @transform_3(%arg0: i32, %arg1: i32, %arg2: i32) -> (i32, i32) {
    %c0_i32 = arith.constant 0 : i32
    return %arg0, %arg1 : i32, i32
  }
}

module attributes {stable_mosaic.version = 11 : i64} {
  func.func @_gate_apply_kernel(%arg0: i32, %arg1: memref<1x1x64xf32, #tpu.memory_space<vmem>>, %arg2: memref<1x256x64xf32, #tpu.memory_space<vmem>>, %arg3: memref<1x256x64xf32, #tpu.memory_space<vmem>>, %arg4: memref<1x256x64xf32, #tpu.memory_space<vmem>>) attributes {dimension_semantics = [#tpu.dimension_semantics<parallel>], iteration_bounds = array<i64: 2>, scalar_prefetch = 0 : i64, scratch_operands = 0 : i64, tpu.core_type = #tpu.core_type<tc>, window_params = [{transform_indices = @transform_0, window_bounds = array<i64: 1, 1, 64>}, {transform_indices = @transform_1, window_bounds = array<i64: 1, 256, 64>}, {transform_indices = @transform_2, window_bounds = array<i64: 1, 256, 64>}, {transform_indices = @transform_3, window_bounds = array<i64: 1, 256, 64>}]} {
    %c0 = arith.constant 0 : index
    %c0_0 = arith.constant 0 : index
    %c0_1 = arith.constant 0 : index
    %0 = vector.load %arg1[%c0, %c0_0, %c0_1] : memref<1x1x64xf32, #tpu.memory_space<vmem>>, vector<1x1x64xf32>
    %1 = vector.shape_cast %0 : vector<1x1x64xf32> to vector<1x64xf32>
    %c0_2 = arith.constant 0 : index
    %c0_3 = arith.constant 0 : index
    %c0_4 = arith.constant 0 : index
    %2 = vector.load %arg2[%c0_2, %c0_3, %c0_4] : memref<1x256x64xf32, #tpu.memory_space<vmem>>, vector<1x256x64xf32>
    %3 = vector.shape_cast %2 : vector<1x256x64xf32> to vector<256x64xf32>
    %c0_5 = arith.constant 0 : index
    %c0_6 = arith.constant 0 : index
    %c0_7 = arith.constant 0 : index
    %4 = vector.load %arg3[%c0_5, %c0_6, %c0_7] : memref<1x256x64xf32, #tpu.memory_space<vmem>>, vector<1x256x64xf32>
    %5 = vector.shape_cast %4 : vector<1x256x64xf32> to vector<256x64xf32>
    %6 = vector.broadcast %1 : vector<1x64xf32> to vector<256x64xf32>
    %7 = arith.mulf %6, %3 : vector<256x64xf32>
    %8 = arith.addf %7, %5 : vector<256x64xf32>
    %c0_8 = arith.constant 0 : index
    %c0_9 = arith.constant 0 : index
    %c0_10 = arith.constant 0 : index
    %9 = vector.load %arg4[%c0_8, %c0_9, %c0_10] : memref<1x256x64xf32, #tpu.memory_space<vmem>>, vector<1x256x64xf32>
    %10 = vector.shape_cast %9 : vector<1x256x64xf32> to vector<256x64xf32>
    %11 = vector.shape_cast %8 : vector<256x64xf32> to vector<1x256x64xf32>
    tpu.vector_store %arg4[%c0_8, %c0_9, %c0_10], %11 {strides = array<i32>} : memref<1x256x64xf32, #tpu.memory_space<vmem>>, vector<1x256x64xf32>,
    return
  }
  func.func @transform_0(%arg0: i32) -> (i32, i32, i32) {
    %c0_i32 = arith.constant 0 : i32
    %c0_i32_0 = arith.constant 0 : i32
    %c0_i32_1 = arith.constant 0 : i32
    return %arg0, %c0_i32, %c0_i32_0 : i32, i32, i32
  }
  func.func @transform_1(%arg0: i32) -> (i32, i32, i32) {
    %c0_i32 = arith.constant 0 : i32
    %c0_i32_0 = arith.constant 0 : i32
    %c0_i32_1 = arith.constant 0 : i32
    return %arg0, %c0_i32, %c0_i32_0 : i32, i32, i32
  }
  func.func @transform_2(%arg0: i32) -> (i32, i32, i32) {
    %c0_i32 = arith.constant 0 : i32
    %c0_i32_0 = arith.constant 0 : i32
    %c0_i32_1 = arith.constant 0 : i32
    return %arg0, %c0_i32, %c0_i32_0 : i32, i32, i32
  }
  func.func @transform_3(%arg0: i32) -> (i32, i32, i32) {
    %c0_i32 = arith.constant 0 : i32
    %c0_i32_0 = arith.constant 0 : i32
    %c0_i32_1 = arith.constant 0 : i32
    return %arg0, %c0_i32, %c0_i32_0 : i32, i32, i32
  }
}

module attributes {stable_mosaic.version = 11 : i64} {
  func.func @_add_relu_kernel(%arg0: i32, %arg1: memref<1x256x64xf32, #tpu.memory_space<vmem>>, %arg2: memref<1x256x64xf32, #tpu.memory_space<vmem>>, %arg3: memref<1x256x64xf32, #tpu.memory_space<vmem>>) attributes {dimension_semantics = [#tpu.dimension_semantics<parallel>], iteration_bounds = array<i64: 2>, scalar_prefetch = 0 : i64, scratch_operands = 0 : i64, tpu.core_type = #tpu.core_type<tc>, window_params = [{transform_indices = @transform_0, window_bounds = array<i64: 1, 256, 64>}, {transform_indices = @transform_1, window_bounds = array<i64: 1, 256, 64>}, {transform_indices = @transform_2, window_bounds = array<i64: 1, 256, 64>}]} {
    %c0 = arith.constant 0 : index
    %c0_0 = arith.constant 0 : index
    %c0_1 = arith.constant 0 : index
    %0 = vector.load %arg1[%c0, %c0_0, %c0_1] : memref<1x256x64xf32, #tpu.memory_space<vmem>>, vector<1x256x64xf32>
    %1 = vector.shape_cast %0 : vector<1x256x64xf32> to vector<256x64xf32>
    %c0_2 = arith.constant 0 : index
    %c0_3 = arith.constant 0 : index
    %c0_4 = arith.constant 0 : index
    %2 = vector.load %arg2[%c0_2, %c0_3, %c0_4] : memref<1x256x64xf32, #tpu.memory_space<vmem>>, vector<1x256x64xf32>
    %3 = vector.shape_cast %2 : vector<1x256x64xf32> to vector<256x64xf32>
    %4 = arith.addf %1, %3 : vector<256x64xf32>
    %cst = arith.constant 0.000000e+00 : f32
    %5 = vector.broadcast %cst : f32 to vector<256x64xf32>
    %6 = arith.maximumf %4, %5 : vector<256x64xf32>
    %c0_5 = arith.constant 0 : index
    %c0_6 = arith.constant 0 : index
    %c0_7 = arith.constant 0 : index
    %7 = vector.load %arg3[%c0_5, %c0_6, %c0_7] : memref<1x256x64xf32, #tpu.memory_space<vmem>>, vector<1x256x64xf32>
    %8 = vector.shape_cast %7 : vector<1x256x64xf32> to vector<256x64xf32>
    %9 = vector.shape_cast %6 : vector<256x64xf32> to vector<1x256x64xf32>
    tpu.vector_store %arg3[%c0_5, %c0_6, %c0_7], %9 {strides = array<i32>} : memref<1x256x64xf32, #tpu.memory_space<vmem>>, vector<1x256x64xf32>,
    return
  }
  func.func @transform_0(%arg0: i32) -> (i32, i32, i32) {
    %c0_i32 = arith.constant 0 : i32
    %c0_i32_0 = arith.constant 0 : i32
    %c0_i32_1 = arith.constant 0 : i32
    return %arg0, %c0_i32, %c0_i32_0 : i32, i32, i32
  }
  func.func @transform_1(%arg0: i32) -> (i32, i32, i32) {
    %c0_i32 = arith.constant 0 : i32
    %c0_i32_0 = arith.constant 0 : i32
    %c0_i32_1 = arith.constant 0 : i32
    return %arg0, %c0_i32, %c0_i32_0 : i32, i32, i32
  }
  func.func @transform_2(%arg0: i32) -> (i32, i32, i32) {
    %c0_i32 = arith.constant 0 : i32
    %c0_i32_0 = arith.constant 0 : i32
    %c0_i32_1 = arith.constant 0 : i32
    return %arg0, %c0_i32, %c0_i32_0 : i32, i32, i32
  }
}

</mosaic_0001>

<bundles_post_ra>
// kernel: stage_block_forward.16
= control target key start
LH: loop header
LB: loop body
LE: loop exit
PB: predicated region body
PF: predicated region fallthrough
CT: control target
= control target key end

     0   :  { %s2696_s12 = smov 0   ;;  %s2698_s13 = smov 0   ;;  %s3358_s0 = inlined_call_operand.vmem [shape: f32[512,128], index: 0, kind: input, shape index: {}]   ;;  %s3359_s1 = inlined_call_operand.vmem [shape: f32[128,128], index: 1, kind: input, shape index: {}]   ;;  %s3360_s2 = inlined_call_operand.vmem [shape: f32[1,128], index: 2, kind: input, shape index: {}]   ;;  %s3361_s3 = inlined_call_operand.vmem [shape: f32[512,128], index: 3, kind: output, shape index: {}]  }
   0x1   :  { %s2700_s14 = smov 0  }
   0x2 LB: > { %s32_s15 = sadd.s32 1, %s2670_s13  ;;  %p1820_p0 = scmp.ge.s32.totalorder %s2674_s14, 1  ;;  %s2674_s14 = sphi %s2700_s14, %s13_s14   ;;  %s2670_s13 = sphi %s2698_s13, %s3478_s13   ;;  %s2666_s12 = sphi %s2696_s12, %s3477_s12  }
   0x3   : > { %p34_p1 = scmp.ge.s32.totalorder %s32_s15, 4  ;;  %p188_p2 = scmp.lt.s32.totalorder %s2674_s14, 5 }
   0x5   : > { %s3480_s15 = smov (%p34_p1, %s32_s15), 0  ;;  %p189_p3 = pnand %p1820_p0, %p188_p2 }
   0x7   : > { %192 = sbr.rel (%p189_p3) target bundleno = 363 (0x16b), region = 32 }
   0xe   : > { %v311_v0 = vld [vmem:[%s3359_s1] sm:$0xff]  ;;  %v312_v1 = vld [vmem:[%s3359_s1 + $0x8] sm:$0xff]  ;;  %v313_v2 = vld [vmem:[%s3359_s1 + $0x10] sm:$0xff]  ;;  %s1821_s22 = sshll.u32 %s2666_s12, 4 }
   0xf   : > { %v328_v3 = vand.u32 4294901760, %v311_v0  ;;  %v331_v4 = vand.u32 4294901760, %v312_v1  ;;  %v314_v5 = vld [vmem:[%s3359_s1 + $0x18] sm:$0xff]  ;;  %v334_v6 = vand.u32 4294901760, %v313_v2  ;;  %v2732_v7 = vld [vmem:[%s3359_s1 + $0x20] sm:$0xff]  ;;  %v2737_v8 = vld [vmem:[%s3359_s1 + $0x28] sm:$0xff] }
  0x10   : > { %v337_v9 = vand.u32 4294901760, %v314_v5  ;;  %v340_v11 = vand.u32 4294901760, %v2732_v7  ;;  %v343_v12 = vand.u32 4294901760, %v2737_v8  ;;  %v2748_v14 = vld [vmem:[%s3359_s1 + $0x30] sm:$0xff]  ;;  %v2753_v15 = vld [vmem:[%s3359_s1 + $0x38] sm:$0xff]  ;;  %p230_p4 = scmp.lt.s32.totalorder %s1821_s22, 63 }
  0x11   : > { %v2739_v10 = vpack.c.bf16 %v331_v4, %v328_v3  ;;  %v346_v17 = vand.u32 4294901760, %v2748_v14  ;;  %v349_v18 = vand.u32 4294901760, %v2753_v15  ;;  %v2774_v19 = vld [vmem:[%s3359_s1 + $0x40] sm:$0xff]  ;;  %v2779_v20 = vld [vmem:[%s3359_s1 + $0x48] sm:$0xff]  ;;  %v2805_v25 = vld [vmem:[%s3359_s1 + $0x50] sm:$0xff]  ;;  %v2815_v29 = vsub.f32 %v311_v0, %v328_v3 }
  0x12   : > { %v2743_v13 = vpack.c.bf16 %v337_v9, %v334_v6  ;;  %s3482_s22 = smov (!%p230_p4, %s1821_s22), 63  ;;  %v2767_v16 = vpack.c.bf16 %v343_v12, %v340_v11  ;;  %v352_v23 = vand.u32 4294901760, %v2774_v19  ;;  %v355_v24 = vand.u32 4294901760, %v2779_v20  ;;  %v2810_v26 = vld [vmem:[%s3359_s1 + $0x58] sm:$0xff]  ;;  %v2821_v31 = vld [vmem:[%s3359_s1 + $0x60] sm:$0xff]  ;;  %v2826_v32 = vld [vmem:[%s3359_s1 + $0x68] sm:$0xff] }
  0x13   : > { %2357 = vmatprep.subr.bf16.mxu1 %v2739_v10  ;;  %2453 = vmatprep.subr.bf16.mxu0 %v2739_v10  ;;  %s1822_s10 = sshll.u32 %s3482_s22, 3  ;;  %v2798_v22 = vpack.c.bf16 %v349_v18, %v346_v17  ;;  %v2831_v33 = vld [vmem:[%s3359_s1 + $0x70] sm:$0xff]  ;;  %v2836_v35 = vsub.f32 %v312_v1, %v331_v4  ;;  %v3369_v36 = vand.u32 4294901760, %v2805_v25  ;;  %v3366_v37 = vand.u32 4294901760, %v2810_v26  ;;  %v2845_v38 = vld [vmem:[%s3359_s1 + $0x78] sm:$0xff] }
  0x14   : > { %2359 = vmatpush3.bf16.msra.mxu1 %v2739_v10  ;;  %2455 = vmatpush3.bf16.msra.mxu0 %v2739_v10  ;;  %s2787_s16 = scalar_lea.vmem %s3358_s0, %s1822_s10  ;;  %v2848_v40 = vsub.f32 %v313_v2, %v334_v6  ;;  %v2850_v41 = vsub.f32 %v314_v5, %v337_v9  ;;  %v2858_v42 = vpack.c.bf16 %v355_v24, %v352_v23  ;;  %v3365_v46 = vand.u32 4294901760, %v2821_v31  ;;  %s3315_s7 = scalar_lea.vmem %s3361_s3, %s1822_s10 }
  0x15   : > { %2361 = vmatprep.subr.bf16.mxu1 %v2743_v13  ;;  %2457 = vmatprep.subr.bf16.mxu0 %v2743_v13  ;;  %v295_v21 = vld [vmem:[%s2787_s16] sm:$0xff]  ;;  %3402 = vst [vmem:[#allocation3_spill] sm:$0xff] %v2798_v22  ;;  %v296_v28 = vld [vmem:[%s2787_s16 + $0x8] sm:$0xff]  ;;  %v297_v30 = vld [vmem:[%s2787_s16 + $0x10] sm:$0xff]  ;;  %v3364_v47 = vand.u32 4294901760, %v2826_v32  ;;  %v3363_v48 = vand.u32 4294901760, %v2831_v33  ;;  %v2881_v55 = vpack.c.bf16 %v3366_v37, %v3369_v36  ;;  %v2889_v59 = vsub.f32 %v2732_v7, %v340_v11 }
  0x16   : > { %v2812_v27 = vand.u32 4294901760, %v295_v21  ;;  %v298_v39 = vld [vmem:[%s2787_s16 + $0x18] sm:$0xff]  ;;  %3404 = vst [vmem:[#allocation5_spill] sm:$0xff] %v2858_v42  ;;  %v2861_v44 = vand.u32 4294901760, %v296_v28  ;;  %v2863_v45 = vand.u32 4294901760, %v297_v30  ;;  %v571_v49 = vand.u32 4294901760, %v2815_v29 }
  0x17   : > { %v299_v50 = vld [vmem:[%s2787_s16 + $0x20] sm:$0xff]  ;;  %v3362_v51 = vand.u32 4294901760, %v2845_v38  ;;  %v578_v53 = vand.u32 4294901760, %v2836_v35  ;;  %v2873_v54 = vand.u32 4294901760, %v298_v39  ;;  %3405 = vst [vmem:[#allocation6_spill] sm:$0xff] %v2881_v55  ;;  %v585_v56 = vand.u32 4294901760, %v2848_v40 }
  0x18   : > { %2363 = vmatpush3.bf16.msra.mxu1 %v2743_v13  ;;  %2459 = vmatpush3.bf16.msra.mxu0 %v2743_v13  ;;  %v2834_v34 = vsub.f32 %v295_v21, %v2812_v27  ;;  %v592_v57 = vand.u32 4294901760, %v2850_v41  ;;  %v300_v58 = vld [vmem:[%s2787_s16 + $0x28] sm:$0xff]  ;;  %v2894_v61 = vsub.f32 %v296_v28, %v2861_v44  ;;  %v2897_v62 = vsub.f32 %v297_v30, %v2863_v45  ;;  %v301_v7 = vld [vmem:[%s2787_s16 + $0x30] sm:$0xff]  ;;  %v302_v11 = vld [vmem:[%s2787_s16 + $0x38] sm:$0xff] }
  0x19   : > { %2365 = vmatprep.subr.bf16.mxu1 %v2767_v16  ;;  %2461 = vmatprep.subr.bf16.mxu0 %v2767_v16  ;;  %v2899_v63 = vand.u32 4294901760, %v299_v50  ;;  %v2905_v0 = vpack.c.bf16 %v3364_v47, %v3365_v46  ;;  %v572_v1 = vsub.f32 %v2815_v29, %v571_v49  ;;  %v2911_v2 = vsub.f32 %v2737_v8, %v343_v12 }
  0x1a   : > { %3403 = vst [vmem:[#allocation4_spill] sm:$0xff] %v2834_v34  ;;  %v410_v43 = vand.u32 4294901760, %v2834_v34  ;;  %3406 = vst [vmem:[#allocation7_spill] sm:$0xff] %v2894_v61  ;;  %v2917_v3 = vpack.c.bf16 %v3362_v51, %v3363_v48  ;;  %v579_v4 = vsub.f32 %v2836_v35, %v578_v53  ;;  %v2921_v5 = vsub.f32 %v298_v39, %v2873_v54 }
  0x1b   : > { %3407 = vst [vmem:[#allocation8_spill] sm:$0xff] %v2897_v62  ;;  %3408 = vst [vmem:[#allocation9_spill] sm:$0xff] %v2905_v0  ;;  %v2923_v6 = vand.u32 4294901760, %v300_v58  ;;  %v586_v8 = vsub.f32 %v2848_v40, %v585_v56  ;;  %v593_v9 = vsub.f32 %v2850_v41, %v592_v57  ;;  %v2934_v12 = vsub.f32 %v2748_v14, %v346_v17 }
  0x1c   : > { %2367 = vmatpush3.bf16.msra.mxu1 %v2767_v16  ;;  %2463 = vmatpush3.bf16.msra.mxu0 %v2767_v16  ;;  %v411_v52 = vsub.f32 %v2834_v34, %v410_v43  ;;  %3409 = vst [vmem:[#allocation10_spill] sm:$0xff] %v2917_v3  ;;  %3410 = vst [vmem:[#allocation11_spill] sm:$0xff] %v2921_v5  ;;  %v3368_v21 = vand.u32 4294901760, %v2894_v61  ;;  %v3367_v28 = vand.u32 4294901760, %v2897_v62  ;;  %v599_v39 = vand.u32 4294901760, %v2889_v59 }
  0x1d   : > { %2369 = vmatprep.subr.bf16.mxu1 %v2798_v22  ;;  %2465 = vmatprep.subr.bf16.mxu0 %v2798_v22  ;;  %3411 = vst [vmem:[#allocation12_spill] sm:$0xff] %v2923_v6  ;;  %v2941_v30 = vsub.f32 %v299_v50, %v2899_v63  ;;  %v2950_v14 = vsub.f32 %v2753_v15, %v349_v18  ;;  %v580_v17 = vand.u32 4294901760, %v579_v4  ;;  %v3370_v51 = vand.u32 4294901760, %v2921_v5 }
  0x1e   : > { %2220 = vmatprep.mubr.f32.mxu0 %v410_v43  ;;  %v412_v60 = vand.u32 4294901760, %v411_v52  ;;  %v573_v43 = vand.u32 4294901760, %v572_v1  ;;  %v606_v52 = vand.u32 4294901760, %v2911_v2  ;;  %v2954_v48 = vsub.f32 %v300_v58, %v2923_v6 }
  0x1f   : > { %3412 = vst [vmem:[#allocation13_spill] sm:$0xff] %v2941_v30  ;;  %v2956_v50 = vand.u32 4294901760, %v302_v11  ;;  %v2960_v1 = vpack.c.bf16 %v578_v53, %v571_v49  ;;  %v587_v47 = vand.u32 4294901760, %v586_v8  ;;  %v594_v46 = vand.u32 4294901760, %v593_v9 }
  0x20   : > { %2371 = vmatpush3.bf16.msra.mxu1 %v2798_v22  ;;  %2467 = vmatpush3.bf16.msra.mxu0 %v2798_v22  ;;  %3414 = vst [vmem:[#allocation15_spill] sm:$0xff] %v2954_v48  ;;  %v2962_v37 = vpack.c.bf16 %v592_v57, %v585_v56  ;;  %v421_v15 = vsub.f32 %v2894_v61, %v3368_v21  ;;  %v303_v56 = vld [vmem:[%s2787_s16 + $0x40] sm:$0xff]  ;;  %v613_v4 = vand.u32 4294901760, %v2934_v12  ;;  %v620_v8 = vand.u32 4294901760, %v2950_v14 }
  0x21   : > { %2373 = vmatprep.subr.bf16.mxu1 %v2858_v42  ;;  %2469 = vmatprep.subr.bf16.mxu0 %v2858_v42  ;;  %3415 = vst [vmem:[#allocation16_spill] sm:$0xff] %v2956_v50  ;;  %v2972_v18 = vsub.f32 %v2897_v62, %v3367_v28  ;;  %v600_v53 = vsub.f32 %v2889_v59, %v599_v39  ;;  %v2996_v49 = vand.u32 4294901760, %v303_v56  ;;  %v3424_v6 = vand.u32 4294901760, %v2894_v61 }
  0x22   : > { %2052 = vmatprep.mubr.f32.mxu1 %v412_v60  ;;  %v2945_v60 = vand.u32 4294901760, %v301_v7  ;;  %v607_v57 = vsub.f32 %v2911_v2, %v606_v52  ;;  %v2388_v9 = vpack.c.bf16 %v580_v17, %v573_v43  ;;  %v2986_v28 = vsub.f32 %v2921_v5, %v3370_v51  ;;  %v304_v43 = vld [vmem:[%s2787_s16 + $0x48] sm:$0xff] }
  0x23   : > { %v2990_v36 = vsub.f32 %v302_v11, %v2956_v50  ;;  %3418 = vst [vmem:[#allocation19_spill] sm:$0xff] %v2996_v49  ;;  %v3002_v17 = vsub.f32 %v2774_v19, %v352_v23  ;;  %v3007_v51 = vsub.f32 %v2779_v20, %v355_v24  ;;  %v422_v11 = vand.u32 4294901760, %v421_v15  ;;  %v305_v19 = vld [vmem:[%s2787_s16 + $0x50] sm:$0xff] }
  0x24   : > { %2375 = vmatpush3.bf16.msra.mxu1 %v2858_v42  ;;  %2471 = vmatpush3.bf16.msra.mxu0 %v2858_v42  ;;  %3413 = vst [vmem:[#allocation14_spill] sm:$0xff] %v2945_v60  ;;  %v2979_v58 = vsub.f32 %v301_v7, %v2945_v60  ;;  %v2994_v7 = vpack.c.bf16 %v594_v46, %v587_v47  ;;  %v432_v46 = vand.u32 4294901760, %v2972_v18  ;;  %v3419_v47 = vand.u32 4294901760, %v2941_v30 }
  0x25   : > { %2377 = vmatprep.subr.bf16.mxu1 %v2881_v55  ;;  %2473 = vmatprep.subr.bf16.mxu0 %v2881_v55  ;;  %3417 = vst [vmem:[#allocation18_spill] sm:$0xff] %v2990_v36  ;;  %v601_v34 = vand.u32 4294901760, %v600_v53  ;;  %v608_v23 = vand.u32 4294901760, %v607_v57  ;;  %v614_v20 = vsub.f32 %v2934_v12, %v613_v4  ;;  %v621_v24 = vsub.f32 %v2950_v14, %v620_v8 }
  0x26   : > { %3416 = vst [vmem:[#allocation17_spill] sm:$0xff] %v2979_v58  ;;  %v3015_v21 = vsub.f32 %v2941_v30, %v3419_v47  ;;  %v3420_v15 = vand.u32 4294901760, %v2954_v48  ;;  %v3028_v42 = vand.u32 4294901760, %v304_v43  ;;  %v3033_v53 = vsub.f32 %v303_v56, %v2996_v49 }
  0x27   : > { %v3042_v50 = vpack.c.bf16 %v606_v52, %v599_v39  ;;  %v3422_v56 = vand.u32 4294901760, %v2810_v26  ;;  %v3423_v49 = vand.u32 4294901760, %v2979_v58  ;;  %v622_v39 = vand.u32 4294901760, %v621_v24  ;;  %v307_v52 = vld [vmem:[%s2787_s16 + $0x60] sm:$0xff] }
  0x28   : > { %2379 = vmatpush3.bf16.msra.mxu1 %v2881_v55  ;;  %2475 = vmatpush3.bf16.msra.mxu0 %v2881_v55  ;;  %v442_v55 = vand.u32 4294901760, %v2986_v28  ;;  %v3025_v18 = vsub.f32 %v2954_v48, %v3420_v15  ;;  %v306_v15 = vld [vmem:[%s2787_s16 + $0x58] sm:$0xff]  ;;  %v452_v47 = vand.u32 4294901760, %v3015_v21  ;;  %v2396_v28 = vpack.c.bf16 %v608_v23, %v601_v34 }
  0x29   : > { %2381 = vmatprep.subr.bf16.mxu1 %v2905_v0  ;;  %2477 = vmatprep.subr.bf16.mxu0 %v2905_v0  ;;  %v3052_v57 = vsub.f32 %v2810_v26, %v3422_v56  ;;  %v3057_v60 = vsub.f32 %v2979_v58, %v3423_v49  ;;  %v615_v21 = vand.u32 4294901760, %v614_v20  ;;  %v3069_v34 = vsub.f32 %v304_v43, %v3028_v42  ;;  %v308_v43 = vld [vmem:[%s2787_s16 + $0x68] sm:$0xff] }
  0x2a   : > { %v3071_v49 = vand.u32 4294901760, %v306_v15  ;;  %v3426_v23 = vand.u32 4294901760, %v3002_v17  ;;  %v3427_v20 = vand.u32 4294901760, %v3007_v51  ;;  %v3431_v56 = vand.u32 4294901760, %v2921_v5 }
  0x2c   : > { %2383 = vmatpush3.bf16.msra.mxu1 %v2905_v0  ;;  %2479 = vmatpush3.bf16.msra.mxu0 %v2905_v0  ;;  %v3037_v0 = vand.u32 4294901760, %v305_v19  ;;  %v635_v24 = vsub.f32 %v3007_v51, %v3427_v20  ;;  %v2400_v20 = vpack.c.bf16 %v622_v39, %v615_v21  ;;  %v3112_v21 = vsub.f32 %v306_v15, %v3071_v49 }
  0x2d   : > { %2385 = vmatprep.subr.bf16.mxu1 %v2917_v3  ;;  %2481 = vmatprep.subr.bf16.mxu0 %v2917_v3  ;;  %v3114_v39 = vand.u32 4294901760, %v308_v43 }
  0x2e   : > { %3432 = vst [vmem:[#allocation20_spill] sm:$0xff] %v3112_v21 }
  0x2f   : > { %3433 = vst [vmem:[#allocation21_spill] sm:$0xff] %v3114_v39 }
  0x30   : > { %2387 = vmatpush3.bf16.msra.mxu1 %v2917_v3  ;;  %2483 = vmatpush3.bf16.msra.mxu0 %v2917_v3  ;;  %v3421_v3 = vand.u32 4294901760, %v2805_v25 }
  0x31   : > { %2389 = vmatprep.subr.bf16.mxu1 %v2388_v9  ;;  %2485 = vmatprep.subr.bf16.mxu0 %v2960_v1 }
  0x32   : > { %v3047_v22 = vsub.f32 %v2805_v25, %v3421_v3  ;;  %v462_v25 = vand.u32 4294901760, %v3025_v18  ;;  %v3425_v3 = vand.u32 4294901760, %v2990_v36  ;;  %v3082_v18 = vsub.f32 %v305_v19, %v3037_v0 }
  0x33   : > { %2053 = vmatmul.mubr.f32.vlgmr.msra.gmra.mrb[0].mxu1 %v422_v11  ;;  %2221 = vmatmul.mubr.f32.vlgmr.msra.gmra.mrb[0].mxu0 %v3424_v6  ;;  %v628_v6 = vsub.f32 %v3002_v17, %v3426_v23  ;;  %v3091_v23 = vand.u32 4294901760, %v307_v52  ;;  %v472_v19 = vand.u32 4294901760, %v3057_v60 }
  0x34   : > { %v3066_v26 = vsub.f32 %v2990_v36, %v3425_v3  ;;  %2391 = vmatpush3.bf16.msra.mxu1 %v2388_v9  ;;  %2487 = vmatpush3.bf16.msra.mxu0 %v2960_v1  ;;  %v3428_v9 = vand.u32 4294901760, %v2897_v62  ;;  %v3087_v1 = vpack.c.bf16 %v620_v8, %v613_v4  ;;  %v3430_v4 = vand.u32 4294901760, %v2826_v32  ;;  %v309_v3 = vld [vmem:[%s2787_s16 + $0x70] sm:$0xff] }
  0x35   : > { %2055 = vmatprep.mubr.f32.mxu1 %v432_v46  ;;  %2393 = vmatprep.subr.bf16.mxu1 %v2994_v7  ;;  %v3429_v46 = vand.u32 4294901760, %v2821_v31  ;;  %v3436_v15 = vand.u32 4294901760, %v3047_v22  ;;  %v3132_v5 = vsub.f32 %v307_v52, %v3091_v23  ;;  %v3441_v52 = vand.u32 4294901760, %v2954_v48 }
  0x36   : > { %2223 = vmatprep.mubr.f32.mxu0 %v3428_v9  ;;  %2489 = vmatprep.subr.bf16.mxu0 %v2962_v37  ;;  %v3104_v8 = vsub.f32 %v2826_v32, %v3430_v4  ;;  %v482_v11 = vand.u32 4294901760, %v3066_v26  ;;  %v310_v26 = vld [vmem:[%s2787_s16 + $0x78] sm:$0xff]  ;;  %v3435_v4 = vand.u32 4294901760, %v2941_v30  ;;  %v520_v30 = vand.u32 4294901760, %v3112_v21 }
  0x37   : > { %v3099_v9 = vsub.f32 %v2821_v31, %v3429_v46  ;;  %2056 = vmatmul.mubr.f32.gmra.mrb[2].mxu1 %v442_v55  ;;  %2224 = vmatmul.mubr.f32.gmra.mrb[2].mxu0 %v3431_v56  ;;  %v3434_v31 = vand.u32 4294901760, %v3033_v53  ;;  %v629_v55 = vand.u32 4294901760, %v628_v6  ;;  %v636_v46 = vand.u32 4294901760, %v635_v24  ;;  %3438 = vst [vmem:[#allocation22_spill] sm:$0xff] %v3132_v5 }
  0x38   : > { %2395 = vmatpush3.bf16.msra.mxu1 %v2994_v7  ;;  %2491 = vmatpush3.bf16.msra.mxu0 %v2962_v37  ;;  %v642_v60 = vsub.f32 %v3047_v22, %v3436_v15  ;;  %v3437_v7 = vand.u32 4294901760, %v3052_v57  ;;  %v3134_v6 = vand.u32 4294901760, %v309_v3  ;;  %v662_v24 = vand.u32 4294901760, %v3104_v8 }
  0x39   : > { %v491_v32 = vsub.f32 %v3033_v53, %v3434_v31  ;;  %2058 = vmatprep.mubr.f32.mxu1 %v452_v47  ;;  %2226 = vmatprep.mubr.f32.mxu0 %v3435_v4  ;;  %v3439_v31 = vand.u32 4294901760, %v2831_v33  ;;  %v3440_v15 = vand.u32 4294901760, %v2845_v38  ;;  %v3442_v56 = vand.u32 4294901760, %v3069_v34 }
  0x3a   : > { %v649_v37 = vsub.f32 %v3052_v57, %v3437_v7  ;;  %2397 = vmatprep.subr.bf16.mxu1 %v2396_v28  ;;  %2493 = vmatprep.subr.bf16.mxu0 %v3042_v50  ;;  %v3156_v62 = vsub.f32 %v308_v43, %v3114_v39  ;;  %v3446_v48 = vand.u32 4294901760, %v3082_v18  ;;  %v3447_v43 = vand.u32 4294901760, %v2979_v58 }
  0x3b   : > { %v3142_v4 = vsub.f32 %v2831_v33, %v3439_v31  ;;  %v3147_v7 = vsub.f32 %v2845_v38, %v3440_v15  ;;  %2059 = vmatmul.mubr.f32.gmra.mrb[4].mxu1 %v462_v25  ;;  %2227 = vmatmul.mubr.f32.gmra.mrb[4].mxu0 %v3441_v52  ;;  %v501_v47 = vsub.f32 %v3069_v34, %v3442_v56  ;;  %v3158_v33 = vand.u32 4294901760, %v310_v26 }
  0x3c   : > { %3443 = vst [vmem:[#allocation23_spill] sm:$0xff] %v3156_v62  ;;  %2399 = vmatpush3.bf16.msra.mxu1 %v2396_v28  ;;  %2495 = vmatpush3.bf16.msra.mxu0 %v3042_v50  ;;  %v492_v38 = vand.u32 4294901760, %v491_v32  ;;  %v2404_v31 = vpack.c.bf16 %v636_v46, %v629_v55  ;;  %v3444_v25 = vand.u32 4294901760, %v3002_v17  ;;  %v3445_v15 = vand.u32 4294901760, %v3007_v51 }
  0x3d   : > { %v511_v56 = vsub.f32 %v3082_v18, %v3446_v48  ;;  %2061 = vmatprep.mubr.f32.mxu1 %v472_v19  ;;  %2229 = vmatprep.mubr.f32.mxu0 %v3447_v43  ;;  %v643_v61 = vand.u32 4294901760, %v642_v60  ;;  %v650_v39 = vand.u32 4294901760, %v649_v37  ;;  %v530_v28 = vand.u32 4294901760, %v3132_v5 }
  0x3e   : > { %v2500_v52 = vpack.c.bf16 %v3445_v15, %v3444_v25  ;;  %v3172_v50 = vsub.f32 %v309_v3, %v3134_v6  ;;  %2401 = vmatprep.subr.bf16.mxu1 %v2400_v20  ;;  %2497 = vmatprep.subr.bf16.mxu0 %v3087_v1  ;;  %v3448_v32 = vand.u32 4294901760, %v3099_v9  ;;  %v663_v48 = vsub.f32 %v3104_v8, %v662_v24 }
  0x3f   : > { %v669_v19 = vand.u32 4294901760, %v3142_v4  ;;  %v676_v46 = vand.u32 4294901760, %v3147_v7  ;;  %2062 = vmatmul.mubr.f32.gmra.mrb[6].mxu1 %v482_v11  ;;  %v3449_v60 = vand.u32 4294901760, %v2990_v36  ;;  %v502_v37 = vand.u32 4294901760, %v501_v47 }
  0x40   : > { %v656_v55 = vsub.f32 %v3099_v9, %v3448_v32  ;;  %v521_v3 = vsub.f32 %v3112_v21, %v520_v30  ;;  %v540_v25 = vand.u32 4294901760, %v3156_v62  ;;  %v3186_v15 = vsub.f32 %v310_v26, %v3158_v33  ;;  %2403 = vmatpush3.bf16.msra.mxu1 %v2400_v20  ;;  %2499 = vmatpush3.bf16.msra.mxu0 %v3087_v1 }
  0x41   : > { %2230 = vmatmul.mubr.f32.gmra.mrb[6].mxu0 %v3449_v60  ;;  %v512_v43 = vand.u32 4294901760, %v511_v56  ;;  %2064 = vmatprep.mubr.f32.mxu1 %v492_v38  ;;  %v3450_v32 = vand.u32 4294901760, %v3033_v53  ;;  %v2408_v11 = vpack.c.bf16 %v650_v39, %v643_v61  ;;  %v3451_v36 = vand.u32 4294901760, %v3047_v22 }
  0x42   : > { %v3452_v47 = vand.u32 4294901760, %v3052_v57  ;;  %v531_v21 = vsub.f32 %v3132_v5, %v530_v28  ;;  %v550_v58 = vand.u32 4294901760, %v3172_v50  ;;  %2405 = vmatprep.subr.bf16.mxu1 %v2404_v31  ;;  %2501 = vmatprep.subr.bf16.mxu0 %v2500_v52  ;;  %v657_v20 = vand.u32 4294901760, %v656_v55 }
  0x43   : > { %2232 = vmatprep.mubr.f32.mxu0 %v3450_v32  ;;  %v664_v26 = vand.u32 4294901760, %v663_v48  ;;  %v670_v1 = vsub.f32 %v3142_v4, %v669_v19  ;;  %v677_v38 = vsub.f32 %v3147_v7, %v676_v46  ;;  %2065 = vmatmul.mubr.f32.gmra.mrb[8].mxu1 %v502_v37  ;;  %v3453_v61 = vand.u32 4294901760, %v3069_v34 }
  0x44   : > { %v2504_v60 = vpack.c.bf16 %v3452_v47, %v3451_v36  ;;  %v522_v39 = vand.u32 4294901760, %v521_v3  ;;  %v541_v56 = vsub.f32 %v3156_v62, %v540_v25  ;;  %v560_v36 = vand.u32 4294901760, %v3186_v15  ;;  %2407 = vmatpush3.bf16.msra.mxu1 %v2404_v31  ;;  %2503 = vmatpush3.bf16.msra.mxu0 %v2500_v52 }
  0x45   : > { %2233 = vmatmul.mubr.f32.gmra.mrb[8].mxu0 %v3453_v61  ;;  %2067 = vmatprep.mubr.f32.mxu1 %v512_v43  ;;  %v3454_v32 = vand.u32 4294901760, %v3082_v18  ;;  %v532_v55 = vand.u32 4294901760, %v531_v21  ;;  %v551_v48 = vsub.f32 %v3172_v50, %v550_v58  ;;  %v2412_v37 = vpack.c.bf16 %v664_v26, %v657_v20 }
  0x46   : > { %2409 = vmatprep.subr.bf16.mxu1 %v2408_v11  ;;  %2505 = vmatprep.subr.bf16.mxu0 %v2504_v60  ;;  %v3455_v47 = vand.u32 4294901760, %v3099_v9  ;;  %v671_v3 = vand.u32 4294901760, %v670_v1  ;;  %v678_v5 = vand.u32 4294901760, %v677_v38  ;;  %v542_v62 = vand.u32 4294901760, %v541_v56 }
  0x47   : > { %2235 = vmatprep.mubr.f32.mxu0 %v3454_v32  ;;  %2068 = vmatmul.mubr.f32.gmra.mrb[10].mxu1 %v522_v39  ;;  %v561_v31 = vsub.f32 %v3186_v15, %v560_v36  ;;  %v552_v21 = vand.u32 4294901760, %v551_v48  ;;  %v2512_v43 = vpack.c.bf16 %v676_v46, %v669_v19 }
  0x48   : > { %v2508_v61 = vpack.c.bf16 %v662_v24, %v3455_v47  ;;  %2411 = vmatpush3.bf16.msra.mxu1 %v2408_v11  ;;  %2507 = vmatpush3.bf16.msra.mxu0 %v2504_v60  ;;  %v2416_v52 = vpack.c.bf16 %v678_v5, %v671_v3  ;;  %v2440_v5 = vpack.c.bf16 %v3052_v57, %v3047_v22  ;;  %v3463_v22 = vld [vmem:[#allocation9_spill] sm:$0xff]  ;;  %v3466_v57 = vld [vmem:[#allocation4_spill] sm:$0xff]  ;;  %v3469_v24 = vld [vmem:[#allocation11_spill] sm:$0xff] }
  0x49   : > { %2236 = vmatmul.mubr.f32.gmra.mrb[10].mxu0 %v520_v30  ;;  %2070 = vmatprep.mubr.f32.mxu1 %v532_v55  ;;  %v562_v20 = vand.u32 4294901760, %v561_v31  ;;  %v2420_v30 = vpack.c.bf16 %v2836_v35, %v2815_v29  ;;  %v2428_v29 = vpack.c.bf16 %v2911_v2, %v2889_v59  ;;  %v3456_v35 = vld [vmem:[#allocation12_spill] sm:$0xff]  ;;  %v3460_v2 = vld [vmem:[#allocation19_spill] sm:$0xff] }
  0x4a   : > { %2238 = vmatprep.mubr.f32.mxu0 %v530_v28  ;;  %2413 = vmatprep.subr.bf16.mxu1 %v2412_v37  ;;  %v3459_v59 = vld [vmem:[#allocation16_spill] sm:$0xff] }
  0x4b   : > { %2509 = vmatprep.subr.bf16.mxu0 %v2508_v61  ;;  %2071 = vmatmul.mubr.f32.gmra.mrb[12].mxu1 %v542_v62  ;;  %v2424_v62 = vpack.c.bf16 %v2850_v41, %v2848_v40  ;;  %v3457_v40 = vld [vmem:[#allocation14_spill] sm:$0xff]  ;;  %v2436_v41 = vpack.c.bf16 %v3007_v51, %v3002_v17 }
  0x4c   : > { %2415 = vmatpush3.bf16.msra.mxu1 %v2412_v37  ;;  %2511 = vmatpush3.bf16.msra.mxu0 %v2508_v61  ;;  %v3462_v51 = vld [vmem:[#allocation6_spill] sm:$0xff] }
  0x4d   : > { %2239 = vmatmul.mubr.f32.gmra.mrb[12].mxu0 %v540_v25  ;;  %2073 = vmatprep.mubr.f32.mxu1 %v552_v21  ;;  %v3465_v17 = vld [vmem:[#allocation10_spill] sm:$0xff] }
  0x4e   : > { %2241 = vmatprep.mubr.f32.mxu0 %v550_v58  ;;  %2417 = vmatprep.subr.bf16.mxu1 %v2416_v52  ;;  %v3464_v58 = vld [vmem:[#allocation21_spill] sm:$0xff] }
  0x4f   : > { %2513 = vmatprep.subr.bf16.mxu0 %v2512_v43  ;;  %2074 = vmatmul.mubr.f32.gmra.mrb[14].mxu1 %v562_v20 }
  0x50   : > { %2419 = vmatpush3.bf16.msra.mxu1 %v2416_v52  ;;  %2515 = vmatpush3.bf16.msra.mxu0 %v2512_v43 }
  0x51   : > { %2242 = vmatmul.mubr.f32.gmra.mrb[14].mxu0 %v560_v36  ;;  %2108 = vmatprep.mubr.f32.mxu1 %v2812_v27 }
  0x52   : > { %2276 = vmatprep.mubr.f32.mxu0 %v2812_v27  ;;  %2421 = vmatprep.subr.bf16.mxu1 %v2420_v30 }
  0x53   : > { %2517 = vmatprep.subr.bf16.mxu0 %v2739_v10  ;;  %2109 = vmatmul.mubr.f32.vlgmr.msra.gmra.mrb[0].mxu1 %v2861_v44 }
  0x54   : > { %2423 = vmatpush3.bf16.msra.mxu1 %v2420_v30  ;;  %2111 = vmatprep.mubr.f32.mxu1 %v2863_v45 }
  0x55   : > { %2277 = vmatmul.mubr.f32.vlgmr.msra.gmra.mrb[0].mxu0 %v2861_v44  ;;  %2425 = vmatprep.subr.bf16.mxu1 %v2424_v62 }
  0x56   : > { %2519 = vmatpush3.bf16.msra.mxu0 %v2739_v10  ;;  %2279 = vmatprep.mubr.f32.mxu0 %v2863_v45  ;;  %v2432_v10 = vpack.c.bf16 %v2950_v14, %v2934_v12  ;;  %v2444_v12 = vpack.c.bf16 %v3104_v8, %v3099_v9  ;;  %v2448_v14 = vpack.c.bf16 %v3147_v7, %v3142_v4  ;;  %v3467_v9 = vld [vmem:[#allocation7_spill] sm:$0xff]  ;;  %v3468_v8 = vld [vmem:[#allocation8_spill] sm:$0xff]  ;;  %v3470_v4 = vld [vmem:[#allocation13_spill] sm:$0xff] }
  0x57   : > { %2521 = vmatprep.subr.bf16.mxu0 %v2743_v13  ;;  %2112 = vmatmul.mubr.f32.gmra.mrb[2].mxu1 %v2873_v54  ;;  %v3471_v7 = vld [vmem:[#allocation15_spill] sm:$0xff] }
  0x58   : > { %2427 = vmatpush3.bf16.msra.mxu1 %v2424_v62  ;;  %2114 = vmatprep.mubr.f32.mxu1 %v2899_v63 }
  0x59   : > { %2280 = vmatmul.mubr.f32.gmra.mrb[2].mxu0 %v2873_v54  ;;  %2429 = vmatprep.subr.bf16.mxu1 %v2428_v29 }
  0x5a   : > { %2523 = vmatpush3.bf16.msra.mxu0 %v2743_v13  ;;  %2282 = vmatprep.mubr.f32.mxu0 %v2899_v63  ;;  %v3458_v13 = vld [vmem:[#allocation3_spill] sm:$0xff] }
  0x5b   : > { %2525 = vmatprep.subr.bf16.mxu0 %v2767_v16  ;;  %2115 = vmatmul.mubr.f32.gmra.mrb[4].mxu1 %v3456_v35 }
  0x5c   : > { %2431 = vmatpush3.bf16.msra.mxu1 %v2428_v29  ;;  %2117 = vmatprep.mubr.f32.mxu1 %v3457_v40 }
  0x5d   : > { %2283 = vmatmul.mubr.f32.gmra.mrb[4].mxu0 %v3456_v35  ;;  %2433 = vmatprep.subr.bf16.mxu1 %v2432_v10 }
  0x5e   : > { %2527 = vmatpush3.bf16.msra.mxu0 %v2767_v16  ;;  %2285 = vmatprep.mubr.f32.mxu0 %v3457_v40  ;;  %v3461_v16 = vld [vmem:[#allocation5_spill] sm:$0xff] }
  0x5f   : > { %2529 = vmatprep.subr.bf16.mxu0 %v3458_v13  ;;  %2118 = vmatmul.mubr.f32.gmra.mrb[6].mxu1 %v3459_v59 }
  0x60   : > { %2435 = vmatpush3.bf16.msra.mxu1 %v2432_v10  ;;  %2120 = vmatprep.mubr.f32.mxu1 %v3460_v2 }
  0x61   : > { %2286 = vmatmul.mubr.f32.gmra.mrb[6].mxu0 %v3459_v59  ;;  %2437 = vmatprep.subr.bf16.mxu1 %v2436_v41 }
  0x62   : > { %2531 = vmatpush3.bf16.msra.mxu0 %v3458_v13  ;;  %2288 = vmatprep.mubr.f32.mxu0 %v3460_v2 }
  0x63   : > { %2533 = vmatprep.subr.bf16.mxu0 %v3461_v16  ;;  %2121 = vmatmul.mubr.f32.gmra.mrb[8].mxu1 %v3028_v42 }
  0x64   : > { %2439 = vmatpush3.bf16.msra.mxu1 %v2436_v41  ;;  %2123 = vmatprep.mubr.f32.mxu1 %v3037_v0 }
  0x65   : > { %2289 = vmatmul.mubr.f32.gmra.mrb[8].mxu0 %v3028_v42  ;;  %2441 = vmatprep.subr.bf16.mxu1 %v2440_v5 }
  0x66   : > { %2535 = vmatpush3.bf16.msra.mxu0 %v3461_v16  ;;  %2291 = vmatprep.mubr.f32.mxu0 %v3037_v0 }
  0x67   : > { %2537 = vmatprep.subr.bf16.mxu0 %v3462_v51  ;;  %2124 = vmatmul.mubr.f32.gmra.mrb[10].mxu1 %v3071_v49 }
  0x68   : > { %2443 = vmatpush3.bf16.msra.mxu1 %v2440_v5  ;;  %2126 = vmatprep.mubr.f32.mxu1 %v3091_v23 }
  0x69   : > { %2292 = vmatmul.mubr.f32.gmra.mrb[10].mxu0 %v3071_v49  ;;  %2445 = vmatprep.subr.bf16.mxu1 %v2444_v12 }
  0x6a   : > { %2539 = vmatpush3.bf16.msra.mxu0 %v3462_v51  ;;  %2294 = vmatprep.mubr.f32.mxu0 %v3091_v23 }
  0x6b   : > { %2541 = vmatprep.subr.bf16.mxu0 %v3463_v22  ;;  %2127 = vmatmul.mubr.f32.gmra.mrb[12].mxu1 %v3464_v58 }
  0x6c   : > { %2447 = vmatpush3.bf16.msra.mxu1 %v2444_v12  ;;  %2129 = vmatprep.mubr.f32.mxu1 %v3134_v6 }
  0x6d   : > { %2295 = vmatmul.mubr.f32.gmra.mrb[12].mxu0 %v3464_v58  ;;  %2449 = vmatprep.subr.bf16.mxu1 %v2448_v14 }
  0x6e   : > { %2543 = vmatpush3.bf16.msra.mxu0 %v3463_v22  ;;  %2297 = vmatprep.mubr.f32.mxu0 %v3134_v6 }
  0x6f   : > { %2545 = vmatprep.subr.bf16.mxu0 %v3465_v17  ;;  %2130 = vmatmul.mubr.f32.gmra.mrb[14].mxu1 %v3158_v33 }
  0x70   : > { %2451 = vmatpush3.bf16.msra.mxu1 %v2448_v14  ;;  %2164 = vmatprep.mubr.f32.mxu1 %v3466_v57 }
  0x71   : > { %2298 = vmatmul.mubr.f32.gmra.mrb[14].mxu0 %v3158_v33 }
  0x72   : > { %2547 = vmatpush3.bf16.msra.mxu0 %v3465_v17  ;;  %2332 = vmatprep.mubr.f32.mxu0 %v2812_v27  ;;  %v3472_v27 = vld [vmem:[#allocation17_spill] sm:$0xff] }
  0x73   : > { %2165 = vmatmul.mubr.f32.vlgmr.msra.gmra.mrb[0].mxu1 %v3467_v9 }
  0x74   : > { %2167 = vmatprep.mubr.f32.mxu1 %v3468_v8 }
  0x75   : > { %2333 = vmatmul.mubr.f32.vlgmr.msra.gmra.mrb[0].mxu0 %v2861_v44  ;;  %v3473_v44 = vld [vmem:[#allocation18_spill] sm:$0xff] }
  0x76   : > { %2335 = vmatprep.mubr.f32.mxu0 %v2863_v45  ;;  %v3474_v45 = vld [vmem:[#allocation20_spill] sm:$0xff] }
  0x77   : > { %2168 = vmatmul.mubr.f32.gmra.mrb[2].mxu1 %v3469_v24 }
  0x78   : > { %2170 = vmatprep.mubr.f32.mxu1 %v3470_v4 }
  0x79   : > { %2336 = vmatmul.mubr.f32.gmra.mrb[2].mxu0 %v2873_v54  ;;  %v3475_v54 = vld [vmem:[#allocation22_spill] sm:$0xff] }
  0x7a   : > { %2338 = vmatprep.mubr.f32.mxu0 %v2899_v63  ;;  %v3476_v63 = vld [vmem:[#allocation23_spill] sm:$0xff] }
  0x7b   : > { %2171 = vmatmul.mubr.f32.gmra.mrb[4].mxu1 %v3471_v7 }
  0x7c   : > { %2173 = vmatprep.mubr.f32.mxu1 %v3472_v27 }
  0x7d   : > { %2339 = vmatmul.mubr.f32.gmra.mrb[4].mxu0 %v3456_v35 }
  0x7e   : > { %2341 = vmatprep.mubr.f32.mxu0 %v3457_v40 }
  0x7f   : > { %2174 = vmatmul.mubr.f32.gmra.mrb[6].mxu1 %v3473_v44 }
  0x80   : > { %2176 = vmatprep.mubr.f32.mxu1 %v3033_v53  ;;  %v3308_v53 = vld [vmem:[%s3360_s2] ss:$0 sm:$0xff] }
  0x81   : > { %2342 = vmatmul.mubr.f32.gmra.mrb[6].mxu0 %v3459_v59 }
  0x82   : > { %2344 = vmatprep.mubr.f32.mxu0 %v3460_v2 }
  0x83   : > { %2177 = vmatmul.mubr.f32.gmra.mrb[8].mxu1 %v3069_v34 }
  0x84   : > { %2179 = vmatprep.mubr.f32.mxu1 %v3082_v18 }
  0x85   : > { %2345 = vmatmul.mubr.f32.gmra.mrb[8].mxu0 %v3028_v42 }
  0x86   : > { %2347 = vmatprep.mubr.f32.mxu0 %v3037_v0 }
  0x87   : > { %2180 = vmatmul.mubr.f32.gmra.mrb[10].mxu1 %v3474_v45 }
  0x88   : > { %2182 = vmatprep.mubr.f32.mxu1 %v3475_v54 }
  0x89   : > { %2348 = vmatmul.mubr.f32.gmra.mrb[10].mxu0 %v3071_v49 }
  0x8a   : > { %2350 = vmatprep.mubr.f32.mxu0 %v3091_v23 }
  0x8b   : > { %2183 = vmatmul.mubr.f32.gmra.mrb[12].mxu1 %v3476_v63 }
  0x8c   : > { %2185 = vmatprep.mubr.f32.mxu1 %v3172_v50 }
  0x8d   : > { %2351 = vmatmul.mubr.f32.gmra.mrb[12].mxu0 %v3464_v58 }
  0x8e   : > { %2353 = vmatprep.mubr.f32.mxu0 %v3134_v6 }
  0x8f   : > { %2186 = vmatmul.mubr.f32.gmra.mrb[14].mxu1 %v3186_v15 }
  0x91   : > { %2354 = vmatmul.mubr.f32.gmra.mrb[14].mxu0 %v3158_v33 }
 0x146   : > { %v2166_v42 = vpop.f32.mrb[0].mxu1 }
 0x147   : > { %v909_v49 = vpop.f32.mrb[1].mxu1 }
 0x148   : > { %v2334_v0 = vpop.f32.mrb[0].mxu0 }
 0x149   : > { %v2548_v34 = vadd.f32 %v2334_v0, %v2166_v42  ;;  %v1519_v18 = vpop.f32.mrb[1].mxu0 }
 0x14a   : > { %v2549_v23 = vadd.f32 %v1519_v18, %v909_v49  ;;  %v2169_v28 = vpop.f32.mrb[2].mxu1 }
 0x14b   : > { %v1672_v6 = vadd.f32 %v2548_v34, %v3308_v53  ;;  %v923_v46 = vpop.f32.mrb[3].mxu1 }
 0x14c   : > { %v1671_v33 = vadd.f32 %v2549_v23, %v3308_v53  ;;  %v2337_v50 = vpop.f32.mrb[2].mxu0 }
 0x14d   : > { %1688 = vst [vmem:[%s3315_s7 + $0x8] sm:$0xff] %v1672_v6  ;;  %v2550_v19 = vadd.f32 %v2337_v50, %v2169_v28  ;;  %v1531_v25 = vpop.f32.mrb[3].mxu0 }
 0x14e   : > { %1687 = vst [vmem:[%s3315_s7] sm:$0xff] %v1671_v33  ;;  %v2551_v15 = vadd.f32 %v1531_v25, %v923_v46  ;;  %v2172_v26 = vpop.f32.mrb[4].mxu1 }
 0x14f   : > { %v1674_v11 = vadd.f32 %v2550_v19, %v3308_v53  ;;  %v937_v39 = vpop.f32.mrb[5].mxu1 }
 0x150   : > { %v1673_v60 = vadd.f32 %v2551_v15, %v3308_v53  ;;  %v2340_v1 = vpop.f32.mrb[4].mxu0 }
 0x151   : > { %1690 = vst [vmem:[%s3315_s7 + $0x18] sm:$0xff] %v1674_v11  ;;  %v2552_v38 = vadd.f32 %v2340_v1, %v2172_v26  ;;  %v1543_v56 = vpop.f32.mrb[5].mxu0 }
 0x152   : > { %1689 = vst [vmem:[%s3315_s7 + $0x10] sm:$0xff] %v1673_v60  ;;  %v2553_v36 = vadd.f32 %v1543_v56, %v937_v39  ;;  %v2175_v48 = vpop.f32.mrb[6].mxu1 }
 0x153   : > { %v1676_v32 = vadd.f32 %v2552_v38, %v3308_v53  ;;  %v951_v61 = vpop.f32.mrb[7].mxu1 }
 0x154   : > { %v1675_v55 = vadd.f32 %v2553_v36, %v3308_v53  ;;  %v2343_v37 = vpop.f32.mrb[6].mxu0 }
 0x155   : > { %1692 = vst [vmem:[%s3315_s7 + $0x28] sm:$0xff] %v1676_v32  ;;  %v2554_v47 = vadd.f32 %v2343_v37, %v2175_v48  ;;  %v1555_v3 = vpop.f32.mrb[7].mxu0 }
 0x156   : > { %1691 = vst [vmem:[%s3315_s7 + $0x20] sm:$0xff] %v1675_v55  ;;  %v2555_v31 = vadd.f32 %v1555_v3, %v951_v61  ;;  %v2178_v43 = vpop.f32.mrb[8].mxu1 }
 0x157   : > { %v1678_v21 = vadd.f32 %v2554_v47, %v3308_v53  ;;  %v965_v62 = vpop.f32.mrb[9].mxu1 }
 0x158   : > { %v1677_v52 = vadd.f32 %v2555_v31, %v3308_v53  ;;  %v2346_v20 = vpop.f32.mrb[8].mxu0 }
 0x159   : > { %1694 = vst [vmem:[%s3315_s7 + $0x38] sm:$0xff] %v1678_v21  ;;  %v2556_v30 = vadd.f32 %v2346_v20, %v2178_v43  ;;  %v1567_v29 = vpop.f32.mrb[9].mxu0 }
 0x15a   : > { %1693 = vst [vmem:[%s3315_s7 + $0x30] sm:$0xff] %v1677_v52  ;;  %v2557_v10 = vadd.f32 %v1567_v29, %v965_v62  ;;  %v2181_v13 = vpop.f32.mrb[10].mxu1 }
 0x15b   : > { %v1680_v35 = vadd.f32 %v2556_v30, %v3308_v53  ;;  %v979_v2 = vpop.f32.mrb[11].mxu1 }
 0x15c   : > { %v1679_v40 = vadd.f32 %v2557_v10, %v3308_v53  ;;  %v2349_v41 = vpop.f32.mrb[10].mxu0 }
 0x15d   : > { %1696 = vst [vmem:[%s3315_s7 + $0x48] sm:$0xff] %v1680_v35  ;;  %v2558_v59 = vadd.f32 %v2349_v41, %v2181_v13  ;;  %v1579_v16 = vpop.f32.mrb[11].mxu0 }
 0x15e   : > { %1695 = vst [vmem:[%s3315_s7 + $0x40] sm:$0xff] %v1679_v40  ;;  %v2559_v5 = vadd.f32 %v1579_v16, %v979_v2  ;;  %v2184_v22 = vpop.f32.mrb[12].mxu1 }
 0x15f   : > { %v1682_v51 = vadd.f32 %v2558_v59, %v3308_v53  ;;  %v993_v17 = vpop.f32.mrb[13].mxu1 }
 0x160   : > { %v1681_v12 = vadd.f32 %v2559_v5, %v3308_v53  ;;  %v2352_v14 = vpop.f32.mrb[12].mxu0 }
 0x161   : > { %1698 = vst [vmem:[%s3315_s7 + $0x58] sm:$0xff] %v1682_v51  ;;  %v2560_v58 = vadd.f32 %v2352_v14, %v2184_v22  ;;  %v1591_v57 = vpop.f32.mrb[13].mxu0 }
 0x162   : > { %1697 = vst [vmem:[%s3315_s7 + $0x50] sm:$0xff] %v1681_v12  ;;  %v2561_v9 = vadd.f32 %v1591_v57, %v993_v17  ;;  %v2187_v4 = vpop.f32.mrb[14].mxu1 }
 0x163   : > { %v1684_v8 = vadd.f32 %v2560_v58, %v3308_v53  ;;  %v1007_v44 = vpop.f32.mrb[15].mxu1 }
 0x164   : > { %v1683_v24 = vadd.f32 %v2561_v9, %v3308_v53  ;;  %v2355_v7 = vpop.f32.mrb[14].mxu0 }
 0x165   : > { %1700 = vst [vmem:[%s3315_s7 + $0x68] sm:$0xff] %v1684_v8  ;;  %v2562_v27 = vadd.f32 %v2355_v7, %v2187_v4  ;;  %v1603_v45 = vpop.f32.mrb[15].mxu0 }
 0x166   : > { %1699 = vst [vmem:[%s3315_s7 + $0x60] sm:$0xff] %v1683_v24  ;;  %v2563_v54 = vadd.f32 %v1603_v45, %v1007_v44 }
 0x167   : > { %v1686_v63 = vadd.f32 %v2562_v27, %v3308_v53 }
 0x168   : > { %v1685_v42 = vadd.f32 %v2563_v54, %v3308_v53 }
 0x169   : > { %1702 = vst [vmem:[%s3315_s7 + $0x78] sm:$0xff] %v1686_v63 }
 0x16a   : > { %1701 = vst [vmem:[%s3315_s7 + $0x70] sm:$0xff] %v1685_v42 }
 0x16b PF: > { %s13_s14 = sadd.s32 1, %s2674_s14   ;;  %s3477_s12 = smov %s2670_s13 }
 0x16c   : > { %p10_p5 = scmp.ge.s32.totalorder %s13_s14, 6   ;;  %s3478_s13 = smov %s3480_s15 }
 0x16e   :  { %12 = sbr.rel (!%p10_p5) target bundleno = 2 (0x2), region = 76 }

// kernel: stage_block_forward.17
= control target key start
LH: loop header
LB: loop body
LE: loop exit
PB: predicated region body
PF: predicated region fallthrough
CT: control target
= control target key end

     0   :  { %s2862_s12 = smov 0   ;;  %s2864_s13 = smov 0   ;;  %s3540_s0 = inlined_call_operand.vmem [shape: f32[512,640], index: 0, kind: input, shape index: {}]   ;;  %s3541_s1 = inlined_call_operand.vmem [shape: f32[640,128], index: 1, kind: input, shape index: {}]   ;;  %s3542_s2 = inlined_call_operand.vmem [shape: f32[1,128], index: 2, kind: input, shape index: {}]   ;;  %s3543_s3 = inlined_call_operand.vmem [shape: f32[512,128], index: 3, kind: output, shape index: {}]  }
   0x1   :  { %s2866_s14 = smov 0   ;;  %s2868_s15 = smov 0  }
   0x2   :  { %s2870_s16 = smov 0   ;;  %s2872_s17 = smov 0  }
   0x3   :  { %s2874_s18 = smov 0  }
   0x4 LB: > { %s25_s19 = sadd.s32 1, %s2831_s16  ;;  %s32_s20 = sadd.s32 1, %s2835_s17  ;;  %s2839_s18 = sphi %s2874_s18, %s13_s18   ;;  %s2835_s17 = sphi %s2872_s17, %s3668_s17   ;;  %s2831_s16 = sphi %s2870_s16, %s3667_s16   ;;  %s2827_s15 = sphi %s2868_s15, %s3666_s15   ;;  %s2823_s14 = sphi %s2866_s14, %s3665_s14   ;;  %s2819_s13 = sphi %s2864_s13, %s3664_s13   ;;  %s2815_s12 = sphi %s2862_s12, %s3663_s12  }
   0x5   : > { %p26_p0 = scmp.ge.s32.totalorder %s25_s19, 5  ;;  %p48_p1 = scmp.ne.s32.totalorder %s2819_s13, %s2815_s12 }
   0x6   : > { %p49_p2 = scmp.eq.s32.totalorder %s2839_s18, 0  ;;  %s41_s24 = sadd.s32 1, %s2819_s13 }
   0x7   : > { %s3670_s19 = smov (%p26_p0, %s25_s19), 0  ;;  %s3672_s20 = smov (!%p26_p0, %s32_s20), %s2835_s17 }
   0x8   : > { %p50_p3 = por %p49_p2, %p48_p1  ;;  %p34_p4 = scmp.ge.s32.totalorder %s3672_s20, 4 }
   0x9   : > { %s37_s21 = ssub.s32 %s2831_s16, %s3670_s19  ;;  %p1911_p6 = scmp.ge.s32.totalorder %s2839_s18, 20 }
   0xa   : > { %s3674_s20 = smov (%p34_p4, %s3672_s20), 0 }
   0xb   : > { %s36_s22 = ssub.s32 %s2835_s17, %s3674_s20  ;;  %162 = sbr.rel (%p1911_p6) target bundleno = 33 (0x21), region = 20 }
   0xc   : > { %s38_s23 = sor.u32 %s37_s21, %s36_s22 }
   0xd   : > { %p39_p5 = scmp.eq.s32.totalorder %s38_s23, 0 }
   0xf   : > { %s2913_s25 = scalar_select %p39_p5, %s2819_s13, %s41_s24  }
  0x12   : > { %165 = sbr.rel (!%p50_p3) target bundleno = 33 (0x21), region = 24  ;;  %s167_s26 = sand.u32 (%p50_p3), 1, %s2819_s13  }
  0x13   : > { %s2727_s27 = smul.u32 (%p50_p3), 80, %s2835_s17  ;;  %s1912_s28 = sshll.u32 (%p50_p3), %s167_s26, 7 }
  0x14   : > { %s169_s7 = scalar_lea.vmem (%p50_p3), [#allocation3], %s1912_s28 }
  0x15   : > { %s172_s29 = sadd.s32 (%p50_p3), %s2831_s16, %s2727_s27 }
  0x16   : > { %s1915_s30 = sshll.u32 (%p50_p3), %s172_s29, 3 }
  0x17   : > { %s2922_s6 = scalar_lea.vmem (%p50_p3), %s3540_s0, %s1915_s30 }
  0x18   : > { %v232_v0 = vld [vmem:[%s2922_s6] sm:$0xff] (%p50_p3)  ;;  %v234_v1 = vld [vmem:[%s2922_s6 + $0x28] sm:$0xff] (%p50_p3)  ;;  %v236_v2 = vld [vmem:[%s2922_s6 + $0x50] sm:$0xff] (%p50_p3) }
  0x19   : > { %233 = vst [vmem:[%s169_s7] sm:$0xff] %v232_v0  ;;  %235 = vst [vmem:[%s169_s7 + $0x8] sm:$0xff] %v234_v1  ;;  %v238_v3 = vld [vmem:[%s2922_s6 + $0x78] sm:$0xff]  ;;  %v240_v4 = vld [vmem:[%s2922_s6 + $0xa0] sm:$0xff] }
  0x1a   : > { %237 = vst [vmem:[%s169_s7 + $0x10] sm:$0xff] %v236_v2  ;;  %v242_v5 = vld [vmem:[%s2922_s6 + $0xc8] sm:$0xff]  ;;  %239 = vst [vmem:[%s169_s7 + $0x18] sm:$0xff] %v238_v3  ;;  %v244_v6 = vld [vmem:[%s2922_s6 + $0xf0] sm:$0xff] }
  0x1b   : > { %241 = vst [vmem:[%s169_s7 + $0x20] sm:$0xff] %v240_v4  ;;  %243 = vst [vmem:[%s169_s7 + $0x28] sm:$0xff] %v242_v5  ;;  %v246_v7 = vld [vmem:[%s2922_s6 + $0x118] sm:$0xff]  ;;  %v248_v8 = vld [vmem:[%s2922_s6 + $0x140] sm:$0xff] }
  0x1c   : > { %245 = vst [vmem:[%s169_s7 + $0x30] sm:$0xff] %v244_v6  ;;  %247 = vst [vmem:[%s169_s7 + $0x38] sm:$0xff] %v246_v7  ;;  %v250_v9 = vld [vmem:[%s2922_s6 + $0x168] sm:$0xff]  ;;  %v252_v10 = vld [vmem:[%s2922_s6 + $0x190] sm:$0xff] }
  0x1d   : > { %249 = vst [vmem:[%s169_s7 + $0x40] sm:$0xff] %v248_v8  ;;  %v254_v11 = vld [vmem:[%s2922_s6 + $0x1b8] sm:$0xff]  ;;  %251 = vst [vmem:[%s169_s7 + $0x48] sm:$0xff] %v250_v9  ;;  %v256_v12 = vld [vmem:[%s2922_s6 + $0x1e0] sm:$0xff] }
  0x1e   : > { %253 = vst [vmem:[%s169_s7 + $0x50] sm:$0xff] %v252_v10  ;;  %255 = vst [vmem:[%s169_s7 + $0x58] sm:$0xff] %v254_v11  ;;  %v258_v13 = vld [vmem:[%s2922_s6 + $0x208] sm:$0xff]  ;;  %v260_v14 = vld [vmem:[%s2922_s6 + $0x230] sm:$0xff] }
  0x1f   : > { %257 = vst [vmem:[%s169_s7 + $0x60] sm:$0xff] %v256_v12  ;;  %259 = vst [vmem:[%s169_s7 + $0x68] sm:$0xff] %v258_v13  ;;  %v262_v15 = vld [vmem:[%s2922_s6 + $0x258] sm:$0xff] }
  0x20   : > { %261 = vst [vmem:[%s169_s7 + $0x70] sm:$0xff] %v260_v14  ;;  %263 = vst [vmem:[%s169_s7 + $0x78] sm:$0xff] %v262_v15 }
  0x21 PF: > { %p1916_p7 = scmp.ge.s32.totalorder %s2839_s18, 1  ;;  %p280_p8 = scmp.lt.s32.totalorder %s2839_s18, 21 }
  0x23   : > { %p281_p9 = pnand %p1916_p7, %p280_p8 }
  0x25   : > { %284 = sbr.rel (%p281_p9) target bundleno = 418 (0x1a2), region = 66 }
  0x2c   : > { %s287_s8 = sand.u32 1, %s2815_s12   ;;  %s1918_s9 = sshll.u32 %s2823_s14, 4 }
  0x2d   : > { %s1917_s10 = sshll.u32 %s287_s8, 7  ;;  %p326_p10 = scmp.lt.s32.totalorder %s1918_s9, 79 }
  0x2e   : > { %s1920_s11 = sshll.u32 %s2827_s15, 4  ;;  %s2955_s12 = scalar_lea.vmem [#allocation3], %s1917_s10 }
  0x2f   : > { %s3676_s9 = smov (!%p326_p10, %s1918_s9), 79  ;;  %p338_p11 = scmp.lt.s32.totalorder %s1920_s11, 63 }
  0x30   : > { %s1919_s21 = sshll.u32 %s3676_s9, 3  ;;  %p1922_p12 = scmp.ne.s32.totalorder %s2823_s14, 0 }
  0x31   : > { %s2948_s24 = scalar_lea.vmem %s3541_s1, %s1919_s21  ;;  %s3678_s11 = smov (!%p338_p11, %s1920_s11), 63  ;;  %v2841_v16 = vmov (!%p1922_p12), 0.0  }
  0x32   : > { %s1921_s26 = sshll.u32 %s3678_s11, 3  ;;  %349 = sbr.rel (%p1922_p12) target bundleno = 58 (0x3a), region = 74  ;;  %350 = vst [vmem:[#allocation2] sm:$0xff] (!%p1922_p12), %v2841_v16  ;;  %351 = vst [vmem:[#allocation2 + $0x8] sm:$0xff] (!%p1922_p12), %v2841_v16 }
  0x33   : > { %s2953_s29 = scalar_lea.vmem %s3543_s3, %s1921_s26  ;;  %352 = vst [vmem:[#allocation2 + $0x10] sm:$0xff] (!%p1922_p12), %v2841_v16  ;;  %353 = vst [vmem:[#allocation2 + $0x18] sm:$0xff] (!%p1922_p12), %v2841_v16 }
  0x34   : > { %354 = vst [vmem:[#allocation2 + $0x20] sm:$0xff] (!%p1922_p12), %v2841_v16  ;;  %355 = vst [vmem:[#allocation2 + $0x28] sm:$0xff] (!%p1922_p12), %v2841_v16 }
  0x35   : > { %356 = vst [vmem:[#allocation2 + $0x30] sm:$0xff] (!%p1922_p12), %v2841_v16  ;;  %357 = vst [vmem:[#allocation2 + $0x38] sm:$0xff] (!%p1922_p12), %v2841_v16 }
  0x36   : > { %358 = vst [vmem:[#allocation2 + $0x40] sm:$0xff] (!%p1922_p12), %v2841_v16  ;;  %359 = vst [vmem:[#allocation2 + $0x48] sm:$0xff] (!%p1922_p12), %v2841_v16 }
  0x37   : > { %360 = vst [vmem:[#allocation2 + $0x50] sm:$0xff] (!%p1922_p12), %v2841_v16  ;;  %361 = vst [vmem:[#allocation2 + $0x58] sm:$0xff] (!%p1922_p12), %v2841_v16 }
  0x38   : > { %362 = vst [vmem:[#allocation2 + $0x60] sm:$0xff] (!%p1922_p12), %v2841_v16  ;;  %363 = vst [vmem:[#allocation2 + $0x68] sm:$0xff] (!%p1922_p12), %v2841_v16 }
  0x39   : > { %364 = vst [vmem:[#allocation2 + $0x70] sm:$0xff] %v2841_v16  ;;  %365 = vst [vmem:[#allocation2 + $0x78] sm:$0xff] %v2841_v16 }
  0x3a PF: > { %v398_v17 = vld [vmem:[%s2948_s24] sm:$0xff]  ;;  %v399_v18 = vld [vmem:[%s2948_s24 + $0x8] sm:$0xff]  ;;  %v400_v19 = vld [vmem:[%s2948_s24 + $0x10] sm:$0xff]  ;;  %p1923_p13 = scmp.ne.s32.totalorder %s2823_s14, 4 }
  0x3b   : > { %v415_v20 = vand.u32 4294901760, %v398_v17  ;;  %v418_v21 = vand.u32 4294901760, %v399_v18  ;;  %v401_v22 = vld [vmem:[%s2948_s24 + $0x18] sm:$0xff]  ;;  %v421_v23 = vand.u32 4294901760, %v400_v19  ;;  %v2963_v24 = vld [vmem:[%s2948_s24 + $0x20] sm:$0xff]  ;;  %v2966_v25 = vld [vmem:[%s2948_s24 + $0x28] sm:$0xff] }
  0x3c   : > { %v424_v26 = vand.u32 4294901760, %v401_v22  ;;  %v427_v28 = vand.u32 4294901760, %v2963_v24  ;;  %v430_v29 = vand.u32 4294901760, %v2966_v25  ;;  %v2975_v31 = vld [vmem:[%s2948_s24 + $0x30] sm:$0xff]  ;;  %v2978_v32 = vld [vmem:[%s2948_s24 + $0x38] sm:$0xff]  ;;  %v382_v33 = vld [vmem:[%s2955_s12] sm:$0xff] }
  0x3d   : > { %v2968_v27 = vpack.c.bf16 %v418_v21, %v415_v20  ;;  %v2985_v34 = vand.u32 4294901760, %v382_v33  ;;  %v433_v36 = vand.u32 4294901760, %v2975_v31  ;;  %v436_v37 = vand.u32 4294901760, %v2978_v32  ;;  %v383_v38 = vld [vmem:[%s2955_s12 + $0x8] sm:$0xff]  ;;  %v2999_v39 = vld [vmem:[%s2948_s24 + $0x40] sm:$0xff]  ;;  %v3023_v47 = vld [vmem:[%s2948_s24 + $0x50] sm:$0xff] }
  0x3e   : > { %v2972_v30 = vpack.c.bf16 %v424_v26, %v421_v23  ;;  %v2993_v35 = vpack.c.bf16 %v430_v29, %v427_v28  ;;  %v3002_v40 = vld [vmem:[%s2948_s24 + $0x48] sm:$0xff]  ;;  %v3010_v43 = vand.u32 4294901760, %v383_v38  ;;  %v439_v45 = vand.u32 4294901760, %v2999_v39  ;;  %v384_v48 = vld [vmem:[%s2955_s12 + $0x10] sm:$0xff]  ;;  %v3027_v49 = vld [vmem:[%s2948_s24 + $0x58] sm:$0xff] }
  0x3f   : > { %2456 = vmatprep.subr.bf16.mxu1 %v2968_v27  ;;  %2552 = vmatprep.subr.bf16.mxu0 %v2968_v27  ;;  %v3005_v41 = vsub.f32 %v382_v33, %v2985_v34  ;;  %v3018_v44 = vpack.c.bf16 %v436_v37, %v433_v36  ;;  %v3552_v46 = vand.u32 4294901760, %v3002_v40  ;;  %v385_v51 = vld [vmem:[%s2955_s12 + $0x18] sm:$0xff]  ;;  %v3031_v52 = vsub.f32 %v398_v17, %v415_v20  ;;  %v3039_v55 = vld [vmem:[%s2948_s24 + $0x60] sm:$0xff]  ;;  %v3042_v56 = vld [vmem:[%s2948_s24 + $0x68] sm:$0xff] }
  0x40   : > { %2458 = vmatpush3.bf16.msra.mxu1 %v2968_v27  ;;  %2554 = vmatpush3.bf16.msra.mxu0 %v2968_v27  ;;  %v3033_v53 = vsub.f32 %v399_v18, %v418_v21  ;;  %v3551_v54 = vand.u32 4294901760, %v3023_v47  ;;  %v3045_v58 = vsub.f32 %v383_v38, %v3010_v43  ;;  %v3047_v59 = vand.u32 4294901760, %v384_v48  ;;  %v3059_v62 = vld [vmem:[%s2948_s24 + $0x70] sm:$0xff]  ;;  %v3062_v63 = vld [vmem:[%s2948_s24 + $0x78] sm:$0xff]  ;;  %v386_v3 = vld [vmem:[%s2955_s12 + $0x20] sm:$0xff] }
  0x41   : > { %2460 = vmatprep.subr.bf16.mxu1 %v2972_v30  ;;  %2556 = vmatprep.subr.bf16.mxu0 %v2972_v30  ;;  %3586 = vst [vmem:[#allocation4_spill] sm:$0xff] %v3005_v41  ;;  %v497_v42 = vand.u32 4294901760, %v3005_v41  ;;  %3587 = vst [vmem:[#allocation5_spill] sm:$0xff] %v3018_v44  ;;  %v3055_v60 = vpack.c.bf16 %v3552_v46, %v439_v45  ;;  %v3549_v61 = vand.u32 4294901760, %v3027_v49  ;;  %v3064_v0 = vand.u32 4294901760, %v385_v51  ;;  %v387_v8 = vld [vmem:[%s2955_s12 + $0x28] sm:$0xff] }
  0x42   : > { %3588 = vst [vmem:[#allocation6_spill] sm:$0xff] %v3045_v58  ;;  %v3066_v1 = vsub.f32 %v400_v19, %v421_v23  ;;  %v3068_v2 = vsub.f32 %v401_v22, %v424_v26  ;;  %v3547_v4 = vand.u32 4294901760, %v3039_v55  ;;  %v3546_v5 = vand.u32 4294901760, %v3042_v56  ;;  %v388_v19 = vld [vmem:[%s2955_s12 + $0x30] sm:$0xff]  ;;  %v389_v26 = vld [vmem:[%s2955_s12 + $0x38] sm:$0xff] }
  0x43   : > { %v498_v50 = vsub.f32 %v3005_v41, %v497_v42  ;;  %2319 = vmatprep.mubr.f32.mxu0 %v497_v42  ;;  %3589 = vst [vmem:[#allocation7_spill] sm:$0xff] %v3055_v60  ;;  %v658_v6 = vand.u32 4294901760, %v3031_v52  ;;  %v665_v7 = vand.u32 4294901760, %v3033_v53  ;;  %v3545_v9 = vand.u32 4294901760, %v3059_v62 }
  0x44   : > { %2462 = vmatpush3.bf16.msra.mxu1 %v2972_v30  ;;  %2558 = vmatpush3.bf16.msra.mxu0 %v2972_v30  ;;  %v3544_v10 = vand.u32 4294901760, %v3062_v63  ;;  %v3548_v11 = vand.u32 4294901760, %v3045_v58  ;;  %v3082_v12 = vsub.f32 %v384_v48, %v3047_v59  ;;  %v3090_v13 = vpack.c.bf16 %v3549_v61, %v3551_v54 }
  0x45   : > { %2464 = vmatprep.subr.bf16.mxu1 %v2993_v35  ;;  %2560 = vmatprep.subr.bf16.mxu0 %v2993_v35  ;;  %v499_v57 = vand.u32 4294901760, %v498_v50  ;;  %v3093_v14 = vsub.f32 %v385_v51, %v3064_v0  ;;  %v672_v15 = vand.u32 4294901760, %v3066_v1  ;;  %v3096_v16 = vand.u32 4294901760, %v386_v3 }
  0x46   : > { %3590 = vst [vmem:[#allocation8_spill] sm:$0xff] %v3082_v12  ;;  %3591 = vst [vmem:[#allocation9_spill] sm:$0xff] %v3090_v13  ;;  %v679_v17 = vand.u32 4294901760, %v3068_v2  ;;  %v3099_v18 = vand.u32 4294901760, %v387_v8  ;;  %v659_v20 = vsub.f32 %v3031_v52, %v658_v6  ;;  %v666_v21 = vsub.f32 %v3033_v53, %v665_v7 }
  0x47   : > { %2151 = vmatprep.mubr.f32.mxu1 %v499_v57  ;;  %3592 = vst [vmem:[#allocation10_spill] sm:$0xff] %v3093_v14  ;;  %v3107_v22 = vsub.f32 %v2963_v24, %v427_v28  ;;  %v3112_v23 = vsub.f32 %v2966_v25, %v430_v29  ;;  %v3121_v33 = vpack.c.bf16 %v3546_v5, %v3547_v4  ;;  %v3550_v28 = vand.u32 4294901760, %v3082_v12 }
  0x48   : > { %2466 = vmatpush3.bf16.msra.mxu1 %v2993_v35  ;;  %2562 = vmatpush3.bf16.msra.mxu0 %v2993_v35  ;;  %v3127_v24 = vpack.c.bf16 %v3544_v10, %v3545_v9  ;;  %v3132_v25 = vsub.f32 %v3045_v58, %v3548_v11  ;;  %v3553_v29 = vand.u32 4294901760, %v3093_v14  ;;  %v673_v38 = vsub.f32 %v3066_v1, %v672_v15 }
  0x49   : > { %2468 = vmatprep.subr.bf16.mxu1 %v3018_v44  ;;  %2564 = vmatprep.subr.bf16.mxu0 %v3018_v44  ;;  %3593 = vst [vmem:[#allocation11_spill] sm:$0xff] %v3121_v33  ;;  %v3140_v42 = vsub.f32 %v386_v3, %v3096_v16  ;;  %v3142_v48 = vand.u32 4294901760, %v388_v19  ;;  %v680_v50 = vsub.f32 %v3068_v2, %v679_v17  ;;  %v3148_v57 = vand.u32 4294901760, %v389_v26 }
  0x4a   : > { %3594 = vst [vmem:[#allocation12_spill] sm:$0xff] %v3127_v24  ;;  %v3146_v51 = vsub.f32 %v387_v8, %v3099_v18  ;;  %v3153_v10 = vsub.f32 %v2975_v31, %v433_v36  ;;  %v660_v9 = vand.u32 4294901760, %v659_v20  ;;  %v667_v5 = vand.u32 4294901760, %v666_v21  ;;  %v390_v36 = vld [vmem:[%s2955_s12 + $0x40] sm:$0xff] }
  0x4b   : > { %3595 = vst [vmem:[#allocation13_spill] sm:$0xff] %v3140_v42  ;;  %3596 = vst [vmem:[#allocation14_spill] sm:$0xff] %v3142_v48  ;;  %v686_v3 = vand.u32 4294901760, %v3107_v22  ;;  %v693_v4 = vand.u32 4294901760, %v3112_v23  ;;  %v509_v8 = vand.u32 4294901760, %v3132_v25  ;;  %v3160_v11 = vpack.c.bf16 %v665_v7, %v658_v6 }
  0x4c   : > { %2470 = vmatpush3.bf16.msra.mxu1 %v3018_v44  ;;  %2566 = vmatpush3.bf16.msra.mxu0 %v3018_v44  ;;  %3597 = vst [vmem:[#allocation15_spill] sm:$0xff] %v3146_v51  ;;  %3598 = vst [vmem:[#allocation16_spill] sm:$0xff] %v3148_v57  ;;  %v3165_v61 = vsub.f32 %v3082_v12, %v3550_v28  ;;  %v3170_v31 = vsub.f32 %v2978_v32, %v436_v37  ;;  %v674_v7 = vand.u32 4294901760, %v673_v38 }
  0x4d   : > { %2472 = vmatprep.subr.bf16.mxu1 %v3055_v60  ;;  %2568 = vmatprep.subr.bf16.mxu0 %v3055_v60  ;;  %v3178_v6 = vsub.f32 %v3093_v14, %v3553_v29  ;;  %v3561_v20 = vand.u32 4294901760, %v3140_v42  ;;  %v3182_v21 = vsub.f32 %v388_v19, %v3142_v48  ;;  %v681_v25 = vand.u32 4294901760, %v680_v50 }
  0x4e   : > { %v3186_v37 = vsub.f32 %v389_v26, %v3148_v57  ;;  %v2487_v54 = vpack.c.bf16 %v667_v5, %v660_v9  ;;  %v687_v46 = vsub.f32 %v3107_v22, %v686_v3  ;;  %v694_v29 = vsub.f32 %v3112_v23, %v693_v4  ;;  %v391_v26 = vld [vmem:[%s2955_s12 + $0x48] sm:$0xff] }
  0x4f   : > { %3599 = vst [vmem:[#allocation17_spill] sm:$0xff] %v3182_v21  ;;  %v3191_v38 = vand.u32 4294901760, %v390_v36  ;;  %v519_v19 = vand.u32 4294901760, %v3165_v61  ;;  %v707_v50 = vand.u32 4294901760, %v3170_v31  ;;  %v3201_v5 = vsub.f32 %v2999_v39, %v439_v45  ;;  %v392_v45 = vld [vmem:[%s2955_s12 + $0x50] sm:$0xff] }
  0x50   : > { %2474 = vmatpush3.bf16.msra.mxu1 %v3055_v60  ;;  %2570 = vmatpush3.bf16.msra.mxu0 %v3055_v60  ;;  %3600 = vst [vmem:[#allocation18_spill] sm:$0xff] %v3186_v37  ;;  %v3602_v9 = vand.u32 4294901760, %v3002_v40  ;;  %v529_v32 = vand.u32 4294901760, %v3178_v6  ;;  %v2587_v61 = vpack.c.bf16 %v679_v17, %v672_v15  ;;  %v3214_v41 = vsub.f32 %v3140_v42, %v3561_v20 }
  0x51   : > { %2476 = vmatprep.subr.bf16.mxu1 %v3090_v13  ;;  %2572 = vmatprep.subr.bf16.mxu0 %v3090_v13  ;;  %3601 = vst [vmem:[#allocation19_spill] sm:$0xff] %v3191_v38  ;;  %v3604_v6 = vand.u32 4294901760, %v3153_v10  ;;  %v688_v17 = vand.u32 4294901760, %v687_v46  ;;  %v695_v60 = vand.u32 4294901760, %v694_v29  ;;  %v3228_v20 = vsub.f32 %v390_v36, %v3191_v38  ;;  %v393_v46 = vld [vmem:[%s2955_s12 + $0x58] sm:$0xff] }
  0x52   : > { %v3206_v28 = vsub.f32 %v3002_v40, %v3602_v9  ;;  %v3603_v40 = vand.u32 4294901760, %v3146_v51  ;;  %v3230_v39 = vand.u32 4294901760, %v391_v26  ;;  %v539_v29 = vand.u32 4294901760, %v3214_v41 }
  0x53   : > { %v701_v15 = vsub.f32 %v3153_v10, %v3604_v6  ;;  %v3242_v36 = vpack.c.bf16 %v693_v4, %v686_v3  ;;  %v3605_v6 = vand.u32 4294901760, %v3182_v21  ;;  %v3606_v38 = vand.u32 4294901760, %v3023_v47 }
  0x54   : > { %2478 = vmatpush3.bf16.msra.mxu1 %v3090_v13  ;;  %2574 = vmatpush3.bf16.msra.mxu0 %v3090_v13  ;;  %v3221_v9 = vsub.f32 %v3146_v51, %v3603_v40  ;;  %v3237_v13 = vand.u32 4294901760, %v392_v45  ;;  %v3607_v57 = vand.u32 4294901760, %v3186_v37  ;;  %v3608_v4 = vand.u32 4294901760, %v3027_v49 }
  0x55   : > { %2480 = vmatprep.subr.bf16.mxu1 %v3121_v33  ;;  %2576 = vmatprep.subr.bf16.mxu0 %v3121_v33  ;;  %v702_v41 = vand.u32 4294901760, %v701_v15  ;;  %v3609_v48 = vand.u32 4294901760, %v3045_v58 }
  0x56   : > { %v549_v40 = vand.u32 4294901760, %v3221_v9  ;;  %v3258_v44 = vsub.f32 %v3186_v37, %v3607_v57  ;;  %v3263_v3 = vsub.f32 %v3027_v49, %v3608_v4  ;;  %v3270_v9 = vsub.f32 %v391_v26, %v3230_v39  ;;  %v395_v26 = vld [vmem:[%s2955_s12 + $0x68] sm:$0xff] }
  0x57   : > { %v3272_v57 = vand.u32 4294901760, %v393_v46  ;;  %v3610_v49 = vand.u32 4294901760, %v3201_v5 }
  0x58   : > { %2482 = vmatpush3.bf16.msra.mxu1 %v3121_v33  ;;  %2578 = vmatpush3.bf16.msra.mxu0 %v3121_v33  ;;  %v2491_v33 = vpack.c.bf16 %v681_v25, %v674_v7  ;;  %v708_v7 = vsub.f32 %v3170_v31, %v707_v50  ;;  %v3252_v25 = vsub.f32 %v3023_v47, %v3606_v38 }
  0x59   : > { %2484 = vmatprep.subr.bf16.mxu1 %v3127_v24  ;;  %2580 = vmatprep.subr.bf16.mxu0 %v3127_v24  ;;  %v2495_v47 = vpack.c.bf16 %v695_v60, %v688_v17  ;;  %v715_v4 = vsub.f32 %v3201_v5, %v3610_v49  ;;  %v3612_v17 = vand.u32 4294901760, %v3082_v12  ;;  %v3613_v49 = vand.u32 4294901760, %v3039_v55  ;;  %v396_v12 = vld [vmem:[%s2955_s12 + $0x70] sm:$0xff] }
  0x5a   : > { %v709_v15 = vand.u32 4294901760, %v708_v7 }
  0x5b   : > { %v3294_v38 = vsub.f32 %v3039_v55, %v3613_v49  ;;  %v3616_v55 = vand.u32 4294901760, %v3093_v14  ;;  %v3617_v49 = vand.u32 4294901760, %v3228_v20  ;;  %v397_v14 = vld [vmem:[%s2955_s12 + $0x78] sm:$0xff] }
  0x5c   : > { %2486 = vmatpush3.bf16.msra.mxu1 %v3127_v24  ;;  %2582 = vmatpush3.bf16.msra.mxu0 %v3127_v24  ;;  %v3247_v24 = vsub.f32 %v3182_v21, %v3605_v6  ;;  %v394_v6 = vld [vmem:[%s2955_s12 + $0x60] sm:$0xff] }
  0x5d   : > { %2488 = vmatprep.subr.bf16.mxu1 %v2487_v54  ;;  %2584 = vmatprep.subr.bf16.mxu0 %v3160_v11  ;;  %v3289_v7 = vand.u32 4294901760, %v394_v6 }
  0x5f   : > { %2152 = vmatmul.mubr.f32.vlgmr.msra.gmra.mrb[0].mxu1 %v509_v8  ;;  %2320 = vmatmul.mubr.f32.vlgmr.msra.gmra.mrb[0].mxu0 %v3609_v48  ;;  %v3611_v8 = vand.u32 4294901760, %v3206_v28  ;;  %v3282_v48 = vsub.f32 %v392_v45, %v3237_v13  ;;  %v569_v45 = vand.u32 4294901760, %v3258_v44  ;;  %v578_v44 = vsub.f32 %v3228_v20, %v3617_v49 }
  0x60   : > { %2490 = vmatpush3.bf16.msra.mxu1 %v2487_v54  ;;  %2586 = vmatpush3.bf16.msra.mxu0 %v3160_v11  ;;  %v559_v54 = vand.u32 4294901760, %v3247_v24  ;;  %v3615_v24 = vand.u32 4294901760, %v3042_v56  ;;  %v3621_v49 = vand.u32 4294901760, %v3252_v25 }
  0x61   : > { %v722_v60 = vsub.f32 %v3206_v28, %v3611_v8  ;;  %2154 = vmatprep.mubr.f32.mxu1 %v519_v19  ;;  %2322 = vmatprep.mubr.f32.mxu0 %v3612_v17  ;;  %v3614_v19 = vand.u32 4294901760, %v3153_v10 }
  0x62   : > { %2492 = vmatprep.subr.bf16.mxu1 %v2491_v33  ;;  %2588 = vmatprep.subr.bf16.mxu0 %v2587_v61  ;;  %v3303_v11 = vsub.f32 %v3042_v56, %v3615_v24  ;;  %v2499_v56 = vpack.c.bf16 %v709_v15, %v702_v41  ;;  %v716_v24 = vand.u32 4294901760, %v715_v4  ;;  %v729_v58 = vsub.f32 %v3252_v25, %v3621_v49 }
  0x63   : > { %v2595_v8 = vpack.c.bf16 %v707_v50, %v3614_v19  ;;  %2155 = vmatmul.mubr.f32.gmra.mrb[2].mxu1 %v529_v32  ;;  %2323 = vmatmul.mubr.f32.gmra.mrb[2].mxu0 %v3616_v55  ;;  %v3313_v50 = vsub.f32 %v393_v46, %v3272_v57  ;;  %v3315_v19 = vand.u32 4294901760, %v395_v26  ;;  %v723_v17 = vand.u32 4294901760, %v722_v60 }
  0x64   : > { %2494 = vmatpush3.bf16.msra.mxu1 %v2491_v33  ;;  %2590 = vmatpush3.bf16.msra.mxu0 %v2587_v61  ;;  %v3620_v55 = vand.u32 4294901760, %v3140_v42  ;;  %v3325_v46 = vsub.f32 %v394_v6, %v3289_v7  ;;  %v3328_v61 = vand.u32 4294901760, %v396_v12  ;;  %v3624_v41 = vand.u32 4294901760, %v3263_v3 }
  0x65   : > { %3618 = vst [vmem:[#allocation20_spill] sm:$0xff] %v3313_v50  ;;  %3619 = vst [vmem:[#allocation21_spill] sm:$0xff] %v3315_v19  ;;  %2157 = vmatprep.mubr.f32.mxu1 %v539_v29  ;;  %2496 = vmatprep.subr.bf16.mxu1 %v2495_v47  ;;  %v749_v15 = vand.u32 4294901760, %v3303_v11  ;;  %v3625_v4 = vand.u32 4294901760, %v3059_v62  ;;  %v3626_v6 = vand.u32 4294901760, %v3062_v63  ;;  %v3627_v49 = vand.u32 4294901760, %v3146_v51 }
  0x66   : > { %2325 = vmatprep.mubr.f32.mxu0 %v3620_v55  ;;  %3622 = vst [vmem:[#allocation22_spill] sm:$0xff] %v3325_v46  ;;  %3623 = vst [vmem:[#allocation23_spill] sm:$0xff] %v3328_v61  ;;  %2592 = vmatprep.subr.bf16.mxu0 %v3242_v36  ;;  %v736_v29 = vsub.f32 %v3263_v3, %v3624_v41  ;;  %v3628_v33 = vand.u32 4294901760, %v3270_v9  ;;  %v607_v32 = vand.u32 4294901760, %v3313_v50  ;;  %v3632_v51 = vand.u32 4294901760, %v3282_v48 }
  0x67   : > { %v3338_v60 = vsub.f32 %v3059_v62, %v3625_v4  ;;  %v3343_v55 = vsub.f32 %v3062_v63, %v3626_v6  ;;  %2158 = vmatmul.mubr.f32.gmra.mrb[4].mxu1 %v549_v40  ;;  %2326 = vmatmul.mubr.f32.gmra.mrb[4].mxu0 %v3627_v49  ;;  %v3352_v42 = vsub.f32 %v395_v26, %v3315_v19  ;;  %v3354_v62 = vand.u32 4294901760, %v397_v14 }
  0x68   : > { %v588_v41 = vsub.f32 %v3270_v9, %v3628_v33  ;;  %2498 = vmatpush3.bf16.msra.mxu1 %v2495_v47  ;;  %2594 = vmatpush3.bf16.msra.mxu0 %v3242_v36  ;;  %v579_v63 = vand.u32 4294901760, %v578_v44  ;;  %v2503_v4 = vpack.c.bf16 %v723_v17, %v716_v24  ;;  %v3630_v40 = vand.u32 4294901760, %v3201_v5 }
  0x69   : > { %3629 = vst [vmem:[#allocation24_spill] sm:$0xff] %v3352_v42  ;;  %v3631_v6 = vand.u32 4294901760, %v3206_v28  ;;  %v598_v33 = vsub.f32 %v3282_v48, %v3632_v51  ;;  %2160 = vmatprep.mubr.f32.mxu1 %v559_v54  ;;  %v3633_v26 = vand.u32 4294901760, %v3182_v21  ;;  %v730_v19 = vand.u32 4294901760, %v729_v58  ;;  %2500 = vmatprep.subr.bf16.mxu1 %v2499_v56 }
  0x6a   : > { %v617_v47 = vand.u32 4294901760, %v3325_v46  ;;  %v3634_v36 = vand.u32 4294901760, %v3294_v38  ;;  %v3371_v44 = vsub.f32 %v396_v12, %v3328_v61  ;;  %2596 = vmatprep.subr.bf16.mxu0 %v2595_v8  ;;  %v737_v24 = vand.u32 4294901760, %v736_v29 }
  0x6b   : > { %v2599_v49 = vpack.c.bf16 %v3631_v6, %v3630_v40  ;;  %2328 = vmatprep.mubr.f32.mxu0 %v3633_v26  ;;  %v750_v40 = vsub.f32 %v3303_v11, %v749_v15  ;;  %v756_v51 = vand.u32 4294901760, %v3338_v60  ;;  %v763_v54 = vand.u32 4294901760, %v3343_v55  ;;  %2161 = vmatmul.mubr.f32.gmra.mrb[6].mxu1 %v569_v45 }
  0x6c   : > { %v743_v17 = vsub.f32 %v3294_v38, %v3634_v36  ;;  %v3635_v58 = vand.u32 4294901760, %v3186_v37  ;;  %v589_v6 = vand.u32 4294901760, %v588_v41  ;;  %v608_v26 = vsub.f32 %v3313_v50, %v607_v32  ;;  %2502 = vmatpush3.bf16.msra.mxu1 %v2499_v56  ;;  %2598 = vmatpush3.bf16.msra.mxu0 %v2595_v8 }
  0x6d   : > { %v627_v36 = vand.u32 4294901760, %v3352_v42  ;;  %v3381_v12 = vsub.f32 %v397_v14, %v3354_v62  ;;  %v599_v29 = vand.u32 4294901760, %v598_v33  ;;  %2163 = vmatprep.mubr.f32.mxu1 %v579_v63  ;;  %v3636_v21 = vand.u32 4294901760, %v3228_v20  ;;  %2504 = vmatprep.subr.bf16.mxu1 %v2503_v4 }
  0x6e   : > { %2329 = vmatmul.mubr.f32.gmra.mrb[6].mxu0 %v3635_v58  ;;  %v3637_v45 = vand.u32 4294901760, %v3252_v25  ;;  %v3638_v37 = vand.u32 4294901760, %v3263_v3  ;;  %v618_v41 = vsub.f32 %v3325_v46, %v617_v47  ;;  %v744_v50 = vand.u32 4294901760, %v743_v17  ;;  %2600 = vmatprep.subr.bf16.mxu0 %v2599_v49 }
  0x6f   : > { %2331 = vmatprep.mubr.f32.mxu0 %v3636_v21  ;;  %v637_v61 = vand.u32 4294901760, %v3371_v44  ;;  %v2507_v14 = vpack.c.bf16 %v737_v24, %v730_v19  ;;  %v751_v56 = vand.u32 4294901760, %v750_v40  ;;  %v757_v8 = vsub.f32 %v3338_v60, %v756_v51  ;;  %2164 = vmatmul.mubr.f32.gmra.mrb[8].mxu1 %v589_v6 }
  0x70   : > { %v2603_v58 = vpack.c.bf16 %v3638_v37, %v3637_v45  ;;  %v764_v63 = vsub.f32 %v3343_v55, %v763_v54  ;;  %v3639_v21 = vand.u32 4294901760, %v3270_v9  ;;  %v609_v33 = vand.u32 4294901760, %v608_v26  ;;  %2506 = vmatpush3.bf16.msra.mxu1 %v2503_v4  ;;  %2602 = vmatpush3.bf16.msra.mxu0 %v2599_v49 }
  0x71   : > { %v628_v37 = vsub.f32 %v3352_v42, %v627_v36  ;;  %v647_v45 = vand.u32 4294901760, %v3381_v12  ;;  %2166 = vmatprep.mubr.f32.mxu1 %v599_v29  ;;  %v3640_v17 = vand.u32 4294901760, %v3282_v48  ;;  %v619_v19 = vand.u32 4294901760, %v618_v41  ;;  %2508 = vmatprep.subr.bf16.mxu1 %v2507_v14 }
  0x72   : > { %2332 = vmatmul.mubr.f32.gmra.mrb[8].mxu0 %v3639_v21  ;;  %v638_v24 = vsub.f32 %v3371_v44, %v637_v61  ;;  %2604 = vmatprep.subr.bf16.mxu0 %v2603_v58  ;;  %v2511_v40 = vpack.c.bf16 %v751_v56, %v744_v50  ;;  %v3641_v6 = vand.u32 4294901760, %v3294_v38  ;;  %v758_v26 = vand.u32 4294901760, %v757_v8  ;;  %v368_v56 = vld [vmem:[#allocation2 + $0x10] sm:$0xff] }
  0x73   : > { %2334 = vmatprep.mubr.f32.mxu0 %v3640_v17  ;;  %v765_v46 = vand.u32 4294901760, %v764_v63  ;;  %2167 = vmatmul.mubr.f32.gmra.mrb[10].mxu1 %v609_v33  ;;  %v629_v42 = vand.u32 4294901760, %v628_v37  ;;  %v648_v4 = vsub.f32 %v3381_v12, %v647_v45  ;;  %v2611_v41 = vpack.c.bf16 %v763_v54, %v756_v51  ;;  %v371_v37 = vld [vmem:[#allocation2 + $0x28] sm:$0xff] }
  0x74   : > { %v2607_v21 = vpack.c.bf16 %v749_v15, %v3641_v6  ;;  %2510 = vmatpush3.bf16.msra.mxu1 %v2507_v14  ;;  %2606 = vmatpush3.bf16.msra.mxu0 %v2603_v58  ;;  %v639_v49 = vand.u32 4294901760, %v638_v24  ;;  %v3655_v15 = vld [vmem:[#allocation10_spill] sm:$0xff]  ;;  %v370_v24 = vld [vmem:[#allocation2 + $0x20] sm:$0xff] }
  0x75   : > { %2169 = vmatprep.mubr.f32.mxu1 %v619_v19  ;;  %2512 = vmatprep.subr.bf16.mxu1 %v2511_v40  ;;  %v2515_v29 = vpack.c.bf16 %v765_v46, %v758_v26  ;;  %v649_v50 = vand.u32 4294901760, %v648_v4  ;;  %v3653_v46 = vld [vmem:[#allocation6_spill] sm:$0xff] }
  0x76   : > { %2335 = vmatmul.mubr.f32.gmra.mrb[10].mxu0 %v607_v32  ;;  %2608 = vmatprep.subr.bf16.mxu0 %v2607_v21  ;;  %v2519_v32 = vpack.c.bf16 %v3033_v53, %v3031_v52  ;;  %v2527_v52 = vpack.c.bf16 %v3112_v23, %v3107_v22  ;;  %v3642_v53 = vld [vmem:[#allocation14_spill] sm:$0xff]  ;;  %v2539_v22 = vpack.c.bf16 %v3263_v3, %v3252_v25  ;;  %v3647_v23 = vld [vmem:[#allocation9_spill] sm:$0xff]  ;;  %v3650_v3 = vld [vmem:[#allocation23_spill] sm:$0xff] }
  0x77   : > { %2337 = vmatprep.mubr.f32.mxu0 %v617_v47  ;;  %2170 = vmatmul.mubr.f32.gmra.mrb[12].mxu1 %v629_v42  ;;  %v2523_v42 = vpack.c.bf16 %v3068_v2, %v3066_v1  ;;  %v2535_v1 = vpack.c.bf16 %v3206_v28, %v3201_v5  ;;  %v3644_v2 = vld [vmem:[#allocation16_spill] sm:$0xff]  ;;  %v2543_v28 = vpack.c.bf16 %v3303_v11, %v3294_v38  ;;  %v3649_v25 = vld [vmem:[#allocation21_spill] sm:$0xff] }
  0x78   : > { %2514 = vmatpush3.bf16.msra.mxu1 %v2511_v40  ;;  %2610 = vmatpush3.bf16.msra.mxu0 %v2607_v21  ;;  %v2547_v5 = vpack.c.bf16 %v3343_v55, %v3338_v60  ;;  %v3651_v38 = vld [vmem:[#allocation12_spill] sm:$0xff]  ;;  %v3656_v60 = vld [vmem:[#allocation13_spill] sm:$0xff]  ;;  %v3657_v55 = vld [vmem:[#allocation15_spill] sm:$0xff] }
  0x79   : > { %2172 = vmatprep.mubr.f32.mxu1 %v639_v49  ;;  %2516 = vmatprep.subr.bf16.mxu1 %v2515_v29  ;;  %v3652_v11 = vld [vmem:[#allocation4_spill] sm:$0xff]  ;;  %v373_v49 = vld [vmem:[#allocation2 + $0x38] sm:$0xff] }
  0x7a   : > { %2338 = vmatmul.mubr.f32.gmra.mrb[12].mxu0 %v627_v36  ;;  %2612 = vmatprep.subr.bf16.mxu0 %v2611_v41  ;;  %v369_v36 = vld [vmem:[#allocation2 + $0x18] sm:$0xff] }
  0x7b   : > { %2340 = vmatprep.mubr.f32.mxu0 %v637_v61  ;;  %2173 = vmatmul.mubr.f32.gmra.mrb[14].mxu1 %v649_v50  ;;  %v3654_v61 = vld [vmem:[#allocation8_spill] sm:$0xff] }
  0x7c   : > { %2518 = vmatpush3.bf16.msra.mxu1 %v2515_v29  ;;  %2614 = vmatpush3.bf16.msra.mxu0 %v2611_v41 }
  0x7d   : > { %2207 = vmatprep.mubr.f32.mxu1 %v2985_v34  ;;  %2520 = vmatprep.subr.bf16.mxu1 %v2519_v32 }
  0x7e   : > { %2341 = vmatmul.mubr.f32.gmra.mrb[14].mxu0 %v647_v45  ;;  %2616 = vmatprep.subr.bf16.mxu0 %v2968_v27 }
  0x7f   : > { %2375 = vmatprep.mubr.f32.mxu0 %v2985_v34  ;;  %2208 = vmatmul.mubr.f32.vlgmr.msra.gmra.mrb[0].mxu1 %v3010_v43 }
  0x80   : > { %2522 = vmatpush3.bf16.msra.mxu1 %v2519_v32  ;;  %2210 = vmatprep.mubr.f32.mxu1 %v3047_v59  ;;  %v372_v32 = vld [vmem:[#allocation2 + $0x30] sm:$0xff] }
  0x81   : > { %2524 = vmatprep.subr.bf16.mxu1 %v2523_v42 }
  0x82   : > { %2376 = vmatmul.mubr.f32.vlgmr.msra.gmra.mrb[0].mxu0 %v3010_v43 }
  0x83   : > { %2618 = vmatpush3.bf16.msra.mxu0 %v2968_v27  ;;  %2378 = vmatprep.mubr.f32.mxu0 %v3047_v59  ;;  %v2531_v27 = vpack.c.bf16 %v3170_v31, %v3153_v10  ;;  %v3645_v10 = vld [vmem:[#allocation19_spill] sm:$0xff] }
  0x84   : > { %2620 = vmatprep.subr.bf16.mxu0 %v2972_v30  ;;  %2211 = vmatmul.mubr.f32.gmra.mrb[2].mxu1 %v3064_v0  ;;  %v3648_v31 = vld [vmem:[#allocation11_spill] sm:$0xff] }
  0x85   : > { %2526 = vmatpush3.bf16.msra.mxu1 %v2523_v42  ;;  %2213 = vmatprep.mubr.f32.mxu1 %v3096_v16 }
  0x86   : > { %2379 = vmatmul.mubr.f32.gmra.mrb[2].mxu0 %v3064_v0  ;;  %2528 = vmatprep.subr.bf16.mxu1 %v2527_v52 }
  0x87   : > { %2622 = vmatpush3.bf16.msra.mxu0 %v2972_v30  ;;  %2381 = vmatprep.mubr.f32.mxu0 %v3096_v16  ;;  %v3643_v30 = vld [vmem:[#allocation5_spill] sm:$0xff] }
  0x88   : > { %2624 = vmatprep.subr.bf16.mxu0 %v2993_v35  ;;  %2214 = vmatmul.mubr.f32.gmra.mrb[4].mxu1 %v3099_v18 }
  0x89   : > { %2530 = vmatpush3.bf16.msra.mxu1 %v2527_v52  ;;  %2216 = vmatprep.mubr.f32.mxu1 %v3642_v53 }
  0x8a   : > { %2382 = vmatmul.mubr.f32.gmra.mrb[4].mxu0 %v3099_v18  ;;  %2532 = vmatprep.subr.bf16.mxu1 %v2531_v27 }
  0x8b   : > { %2626 = vmatpush3.bf16.msra.mxu0 %v2993_v35  ;;  %2384 = vmatprep.mubr.f32.mxu0 %v3642_v53  ;;  %v3646_v35 = vld [vmem:[#allocation7_spill] sm:$0xff] }
  0x8c   : > { %2628 = vmatprep.subr.bf16.mxu0 %v3643_v30  ;;  %2217 = vmatmul.mubr.f32.gmra.mrb[6].mxu1 %v3644_v2 }
  0x8d   : > { %2534 = vmatpush3.bf16.msra.mxu1 %v2531_v27  ;;  %2219 = vmatprep.mubr.f32.mxu1 %v3645_v10 }
  0x8e   : > { %2385 = vmatmul.mubr.f32.gmra.mrb[6].mxu0 %v3644_v2  ;;  %2536 = vmatprep.subr.bf16.mxu1 %v2535_v1 }
  0x8f   : > { %2630 = vmatpush3.bf16.msra.mxu0 %v3643_v30  ;;  %2387 = vmatprep.mubr.f32.mxu0 %v3645_v10 }
  0x90   : > { %2632 = vmatprep.subr.bf16.mxu0 %v3646_v35  ;;  %2220 = vmatmul.mubr.f32.gmra.mrb[8].mxu1 %v3230_v39 }
  0x91   : > { %2538 = vmatpush3.bf16.msra.mxu1 %v2535_v1  ;;  %2222 = vmatprep.mubr.f32.mxu1 %v3237_v13  ;;  %v375_v1 = vld [vmem:[#allocation2 + $0x48] sm:$0xff] }
  0x92   : > { %2388 = vmatmul.mubr.f32.gmra.mrb[8].mxu0 %v3230_v39  ;;  %2540 = vmatprep.subr.bf16.mxu1 %v2539_v22 }
  0x93   : > { %2634 = vmatpush3.bf16.msra.mxu0 %v3646_v35  ;;  %2390 = vmatprep.mubr.f32.mxu0 %v3237_v13 }
  0x94   : > { %2636 = vmatprep.subr.bf16.mxu0 %v3647_v23  ;;  %2223 = vmatmul.mubr.f32.gmra.mrb[10].mxu1 %v3272_v57 }
  0x95   : > { %2542 = vmatpush3.bf16.msra.mxu1 %v2539_v22  ;;  %2225 = vmatprep.mubr.f32.mxu1 %v3289_v7  ;;  %v374_v22 = vld [vmem:[#allocation2 + $0x40] sm:$0xff] }
  0x96   : > { %2391 = vmatmul.mubr.f32.gmra.mrb[10].mxu0 %v3272_v57  ;;  %2544 = vmatprep.subr.bf16.mxu1 %v2543_v28 }
  0x97   : > { %2638 = vmatpush3.bf16.msra.mxu0 %v3647_v23  ;;  %2393 = vmatprep.mubr.f32.mxu0 %v3289_v7 }
  0x98   : > { %2640 = vmatprep.subr.bf16.mxu0 %v3648_v31  ;;  %2226 = vmatmul.mubr.f32.gmra.mrb[12].mxu1 %v3649_v25 }
  0x99   : > { %2546 = vmatpush3.bf16.msra.mxu1 %v2543_v28  ;;  %2228 = vmatprep.mubr.f32.mxu1 %v3650_v3 }
  0x9a   : > { %2394 = vmatmul.mubr.f32.gmra.mrb[12].mxu0 %v3649_v25  ;;  %2548 = vmatprep.subr.bf16.mxu1 %v2547_v5 }
  0x9b   : > { %2642 = vmatpush3.bf16.msra.mxu0 %v3648_v31  ;;  %2396 = vmatprep.mubr.f32.mxu0 %v3650_v3 }
  0x9c   : > { %2644 = vmatprep.subr.bf16.mxu0 %v3651_v38  ;;  %2229 = vmatmul.mubr.f32.gmra.mrb[14].mxu1 %v3354_v62 }
  0x9d   : > { %2550 = vmatpush3.bf16.msra.mxu1 %v2547_v5  ;;  %2263 = vmatprep.mubr.f32.mxu1 %v3652_v11 }
  0x9e   : > { %2397 = vmatmul.mubr.f32.gmra.mrb[14].mxu0 %v3354_v62 }
  0x9f   : > { %2646 = vmatpush3.bf16.msra.mxu0 %v3651_v38  ;;  %2431 = vmatprep.mubr.f32.mxu0 %v2985_v34  ;;  %v3658_v34 = vld [vmem:[#allocation17_spill] sm:$0xff] }
  0xa0   : > { %2264 = vmatmul.mubr.f32.vlgmr.msra.gmra.mrb[0].mxu1 %v3653_v46 }
  0xa1   : > { %2266 = vmatprep.mubr.f32.mxu1 %v3654_v61  ;;  %v376_v61 = vld [vmem:[#allocation2 + $0x50] sm:$0xff] }
  0xa2   : > { %2432 = vmatmul.mubr.f32.vlgmr.msra.gmra.mrb[0].mxu0 %v3010_v43  ;;  %v3659_v43 = vld [vmem:[#allocation18_spill] sm:$0xff] }
  0xa3   : > { %2434 = vmatprep.mubr.f32.mxu0 %v3047_v59  ;;  %v3660_v59 = vld [vmem:[#allocation20_spill] sm:$0xff] }
  0xa4   : > { %2267 = vmatmul.mubr.f32.gmra.mrb[2].mxu1 %v3655_v15 }
  0xa5   : > { %2269 = vmatprep.mubr.f32.mxu1 %v3656_v60 }
  0xa6   : > { %2435 = vmatmul.mubr.f32.gmra.mrb[2].mxu0 %v3064_v0  ;;  %v3661_v0 = vld [vmem:[#allocation22_spill] sm:$0xff] }
  0xa7   : > { %2437 = vmatprep.mubr.f32.mxu0 %v3096_v16  ;;  %v3662_v16 = vld [vmem:[#allocation24_spill] sm:$0xff] }
  0xa8   : > { %2270 = vmatmul.mubr.f32.gmra.mrb[4].mxu1 %v3657_v55 }
  0xa9   : > { %2272 = vmatprep.mubr.f32.mxu1 %v3658_v34 }
  0xaa   : > { %2438 = vmatmul.mubr.f32.gmra.mrb[4].mxu0 %v3099_v18  ;;  %v367_v18 = vld [vmem:[#allocation2 + $0x8] sm:$0xff] }
  0xab   : > { %2440 = vmatprep.mubr.f32.mxu0 %v3642_v53 }
  0xac   : > { %2273 = vmatmul.mubr.f32.gmra.mrb[6].mxu1 %v3659_v43 }
  0xad   : > { %2275 = vmatprep.mubr.f32.mxu1 %v3228_v20 }
  0xae   : > { %2441 = vmatmul.mubr.f32.gmra.mrb[6].mxu0 %v3644_v2 }
  0xaf   : > { %2443 = vmatprep.mubr.f32.mxu0 %v3645_v10 }
  0xb0   : > { %2276 = vmatmul.mubr.f32.gmra.mrb[8].mxu1 %v3270_v9 }
  0xb1   : > { %2278 = vmatprep.mubr.f32.mxu1 %v3282_v48 }
  0xb2   : > { %2444 = vmatmul.mubr.f32.gmra.mrb[8].mxu0 %v3230_v39 }
  0xb3   : > { %2446 = vmatprep.mubr.f32.mxu0 %v3237_v13 }
  0xb4   : > { %2279 = vmatmul.mubr.f32.gmra.mrb[10].mxu1 %v3660_v59  ;;  %v379_v59 = vld [vmem:[#allocation2 + $0x68] sm:$0xff] }
  0xb5   : > { %2281 = vmatprep.mubr.f32.mxu1 %v3661_v0 }
  0xb6   : > { %2447 = vmatmul.mubr.f32.gmra.mrb[10].mxu0 %v3272_v57  ;;  %v366_v57 = vld [vmem:[#allocation2] sm:$0xff] }
  0xb7   : > { %2449 = vmatprep.mubr.f32.mxu0 %v3289_v7 }
  0xb8   : > { %2282 = vmatmul.mubr.f32.gmra.mrb[12].mxu1 %v3662_v16 }
  0xb9   : > { %2284 = vmatprep.mubr.f32.mxu1 %v3371_v44 }
  0xba   : > { %2450 = vmatmul.mubr.f32.gmra.mrb[12].mxu0 %v3649_v25 }
  0xbb   : > { %2452 = vmatprep.mubr.f32.mxu0 %v3650_v3  ;;  %v377_v3 = vld [vmem:[#allocation2 + $0x58] sm:$0xff] }
  0xbc   : > { %2285 = vmatmul.mubr.f32.gmra.mrb[14].mxu1 %v3381_v12 }
  0xbe   : > { %2453 = vmatmul.mubr.f32.gmra.mrb[14].mxu0 %v3354_v62 }
 0x173   : > { %v2265_v13 = vpop.f32.mrb[0].mxu1 }
 0x174   : > { %v996_v9 = vpop.f32.mrb[1].mxu1 }
 0x175   : > { %v2433_v20 = vpop.f32.mrb[0].mxu0 }
 0x176   : > { %v2647_v39 = vadd.f32 %v2433_v20, %v2265_v13  ;;  %v1606_v48 = vpop.f32.mrb[1].mxu0 }
 0x177   : > { %v2648_v7 = vadd.f32 %v1606_v48, %v996_v9  ;;  %v2268_v54 = vpop.f32.mrb[2].mxu1 }
 0x178   : > { %v1701_v47 = vadd.f32 %v2647_v39, %v367_v18  ;;  %v1010_v14 = vpop.f32.mrb[3].mxu1  ;;  %v378_v18 = vld [vmem:[#allocation2 + $0x60] sm:$0xff] }
 0x179   : > { %v1700_v51 = vadd.f32 %v2648_v7, %v366_v57  ;;  %v2436_v58 = vpop.f32.mrb[2].mxu0  ;;  %v381_v7 = vld [vmem:[#allocation2 + $0x78] sm:$0xff] }
 0x17a   : > { %1717 = vst [vmem:[#allocation2 + $0x8] sm:$0xff] %v1701_v47  ;;  %v2649_v44 = vadd.f32 %v2436_v58, %v2268_v54  ;;  %v1618_v12 = vpop.f32.mrb[3].mxu0 }
 0x17b   : > { %1716 = vst [vmem:[#allocation2] sm:$0xff] %v1700_v51  ;;  %v2650_v62 = vadd.f32 %v1618_v12, %v1010_v14  ;;  %v2271_v33 = vpop.f32.mrb[4].mxu1 }
 0x17c   : > { %v1703_v8 = vadd.f32 %v2649_v44, %v369_v36  ;;  %v1024_v19 = vpop.f32.mrb[5].mxu1  ;;  %v380_v36 = vld [vmem:[#allocation2 + $0x70] sm:$0xff] }
 0x17d   : > { %v1702_v63 = vadd.f32 %v2650_v62, %v368_v56  ;;  %v2439_v45 = vpop.f32.mrb[4].mxu0  ;;  %v1924_v62 = vld [vmem:[%s3542_s2] ss:$0 sm:$0xff] (!%p1923_p13) }
 0x17e   : > { %1719 = vst [vmem:[#allocation2 + $0x18] sm:$0xff] %v1703_v8  ;;  %v2651_v17 = vadd.f32 %v2439_v45, %v2271_v33  ;;  %v1630_v40 = vpop.f32.mrb[5].mxu0 }
 0x17f   : > { %1718 = vst [vmem:[#allocation2 + $0x10] sm:$0xff] %v1702_v63  ;;  %v2652_v6 = vadd.f32 %v1630_v40, %v1024_v19  ;;  %v2274_v4 = vpop.f32.mrb[6].mxu1 }
 0x180   : > { %v1705_v21 = vadd.f32 %v2651_v17, %v371_v37  ;;  %v1038_v50 = vpop.f32.mrb[7].mxu1 }
 0x181   : > { %v1704_v26 = vadd.f32 %v2652_v6, %v370_v24  ;;  %v2442_v29 = vpop.f32.mrb[6].mxu0  ;;  %v1737_v8 = vld [vmem:[#allocation2 + $0x8] sm:$0xff] (!%p1923_p13) }
 0x182   : > { %1721 = vst [vmem:[#allocation2 + $0x28] sm:$0xff] %v1705_v21  ;;  %v2653_v41 = vadd.f32 %v2442_v29, %v2274_v4  ;;  %v1642_v42 = vpop.f32.mrb[7].mxu0  ;;  %v1736_v12 = vld [vmem:[#allocation2] sm:$0xff] (!%p1923_p13)  ;;  %v1760_v33 = vadd.f32 (!%p1923_p13), %v1924_v62, %v1737_v8 }
 0x183   : > { %1720 = vst [vmem:[#allocation2 + $0x20] sm:$0xff] %v1704_v26  ;;  %v2654_v52 = vadd.f32 %v1642_v42, %v1038_v50  ;;  %v2277_v30 = vpop.f32.mrb[8].mxu1  ;;  %v1759_v63 = vadd.f32 (!%p1923_p13), %v1924_v62, %v1736_v12 }
 0x184   : > { %v1707_v27 = vadd.f32 %v2653_v41, %v373_v49  ;;  %v1052_v35 = vpop.f32.mrb[9].mxu1  ;;  %1776 = vst [vmem:[%s2953_s29 + $0x8] sm:$0xff] (!%p1923_p13), %v1760_v33 }
 0x185   : > { %v1706_v53 = vadd.f32 %v2654_v52, %v372_v32  ;;  %v2445_v2 = vpop.f32.mrb[8].mxu0  ;;  %v1739_v45 = vld [vmem:[#allocation2 + $0x18] sm:$0xff] (!%p1923_p13)  ;;  %1775 = vst [vmem:[%s2953_s29] sm:$0xff] (!%p1923_p13), %v1759_v63 }
 0x186   : > { %1723 = vst [vmem:[#allocation2 + $0x38] sm:$0xff] %v1707_v27  ;;  %v2655_v10 = vadd.f32 %v2445_v2, %v2277_v30  ;;  %v1654_v23 = vpop.f32.mrb[9].mxu0  ;;  %v1738_v37 = vld [vmem:[#allocation2 + $0x10] sm:$0xff] (!%p1923_p13)  ;;  %v1762_v24 = vadd.f32 (!%p1923_p13), %v1924_v62, %v1739_v45 }
 0x187   : > { %1722 = vst [vmem:[#allocation2 + $0x30] sm:$0xff] %v1706_v53  ;;  %v2656_v28 = vadd.f32 %v1654_v23, %v1052_v35  ;;  %v2280_v25 = vpop.f32.mrb[10].mxu1  ;;  %v1761_v19 = vadd.f32 (!%p1923_p13), %v1924_v62, %v1738_v37 }
 0x188   : > { %v1709_v31 = vadd.f32 %v2655_v10, %v375_v1  ;;  %v1066_v46 = vpop.f32.mrb[11].mxu1  ;;  %1778 = vst [vmem:[%s2953_s29 + $0x18] sm:$0xff] (!%p1923_p13), %v1762_v24 }
 0x189   : > { %v1708_v5 = vadd.f32 %v2656_v28, %v374_v22  ;;  %v2448_v38 = vpop.f32.mrb[10].mxu0  ;;  %v1741_v6 = vld [vmem:[#allocation2 + $0x28] sm:$0xff] (!%p1923_p13)  ;;  %1777 = vst [vmem:[%s2953_s29 + $0x10] sm:$0xff] (!%p1923_p13), %v1761_v19 }
 0x18a   : > { %1725 = vst [vmem:[#allocation2 + $0x48] sm:$0xff] %v1709_v31  ;;  %v2657_v11 = vadd.f32 %v2448_v38, %v2280_v25  ;;  %v1666_v15 = vpop.f32.mrb[11].mxu0  ;;  %v1740_v17 = vld [vmem:[#allocation2 + $0x20] sm:$0xff] (!%p1923_p13)  ;;  %v1764_v4 = vadd.f32 (!%p1923_p13), %v1924_v62, %v1741_v6 }
 0x18b   : > { %1724 = vst [vmem:[#allocation2 + $0x40] sm:$0xff] %v1708_v5  ;;  %v2658_v60 = vadd.f32 %v1666_v15, %v1066_v46  ;;  %v2283_v43 = vpop.f32.mrb[12].mxu1  ;;  %v1763_v40 = vadd.f32 (!%p1923_p13), %v1924_v62, %v1740_v17 }
 0x18c   : > { %v1711_v55 = vadd.f32 %v2657_v11, %v377_v3  ;;  %v1080_v13 = vpop.f32.mrb[13].mxu1  ;;  %1780 = vst [vmem:[%s2953_s29 + $0x28] sm:$0xff] (!%p1923_p13), %v1764_v4 }
 0x18d   : > { %v1710_v34 = vadd.f32 %v2658_v60, %v376_v61  ;;  %v2451_v0 = vpop.f32.mrb[12].mxu0  ;;  %v1743_v26 = vld [vmem:[#allocation2 + $0x38] sm:$0xff] (!%p1923_p13)  ;;  %1779 = vst [vmem:[%s2953_s29 + $0x20] sm:$0xff] (!%p1923_p13), %v1763_v40 }
 0x18e   : > { %1727 = vst [vmem:[#allocation2 + $0x58] sm:$0xff] %v1711_v55  ;;  %v2659_v16 = vadd.f32 %v2451_v0, %v2283_v43  ;;  %v1678_v20 = vpop.f32.mrb[13].mxu0  ;;  %v1742_v21 = vld [vmem:[#allocation2 + $0x30] sm:$0xff] (!%p1923_p13)  ;;  %v1766_v29 = vadd.f32 (!%p1923_p13), %v1924_v62, %v1743_v26 }
 0x18f   : > { %1726 = vst [vmem:[#allocation2 + $0x50] sm:$0xff] %v1710_v34  ;;  %v2660_v39 = vadd.f32 %v1678_v20, %v1080_v13  ;;  %v2286_v48 = vpop.f32.mrb[14].mxu1  ;;  %v1765_v49 = vadd.f32 (!%p1923_p13), %v1924_v62, %v1742_v21 }
 0x190   : > { %v1713_v9 = vadd.f32 %v2659_v16, %v379_v59  ;;  %v1094_v54 = vpop.f32.mrb[15].mxu1  ;;  %1782 = vst [vmem:[%s2953_s29 + $0x38] sm:$0xff] (!%p1923_p13), %v1766_v29 }
 0x191   : > { %v1712_v57 = vadd.f32 %v2660_v39, %v378_v18  ;;  %v2454_v47 = vpop.f32.mrb[14].mxu0  ;;  %1735 = sbr.rel (%p1923_p13) target bundleno = 418 (0x1a2), region = 78  ;;  %v1745_v50 = vld [vmem:[#allocation2 + $0x48] sm:$0xff] (!%p1923_p13)  ;;  %1781 = vst [vmem:[%s2953_s29 + $0x30] sm:$0xff] (!%p1923_p13), %v1765_v49 }
 0x192   : > { %1729 = vst [vmem:[#allocation2 + $0x68] sm:$0xff] %v1713_v9  ;;  %v2661_v51 = vadd.f32 %v2454_v47, %v2286_v48  ;;  %v1690_v58 = vpop.f32.mrb[15].mxu0  ;;  %v1744_v41 = vld [vmem:[#allocation2 + $0x40] sm:$0xff] (!%p1923_p13)  ;;  %v1768_v52 = vadd.f32 (!%p1923_p13), %v1924_v62, %v1745_v50 }
 0x193   : > { %1728 = vst [vmem:[#allocation2 + $0x60] sm:$0xff] %v1712_v57  ;;  %v2662_v44 = vadd.f32 %v1690_v58, %v1094_v54  ;;  %v1767_v42 = vadd.f32 (!%p1923_p13), %v1924_v62, %v1744_v41 }
 0x194   : > { %v1715_v14 = vadd.f32 %v2661_v51, %v381_v7  ;;  %1784 = vst [vmem:[%s2953_s29 + $0x48] sm:$0xff] (!%p1923_p13), %v1768_v52 }
 0x195   : > { %v1714_v56 = vadd.f32 %v2662_v44, %v380_v36  ;;  %v1747_v53 = vld [vmem:[#allocation2 + $0x58] sm:$0xff] (!%p1923_p13)  ;;  %1783 = vst [vmem:[%s2953_s29 + $0x40] sm:$0xff] (!%p1923_p13), %v1767_v42 }
 0x196   : > { %1731 = vst [vmem:[#allocation2 + $0x78] sm:$0xff] %v1715_v14  ;;  %v1746_v32 = vld [vmem:[#allocation2 + $0x50] sm:$0xff] (!%p1923_p13)  ;;  %v1770_v2 = vadd.f32 (!%p1923_p13), %v1924_v62, %v1747_v53 }
 0x197   : > { %1730 = vst [vmem:[#allocation2 + $0x70] sm:$0xff] %v1714_v56  ;;  %v1769_v27 = vadd.f32 (!%p1923_p13), %v1924_v62, %v1746_v32 }
 0x198   : > { %1786 = vst [vmem:[%s2953_s29 + $0x58] sm:$0xff] %v1770_v2 }
 0x199   : > { %v1749_v1 = vld [vmem:[#allocation2 + $0x68] sm:$0xff]  ;;  %1785 = vst [vmem:[%s2953_s29 + $0x50] sm:$0xff] %v1769_v27 }
 0x19a   : > { %v1748_v30 = vld [vmem:[#allocation2 + $0x60] sm:$0xff]  ;;  %v1772_v35 = vadd.f32 %v1924_v62, %v1749_v1 }
 0x19b   : > { %v1771_v10 = vadd.f32 %v1924_v62, %v1748_v30 }
 0x19c   : > { %1788 = vst [vmem:[%s2953_s29 + $0x68] sm:$0xff] %v1772_v35 }
 0x19d   : > { %v1751_v23 = vld [vmem:[#allocation2 + $0x78] sm:$0xff]  ;;  %1787 = vst [vmem:[%s2953_s29 + $0x60] sm:$0xff] %v1771_v10 }
 0x19e   : > { %v1750_v22 = vld [vmem:[#allocation2 + $0x70] sm:$0xff]  ;;  %v1774_v31 = vadd.f32 %v1924_v62, %v1751_v23 }
 0x19f   : > { %v1773_v28 = vadd.f32 %v1924_v62, %v1750_v22 }
 0x1a0   : > { %1790 = vst [vmem:[%s2953_s29 + $0x78] sm:$0xff] %v1774_v31 }
 0x1a1   : > { %1789 = vst [vmem:[%s2953_s29 + $0x70] sm:$0xff] %v1773_v28 }
 0x1a2 PF: > { %s13_s18 = sadd.s32 1, %s2839_s18   ;;  %s3663_s12 = smov %s2819_s13 }
 0x1a3   : > { %p10_p0 = scmp.ge.s32.totalorder %s13_s18, 22   ;;  %s3664_s13 = smov %s2913_s25 }
 0x1a4   : > { %s3665_s14 = smov %s2831_s16  ;;  %s3666_s15 = smov %s2835_s17 }
 0x1a5   : > { %s3667_s16 = smov %s3670_s19  ;;  %s3668_s17 = smov %s3674_s20 }
 0x1a6   :  { %12 = sbr.rel (!%p10_p0) target bundleno = 4 (0x4), region = 119 }

// kernel: stage_block_forward.18
= control target key start
LH: loop header
LB: loop body
LE: loop exit
PB: predicated region body
PF: predicated region fallthrough
CT: control target
= control target key end

     0   :  { %s1492_s0 = inlined_call_operand.vmem [shape: f32[512,128], index: 0, kind: input, shape index: {}]   ;;  %s1493_s1 = inlined_call_operand.vmem [shape: f32[1,128], index: 1, kind: input, shape index: {}]   ;;  %s1494_s2 = inlined_call_operand.vmem [shape: f32[1,128], index: 2, kind: input, shape index: {}]   ;;  %s1495_s3 = inlined_call_operand.vmem [shape: f32[512,128], index: 3, kind: output, shape index: {}]  }
   0x1   :  { %v589_v0 = vld [vmem:[%s1492_s0] sm:$0xff]  ;;  %v594_v1 = vld [vmem:[%s1492_s0 + $0x8] sm:$0xff]  ;;  %v599_v2 = vld [vmem:[%s1492_s0 + $0x10] sm:$0xff] }
   0x2   :  { %v604_v3 = vld [vmem:[%s1492_s0 + $0x18] sm:$0xff]  ;;  %v78_v4 = vadd.f32 %v594_v1, %v589_v0  ;;  %v147_v5 = vmul.f32 %v589_v0, %v589_v0  ;;  %v148_v6 = vmul.f32 %v594_v1, %v594_v1  ;;  %v149_v7 = vmul.f32 %v599_v2, %v599_v2  ;;  %v617_v8 = vld [vmem:[%s1492_s0 + $0x20] sm:$0xff]  ;;  %v625_v12 = vld [vmem:[%s1492_s0 + $0x28] sm:$0xff] }
   0x3   :  { %v150_v10 = vmul.f32 %v604_v3, %v604_v3  ;;  %v151_v14 = vmul.f32 %v617_v8, %v617_v8  ;;  %v633_v16 = vld [vmem:[%s1492_s0 + $0x30] sm:$0xff]  ;;  %v152_v18 = vmul.f32 %v625_v12, %v625_v12  ;;  %v641_v20 = vld [vmem:[%s1492_s0 + $0x38] sm:$0xff]  ;;  %v649_v24 = vld [vmem:[%s1492_s0 + $0x40] sm:$0xff] }
   0x4   :  { %v79_v9 = vadd.f32 %v78_v4, %v599_v2  ;;  %v211_v11 = vadd.f32 %v148_v6, %v147_v5  ;;  %v153_v22 = vmul.f32 %v633_v16, %v633_v16  ;;  %v154_v26 = vmul.f32 %v641_v20, %v641_v20  ;;  %v657_v28 = vld [vmem:[%s1492_s0 + $0x48] sm:$0xff]  ;;  %v665_v32 = vld [vmem:[%s1492_s0 + $0x50] sm:$0xff]  ;;  %v673_v36 = vld [vmem:[%s1492_s0 + $0x58] sm:$0xff] }
   0x5   :  { %v155_v30 = vmul.f32 %v649_v24, %v649_v24  ;;  %v156_v34 = vmul.f32 %v657_v28, %v657_v28  ;;  %v157_v38 = vmul.f32 %v665_v32, %v665_v32  ;;  %v681_v40 = vld [vmem:[%s1492_s0 + $0x60] sm:$0xff]  ;;  %v158_v42 = vmul.f32 %v673_v36, %v673_v36  ;;  %v689_v44 = vld [vmem:[%s1492_s0 + $0x68] sm:$0xff]  ;;  %v697_v48 = vld [vmem:[%s1492_s0 + $0x70] sm:$0xff] }
   0x6   :  { %v80_v13 = vadd.f32 %v79_v9, %v604_v3  ;;  %v212_v15 = vadd.f32 %v211_v11, %v149_v7  ;;  %v159_v46 = vmul.f32 %v681_v40, %v681_v40  ;;  %v160_v50 = vmul.f32 %v689_v44, %v689_v44  ;;  %v705_v52 = vld [vmem:[%s1492_s0 + $0x78] sm:$0xff]  ;;  %v713_v56 = vld [vmem:[%s1492_s0 + $0x80] sm:$0xff]  ;;  %v721_v60 = vld [vmem:[%s1492_s0 + $0x88] sm:$0xff] }
   0x7   :  { %v161_v54 = vmul.f32 %v697_v48, %v697_v48  ;;  %v162_v58 = vmul.f32 %v705_v52, %v705_v52  ;;  %v163_v62 = vmul.f32 %v713_v56, %v713_v56  ;;  %v729_v4 = vld [vmem:[%s1492_s0 + $0x90] sm:$0xff]  ;;  %v164_v6 = vmul.f32 %v721_v60, %v721_v60  ;;  %v737_v9 = vld [vmem:[%s1492_s0 + $0x98] sm:$0xff] }
   0x8   :  { %v81_v17 = vadd.f32 %v80_v13, %v617_v8  ;;  %v213_v19 = vadd.f32 %v212_v15, %v150_v10  ;;  %v165_v11 = vmul.f32 %v729_v4, %v729_v4 }
   0xa   :  { %v82_v21 = vadd.f32 %v81_v17, %v625_v12  ;;  %v214_v23 = vadd.f32 %v213_v19, %v151_v14  ;;  %v745_v14 = vld [vmem:[%s1492_s0 + $0xa0] sm:$0xff]  ;;  %v166_v17 = vmul.f32 %v737_v9, %v737_v9  ;;  %v753_v19 = vld [vmem:[%s1492_s0 + $0xa8] sm:$0xff] }
   0xc   :  { %v83_v25 = vadd.f32 %v82_v21, %v633_v16  ;;  %v215_v27 = vadd.f32 %v214_v23, %v152_v18 }
   0xe   :  { %v84_v29 = vadd.f32 %v83_v25, %v641_v20  ;;  %v216_v31 = vadd.f32 %v215_v27, %v153_v22  ;;  %v167_v22 = vmul.f32 %v745_v14, %v745_v14  ;;  %v761_v25 = vld [vmem:[%s1492_s0 + $0xb0] sm:$0xff]  ;;  %v168_v27 = vmul.f32 %v753_v19, %v753_v19 }
  0x10   :  { %v85_v33 = vadd.f32 %v84_v29, %v649_v24  ;;  %v217_v35 = vadd.f32 %v216_v31, %v154_v26 }
  0x12   :  { %v86_v37 = vadd.f32 %v85_v33, %v657_v28  ;;  %v218_v39 = vadd.f32 %v217_v35, %v155_v30  ;;  %v769_v30 = vld [vmem:[%s1492_s0 + $0xb8] sm:$0xff]  ;;  %v169_v33 = vmul.f32 %v761_v25, %v761_v25  ;;  %v777_v35 = vld [vmem:[%s1492_s0 + $0xc0] sm:$0xff] }
  0x14   :  { %v87_v41 = vadd.f32 %v86_v37, %v665_v32  ;;  %v219_v43 = vadd.f32 %v218_v39, %v156_v34 }
  0x16   :  { %v88_v45 = vadd.f32 %v87_v41, %v673_v36  ;;  %v220_v47 = vadd.f32 %v219_v43, %v157_v38  ;;  %v170_v38 = vmul.f32 %v769_v30, %v769_v30  ;;  %v785_v41 = vld [vmem:[%s1492_s0 + $0xc8] sm:$0xff]  ;;  %v171_v43 = vmul.f32 %v777_v35, %v777_v35 }
  0x18   :  { %v89_v49 = vadd.f32 %v88_v45, %v681_v40  ;;  %v221_v51 = vadd.f32 %v220_v47, %v158_v42 }
  0x1a   :  { %v90_v53 = vadd.f32 %v89_v49, %v689_v44  ;;  %v222_v55 = vadd.f32 %v221_v51, %v159_v46  ;;  %v793_v46 = vld [vmem:[%s1492_s0 + $0xd0] sm:$0xff]  ;;  %v172_v49 = vmul.f32 %v785_v41, %v785_v41  ;;  %v801_v51 = vld [vmem:[%s1492_s0 + $0xd8] sm:$0xff] }
  0x1c   :  { %v91_v57 = vadd.f32 %v90_v53, %v697_v48  ;;  %v223_v59 = vadd.f32 %v222_v55, %v160_v50 }
  0x1e   :  { %v92_v61 = vadd.f32 %v91_v57, %v705_v52  ;;  %v224_v63 = vadd.f32 %v223_v59, %v161_v54  ;;  %v173_v54 = vmul.f32 %v793_v46, %v793_v46  ;;  %v809_v57 = vld [vmem:[%s1492_s0 + $0xe0] sm:$0xff]  ;;  %v174_v59 = vmul.f32 %v801_v51, %v801_v51 }
  0x20   :  { %v93_v5 = vadd.f32 %v92_v61, %v713_v56  ;;  %v225_v7 = vadd.f32 %v224_v63, %v162_v58 }
  0x22   :  { %v94_v10 = vadd.f32 %v93_v5, %v721_v60  ;;  %v226_v13 = vadd.f32 %v225_v7, %v163_v62  ;;  %v817_v62 = vld [vmem:[%s1492_s0 + $0xe8] sm:$0xff]  ;;  %v175_v5 = vmul.f32 %v809_v57, %v809_v57  ;;  %v825_v7 = vld [vmem:[%s1492_s0 + $0xf0] sm:$0xff] }
  0x24   :  { %v95_v15 = vadd.f32 %v94_v10, %v729_v4  ;;  %v227_v18 = vadd.f32 %v226_v13, %v164_v6 }
  0x26   :  { %v96_v21 = vadd.f32 %v95_v15, %v737_v9  ;;  %v228_v23 = vadd.f32 %v227_v18, %v165_v11  ;;  %v176_v11 = vmul.f32 %v817_v62, %v817_v62  ;;  %v833_v15 = vld [vmem:[%s1492_s0 + $0xf8] sm:$0xff]  ;;  %v177_v18 = vmul.f32 %v825_v7, %v825_v7 }
  0x28   :  { %v97_v26 = vadd.f32 %v96_v21, %v745_v14  ;;  %v229_v29 = vadd.f32 %v228_v23, %v166_v17 }
  0x2a   :  { %v98_v31 = vadd.f32 %v97_v26, %v753_v19  ;;  %v230_v34 = vadd.f32 %v229_v29, %v167_v22  ;;  %v841_v22 = vld [vmem:[%s1492_s0 + $0x100] sm:$0xff]  ;;  %v178_v26 = vmul.f32 %v833_v15, %v833_v15  ;;  %v849_v29 = vld [vmem:[%s1492_s0 + $0x108] sm:$0xff] }
  0x2c   :  { %v99_v37 = vadd.f32 %v98_v31, %v761_v25  ;;  %v231_v39 = vadd.f32 %v230_v34, %v168_v27 }
  0x2e   :  { %v100_v42 = vadd.f32 %v99_v37, %v769_v30  ;;  %v232_v45 = vadd.f32 %v231_v39, %v169_v33  ;;  %v179_v33 = vmul.f32 %v841_v22, %v841_v22  ;;  %v857_v37 = vld [vmem:[%s1492_s0 + $0x110] sm:$0xff]  ;;  %v180_v39 = vmul.f32 %v849_v29, %v849_v29 }
  0x30   :  { %v101_v47 = vadd.f32 %v100_v42, %v777_v35  ;;  %v233_v50 = vadd.f32 %v232_v45, %v170_v38 }
  0x32   :  { %v102_v53 = vadd.f32 %v101_v47, %v785_v41  ;;  %v234_v55 = vadd.f32 %v233_v50, %v171_v43  ;;  %v865_v43 = vld [vmem:[%s1492_s0 + $0x118] sm:$0xff]  ;;  %v181_v47 = vmul.f32 %v857_v37, %v857_v37  ;;  %v873_v50 = vld [vmem:[%s1492_s0 + $0x120] sm:$0xff] }
  0x34   :  { %v103_v58 = vadd.f32 %v102_v53, %v793_v46  ;;  %v235_v61 = vadd.f32 %v234_v55, %v172_v49 }
  0x36   :  { %v104_v63 = vadd.f32 %v103_v58, %v801_v51  ;;  %v236_v6 = vadd.f32 %v235_v61, %v173_v54  ;;  %v182_v54 = vmul.f32 %v865_v43, %v865_v43  ;;  %v881_v58 = vld [vmem:[%s1492_s0 + $0x128] sm:$0xff]  ;;  %v183_v61 = vmul.f32 %v873_v50, %v873_v50 }
  0x38   :  { %v105_v10 = vadd.f32 %v104_v63, %v809_v57  ;;  %v237_v13 = vadd.f32 %v236_v6, %v174_v59 }
  0x3a   :  { %v106_v17 = vadd.f32 %v105_v10, %v817_v62  ;;  %v238_v21 = vadd.f32 %v237_v13, %v175_v5  ;;  %v889_v5 = vld [vmem:[%s1492_s0 + $0x130] sm:$0xff]  ;;  %v184_v10 = vmul.f32 %v881_v58, %v881_v58  ;;  %v897_v13 = vld [vmem:[%s1492_s0 + $0x138] sm:$0xff] }
  0x3b   :  { %1520 = vst [vmem:[#allocation2_spill] sm:$0xff] %v897_v13 }
  0x3c   :  { %v107_v23 = vadd.f32 %v106_v17, %v825_v7  ;;  %v239_v27 = vadd.f32 %v238_v21, %v176_v11 }
  0x3e   :  { %v108_v31 = vadd.f32 %v107_v23, %v833_v15  ;;  %v240_v34 = vadd.f32 %v239_v27, %v177_v18  ;;  %v185_v18 = vmul.f32 %v889_v5, %v889_v5  ;;  %v905_v23 = vld [vmem:[%s1492_s0 + $0x140] sm:$0xff]  ;;  %v186_v27 = vmul.f32 %v897_v13, %v897_v13 }
  0x3f   :  { %1521 = vst [vmem:[#allocation3_spill] sm:$0xff] %v905_v23 }
  0x40   :  { %v109_v38 = vadd.f32 %v108_v31, %v841_v22  ;;  %v241_v42 = vadd.f32 %v240_v34, %v178_v26 }
  0x42   :  { %v110_v45 = vadd.f32 %v109_v38, %v849_v29  ;;  %v242_v49 = vadd.f32 %v241_v42, %v179_v33  ;;  %v913_v33 = vld [vmem:[%s1492_s0 + $0x148] sm:$0xff]  ;;  %v187_v38 = vmul.f32 %v905_v23, %v905_v23  ;;  %v921_v42 = vld [vmem:[%s1492_s0 + $0x150] sm:$0xff] }
  0x43   :  { %1522 = vst [vmem:[#allocation4_spill] sm:$0xff] %v913_v33  ;;  %1523 = vst [vmem:[#allocation5_spill] sm:$0xff] %v921_v42 }
  0x44   :  { %v111_v53 = vadd.f32 %v110_v45, %v857_v37  ;;  %v243_v55 = vadd.f32 %v242_v49, %v180_v39 }
  0x46   :  { %v112_v59 = vadd.f32 %v111_v53, %v865_v43  ;;  %v244_v63 = vadd.f32 %v243_v55, %v181_v47  ;;  %v188_v47 = vmul.f32 %v913_v33, %v913_v33  ;;  %v929_v53 = vld [vmem:[%s1492_s0 + $0x158] sm:$0xff]  ;;  %v189_v55 = vmul.f32 %v921_v42, %v921_v42 }
  0x47   :  { %1524 = vst [vmem:[#allocation6_spill] sm:$0xff] %v929_v53 }
  0x48   :  { %v113_v6 = vadd.f32 %v112_v59, %v873_v50  ;;  %v245_v11 = vadd.f32 %v244_v63, %v182_v54 }
  0x4a   :  { %v114_v17 = vadd.f32 %v113_v6, %v881_v58  ;;  %v246_v21 = vadd.f32 %v245_v11, %v183_v61  ;;  %v937_v61 = vld [vmem:[%s1492_s0 + $0x160] sm:$0xff]  ;;  %v190_v6 = vmul.f32 %v929_v53, %v929_v53  ;;  %v945_v11 = vld [vmem:[%s1492_s0 + $0x168] sm:$0xff] }
  0x4b   :  { %1525 = vst [vmem:[#allocation7_spill] sm:$0xff] %v937_v61  ;;  %1526 = vst [vmem:[#allocation8_spill] sm:$0xff] %v945_v11 }
  0x4c   :  { %v115_v26 = vadd.f32 %v114_v17, %v889_v5  ;;  %v247_v31 = vadd.f32 %v246_v21, %v184_v10 }
  0x4e   :  { %v116_v34 = vadd.f32 %v115_v26, %v897_v13  ;;  %v248_v39 = vadd.f32 %v247_v31, %v185_v18  ;;  %v191_v18 = vmul.f32 %v937_v61, %v937_v61  ;;  %v953_v26 = vld [vmem:[%s1492_s0 + $0x170] sm:$0xff]  ;;  %v192_v31 = vmul.f32 %v945_v11, %v945_v11 }
  0x4f   :  { %1527 = vst [vmem:[#allocation9_spill] sm:$0xff] %v953_v26 }
  0x50   :  { %v117_v45 = vadd.f32 %v116_v34, %v905_v23  ;;  %v249_v49 = vadd.f32 %v248_v39, %v186_v27 }
  0x52   :  { %v118_v54 = vadd.f32 %v117_v45, %v913_v33  ;;  %v250_v59 = vadd.f32 %v249_v49, %v187_v38  ;;  %v961_v38 = vld [vmem:[%s1492_s0 + $0x178] sm:$0xff]  ;;  %v193_v45 = vmul.f32 %v953_v26, %v953_v26  ;;  %v969_v49 = vld [vmem:[%s1492_s0 + $0x180] sm:$0xff] }
  0x53   :  { %1528 = vst [vmem:[#allocation10_spill] sm:$0xff] %v961_v38  ;;  %1529 = vst [vmem:[#allocation11_spill] sm:$0xff] %v969_v49 }
  0x54   :  { %v119_v63 = vadd.f32 %v118_v54, %v921_v42  ;;  %v251_v10 = vadd.f32 %v250_v59, %v188_v47 }
  0x56   :  { %v120_v17 = vadd.f32 %v119_v63, %v929_v53  ;;  %v252_v21 = vadd.f32 %v251_v10, %v189_v55  ;;  %v194_v55 = vmul.f32 %v961_v38, %v961_v38  ;;  %v977_v63 = vld [vmem:[%s1492_s0 + $0x188] sm:$0xff]  ;;  %v195_v10 = vmul.f32 %v969_v49, %v969_v49 }
  0x57   :  { %1530 = vst [vmem:[#allocation12_spill] sm:$0xff] %v977_v63 }
  0x58   :  { %v121_v27 = vadd.f32 %v120_v17, %v937_v61  ;;  %v253_v34 = vadd.f32 %v252_v21, %v190_v6 }
  0x5a   :  { %v122_v39 = vadd.f32 %v121_v27, %v945_v11  ;;  %v254_v47 = vadd.f32 %v253_v34, %v191_v18  ;;  %v985_v18 = vld [vmem:[%s1492_s0 + $0x190] sm:$0xff]  ;;  %v196_v27 = vmul.f32 %v977_v63, %v977_v63  ;;  %v993_v34 = vld [vmem:[%s1492_s0 + $0x198] sm:$0xff] }
  0x5b   :  { %1531 = vst [vmem:[#allocation13_spill] sm:$0xff] %v985_v18  ;;  %1532 = vst [vmem:[#allocation14_spill] sm:$0xff] %v993_v34 }
  0x5c   :  { %v123_v54 = vadd.f32 %v122_v39, %v953_v26  ;;  %v255_v59 = vadd.f32 %v254_v47, %v192_v31 }
  0x5e   :  { %v124_v6 = vadd.f32 %v123_v54, %v961_v38  ;;  %v256_v17 = vadd.f32 %v255_v59, %v193_v45  ;;  %v197_v45 = vmul.f32 %v985_v18, %v985_v18  ;;  %v1001_v54 = vld [vmem:[%s1492_s0 + $0x1a0] sm:$0xff] }
  0x5f   :  { %1533 = vst [vmem:[#allocation15_spill] sm:$0xff] %v1001_v54 }
  0x60   :  { %v125_v21 = vadd.f32 %v124_v6, %v969_v49  ;;  %v257_v31 = vadd.f32 %v256_v17, %v194_v55  ;;  %v198_v55 = vmul.f32 %v993_v34, %v993_v34  ;;  %v1009_v17 = vld [vmem:[%s1492_s0 + $0x1a8] sm:$0xff] }
  0x61   :  { %1534 = vst [vmem:[#allocation16_spill] sm:$0xff] %v1009_v17 }
  0x62   :  { %v126_v39 = vadd.f32 %v125_v21, %v977_v63  ;;  %v258_v47 = vadd.f32 %v257_v31, %v195_v10  ;;  %v199_v10 = vmul.f32 %v1001_v54, %v1001_v54  ;;  %v1017_v63 = vld [vmem:[%s1492_s0 + $0x1b0] sm:$0xff] }
  0x63   :  { %1535 = vst [vmem:[#allocation17_spill] sm:$0xff] %v1017_v63 }
  0x64   :  { %v127_v59 = vadd.f32 %v126_v39, %v985_v18  ;;  %v259_v6 = vadd.f32 %v258_v47, %v196_v27  ;;  %v200_v27 = vmul.f32 %v1009_v17, %v1009_v17  ;;  %v1025_v18 = vld [vmem:[%s1492_s0 + $0x1b8] sm:$0xff] }
  0x65   :  { %1536 = vst [vmem:[#allocation18_spill] sm:$0xff] %v1025_v18 }
  0x66   :  { %v128_v21 = vadd.f32 %v127_v59, %v993_v34  ;;  %v260_v31 = vadd.f32 %v259_v6, %v197_v45  ;;  %v201_v45 = vmul.f32 %v1017_v63, %v1017_v63  ;;  %v1033_v34 = vld [vmem:[%s1492_s0 + $0x1c0] sm:$0xff] }
  0x67   :  { %1537 = vst [vmem:[#allocation19_spill] sm:$0xff] %v1033_v34 }
  0x68   :  { %v129_v39 = vadd.f32 %v128_v21, %v1001_v54  ;;  %v261_v47 = vadd.f32 %v260_v31, %v198_v55  ;;  %v202_v55 = vmul.f32 %v1025_v18, %v1025_v18  ;;  %v1041_v54 = vld [vmem:[%s1492_s0 + $0x1c8] sm:$0xff] }
  0x69   :  { %1538 = vst [vmem:[#allocation20_spill] sm:$0xff] %v1041_v54 }
  0x6a   :  { %v130_v59 = vadd.f32 %v129_v39, %v1009_v17  ;;  %v262_v6 = vadd.f32 %v261_v47, %v199_v10  ;;  %v203_v10 = vmul.f32 %v1033_v34, %v1033_v34  ;;  %v1049_v17 = vld [vmem:[%s1492_s0 + $0x1d0] sm:$0xff] }
  0x6b   :  { %1539 = vst [vmem:[#allocation21_spill] sm:$0xff] %v1049_v17 }
  0x6c   :  { %v131_v21 = vadd.f32 %v130_v59, %v1017_v63  ;;  %v263_v31 = vadd.f32 %v262_v6, %v200_v27  ;;  %v204_v27 = vmul.f32 %v1041_v54, %v1041_v54  ;;  %v1057_v63 = vld [vmem:[%s1492_s0 + $0x1d8] sm:$0xff] }
  0x6d   :  { %1540 = vst [vmem:[#allocation22_spill] sm:$0xff] %v1057_v63 }
  0x6e   :  { %v132_v39 = vadd.f32 %v131_v21, %v1025_v18  ;;  %v264_v47 = vadd.f32 %v263_v31, %v201_v45  ;;  %v205_v45 = vmul.f32 %v1049_v17, %v1049_v17  ;;  %v1065_v18 = vld [vmem:[%s1492_s0 + $0x1e0] sm:$0xff] }
  0x6f   :  { %1541 = vst [vmem:[#allocation23_spill] sm:$0xff] %v1065_v18 }
  0x70   :  { %v133_v59 = vadd.f32 %v132_v39, %v1033_v34  ;;  %v265_v6 = vadd.f32 %v264_v47, %v202_v55  ;;  %v206_v55 = vmul.f32 %v1057_v63, %v1057_v63  ;;  %v1073_v34 = vld [vmem:[%s1492_s0 + $0x1e8] sm:$0xff] }
  0x71   :  { %1542 = vst [vmem:[#allocation24_spill] sm:$0xff] %v1073_v34 }
  0x72   :  { %v134_v21 = vadd.f32 %v133_v59, %v1041_v54  ;;  %v266_v31 = vadd.f32 %v265_v6, %v203_v10  ;;  %v207_v10 = vmul.f32 %v1065_v18, %v1065_v18  ;;  %v1081_v54 = vld [vmem:[%s1492_s0 + $0x1f0] sm:$0xff] }
  0x73   :  { %1543 = vst [vmem:[#allocation25_spill] sm:$0xff] %v1081_v54 }
  0x74   :  { %v135_v39 = vadd.f32 %v134_v21, %v1049_v17  ;;  %v267_v47 = vadd.f32 %v266_v31, %v204_v27  ;;  %v208_v27 = vmul.f32 %v1073_v34, %v1073_v34  ;;  %v1089_v17 = vld [vmem:[%s1492_s0 + $0x1f8] sm:$0xff] }
  0x76   :  { %v136_v59 = vadd.f32 %v135_v39, %v1057_v63  ;;  %v268_v6 = vadd.f32 %v267_v47, %v205_v45  ;;  %v209_v45 = vmul.f32 %v1081_v54, %v1081_v54 }
  0x78   :  { %v137_v21 = vadd.f32 %v136_v59, %v1065_v18  ;;  %v269_v31 = vadd.f32 %v268_v6, %v206_v55  ;;  %v210_v59 = vmul.f32 %v1089_v17, %v1089_v17 }
  0x7a   :  { %v138_v39 = vadd.f32 %v137_v21, %v1073_v34  ;;  %v270_v47 = vadd.f32 %v269_v31, %v207_v10 }
  0x7c   :  { %v139_v63 = vadd.f32 %v138_v39, %v1081_v54  ;;  %v271_v18 = vadd.f32 %v270_v47, %v208_v27 }
  0x7e   :  { %v140_v49 = vadd.f32 %v139_v63, %v1089_v17  ;;  %v272_v55 = vadd.f32 %v271_v18, %v209_v45  ;;  %v293_v63 = vlaneseq }
  0x80   :  { %v141_v6 = vrot.slane %v140_v49, 4  ;;  %v273_v38 = vadd.f32 %v272_v55, %v210_v59  ;;  %v294_v18 = vshrl.u32 %v293_v63, 7 }
  0x82   :  { %v142_v26 = vadd.f32 %v141_v6, %v140_v49  ;;  %v274_v11 = vrot.slane %v273_v38, 4  ;;  %v287_v49 = vld [vmem:[%s1493_s1] sm:$0x1] }
  0x84   :  { %v143_v61 = vrot.slane %v142_v26, 2  ;;  %v275_v53 = vadd.f32 %v274_v11, %v273_v38  ;;  %v295_v11 = vsub.s32 0, %v294_v18 }
  0x86   :  { %v144_v21 = vadd.f32 %v143_v61, %v142_v26  ;;  %v276_v34 = vrot.slane %v275_v53, 2 }
  0x88   :  { %v145_v42 = vrot.slane %v144_v21, 1  ;;  %v277_v33 = vadd.f32 %v276_v34, %v275_v53 }
  0x8a   :  { %v146_v10 = vadd.f32 %v145_v42, %v144_v21  ;;  %v278_v31 = vrot.slane %v277_v33, 1  ;;  %v289_v42 = vld [vmem:[%s1494_s2] sm:$0x1] }
  0x8c   :  { %v281_v39 = vmul.f32 0.001953125, %v146_v10  ;;  %v279_v54 = vadd.f32 %v278_v31, %v277_v33 }
  0x8e   :  { %v283_v23 = vmul.f32 %v281_v39, %v281_v39  ;;  %v282_v13 = vmul.f32 0.001953125, %v279_v54 }
  0x90   :  { %v284_v27 = vsub.f32 %v282_v13, %v283_v23 }
  0x92   :  { %v285_v47 = vadd.f32 1e-05, %v284_v27 }
  0x94   :  { %564 = vrsqrt.f32 %v285_v47 }
  0x9e   :  { %v565_v61 = vpop.eup %564 }
  0x9f   :  { %v288_v26 = vmul.f32 %v565_v61, %v287_v49 }
  0xa1   :  { %v290_v53 = vmul.f32 %v288_v26, %v281_v39  ;;  %v1104_v33 = vrot.slane %v288_v26, %v295_v11 }
  0xa3   :  { %v291_v38 = vsub.f32 %v289_v42, %v290_v53  ;;  %v298_v13 = vmul.f32 %v1104_v33, %v589_v0  ;;  %v299_v23 = vmul.f32 %v1104_v33, %v594_v1  ;;  %v300_v34 = vmul.f32 %v1104_v33, %v599_v2 }
  0xa4   :  { %v301_v54 = vmul.f32 %v1104_v33, %v604_v3  ;;  %v302_v45 = vmul.f32 %v1104_v33, %v617_v8  ;;  %v303_v59 = vmul.f32 %v1104_v33, %v625_v12  ;;  %v304_v55 = vmul.f32 %v1104_v33, %v633_v16 }
  0xa5   :  { %v1120_v6 = vrot.slane %v291_v38, %v295_v11  ;;  %v305_v0 = vmul.f32 %v1104_v33, %v641_v20  ;;  %v306_v1 = vmul.f32 %v1104_v33, %v649_v24  ;;  %v307_v2 = vmul.f32 %v1104_v33, %v657_v28 }
  0xa6   :  { %v308_v3 = vmul.f32 %v1104_v33, %v665_v32  ;;  %v309_v8 = vmul.f32 %v1104_v33, %v673_v36  ;;  %v310_v12 = vmul.f32 %v1104_v33, %v681_v40  ;;  %v311_v16 = vmul.f32 %v1104_v33, %v689_v44 }
  0xa7   :  { %v368_v20 = vadd.f32 %v1120_v6, %v298_v13  ;;  %v369_v21 = vadd.f32 %v1120_v6, %v299_v23  ;;  %v370_v24 = vadd.f32 %v1120_v6, %v300_v34  ;;  %v371_v28 = vadd.f32 %v1120_v6, %v301_v54 }
  0xa8   :  { %v372_v10 = vadd.f32 %v1120_v6, %v302_v45  ;;  %v373_v32 = vadd.f32 %v1120_v6, %v303_v59  ;;  %v374_v36 = vadd.f32 %v1120_v6, %v304_v55  ;;  %v375_v31 = vadd.f32 %v1120_v6, %v305_v0 }
  0xa9   :  { %v432_v40 = vmax.f32 %v368_v20, 0.0  ;;  %v433_v39 = vmax.f32 %v369_v21, 0.0  ;;  %v434_v27 = vmax.f32 %v370_v24, 0.0  ;;  %v435_v44 = vmax.f32 %v371_v28, 0.0 }
  0xaa   :  { %v436_v47 = vmax.f32 %v372_v10, 0.0  ;;  %v437_v63 = vmax.f32 %v373_v32, 0.0  ;;  %v438_v18 = vmax.f32 %v374_v36, 0.0  ;;  %v439_v49 = vmax.f32 %v375_v31, 0.0 }
  0xab   :  { %496 = vst [vmem:[%s1495_s3] sm:$0xff] %v432_v40  ;;  %497 = vst [vmem:[%s1495_s3 + $0x8] sm:$0xff] %v433_v39  ;;  %v376_v11 = vadd.f32 %v1120_v6, %v306_v1  ;;  %v377_v61 = vadd.f32 %v1120_v6, %v307_v2  ;;  %v378_v26 = vadd.f32 %v1120_v6, %v308_v3 }
  0xac   :  { %498 = vst [vmem:[%s1495_s3 + $0x10] sm:$0xff] %v434_v27  ;;  %499 = vst [vmem:[%s1495_s3 + $0x18] sm:$0xff] %v435_v44  ;;  %v379_v42 = vadd.f32 %v1120_v6, %v309_v8  ;;  %v380_v53 = vadd.f32 %v1120_v6, %v310_v12  ;;  %v381_v38 = vadd.f32 %v1120_v6, %v311_v16 }
  0xad   :  { %500 = vst [vmem:[%s1495_s3 + $0x20] sm:$0xff] %v436_v47  ;;  %501 = vst [vmem:[%s1495_s3 + $0x28] sm:$0xff] %v437_v63  ;;  %v312_v13 = vmul.f32 %v1104_v33, %v697_v48  ;;  %v313_v23 = vmul.f32 %v1104_v33, %v705_v52  ;;  %v440_v34 = vmax.f32 %v376_v11, 0.0  ;;  %v441_v54 = vmax.f32 %v377_v61, 0.0 }
  0xae   :  { %502 = vst [vmem:[%s1495_s3 + $0x30] sm:$0xff] %v438_v18  ;;  %503 = vst [vmem:[%s1495_s3 + $0x38] sm:$0xff] %v439_v49  ;;  %v442_v45 = vmax.f32 %v378_v26, 0.0  ;;  %v443_v59 = vmax.f32 %v379_v42, 0.0  ;;  %v444_v55 = vmax.f32 %v380_v53, 0.0  ;;  %v445_v0 = vmax.f32 %v381_v38, 0.0 }
  0xaf   :  { %v382_v1 = vadd.f32 %v1120_v6, %v312_v13  ;;  %v383_v2 = vadd.f32 %v1120_v6, %v313_v23  ;;  %504 = vst [vmem:[%s1495_s3 + $0x40] sm:$0xff] %v440_v34  ;;  %505 = vst [vmem:[%s1495_s3 + $0x48] sm:$0xff] %v441_v54  ;;  %v314_v48 = vmul.f32 %v1104_v33, %v713_v56 }
  0xb0   :  { %506 = vst [vmem:[%s1495_s3 + $0x50] sm:$0xff] %v442_v45  ;;  %507 = vst [vmem:[%s1495_s3 + $0x58] sm:$0xff] %v443_v59  ;;  %v315_v52 = vmul.f32 %v1104_v33, %v721_v60  ;;  %v316_v3 = vmul.f32 %v1104_v33, %v729_v4  ;;  %v317_v8 = vmul.f32 %v1104_v33, %v737_v9 }
  0xb1   :  { %508 = vst [vmem:[%s1495_s3 + $0x60] sm:$0xff] %v444_v55  ;;  %509 = vst [vmem:[%s1495_s3 + $0x68] sm:$0xff] %v445_v0  ;;  %v446_v12 = vmax.f32 %v382_v1, 0.0  ;;  %v447_v16 = vmax.f32 %v383_v2, 0.0  ;;  %v318_v56 = vmul.f32 %v1104_v33, %v745_v14  ;;  %v319_v60 = vmul.f32 %v1104_v33, %v753_v19 }
  0xb2   :  { %v384_v4 = vadd.f32 %v1120_v6, %v314_v48  ;;  %v385_v9 = vadd.f32 %v1120_v6, %v315_v52  ;;  %v386_v20 = vadd.f32 %v1120_v6, %v316_v3  ;;  %v387_v21 = vadd.f32 %v1120_v6, %v317_v8  ;;  %v1544_v8 = vld [vmem:[#allocation2_spill] sm:$0xff] }
  0xb3   :  { %510 = vst [vmem:[%s1495_s3 + $0x70] sm:$0xff] %v446_v12  ;;  %511 = vst [vmem:[%s1495_s3 + $0x78] sm:$0xff] %v447_v16  ;;  %v388_v14 = vadd.f32 %v1120_v6, %v318_v56  ;;  %v389_v19 = vadd.f32 %v1120_v6, %v319_v60  ;;  %v320_v24 = vmul.f32 %v1104_v33, %v761_v25 }
  0xb4   :  { %v321_v28 = vmul.f32 %v1104_v33, %v769_v30  ;;  %v448_v10 = vmax.f32 %v384_v4, 0.0  ;;  %v449_v32 = vmax.f32 %v385_v9, 0.0  ;;  %v450_v36 = vmax.f32 %v386_v20, 0.0 }
  0xb5   :  { %v451_v31 = vmax.f32 %v387_v21, 0.0  ;;  %v452_v40 = vmax.f32 %v388_v14, 0.0  ;;  %v453_v39 = vmax.f32 %v389_v19, 0.0  ;;  %v390_v27 = vadd.f32 %v1120_v6, %v320_v24  ;;  %v1546_v24 = vld [vmem:[#allocation4_spill] sm:$0xff] }
  0xb6   :  { %v391_v44 = vadd.f32 %v1120_v6, %v321_v28  ;;  %512 = vst [vmem:[%s1495_s3 + $0x80] sm:$0xff] %v448_v10  ;;  %513 = vst [vmem:[%s1495_s3 + $0x88] sm:$0xff] %v449_v32  ;;  %v322_v25 = vmul.f32 %v1104_v33, %v777_v35  ;;  %v323_v30 = vmul.f32 %v1104_v33, %v785_v41  ;;  %v1547_v10 = vld [vmem:[#allocation5_spill] sm:$0xff] }
  0xb7   :  { %514 = vst [vmem:[%s1495_s3 + $0x90] sm:$0xff] %v450_v36  ;;  %515 = vst [vmem:[%s1495_s3 + $0x98] sm:$0xff] %v451_v31  ;;  %v324_v47 = vmul.f32 %v1104_v33, %v793_v46  ;;  %v325_v63 = vmul.f32 %v1104_v33, %v801_v51  ;;  %v454_v18 = vmax.f32 %v390_v27, 0.0  ;;  %v326_v35 = vmul.f32 %v1104_v33, %v809_v57  ;;  %v1548_v36 = vld [vmem:[#allocation6_spill] sm:$0xff]  ;;  %v1549_v27 = vld [vmem:[#allocation7_spill] sm:$0xff] }
  0xb8   :  { %516 = vst [vmem:[%s1495_s3 + $0xa0] sm:$0xff] %v452_v40  ;;  %517 = vst [vmem:[%s1495_s3 + $0xa8] sm:$0xff] %v453_v39  ;;  %v455_v49 = vmax.f32 %v391_v44, 0.0  ;;  %v327_v41 = vmul.f32 %v1104_v33, %v817_v62  ;;  %v392_v46 = vadd.f32 %v1120_v6, %v322_v25  ;;  %v393_v51 = vadd.f32 %v1120_v6, %v323_v30  ;;  %v1550_v25 = vld [vmem:[#allocation8_spill] sm:$0xff] }
  0xb9   :  { %v394_v11 = vadd.f32 %v1120_v6, %v324_v47  ;;  %v395_v61 = vadd.f32 %v1120_v6, %v325_v63  ;;  %518 = vst [vmem:[%s1495_s3 + $0xb0] sm:$0xff] %v454_v18  ;;  %v396_v57 = vadd.f32 %v1120_v6, %v326_v35  ;;  %v328_v26 = vmul.f32 %v1104_v33, %v825_v7 }
  0xba   :  { %519 = vst [vmem:[%s1495_s3 + $0xb8] sm:$0xff] %v455_v49  ;;  %v397_v62 = vadd.f32 %v1120_v6, %v327_v41  ;;  %v329_v42 = vmul.f32 %v1104_v33, %v833_v15  ;;  %v456_v53 = vmax.f32 %v392_v46, 0.0  ;;  %v457_v38 = vmax.f32 %v393_v51, 0.0  ;;  %v1551_v46 = vld [vmem:[#allocation9_spill] sm:$0xff] }
  0xbb   :  { %v458_v13 = vmax.f32 %v394_v11, 0.0  ;;  %v459_v23 = vmax.f32 %v395_v61, 0.0  ;;  %v460_v34 = vmax.f32 %v396_v57, 0.0  ;;  %v398_v45 = vadd.f32 %v1120_v6, %v328_v26  ;;  %v1552_v11 = vld [vmem:[#allocation10_spill] sm:$0xff] }
  0xbc   :  { %v461_v54 = vmax.f32 %v397_v62, 0.0  ;;  %v399_v59 = vadd.f32 %v1120_v6, %v329_v42  ;;  %520 = vst [vmem:[%s1495_s3 + $0xc0] sm:$0xff] %v456_v53  ;;  %521 = vst [vmem:[%s1495_s3 + $0xc8] sm:$0xff] %v457_v38  ;;  %v330_v7 = vmul.f32 %v1104_v33, %v841_v22  ;;  %v331_v15 = vmul.f32 %v1104_v33, %v849_v29 }
  0xbd   :  { %522 = vst [vmem:[%s1495_s3 + $0xd0] sm:$0xff] %v458_v13  ;;  %523 = vst [vmem:[%s1495_s3 + $0xd8] sm:$0xff] %v459_v23  ;;  %v332_v55 = vmul.f32 %v1104_v33, %v857_v37  ;;  %v333_v0 = vmul.f32 %v1104_v33, %v865_v43  ;;  %v462_v1 = vmax.f32 %v398_v45, 0.0  ;;  %v334_v22 = vmul.f32 %v1104_v33, %v873_v50  ;;  %v1554_v45 = vld [vmem:[#allocation12_spill] sm:$0xff] }
  0xbe   :  { %524 = vst [vmem:[%s1495_s3 + $0xe0] sm:$0xff] %v460_v34  ;;  %525 = vst [vmem:[%s1495_s3 + $0xe8] sm:$0xff] %v461_v54  ;;  %v463_v2 = vmax.f32 %v399_v59, 0.0  ;;  %v335_v29 = vmul.f32 %v1104_v33, %v881_v58  ;;  %v400_v37 = vadd.f32 %v1120_v6, %v330_v7  ;;  %v401_v43 = vadd.f32 %v1120_v6, %v331_v15  ;;  %v1553_v34 = vld [vmem:[#allocation11_spill] sm:$0xff]  ;;  %v1555_v7 = vld [vmem:[#allocation13_spill] sm:$0xff] }
  0xbf   :  { %v402_v48 = vadd.f32 %v1120_v6, %v332_v55  ;;  %v403_v52 = vadd.f32 %v1120_v6, %v333_v0  ;;  %526 = vst [vmem:[%s1495_s3 + $0xf0] sm:$0xff] %v462_v1  ;;  %v404_v50 = vadd.f32 %v1120_v6, %v334_v22  ;;  %v336_v3 = vmul.f32 %v1104_v33, %v889_v5  ;;  %v1545_v5 = vld [vmem:[#allocation3_spill] sm:$0xff]  ;;  %v1556_v55 = vld [vmem:[#allocation14_spill] sm:$0xff] }
  0xc0   :  { %527 = vst [vmem:[%s1495_s3 + $0xf8] sm:$0xff] %v463_v2  ;;  %v405_v58 = vadd.f32 %v1120_v6, %v335_v29  ;;  %v337_v12 = vmul.f32 %v1104_v33, %v1544_v8  ;;  %v464_v16 = vmax.f32 %v400_v37, 0.0  ;;  %v465_v56 = vmax.f32 %v401_v43, 0.0  ;;  %v1557_v22 = vld [vmem:[#allocation15_spill] sm:$0xff]  ;;  %v1558_v37 = vld [vmem:[#allocation16_spill] sm:$0xff] }
  0xc1   :  { %v466_v60 = vmax.f32 %v402_v48, 0.0  ;;  %v467_v4 = vmax.f32 %v403_v52, 0.0  ;;  %v468_v9 = vmax.f32 %v404_v50, 0.0  ;;  %v406_v21 = vadd.f32 %v1120_v6, %v336_v3 }
  0xc2   :  { %v469_v20 = vmax.f32 %v405_v58, 0.0  ;;  %v407_v14 = vadd.f32 %v1120_v6, %v337_v12  ;;  %528 = vst [vmem:[%s1495_s3 + $0x100] sm:$0xff] %v464_v16  ;;  %529 = vst [vmem:[%s1495_s3 + $0x108] sm:$0xff] %v465_v56  ;;  %v338_v19 = vmul.f32 %v1104_v33, %v1545_v5  ;;  %v339_v28 = vmul.f32 %v1104_v33, %v1546_v24  ;;  %v1559_v12 = vld [vmem:[#allocation17_spill] sm:$0xff]  ;;  %v1560_v56 = vld [vmem:[#allocation18_spill] sm:$0xff] }
  0xc3   :  { %530 = vst [vmem:[%s1495_s3 + $0x110] sm:$0xff] %v466_v60  ;;  %531 = vst [vmem:[%s1495_s3 + $0x118] sm:$0xff] %v467_v4  ;;  %v340_v32 = vmul.f32 %v1104_v33, %v1547_v10  ;;  %v341_v31 = vmul.f32 %v1104_v33, %v1548_v36  ;;  %v470_v40 = vmax.f32 %v406_v21, 0.0  ;;  %v342_v44 = vmul.f32 %v1104_v33, %v1549_v27 }
  0xc4   :  { %532 = vst [vmem:[%s1495_s3 + $0x120] sm:$0xff] %v468_v9  ;;  %533 = vst [vmem:[%s1495_s3 + $0x128] sm:$0xff] %v469_v20  ;;  %v471_v39 = vmax.f32 %v407_v14, 0.0  ;;  %v343_v30 = vmul.f32 %v1104_v33, %v1550_v25  ;;  %v408_v47 = vadd.f32 %v1120_v6, %v338_v19  ;;  %v409_v63 = vadd.f32 %v1120_v6, %v339_v28  ;;  %v1561_v28 = vld [vmem:[#allocation19_spill] sm:$0xff] }
  0xc5   :  { %v410_v18 = vadd.f32 %v1120_v6, %v340_v32  ;;  %v411_v49 = vadd.f32 %v1120_v6, %v341_v31  ;;  %534 = vst [vmem:[%s1495_s3 + $0x130] sm:$0xff] %v470_v40  ;;  %v412_v35 = vadd.f32 %v1120_v6, %v342_v44  ;;  %v344_v51 = vmul.f32 %v1104_v33, %v1551_v46  ;;  %v1562_v32 = vld [vmem:[#allocation20_spill] sm:$0xff]  ;;  %v1563_v31 = vld [vmem:[#allocation21_spill] sm:$0xff] }
  0xc6   :  { %535 = vst [vmem:[%s1495_s3 + $0x138] sm:$0xff] %v471_v39  ;;  %v413_v41 = vadd.f32 %v1120_v6, %v343_v30  ;;  %v345_v61 = vmul.f32 %v1104_v33, %v1552_v11  ;;  %v472_v57 = vmax.f32 %v408_v47, 0.0  ;;  %v473_v62 = vmax.f32 %v409_v63, 0.0  ;;  %v1564_v39 = vld [vmem:[#allocation22_spill] sm:$0xff]  ;;  %v1565_v30 = vld [vmem:[#allocation23_spill] sm:$0xff]  ;;  %v1566_v63 = vld [vmem:[#allocation24_spill] sm:$0xff] }
  0xc7   :  { %v474_v26 = vmax.f32 %v410_v18, 0.0  ;;  %v475_v42 = vmax.f32 %v411_v49, 0.0  ;;  %v476_v53 = vmax.f32 %v412_v35, 0.0  ;;  %v414_v13 = vadd.f32 %v1120_v6, %v344_v51 }
  0xc8   :  { %v477_v38 = vmax.f32 %v413_v41, 0.0  ;;  %v415_v23 = vadd.f32 %v1120_v6, %v345_v61  ;;  %536 = vst [vmem:[%s1495_s3 + $0x140] sm:$0xff] %v472_v57  ;;  %537 = vst [vmem:[%s1495_s3 + $0x148] sm:$0xff] %v473_v62  ;;  %v346_v54 = vmul.f32 %v1104_v33, %v1553_v34  ;;  %v347_v59 = vmul.f32 %v1104_v33, %v1554_v45  ;;  %v1567_v61 = vld [vmem:[#allocation25_spill] sm:$0xff] }
  0xc9   :  { %538 = vst [vmem:[%s1495_s3 + $0x150] sm:$0xff] %v474_v26  ;;  %539 = vst [vmem:[%s1495_s3 + $0x158] sm:$0xff] %v475_v42  ;;  %v348_v15 = vmul.f32 %v1104_v33, %v1555_v7  ;;  %v349_v0 = vmul.f32 %v1104_v33, %v1556_v55  ;;  %v478_v1 = vmax.f32 %v414_v13, 0.0  ;;  %v350_v29 = vmul.f32 %v1104_v33, %v1557_v22 }
  0xca   :  { %540 = vst [vmem:[%s1495_s3 + $0x160] sm:$0xff] %v476_v53  ;;  %541 = vst [vmem:[%s1495_s3 + $0x168] sm:$0xff] %v477_v38  ;;  %v479_v2 = vmax.f32 %v415_v23, 0.0  ;;  %v351_v43 = vmul.f32 %v1104_v33, %v1558_v37  ;;  %v416_v48 = vadd.f32 %v1120_v6, %v346_v54  ;;  %v417_v52 = vadd.f32 %v1120_v6, %v347_v59 }
  0xcb   :  { %v418_v50 = vadd.f32 %v1120_v6, %v348_v15  ;;  %v419_v58 = vadd.f32 %v1120_v6, %v349_v0  ;;  %542 = vst [vmem:[%s1495_s3 + $0x170] sm:$0xff] %v478_v1  ;;  %v420_v3 = vadd.f32 %v1120_v6, %v350_v29  ;;  %v352_v16 = vmul.f32 %v1104_v33, %v1559_v12 }
  0xcc   :  { %543 = vst [vmem:[%s1495_s3 + $0x178] sm:$0xff] %v479_v2  ;;  %v421_v8 = vadd.f32 %v1120_v6, %v351_v43  ;;  %v353_v60 = vmul.f32 %v1104_v33, %v1560_v56  ;;  %v480_v4 = vmax.f32 %v416_v48, 0.0  ;;  %v481_v9 = vmax.f32 %v417_v52, 0.0 }
  0xcd   :  { %v482_v20 = vmax.f32 %v418_v50, 0.0  ;;  %v483_v21 = vmax.f32 %v419_v58, 0.0  ;;  %v484_v14 = vmax.f32 %v420_v3, 0.0  ;;  %v422_v19 = vadd.f32 %v1120_v6, %v352_v16 }
  0xce   :  { %v485_v5 = vmax.f32 %v421_v8, 0.0  ;;  %v423_v24 = vadd.f32 %v1120_v6, %v353_v60  ;;  %544 = vst [vmem:[%s1495_s3 + $0x180] sm:$0xff] %v480_v4  ;;  %545 = vst [vmem:[%s1495_s3 + $0x188] sm:$0xff] %v481_v9  ;;  %v354_v10 = vmul.f32 %v1104_v33, %v1561_v28  ;;  %v355_v36 = vmul.f32 %v1104_v33, %v1562_v32 }
  0xcf   :  { %546 = vst [vmem:[%s1495_s3 + $0x190] sm:$0xff] %v482_v20  ;;  %547 = vst [vmem:[%s1495_s3 + $0x198] sm:$0xff] %v483_v21  ;;  %v356_v40 = vmul.f32 %v1104_v33, %v1563_v31  ;;  %v357_v27 = vmul.f32 %v1104_v33, %v1564_v39  ;;  %v486_v44 = vmax.f32 %v422_v19, 0.0  ;;  %v358_v47 = vmul.f32 %v1104_v33, %v1565_v30 }
  0xd0   :  { %548 = vst [vmem:[%s1495_s3 + $0x1a0] sm:$0xff] %v484_v14  ;;  %549 = vst [vmem:[%s1495_s3 + $0x1a8] sm:$0xff] %v485_v5  ;;  %v487_v25 = vmax.f32 %v423_v24, 0.0  ;;  %v359_v18 = vmul.f32 %v1104_v33, %v1566_v63  ;;  %v424_v49 = vadd.f32 %v1120_v6, %v354_v10  ;;  %v425_v35 = vadd.f32 %v1120_v6, %v355_v36 }
  0xd1   :  { %v426_v41 = vadd.f32 %v1120_v6, %v356_v40  ;;  %v427_v46 = vadd.f32 %v1120_v6, %v357_v27  ;;  %550 = vst [vmem:[%s1495_s3 + $0x1b0] sm:$0xff] %v486_v44  ;;  %v428_v51 = vadd.f32 %v1120_v6, %v358_v47  ;;  %v360_v57 = vmul.f32 %v1104_v33, %v1567_v61 }
  0xd2   :  { %551 = vst [vmem:[%s1495_s3 + $0x1b8] sm:$0xff] %v487_v25  ;;  %v429_v11 = vadd.f32 %v1120_v6, %v359_v18  ;;  %v361_v62 = vmul.f32 %v1104_v33, %v1089_v17  ;;  %v488_v26 = vmax.f32 %v424_v49, 0.0  ;;  %v489_v42 = vmax.f32 %v425_v35, 0.0 }
  0xd3   :  { %v490_v53 = vmax.f32 %v426_v41, 0.0  ;;  %v491_v38 = vmax.f32 %v427_v46, 0.0  ;;  %v492_v13 = vmax.f32 %v428_v51, 0.0  ;;  %v430_v34 = vadd.f32 %v1120_v6, %v360_v57 }
  0xd4   :  { %v493_v23 = vmax.f32 %v429_v11, 0.0  ;;  %v431_v54 = vadd.f32 %v1120_v6, %v361_v62  ;;  %552 = vst [vmem:[%s1495_s3 + $0x1c0] sm:$0xff] %v488_v26  ;;  %553 = vst [vmem:[%s1495_s3 + $0x1c8] sm:$0xff] %v489_v42 }
  0xd5   :  { %554 = vst [vmem:[%s1495_s3 + $0x1d0] sm:$0xff] %v490_v53  ;;  %555 = vst [vmem:[%s1495_s3 + $0x1d8] sm:$0xff] %v491_v38  ;;  %v494_v17 = vmax.f32 %v430_v34, 0.0 }
  0xd6   :  { %556 = vst [vmem:[%s1495_s3 + $0x1e0] sm:$0xff] %v492_v13  ;;  %557 = vst [vmem:[%s1495_s3 + $0x1e8] sm:$0xff] %v493_v23  ;;  %v495_v33 = vmax.f32 %v431_v54, 0.0 }
  0xd7   :  { %558 = vst [vmem:[%s1495_s3 + $0x1f0] sm:$0xff] %v494_v17 }
  0xd8   :  { %559 = vst [vmem:[%s1495_s3 + $0x1f8] sm:$0xff] %v495_v33 }

// kernel: stage_block_forward.22
= control target key start
LH: loop header
LB: loop body
LE: loop exit
PB: predicated region body
PF: predicated region fallthrough
CT: control target
= control target key end

     0   :  { %s302_s6 = smov 0   ;;  %s389_s0 = inlined_call_operand.vmem [shape: f32[2,256,64], index: 0, kind: input, shape index: {}]   ;;  %s390_s1 = inlined_call_operand.vmem [shape: f32[2,1,64], index: 1, kind: output, shape index: {}]  }
   0x1 LB: > { %s266_s7 = sadd.s32 4294967295, %s290_s6   ;;  %p270_p0 = scmp.ge.s32.totalorder %s290_s6, 1  ;;  %s290_s6 = sphi %s302_s6, %s11_s6  }
   0x2   : > { %p87_p1 = scmp.lt.s32.totalorder %s290_s6, 3 }
   0x4   : > { %p88_p2 = pnand %p270_p0, %p87_p1 }
   0x5   : > { %p105_p3 = scmp.lt.s32.totalorder (!%p88_p2), %s266_s7, 1  ;;  %vm145_vm0 = vcmask (!%p88_p2), 523264   ;;  %vm217_vm1 = vcmask (!%p88_p2), 516096  }
   0x6   : > { %91 = sbr.rel (%p88_p2) target bundleno = 95 (0x5f), region = 24 }
   0xd   : > { %s392_s7 = smov (!%p105_p3, %s266_s7), 1 }
   0xe   : > { %s275_s8 = sshll.u32 %s392_s7, 8  ;;  %s112_s14 = scalar_lea.vmem %s390_s1, %s392_s7 }
   0xf   : > { %s316_s11 = scalar_lea.vmem %s389_s0, %s275_s8 }
  0x10   : > { %v113_v0 = vld [vmem:[%s316_s11] sm:$0xff]  ;;  %v114_v1 = vld [vmem:[%s316_s11 + $0x8] sm:$0xff]  ;;  %v115_v2 = vld [vmem:[%s316_s11 + $0x10] sm:$0xff] }
  0x11   : > { %v116_v3 = vld [vmem:[%s316_s11 + $0x18] sm:$0xff]  ;;  %v146_v4 = vsel %vm145_vm0, %v113_v0, 0.0  ;;  %v147_v5 = vsel %vm145_vm0, %v114_v1, 0.0  ;;  %v149_v6 = vsel %vm145_vm0, %v115_v2, 0.0  ;;  %v117_v7 = vld [vmem:[%s316_s11 + $0x20] sm:$0xff]  ;;  %v118_v10 = vld [vmem:[%s316_s11 + $0x28] sm:$0xff] }
  0x12   : > { %v148_v8 = vadd.f32 %v147_v5, %v146_v4  ;;  %v151_v9 = vsel %vm145_vm0, %v116_v3, 0.0  ;;  %v153_v12 = vsel %vm145_vm0, %v117_v7, 0.0  ;;  %v119_v13 = vld [vmem:[%s316_s11 + $0x30] sm:$0xff]  ;;  %v155_v15 = vsel %vm145_vm0, %v118_v10, 0.0  ;;  %v120_v16 = vld [vmem:[%s316_s11 + $0x38] sm:$0xff]  ;;  %v121_v19 = vld [vmem:[%s316_s11 + $0x40] sm:$0xff] }
  0x13   : > { %v157_v18 = vsel %vm145_vm0, %v119_v13, 0.0  ;;  %v159_v21 = vsel %vm145_vm0, %v120_v16, 0.0  ;;  %v122_v22 = vld [vmem:[%s316_s11 + $0x48] sm:$0xff]  ;;  %v161_v24 = vsel %vm145_vm0, %v121_v19, 0.0  ;;  %v123_v25 = vld [vmem:[%s316_s11 + $0x50] sm:$0xff]  ;;  %v124_v28 = vld [vmem:[%s316_s11 + $0x58] sm:$0xff] }
  0x14   : > { %v150_v11 = vadd.f32 %v149_v6, %v148_v8  ;;  %v163_v27 = vsel %vm145_vm0, %v122_v22, 0.0  ;;  %v165_v30 = vsel %vm145_vm0, %v123_v25, 0.0  ;;  %v125_v31 = vld [vmem:[%s316_s11 + $0x60] sm:$0xff]  ;;  %v167_v33 = vsel %vm145_vm0, %v124_v28, 0.0  ;;  %v126_v34 = vld [vmem:[%s316_s11 + $0x68] sm:$0xff]  ;;  %v127_v37 = vld [vmem:[%s316_s11 + $0x70] sm:$0xff] }
  0x15   : > { %v169_v36 = vsel %vm145_vm0, %v125_v31, 0.0  ;;  %v171_v39 = vsel %vm145_vm0, %v126_v34, 0.0  ;;  %v128_v40 = vld [vmem:[%s316_s11 + $0x78] sm:$0xff]  ;;  %v173_v42 = vsel %vm145_vm0, %v127_v37, 0.0  ;;  %v129_v43 = vld [vmem:[%s316_s11 + $0x80] sm:$0xff]  ;;  %v130_v46 = vld [vmem:[%s316_s11 + $0x88] sm:$0xff] }
  0x16   : > { %v152_v14 = vadd.f32 %v151_v9, %v150_v11  ;;  %v175_v45 = vsel %vm145_vm0, %v128_v40, 0.0  ;;  %v177_v48 = vsel %vm145_vm0, %v129_v43, 0.0  ;;  %v131_v49 = vld [vmem:[%s316_s11 + $0x90] sm:$0xff]  ;;  %v179_v51 = vsel %vm145_vm0, %v130_v46, 0.0  ;;  %v132_v52 = vld [vmem:[%s316_s11 + $0x98] sm:$0xff]  ;;  %v133_v55 = vld [vmem:[%s316_s11 + $0xa0] sm:$0xff] }
  0x17   : > { %v181_v54 = vsel %vm145_vm0, %v131_v49, 0.0  ;;  %v183_v57 = vsel %vm145_vm0, %v132_v52, 0.0  ;;  %v134_v58 = vld [vmem:[%s316_s11 + $0xa8] sm:$0xff]  ;;  %v185_v60 = vsel %vm145_vm0, %v133_v55, 0.0  ;;  %v135_v61 = vld [vmem:[%s316_s11 + $0xb0] sm:$0xff]  ;;  %v136_v0 = vld [vmem:[%s316_s11 + $0xb8] sm:$0xff] }
  0x18   : > { %v154_v17 = vadd.f32 %v153_v12, %v152_v14  ;;  %v187_v63 = vsel %vm145_vm0, %v134_v58, 0.0  ;;  %v189_v2 = vsel %vm145_vm0, %v135_v61, 0.0  ;;  %v137_v3 = vld [vmem:[%s316_s11 + $0xc0] sm:$0xff]  ;;  %v191_v5 = vsel %vm145_vm0, %v136_v0, 0.0  ;;  %v138_v6 = vld [vmem:[%s316_s11 + $0xc8] sm:$0xff]  ;;  %v139_v9 = vld [vmem:[%s316_s11 + $0xd0] sm:$0xff] }
  0x19   : > { %v193_v8 = vsel %vm145_vm0, %v137_v3, 0.0  ;;  %v195_v11 = vsel %vm145_vm0, %v138_v6, 0.0  ;;  %v140_v12 = vld [vmem:[%s316_s11 + $0xd8] sm:$0xff]  ;;  %v197_v14 = vsel %vm145_vm0, %v139_v9, 0.0 }
  0x1a   : > { %v156_v20 = vadd.f32 %v155_v15, %v154_v17  ;;  %v141_v15 = vld [vmem:[%s316_s11 + $0xe0] sm:$0xff]  ;;  %v199_v17 = vsel %vm145_vm0, %v140_v12, 0.0 }
  0x1c   : > { %v158_v23 = vadd.f32 %v157_v18, %v156_v20  ;;  %v142_v18 = vld [vmem:[%s316_s11 + $0xe8] sm:$0xff]  ;;  %v201_v20 = vsel %vm145_vm0, %v141_v15, 0.0 }
  0x1e   : > { %v160_v26 = vadd.f32 %v159_v21, %v158_v23  ;;  %v143_v21 = vld [vmem:[%s316_s11 + $0xf0] sm:$0xff]  ;;  %v203_v23 = vsel %vm145_vm0, %v142_v18, 0.0 }
  0x20   : > { %v162_v29 = vadd.f32 %v161_v24, %v160_v26  ;;  %v144_v24 = vld [vmem:[%s316_s11 + $0xf8] sm:$0xff]  ;;  %v205_v26 = vsel %vm145_vm0, %v143_v21, 0.0 }
  0x21   : > { %v207_v28 = vsel %vm145_vm0, %v144_v24, 0.0 }
  0x22   : > { %v164_v32 = vadd.f32 %v163_v27, %v162_v29 }
  0x24   : > { %v166_v35 = vadd.f32 %v165_v30, %v164_v32 }
  0x26   : > { %v168_v38 = vadd.f32 %v167_v33, %v166_v35 }
  0x28   : > { %v170_v41 = vadd.f32 %v169_v36, %v168_v38 }
  0x2a   : > { %v172_v44 = vadd.f32 %v171_v39, %v170_v41 }
  0x2c   : > { %v174_v47 = vadd.f32 %v173_v42, %v172_v44 }
  0x2e   : > { %v176_v50 = vadd.f32 %v175_v45, %v174_v47 }
  0x30   : > { %v178_v53 = vadd.f32 %v177_v48, %v176_v50 }
  0x32   : > { %v180_v56 = vadd.f32 %v179_v51, %v178_v53 }
  0x34   : > { %v182_v59 = vadd.f32 %v181_v54, %v180_v56 }
  0x36   : > { %v184_v62 = vadd.f32 %v183_v57, %v182_v59 }
  0x38   : > { %v186_v1 = vadd.f32 %v185_v60, %v184_v62 }
  0x3a   : > { %v188_v4 = vadd.f32 %v187_v63, %v186_v1 }
  0x3c   : > { %v190_v7 = vadd.f32 %v189_v2, %v188_v4 }
  0x3e   : > { %v192_v10 = vadd.f32 %v191_v5, %v190_v7 }
  0x40   : > { %v194_v13 = vadd.f32 %v193_v8, %v192_v10 }
  0x42   : > { %v196_v16 = vadd.f32 %v195_v11, %v194_v13 }
  0x44   : > { %v198_v19 = vadd.f32 %v197_v14, %v196_v16 }
  0x46   : > { %v200_v22 = vadd.f32 %v199_v17, %v198_v19 }
  0x48   : > { %v202_v25 = vadd.f32 %v201_v20, %v200_v22 }
  0x4a   : > { %v204_v27 = vadd.f32 %v203_v23, %v202_v25 }
  0x4c   : > { %v206_v29 = vadd.f32 %v205_v26, %v204_v27 }
  0x4e   : > { %v208_v30 = vadd.f32 %v207_v28, %v206_v29 }
  0x50   : > { %v209_v31 = vrot.slane %v208_v30, 4 }
  0x52   : > { %v210_v32 = vadd.f32 %v209_v31, %v208_v30 }
  0x54   : > { %v211_v33 = vrot.slane %v210_v32, 2 }
  0x56   : > { %v212_v34 = vadd.f32 %v211_v33, %v210_v32 }
  0x58   : > { %v213_v35 = vrot.slane %v212_v34, 1 }
  0x5a   : > { %v214_v36 = vadd.f32 %v213_v35, %v212_v34 }
  0x5c   : > { %v216_v37 = vmul.f32 0.00390625, %v214_v36 }
  0x5e   : > { %218 = vst.msk [vmem:[%s112_s14] sm:$0x1] %vm217_vm1, %v216_v37 }
  0x5f PF: > { %s11_s6 = sadd.s32 1, %s290_s6  }
  0x60   : > { %p8_p4 = scmp.ge.s32.totalorder %s11_s6, 4  }
  0x62   :  { %10 = sbr.rel (!%p8_p4) target bundleno = 1 (0x1), region = 54 }

// kernel: stage_block_forward.20
= control target key start
LH: loop header
LB: loop body
LE: loop exit
PB: predicated region body
PF: predicated region fallthrough
CT: control target
= control target key end

     0   :  { %s439_s9 = smov 0   ;;  %s593_s0 = inlined_call_operand.vmem [shape: f32[2,256,64], index: 0, kind: input, shape index: {}]   ;;  %s594_s1 = inlined_call_operand.vmem [shape: f32[2,256,64], index: 1, kind: input, shape index: {}]   ;;  %s595_s2 = inlined_call_operand.vmem [shape: f32[2,256,64], index: 2, kind: output, shape index: {}]  }
   0x1 LB: > { %s392_s10 = sadd.s32 4294967295, %s422_s9   ;;  %p396_p0 = scmp.ge.s32.totalorder %s422_s9, 1  ;;  %s422_s9 = sphi %s439_s9, %s12_s9  }
   0x2   : > { %p122_p1 = scmp.lt.s32.totalorder %s422_s9, 3 }
   0x4   : > { %p123_p2 = pnand %p396_p0, %p122_p1 }
   0x5   : > { %p149_p3 = scmp.lt.s32.totalorder (!%p123_p2), %s392_s10, 1  ;;  %vm292_vm0 = vcmask (!%p123_p2), 523264  }
   0x6   : > { %126 = sbr.rel (%p123_p2) target bundleno = 46 (0x2e), region = 28 }
   0xd   : > { %s597_s10 = smov (!%p149_p3, %s392_s10), 1 }
   0xe   : > { %s405_s11 = sshll.u32 %s597_s10, 8 }
   0xf   : > { %s450_s14 = scalar_lea.vmem %s593_s0, %s405_s11  ;;  %s455_s17 = scalar_lea.vmem %s594_s1, %s405_s11 }
  0x10   : > { %v164_v0 = vld [vmem:[%s450_s14] sm:$0xff]  ;;  %v165_v2 = vld [vmem:[%s450_s14 + $0x8] sm:$0xff]  ;;  %v166_v5 = vld [vmem:[%s450_s14 + $0x10] sm:$0xff]  ;;  %s466_s20 = scalar_lea.vmem %s595_s2, %s405_s11 }
  0x11   : > { %v196_v1 = vld [vmem:[%s455_s17] sm:$0xff]  ;;  %v197_v4 = vld [vmem:[%s455_s17 + $0x8] sm:$0xff]  ;;  %v198_v6 = vld [vmem:[%s455_s17 + $0x10] sm:$0xff] }
  0x12   : > { %v228_v3 = vadd.f32 %v196_v1, %v164_v0  ;;  %v229_v7 = vadd.f32 %v197_v4, %v165_v2  ;;  %v230_v8 = vadd.f32 %v198_v6, %v166_v5  ;;  %v167_v9 = vld [vmem:[%s450_s14 + $0x18] sm:$0xff]  ;;  %v168_v11 = vld [vmem:[%s450_s14 + $0x20] sm:$0xff]  ;;  %v169_v15 = vld [vmem:[%s450_s14 + $0x28] sm:$0xff] }
  0x13   : > { %v199_v10 = vld [vmem:[%s455_s17 + $0x18] sm:$0xff]  ;;  %v200_v14 = vld [vmem:[%s455_s17 + $0x20] sm:$0xff]  ;;  %v201_v16 = vld [vmem:[%s455_s17 + $0x28] sm:$0xff] }
  0x14   : > { %v260_v12 = vmax.f32 %v228_v3, 0.0  ;;  %v231_v13 = vadd.f32 %v199_v10, %v167_v9  ;;  %v261_v17 = vmax.f32 %v229_v7, 0.0  ;;  %v262_v18 = vmax.f32 %v230_v8, 0.0  ;;  %v170_v21 = vld [vmem:[%s450_s14 + $0x30] sm:$0xff]  ;;  %v171_v23 = vld [vmem:[%s450_s14 + $0x38] sm:$0xff]  ;;  %v172_v27 = vld [vmem:[%s450_s14 + $0x40] sm:$0xff] }
  0x15   : > { %v232_v19 = vadd.f32 %v200_v14, %v168_v11  ;;  %v233_v20 = vadd.f32 %v201_v16, %v169_v15  ;;  %v202_v22 = vld [vmem:[%s455_s17 + $0x30] sm:$0xff]  ;;  %v203_v26 = vld [vmem:[%s455_s17 + $0x38] sm:$0xff]  ;;  %v204_v28 = vld [vmem:[%s455_s17 + $0x40] sm:$0xff] }
  0x16   : > { %293 = vst.msk [vmem:[%s466_s20] sm:$0xff] %vm292_vm0, %v260_v12  ;;  %v263_v24 = vmax.f32 %v231_v13, 0.0  ;;  %v234_v25 = vadd.f32 %v202_v22, %v170_v21  ;;  %294 = vst.msk [vmem:[%s466_s20 + $0x8] sm:$0xff] %vm292_vm0, %v261_v17  ;;  %v235_v31 = vadd.f32 %v203_v26, %v171_v23  ;;  %v236_v32 = vadd.f32 %v204_v28, %v172_v27  ;;  %v173_v33 = vld [vmem:[%s450_s14 + $0x48] sm:$0xff]  ;;  %v174_v35 = vld [vmem:[%s450_s14 + $0x50] sm:$0xff] }
  0x17   : > { %295 = vst.msk [vmem:[%s466_s20 + $0x10] sm:$0xff] %vm292_vm0, %v262_v18  ;;  %v264_v29 = vmax.f32 %v232_v19, 0.0  ;;  %v265_v30 = vmax.f32 %v233_v20, 0.0  ;;  %v205_v34 = vld [vmem:[%s455_s17 + $0x48] sm:$0xff]  ;;  %v206_v38 = vld [vmem:[%s455_s17 + $0x50] sm:$0xff]  ;;  %v175_v39 = vld [vmem:[%s450_s14 + $0x58] sm:$0xff] }
  0x18   : > { %296 = vst.msk [vmem:[%s466_s20 + $0x18] sm:$0xff] %vm292_vm0, %v263_v24  ;;  %v266_v36 = vmax.f32 %v234_v25, 0.0  ;;  %v237_v37 = vadd.f32 %v205_v34, %v173_v33  ;;  %v207_v40 = vld [vmem:[%s455_s17 + $0x58] sm:$0xff]  ;;  %v267_v41 = vmax.f32 %v235_v31, 0.0  ;;  %v268_v42 = vmax.f32 %v236_v32, 0.0  ;;  %v176_v45 = vld [vmem:[%s450_s14 + $0x60] sm:$0xff] }
  0x19   : > { %297 = vst.msk [vmem:[%s466_s20 + $0x20] sm:$0xff] %vm292_vm0, %v264_v29  ;;  %298 = vst.msk [vmem:[%s466_s20 + $0x28] sm:$0xff] %vm292_vm0, %v265_v30  ;;  %v238_v43 = vadd.f32 %v206_v38, %v174_v35  ;;  %v239_v44 = vadd.f32 %v207_v40, %v175_v39  ;;  %v208_v46 = vld [vmem:[%s455_s17 + $0x60] sm:$0xff]  ;;  %v177_v47 = vld [vmem:[%s450_s14 + $0x68] sm:$0xff] }
  0x1a   : > { %299 = vst.msk [vmem:[%s466_s20 + $0x30] sm:$0xff] %vm292_vm0, %v266_v36  ;;  %v269_v48 = vmax.f32 %v237_v37, 0.0  ;;  %v240_v49 = vadd.f32 %v208_v46, %v176_v45  ;;  %v209_v50 = vld [vmem:[%s455_s17 + $0x68] sm:$0xff]  ;;  %v178_v51 = vld [vmem:[%s450_s14 + $0x70] sm:$0xff]  ;;  %300 = vst.msk [vmem:[%s466_s20 + $0x38] sm:$0xff] %vm292_vm0, %v267_v41 }
  0x1b   : > { %v210_v52 = vld [vmem:[%s455_s17 + $0x70] sm:$0xff]  ;;  %301 = vst.msk [vmem:[%s466_s20 + $0x40] sm:$0xff] %vm292_vm0, %v268_v42  ;;  %v270_v53 = vmax.f32 %v238_v43, 0.0  ;;  %v271_v54 = vmax.f32 %v239_v44, 0.0  ;;  %v241_v55 = vadd.f32 %v209_v50, %v177_v47  ;;  %v179_v57 = vld [vmem:[%s450_s14 + $0x78] sm:$0xff]  ;;  %v180_v59 = vld [vmem:[%s450_s14 + $0x80] sm:$0xff] }
  0x1c   : > { %v242_v56 = vadd.f32 %v210_v52, %v178_v51  ;;  %v211_v58 = vld [vmem:[%s455_s17 + $0x78] sm:$0xff]  ;;  %302 = vst.msk [vmem:[%s466_s20 + $0x48] sm:$0xff] %vm292_vm0, %v269_v48  ;;  %v272_v60 = vmax.f32 %v240_v49, 0.0  ;;  %v212_v62 = vld [vmem:[%s455_s17 + $0x80] sm:$0xff]  ;;  %v181_v63 = vld [vmem:[%s450_s14 + $0x88] sm:$0xff] }
  0x1d   : > { %v243_v61 = vadd.f32 %v211_v58, %v179_v57  ;;  %v213_v0 = vld [vmem:[%s455_s17 + $0x88] sm:$0xff]  ;;  %303 = vst.msk [vmem:[%s466_s20 + $0x50] sm:$0xff] %vm292_vm0, %v270_v53  ;;  %304 = vst.msk [vmem:[%s466_s20 + $0x58] sm:$0xff] %vm292_vm0, %v271_v54  ;;  %v273_v1 = vmax.f32 %v241_v55, 0.0  ;;  %v244_v3 = vadd.f32 %v212_v62, %v180_v59  ;;  %v182_v5 = vld [vmem:[%s450_s14 + $0x90] sm:$0xff] }
  0x1e   : > { %v274_v2 = vmax.f32 %v242_v56, 0.0  ;;  %v245_v4 = vadd.f32 %v213_v0, %v181_v63  ;;  %v214_v6 = vld [vmem:[%s455_s17 + $0x90] sm:$0xff]  ;;  %v183_v7 = vld [vmem:[%s450_s14 + $0x98] sm:$0xff]  ;;  %305 = vst.msk [vmem:[%s466_s20 + $0x60] sm:$0xff] %vm292_vm0, %v272_v60  ;;  %v184_v11 = vld [vmem:[%s450_s14 + $0xa0] sm:$0xff] }
  0x1f   : > { %v275_v8 = vmax.f32 %v243_v61, 0.0  ;;  %v246_v9 = vadd.f32 %v214_v6, %v182_v5  ;;  %v215_v10 = vld [vmem:[%s455_s17 + $0x98] sm:$0xff]  ;;  %v216_v12 = vld [vmem:[%s455_s17 + $0xa0] sm:$0xff]  ;;  %306 = vst.msk [vmem:[%s466_s20 + $0x68] sm:$0xff] %vm292_vm0, %v273_v1  ;;  %v276_v13 = vmax.f32 %v244_v3, 0.0  ;;  %v185_v17 = vld [vmem:[%s450_s14 + $0xa8] sm:$0xff] }
  0x20   : > { %307 = vst.msk [vmem:[%s466_s20 + $0x70] sm:$0xff] %vm292_vm0, %v274_v2  ;;  %v277_v14 = vmax.f32 %v245_v4, 0.0  ;;  %v247_v15 = vadd.f32 %v215_v10, %v183_v7  ;;  %v248_v16 = vadd.f32 %v216_v12, %v184_v11  ;;  %v217_v18 = vld [vmem:[%s455_s17 + $0xa8] sm:$0xff]  ;;  %v186_v19 = vld [vmem:[%s450_s14 + $0xb0] sm:$0xff]  ;;  %v187_v23 = vld [vmem:[%s450_s14 + $0xb8] sm:$0xff] }
  0x21   : > { %308 = vst.msk [vmem:[%s466_s20 + $0x78] sm:$0xff] %vm292_vm0, %v275_v8  ;;  %v278_v20 = vmax.f32 %v246_v9, 0.0  ;;  %v249_v21 = vadd.f32 %v217_v18, %v185_v17  ;;  %v218_v22 = vld [vmem:[%s455_s17 + $0xb0] sm:$0xff]  ;;  %v219_v24 = vld [vmem:[%s455_s17 + $0xb8] sm:$0xff]  ;;  %309 = vst.msk [vmem:[%s466_s20 + $0x80] sm:$0xff] %vm292_vm0, %v276_v13 }
  0x22   : > { %310 = vst.msk [vmem:[%s466_s20 + $0x88] sm:$0xff] %vm292_vm0, %v277_v14  ;;  %v279_v25 = vmax.f32 %v247_v15, 0.0  ;;  %v280_v26 = vmax.f32 %v248_v16, 0.0  ;;  %v250_v27 = vadd.f32 %v218_v22, %v186_v19  ;;  %v251_v28 = vadd.f32 %v219_v24, %v187_v23  ;;  %v188_v29 = vld [vmem:[%s450_s14 + $0xc0] sm:$0xff]  ;;  %v189_v31 = vld [vmem:[%s450_s14 + $0xc8] sm:$0xff]  ;;  %v190_v35 = vld [vmem:[%s450_s14 + $0xd0] sm:$0xff] }
  0x23   : > { %v220_v30 = vld [vmem:[%s455_s17 + $0xc0] sm:$0xff]  ;;  %311 = vst.msk [vmem:[%s466_s20 + $0x90] sm:$0xff] %vm292_vm0, %v278_v20  ;;  %v281_v32 = vmax.f32 %v249_v21, 0.0  ;;  %v221_v34 = vld [vmem:[%s455_s17 + $0xc8] sm:$0xff]  ;;  %v222_v36 = vld [vmem:[%s455_s17 + $0xd0] sm:$0xff] }
  0x24   : > { %v252_v33 = vadd.f32 %v220_v30, %v188_v29  ;;  %312 = vst.msk [vmem:[%s466_s20 + $0x98] sm:$0xff] %vm292_vm0, %v279_v25  ;;  %313 = vst.msk [vmem:[%s466_s20 + $0xa0] sm:$0xff] %vm292_vm0, %v280_v26  ;;  %v282_v37 = vmax.f32 %v250_v27, 0.0  ;;  %v283_v38 = vmax.f32 %v251_v28, 0.0  ;;  %v253_v39 = vadd.f32 %v221_v34, %v189_v31  ;;  %v191_v41 = vld [vmem:[%s450_s14 + $0xd8] sm:$0xff]  ;;  %v192_v43 = vld [vmem:[%s450_s14 + $0xe0] sm:$0xff] }
  0x25   : > { %v254_v40 = vadd.f32 %v222_v36, %v190_v35  ;;  %v223_v42 = vld [vmem:[%s455_s17 + $0xd8] sm:$0xff]  ;;  %314 = vst.msk [vmem:[%s466_s20 + $0xa8] sm:$0xff] %vm292_vm0, %v281_v32  ;;  %v224_v46 = vld [vmem:[%s455_s17 + $0xe0] sm:$0xff]  ;;  %v193_v47 = vld [vmem:[%s450_s14 + $0xe8] sm:$0xff] }
  0x26   : > { %v284_v44 = vmax.f32 %v252_v33, 0.0  ;;  %v255_v45 = vadd.f32 %v223_v42, %v191_v41  ;;  %v225_v48 = vld [vmem:[%s455_s17 + $0xe8] sm:$0xff]  ;;  %315 = vst.msk [vmem:[%s466_s20 + $0xb0] sm:$0xff] %vm292_vm0, %v282_v37  ;;  %316 = vst.msk [vmem:[%s466_s20 + $0xb8] sm:$0xff] %vm292_vm0, %v283_v38  ;;  %v285_v49 = vmax.f32 %v253_v39, 0.0  ;;  %v256_v51 = vadd.f32 %v224_v46, %v192_v43  ;;  %v194_v53 = vld [vmem:[%s450_s14 + $0xf0] sm:$0xff] }
  0x27   : > { %v286_v50 = vmax.f32 %v254_v40, 0.0  ;;  %v257_v52 = vadd.f32 %v225_v48, %v193_v47  ;;  %v226_v54 = vld [vmem:[%s455_s17 + $0xf0] sm:$0xff]  ;;  %v195_v55 = vld [vmem:[%s450_s14 + $0xf8] sm:$0xff] }
  0x28   : > { %317 = vst.msk [vmem:[%s466_s20 + $0xc0] sm:$0xff] %vm292_vm0, %v284_v44  ;;  %v287_v56 = vmax.f32 %v255_v45, 0.0  ;;  %v258_v57 = vadd.f32 %v226_v54, %v194_v53  ;;  %v227_v58 = vld [vmem:[%s455_s17 + $0xf8] sm:$0xff]  ;;  %318 = vst.msk [vmem:[%s466_s20 + $0xc8] sm:$0xff] %vm292_vm0, %v285_v49  ;;  %v288_v59 = vmax.f32 %v256_v51, 0.0 }
  0x29   : > { %319 = vst.msk [vmem:[%s466_s20 + $0xd0] sm:$0xff] %vm292_vm0, %v286_v50  ;;  %v289_v60 = vmax.f32 %v257_v52, 0.0  ;;  %v259_v61 = vadd.f32 %v227_v58, %v195_v55 }
  0x2a   : > { %320 = vst.msk [vmem:[%s466_s20 + $0xd8] sm:$0xff] %vm292_vm0, %v287_v56  ;;  %v290_v62 = vmax.f32 %v258_v57, 0.0  ;;  %321 = vst.msk [vmem:[%s466_s20 + $0xe0] sm:$0xff] %vm292_vm0, %v288_v59 }
  0x2b   : > { %322 = vst.msk [vmem:[%s466_s20 + $0xe8] sm:$0xff] %vm292_vm0, %v289_v60  ;;  %v291_v63 = vmax.f32 %v259_v61, 0.0 }
  0x2c   : > { %323 = vst.msk [vmem:[%s466_s20 + $0xf0] sm:$0xff] %vm292_vm0, %v290_v62 }
  0x2d   : > { %324 = vst.msk [vmem:[%s466_s20 + $0xf8] sm:$0xff] %vm292_vm0, %v291_v63 }
  0x2e PF: > { %s12_s9 = sadd.s32 1, %s422_s9  }
  0x2f   : > { %p9_p4 = scmp.ge.s32.totalorder %s12_s9, 4  }
  0x31   :  { %11 = sbr.rel (!%p9_p4) target bundleno = 1 (0x1), region = 61 }

// kernel: stage_block_forward.21
= control target key start
LH: loop header
LB: loop body
LE: loop exit
PB: predicated region body
PF: predicated region fallthrough
CT: control target
= control target key end

     0   :  { %s2896_s12 = smov 0   ;;  %s2898_s13 = smov 0   ;;  %s3630_s0 = inlined_call_operand.vmem [shape: f32[128,128], index: 0, kind: input, shape index: {}]   ;;  %s3631_s1 = inlined_call_operand.vmem [shape: f32[128,256], index: 1, kind: input, shape index: {}]   ;;  %s3632_s2 = inlined_call_operand.vmem [shape: f32[1,256], index: 2, kind: input, shape index: {}]   ;;  %s3633_s3 = inlined_call_operand.vmem [shape: f32[128,256], index: 3, kind: output, shape index: {}]  }
   0x1   :  { %s2900_s14 = smov 0   ;;  %s2902_s15 = smov 0  }
   0x2   :  { %s2904_s16 = smov 0  }
   0x3 LB: > { %s28_s17 = sadd.s32 1, %s2870_s15  ;;  %s1981_s18 = sadd.s32 4294967295, %s2874_s16   ;;  %s2874_s16 = sphi %s2904_s16, %s13_s16   ;;  %s2870_s15 = sphi %s2902_s15, %s3762_s15   ;;  %s2866_s14 = sphi %s2900_s14, %s3761_s14   ;;  %s2862_s13 = sphi %s2898_s13, %s3760_s13   ;;  %s2858_s12 = sphi %s2896_s12, %s3759_s12  }
   0x4   : > { %p30_p0 = scmp.ge.s32.totalorder %s28_s17, 2  ;;  %p76_p1 = scmp.ne.s32.totalorder %s2862_s13, %s2858_s12 }
   0x5   : > { %p77_p2 = scmp.eq.s32.totalorder %s2874_s16, 0  ;;  %p134_p4 = scmp.eq.s32.totalorder %s1981_s18, 1 }
   0x6   : > { %s3764_s17 = smov (%p30_p0, %s28_s17), 0  ;;  %s69_s20 = sadd.s32 1, %s2862_s13 }
   0x7   : > { %p78_p3 = por %p77_p2, %p76_p1  ;;  %s65_s19 = ssub.s32 %s2870_s15, %s3764_s17 }
   0x8   : > { %p67_p5 = scmp.eq.s32.totalorder %s65_s19, 0  ;;  %p2931_p6 = por %p134_p4, %p76_p1 }
   0x9   : > { %p1985_p7 = scmp.ge.s32.totalorder %s2874_s16, 2 }
   0xa   : > { %s2936_s22 = scalar_select %p67_p5, %s2862_s13, %s69_s20  }
   0xb   : > { %168 = sbr.rel (%p1985_p7) target bundleno = 30 (0x1e), region = 20 }
  0x12   : > { %171 = sbr.rel (!%p78_p3) target bundleno = 30 (0x1e), region = 24  ;;  %s173_s23 = sand.u32 (%p78_p3), 1, %s2862_s13  }
  0x13   : > { %s1987_s24 = sshll.u32 (%p78_p3), %s2870_s15, 3  ;;  %s1986_s25 = sshll.u32 (%p78_p3), %s173_s23, 7 }
  0x14   : > { %s2944_s28 = scalar_lea.vmem (%p78_p3), %s3631_s1, %s1987_s24  ;;  %s175_s29 = scalar_lea.vmem (%p78_p3), [#allocation3], %s1986_s25 }
  0x15   : > { %v238_v0 = vld [vmem:[%s2944_s28] sm:$0xff] (%p78_p3)  ;;  %v240_v1 = vld [vmem:[%s2944_s28 + $0x10] sm:$0xff] (%p78_p3) }
  0x16   : > { %v242_v2 = vld [vmem:[%s2944_s28 + $0x20] sm:$0xff] (%p78_p3)  ;;  %239 = vst [vmem:[%s175_s29] sm:$0xff] (%p78_p3), %v238_v0  ;;  %241 = vst [vmem:[%s175_s29 + $0x8] sm:$0xff] (%p78_p3), %v240_v1  ;;  %v244_v3 = vld [vmem:[%s2944_s28 + $0x30] sm:$0xff] (%p78_p3) }
  0x17   : > { %243 = vst [vmem:[%s175_s29 + $0x10] sm:$0xff] (%p78_p3), %v242_v2  ;;  %v246_v4 = vld [vmem:[%s2944_s28 + $0x40] sm:$0xff] (%p78_p3)  ;;  %v248_v5 = vld [vmem:[%s2944_s28 + $0x50] sm:$0xff] (%p78_p3)  ;;  %245 = vst [vmem:[%s175_s29 + $0x18] sm:$0xff] (%p78_p3), %v244_v3 }
  0x18   : > { %247 = vst [vmem:[%s175_s29 + $0x20] sm:$0xff] (%p78_p3), %v246_v4  ;;  %249 = vst [vmem:[%s175_s29 + $0x28] sm:$0xff] (%p78_p3), %v248_v5  ;;  %v250_v6 = vld [vmem:[%s2944_s28 + $0x60] sm:$0xff] (%p78_p3)  ;;  %v252_v7 = vld [vmem:[%s2944_s28 + $0x70] sm:$0xff] (%p78_p3) }
  0x19   : > { %v254_v8 = vld [vmem:[%s2944_s28 + $0x80] sm:$0xff]  ;;  %251 = vst [vmem:[%s175_s29 + $0x30] sm:$0xff] %v250_v6  ;;  %253 = vst [vmem:[%s175_s29 + $0x38] sm:$0xff] %v252_v7  ;;  %v256_v9 = vld [vmem:[%s2944_s28 + $0x90] sm:$0xff] }
  0x1a   : > { %255 = vst [vmem:[%s175_s29 + $0x40] sm:$0xff] %v254_v8  ;;  %v258_v10 = vld [vmem:[%s2944_s28 + $0xa0] sm:$0xff]  ;;  %v260_v11 = vld [vmem:[%s2944_s28 + $0xb0] sm:$0xff]  ;;  %257 = vst [vmem:[%s175_s29 + $0x48] sm:$0xff] %v256_v9 }
  0x1b   : > { %259 = vst [vmem:[%s175_s29 + $0x50] sm:$0xff] %v258_v10  ;;  %261 = vst [vmem:[%s175_s29 + $0x58] sm:$0xff] %v260_v11  ;;  %v262_v12 = vld [vmem:[%s2944_s28 + $0xc0] sm:$0xff]  ;;  %v264_v13 = vld [vmem:[%s2944_s28 + $0xd0] sm:$0xff] }
  0x1c   : > { %v266_v14 = vld [vmem:[%s2944_s28 + $0xe0] sm:$0xff]  ;;  %263 = vst [vmem:[%s175_s29 + $0x60] sm:$0xff] %v262_v12  ;;  %265 = vst [vmem:[%s175_s29 + $0x68] sm:$0xff] %v264_v13  ;;  %v268_v15 = vld [vmem:[%s2944_s28 + $0xf0] sm:$0xff] }
  0x1d   : > { %267 = vst [vmem:[%s175_s29 + $0x70] sm:$0xff] %v266_v14  ;;  %269 = vst [vmem:[%s175_s29 + $0x78] sm:$0xff] %v268_v15 }
  0x1e PF: > { %p1988_p8 = scmp.ge.s32.totalorder %s2874_s16, 1  ;;  %p280_p9 = scmp.lt.s32.totalorder %s2874_s16, 3 }
  0x20   : > { %p281_p10 = pnand %p1988_p8, %p280_p9 }
  0x22   : > { %284 = sbr.rel (%p281_p10) target bundleno = 403 (0x193), region = 66 }
  0x29   : > { %s287_s30 = sand.u32 1, %s2858_s12   ;;  %v370_v16 = vld [vmem:[%s3630_s0] sm:$0xff]  ;;  %v371_v36 = vld [vmem:[%s3630_s0 + $0x8] sm:$0xff]  ;;  %v372_v40 = vld [vmem:[%s3630_s0 + $0x10] sm:$0xff]  ;;  %p330_p11 = scmp.lt.s32.totalorder %s2866_s14, 1 }
  0x2a   : > { %s2968_s6 = sshll.u32 %s287_s30, 7  ;;  %v2970_v17 = vand.u32 4294901760, %v370_v16  ;;  %v3028_v44 = vand.u32 4294901760, %v371_v36  ;;  %v3032_v46 = vand.u32 4294901760, %v372_v40  ;;  %v373_v47 = vld [vmem:[%s3630_s0 + $0x18] sm:$0xff]  ;;  %v374_v57 = vld [vmem:[%s3630_s0 + $0x20] sm:$0xff] }
  0x2b   : > { %s2973_s7 = scalar_lea.vmem [#allocation3], %s2968_s6  ;;  %v3056_v54 = vand.u32 4294901760, %v373_v47  ;;  %v3100_v6 = vand.u32 4294901760, %v374_v57  ;;  %v375_v7 = vld [vmem:[%s3630_s0 + $0x28] sm:$0xff]  ;;  %s3561_s30 = scalar_lea.vmem [#allocation4], %s2968_s6 }
  0x2c   : > { %v386_v18 = vld [vmem:[%s2973_s7] sm:$0xff]  ;;  %v387_v19 = vld [vmem:[%s2973_s7 + $0x8] sm:$0xff]  ;;  %v388_v20 = vld [vmem:[%s2973_s7 + $0x10] sm:$0xff]  ;;  %v2986_v28 = vsub.f32 %v370_v16, %v2970_v17  ;;  %v3054_v53 = vsub.f32 %v371_v36, %v3028_v44  ;;  %v3062_v56 = vsub.f32 %v372_v40, %v3032_v46  ;;  %s331_s26 = scalar_select %p330_p11, %s2866_s14, 1 }
  0x2d   : > { %v403_v21 = vand.u32 4294901760, %v386_v18  ;;  %v406_v22 = vand.u32 4294901760, %v387_v19  ;;  %v389_v23 = vld [vmem:[%s2973_s7 + $0x18] sm:$0xff]  ;;  %v409_v24 = vand.u32 4294901760, %v388_v20  ;;  %v2980_v25 = vld [vmem:[%s2973_s7 + $0x20] sm:$0xff]  ;;  %v2983_v26 = vld [vmem:[%s2973_s7 + $0x28] sm:$0xff]  ;;  %v3096_v4 = vsub.f32 %v373_v47, %v3056_v54 }
  0x2e   : > { %v412_v27 = vand.u32 4294901760, %v389_v23  ;;  %3678 = vst [vmem:[#allocation5_spill] sm:$0xff] %v2986_v28  ;;  %v415_v30 = vand.u32 4294901760, %v2980_v25  ;;  %v418_v31 = vand.u32 4294901760, %v2983_v26  ;;  %v2995_v33 = vld [vmem:[%s2973_s7 + $0x30] sm:$0xff]  ;;  %v2998_v34 = vld [vmem:[%s2973_s7 + $0x38] sm:$0xff]  ;;  %s332_s29 = scalar_lea.vmem %s3632_s2, %s331_s26 }
  0x2f   : > { %v2988_v29 = vpack.c.bf16 %v406_v22, %v403_v21  ;;  %v485_v35 = vand.u32 4294901760, %v2986_v28  ;;  %v421_v38 = vand.u32 4294901760, %v2995_v33  ;;  %v424_v39 = vand.u32 4294901760, %v2998_v34  ;;  %v3022_v41 = vld [vmem:[%s2973_s7 + $0x40] sm:$0xff]  ;;  %v3025_v42 = vld [vmem:[%s2973_s7 + $0x48] sm:$0xff]  ;;  %v3048_v51 = vld [vmem:[%s2973_s7 + $0x50] sm:$0xff] }
  0x30   : > { %v2992_v32 = vpack.c.bf16 %v412_v27, %v409_v24  ;;  %v3014_v37 = vpack.c.bf16 %v418_v31, %v415_v30  ;;  %v427_v49 = vand.u32 4294901760, %v3022_v41  ;;  %v430_v50 = vand.u32 4294901760, %v3025_v42  ;;  %v3051_v52 = vld [vmem:[%s2973_s7 + $0x58] sm:$0xff]  ;;  %3680 = vst [vmem:[#allocation7_spill] sm:$0xff] %v3054_v53  ;;  %3681 = vst [vmem:[#allocation8_spill] sm:$0xff] %v3062_v56  ;;  %v3077_v60 = vld [vmem:[%s2973_s7 + $0x60] sm:$0xff] }
  0x31   : > { %2525 = vmatprep.subr.bf16.mxu1 %v2988_v29  ;;  %2621 = vmatprep.subr.bf16.mxu0 %v2988_v29  ;;  %v486_v43 = vsub.f32 %v2986_v28, %v485_v35  ;;  %v3043_v48 = vpack.c.bf16 %v424_v39, %v421_v38  ;;  %v3642_v55 = vand.u32 4294901760, %v3048_v51  ;;  %v3641_v59 = vand.u32 4294901760, %v3051_v52  ;;  %v3080_v61 = vld [vmem:[%s2973_s7 + $0x68] sm:$0xff]  ;;  %v3083_v62 = vld [vmem:[%s2973_s7 + $0x70] sm:$0xff]  ;;  %v3090_v1 = vld [vmem:[%s2973_s7 + $0x78] sm:$0xff]  ;;  %3683 = vst [vmem:[#allocation10_spill] sm:$0xff] %v3096_v4 }
  0x32   : > { %2527 = vmatpush3.bf16.msra.mxu1 %v2988_v29  ;;  %2623 = vmatpush3.bf16.msra.mxu0 %v2988_v29  ;;  %v3073_v58 = vpack.c.bf16 %v430_v50, %v427_v49  ;;  %v3085_v63 = vsub.f32 %v386_v18, %v403_v21  ;;  %v3087_v0 = vsub.f32 %v387_v19, %v406_v22  ;;  %v3639_v3 = vand.u32 4294901760, %v3054_v53  ;;  %v376_v21 = vld [vmem:[%s3630_s0 + $0x30] sm:$0xff]  ;;  %s1993_s6 = sshll.u32 (%p2931_p6), %s2866_s14, 3 }
  0x33   : > { %2529 = vmatprep.subr.bf16.mxu1 %v2992_v32  ;;  %2625 = vmatprep.subr.bf16.mxu0 %v2992_v32  ;;  %v487_v45 = vand.u32 4294901760, %v486_v43  ;;  %3679 = vst [vmem:[#allocation6_spill] sm:$0xff] %v3043_v48  ;;  %v3092_v2 = vsub.f32 %v388_v20, %v409_v24  ;;  %v3098_v5 = vsub.f32 %v389_v23, %v412_v27  ;;  %v3637_v8 = vand.u32 4294901760, %v3077_v60  ;;  %s1789_s7 = scalar_lea.vmem (%p2931_p6), %s3633_s3, %s1993_s6 }
  0x34   : > { %2388 = vmatprep.mubr.f32.mxu0 %v485_v35  ;;  %3682 = vst [vmem:[#allocation9_spill] sm:$0xff] %v3073_v58  ;;  %v3634_v9 = vand.u32 4294901760, %v3080_v61  ;;  %v3636_v10 = vand.u32 4294901760, %v3083_v62  ;;  %v3638_v11 = vand.u32 4294901760, %v3062_v56  ;;  %v3117_v12 = vpack.c.bf16 %v3641_v59, %v3642_v55 }
  0x35   : > { %2220 = vmatprep.mubr.f32.mxu1 %v487_v45  ;;  %v3635_v13 = vand.u32 4294901760, %v3090_v1  ;;  %v646_v14 = vand.u32 4294901760, %v3085_v63  ;;  %v653_v15 = vand.u32 4294901760, %v3087_v0  ;;  %v660_v16 = vand.u32 4294901760, %v3092_v2 }
  0x36   : > { %2531 = vmatpush3.bf16.msra.mxu1 %v2992_v32  ;;  %2627 = vmatpush3.bf16.msra.mxu0 %v2992_v32  ;;  %3684 = vst [vmem:[#allocation11_spill] sm:$0xff] %v3117_v12  ;;  %v3123_v18 = vand.u32 4294901760, %v375_v7  ;;  %v3128_v19 = vsub.f32 %v2980_v25, %v415_v30  ;;  %v3133_v20 = vsub.f32 %v2983_v26, %v418_v31  ;;  %v667_v23 = vand.u32 4294901760, %v3098_v5  ;;  %v377_v30 = vld [vmem:[%s3630_s0 + $0x38] sm:$0xff] }
  0x37   : > { %2533 = vmatprep.subr.bf16.mxu1 %v3014_v37  ;;  %2629 = vmatprep.subr.bf16.mxu0 %v3014_v37  ;;  %v3141_v22 = vsub.f32 %v3054_v53, %v3639_v3  ;;  %v3150_v24 = vpack.c.bf16 %v3634_v9, %v3637_v8  ;;  %v3155_v25 = vsub.f32 %v3062_v56, %v3638_v11  ;;  %v3640_v26 = vand.u32 4294901760, %v3096_v4 }
  0x38   : > { %v3159_v27 = vsub.f32 %v374_v57, %v3100_v6  ;;  %v3170_v31 = vpack.c.bf16 %v3635_v13, %v3636_v10  ;;  %v647_v35 = vsub.f32 %v3085_v63, %v646_v14  ;;  %v654_v36 = vsub.f32 %v3087_v0, %v653_v15 }
  0x39   : > { %3685 = vst [vmem:[#allocation12_spill] sm:$0xff] %v3150_v24  ;;  %v3174_v40 = vand.u32 4294901760, %v376_v21  ;;  %v661_v43 = vsub.f32 %v3092_v2, %v660_v16  ;;  %v3178_v45 = vsub.f32 %v375_v7, %v3123_v18  ;;  %v3644_v47 = vand.u32 4294901760, %v3128_v19 }
  0x3a   : > { %2535 = vmatpush3.bf16.msra.mxu1 %v3014_v37  ;;  %2631 = vmatpush3.bf16.msra.mxu0 %v3014_v37  ;;  %3686 = vst [vmem:[#allocation13_spill] sm:$0xff] %v3159_v27  ;;  %3687 = vst [vmem:[#allocation14_spill] sm:$0xff] %v3170_v31  ;;  %v3643_v57 = vand.u32 4294901760, %v3133_v20  ;;  %v668_v13 = vsub.f32 %v3098_v5, %v667_v23  ;;  %v3184_v10 = vand.u32 4294901760, %v377_v30 }
  0x3b   : > { %2537 = vmatprep.subr.bf16.mxu1 %v3043_v48  ;;  %2633 = vmatprep.subr.bf16.mxu0 %v3043_v48  ;;  %3688 = vst [vmem:[#allocation15_spill] sm:$0xff] %v3178_v45  ;;  %v3189_v8 = vsub.f32 %v2995_v33, %v421_v38  ;;  %v3193_v7 = vpack.c.bf16 %v653_v15, %v646_v14  ;;  %v378_v33 = vld [vmem:[%s3630_s0 + $0x40] sm:$0xff]  ;;  %v648_v38 = vand.u32 4294901760, %v647_v35  ;;  %v655_v14 = vand.u32 4294901760, %v654_v36 }
  0x3c   : > { %3689 = vst [vmem:[#allocation16_spill] sm:$0xff] %v3184_v10  ;;  %v3199_v3 = vsub.f32 %v3096_v4, %v3640_v26  ;;  %v3204_v9 = vsub.f32 %v2998_v34, %v424_v39  ;;  %v3213_v26 = vsub.f32 %v376_v21, %v3174_v40  ;;  %v662_v11 = vand.u32 4294901760, %v661_v43  ;;  %v379_v21 = vld [vmem:[%s3630_s0 + $0x48] sm:$0xff] }
  0x3d   : > { %v675_v34 = vsub.f32 %v3128_v19, %v3644_v47  ;;  %v682_v39 = vsub.f32 %v3133_v20, %v3643_v57  ;;  %v669_v55 = vand.u32 4294901760, %v668_v13  ;;  %v3223_v35 = vsub.f32 %v377_v30, %v3184_v10 }
  0x3e   : > { %2539 = vmatpush3.bf16.msra.mxu1 %v3043_v48  ;;  %2635 = vmatpush3.bf16.msra.mxu0 %v3043_v48  ;;  %3690 = vst [vmem:[#allocation17_spill] sm:$0xff] %v3213_v26  ;;  %v3226_v15 = vand.u32 4294901760, %v378_v33  ;;  %v517_v43 = vand.u32 4294901760, %v3199_v3  ;;  %v695_v57 = vand.u32 4294901760, %v3204_v9  ;;  %v3238_v13 = vsub.f32 %v3022_v41, %v427_v49  ;;  %v380_v41 = vld [vmem:[%s3630_s0 + $0x50] sm:$0xff] }
  0x3f   : > { %2541 = vmatprep.subr.bf16.mxu1 %v3073_v58  ;;  %2637 = vmatprep.subr.bf16.mxu0 %v3073_v58  ;;  %3691 = vst [vmem:[#allocation18_spill] sm:$0xff] %v3223_v35  ;;  %v3243_v30 = vsub.f32 %v3025_v42, %v430_v50  ;;  %v2556_v47 = vpack.c.bf16 %v655_v14, %v648_v38  ;;  %v3693_v3 = vand.u32 4294901760, %v3159_v27  ;;  %v3694_v42 = vand.u32 4294901760, %v3178_v45 }
  0x40   : > { %3692 = vst [vmem:[#allocation19_spill] sm:$0xff] %v3226_v15  ;;  %v2656_v36 = vpack.c.bf16 %v667_v23, %v660_v16  ;;  %v676_v50 = vand.u32 4294901760, %v675_v34  ;;  %v3261_v38 = vand.u32 4294901760, %v379_v21  ;;  %v2560_v16 = vpack.c.bf16 %v669_v55, %v662_v11  ;;  %v381_v11 = vld [vmem:[%s3630_s0 + $0x58] sm:$0xff] }
  0x41   : > { %v3250_v59 = vsub.f32 %v3159_v27, %v3693_v3  ;;  %v3259_v49 = vsub.f32 %v3178_v45, %v3694_v42  ;;  %v3695_v14 = vand.u32 4294901760, %v3189_v8  ;;  %v3268_v28 = vsub.f32 %v378_v33, %v3226_v15 }
  0x42   : > { %2543 = vmatpush3.bf16.msra.mxu1 %v3073_v58  ;;  %2639 = vmatpush3.bf16.msra.mxu0 %v3073_v58  ;;  %v696_v42 = vsub.f32 %v3204_v9, %v695_v57  ;;  %v3275_v55 = vand.u32 4294901760, %v380_v41  ;;  %v3698_v34 = vand.u32 4294901760, %v3048_v51  ;;  %v3701_v10 = vand.u32 4294901760, %v3133_v20 }
  0x43   : > { %2545 = vmatprep.subr.bf16.mxu1 %v3117_v12  ;;  %2641 = vmatprep.subr.bf16.mxu0 %v3117_v12  ;;  %v689_v3 = vsub.f32 %v3189_v8, %v3695_v14  ;;  %v527_v33 = vand.u32 4294901760, %v3250_v59  ;;  %v3697_v14 = vand.u32 4294901760, %v3213_v26  ;;  %v537_v58 = vand.u32 4294901760, %v3259_v49 }
  0x44   : > { %3696 = vst [vmem:[#allocation20_spill] sm:$0xff] %v3275_v55  ;;  %v3700_v59 = vand.u32 4294901760, %v3128_v19 }
  0x45   : > { %v3285_v23 = vsub.f32 %v3213_v26, %v3697_v14  ;;  %v3303_v14 = vsub.f32 %v379_v21, %v3261_v38  ;;  %v690_v49 = vand.u32 4294901760, %v689_v3  ;;  %v3318_v21 = vand.u32 4294901760, %v381_v11  ;;  %v383_v3 = vld [vmem:[%s3630_s0 + $0x68] sm:$0xff] }
  0x46   : > { %2547 = vmatpush3.bf16.msra.mxu1 %v3117_v12  ;;  %2643 = vmatpush3.bf16.msra.mxu0 %v3117_v12  ;;  %v2660_v48 = vpack.c.bf16 %v3701_v10, %v3700_v59  ;;  %v384_v10 = vld [vmem:[%s3630_s0 + $0x70] sm:$0xff] }
  0x47   : > { %2549 = vmatprep.subr.bf16.mxu1 %v3150_v24  ;;  %2645 = vmatprep.subr.bf16.mxu0 %v3150_v24 }
  0x4a   : > { %2551 = vmatpush3.bf16.msra.mxu1 %v3150_v24  ;;  %2647 = vmatpush3.bf16.msra.mxu0 %v3150_v24  ;;  %v683_v24 = vand.u32 4294901760, %v682_v39  ;;  %v3290_v39 = vsub.f32 %v3048_v51, %v3698_v34  ;;  %v382_v51 = vld [vmem:[%s3630_s0 + $0x60] sm:$0xff]  ;;  %v3702_v34 = vand.u32 4294901760, %v3141_v22  ;;  %v3705_v22 = vand.u32 4294901760, %v3238_v13 }
  0x4b   : > { %2553 = vmatprep.subr.bf16.mxu1 %v3170_v31  ;;  %2649 = vmatprep.subr.bf16.mxu0 %v3170_v31 }
  0x4c   : > { %v2564_v15 = vpack.c.bf16 %v683_v24, %v676_v50  ;;  %v3704_v24 = vand.u32 4294901760, %v3223_v35  ;;  %v697_v50 = vand.u32 4294901760, %v696_v42  ;;  %v703_v59 = vsub.f32 %v3238_v13, %v3705_v22 }
  0x4d   : > { %v547_v42 = vand.u32 4294901760, %v3285_v23  ;;  %v3712_v23 = vand.u32 4294901760, %v3080_v61  ;;  %v3713_v22 = vand.u32 4294901760, %v3096_v4 }
  0x4e   : > { %2555 = vmatpush3.bf16.msra.mxu1 %v3170_v31  ;;  %2651 = vmatpush3.bf16.msra.mxu0 %v3170_v31  ;;  %v3699_v31 = vand.u32 4294901760, %v3051_v52 }
  0x4f   : > { %2557 = vmatprep.subr.bf16.mxu1 %v2556_v47  ;;  %2653 = vmatprep.subr.bf16.mxu0 %v3193_v7 }
  0x50   : > { %v3295_v12 = vsub.f32 %v3051_v52, %v3699_v31  ;;  %v3703_v52 = vand.u32 4294901760, %v3054_v53  ;;  %v3315_v31 = vsub.f32 %v3223_v35, %v3704_v24  ;;  %v3328_v24 = vsub.f32 %v380_v41, %v3275_v55 }
  0x51   : > { %2221 = vmatmul.mubr.f32.vlgmr.msra.gmra.mrb[0].mxu1 %v3702_v34  ;;  %v3706_v34 = vand.u32 4294901760, %v3243_v30  ;;  %v3710_v41 = vand.u32 4294901760, %v3189_v8  ;;  %v3367_v55 = vand.u32 4294901760, %v383_v3 }
  0x52   : > { %2389 = vmatmul.mubr.f32.vlgmr.msra.gmra.mrb[0].mxu0 %v3703_v52  ;;  %2559 = vmatpush3.bf16.msra.mxu1 %v2556_v47  ;;  %v3707_v47 = vand.u32 4294901760, %v3155_v25  ;;  %v3711_v25 = vand.u32 4294901760, %v3077_v60 }
  0x53   : > { %2655 = vmatpush3.bf16.msra.mxu0 %v3193_v7  ;;  %v710_v52 = vsub.f32 %v3243_v30, %v3706_v34  ;;  %v3708_v7 = vand.u32 4294901760, %v3062_v56  ;;  %v3340_v34 = vand.u32 4294901760, %v382_v51  ;;  %2561 = vmatprep.subr.bf16.mxu1 %v2560_v16  ;;  %v2664_v53 = vpack.c.bf16 %v695_v57, %v3710_v41  ;;  %3716 = vst [vmem:[#allocation23_spill] sm:$0xff] %v3367_v55 }
  0x54   : > { %2223 = vmatprep.mubr.f32.mxu1 %v3707_v47  ;;  %2657 = vmatprep.subr.bf16.mxu0 %v2656_v36  ;;  %v3348_v47 = vsub.f32 %v3077_v60, %v3711_v25  ;;  %v557_v57 = vand.u32 4294901760, %v3315_v31  ;;  %v3714_v41 = vand.u32 4294901760, %v3268_v28  ;;  %v3365_v25 = vsub.f32 %v381_v11, %v3318_v21  ;;  %v385_v31 = vld [vmem:[%s3630_s0 + $0x78] sm:$0xff] }
  0x55   : > { %2391 = vmatprep.mubr.f32.mxu0 %v3708_v7  ;;  %3709 = vst [vmem:[#allocation21_spill] sm:$0xff] %v3340_v34  ;;  %v3353_v7 = vsub.f32 %v3080_v61, %v3712_v23  ;;  %2224 = vmatmul.mubr.f32.gmra.mrb[2].mxu1 %v517_v43  ;;  %v2568_v61 = vpack.c.bf16 %v697_v50, %v690_v49  ;;  %v704_v23 = vand.u32 4294901760, %v703_v59  ;;  %v711_v56 = vand.u32 4294901760, %v710_v52 }
  0x56   : > { %2392 = vmatmul.mubr.f32.gmra.mrb[2].mxu0 %v3713_v22  ;;  %v566_v60 = vsub.f32 %v3268_v28, %v3714_v41  ;;  %3715 = vst [vmem:[#allocation22_spill] sm:$0xff] %v3365_v25  ;;  %2563 = vmatpush3.bf16.msra.mxu1 %v2560_v16  ;;  %v3717_v22 = vand.u32 4294901760, %v3159_v27  ;;  %v3718_v11 = vand.u32 4294901760, %v3290_v39  ;;  %v3719_v16 = vand.u32 4294901760, %v3295_v12 }
  0x57   : > { %2659 = vmatpush3.bf16.msra.mxu0 %v2656_v36  ;;  %2226 = vmatprep.mubr.f32.mxu1 %v527_v33  ;;  %v3382_v49 = vsub.f32 %v382_v51, %v3340_v34  ;;  %v3384_v50 = vand.u32 4294901760, %v384_v10  ;;  %v737_v59 = vand.u32 4294901760, %v3353_v7  ;;  %v3720_v52 = vand.u32 4294901760, %v3083_v62 }
  0x58   : > { %2394 = vmatprep.mubr.f32.mxu0 %v3717_v22  ;;  %v717_v41 = vsub.f32 %v3290_v39, %v3718_v11  ;;  %v724_v36 = vsub.f32 %v3295_v12, %v3719_v16  ;;  %2565 = vmatprep.subr.bf16.mxu1 %v2564_v15  ;;  %v3721_v11 = vand.u32 4294901760, %v3090_v1  ;;  %v3722_v51 = vand.u32 4294901760, %v3178_v45 }
  0x59   : > { %2661 = vmatprep.subr.bf16.mxu0 %v2660_v48  ;;  %v3391_v22 = vsub.f32 %v3083_v62, %v3720_v52  ;;  %2227 = vmatmul.mubr.f32.gmra.mrb[4].mxu1 %v537_v58  ;;  %v3723_v43 = vand.u32 4294901760, %v3303_v14  ;;  %v595_v27 = vand.u32 4294901760, %v3365_v25  ;;  %v3405_v4 = vsub.f32 %v383_v3, %v3367_v55 }
  0x5a   : > { %v3396_v16 = vsub.f32 %v3090_v1, %v3721_v11  ;;  %2395 = vmatmul.mubr.f32.gmra.mrb[4].mxu0 %v3722_v51  ;;  %v3407_v62 = vand.u32 4294901760, %v385_v31  ;;  %2567 = vmatpush3.bf16.msra.mxu1 %v2564_v15  ;;  %v567_v52 = vand.u32 4294901760, %v566_v60  ;;  %v2572_v1 = vpack.c.bf16 %v711_v56, %v704_v23 }
  0x5b   : > { %v576_v33 = vsub.f32 %v3303_v14, %v3723_v43  ;;  %3724 = vst [vmem:[#allocation24_spill] sm:$0xff] %v3405_v4  ;;  %2663 = vmatpush3.bf16.msra.mxu0 %v2660_v48  ;;  %v3726_v58 = vand.u32 4294901760, %v3238_v13  ;;  %v3727_v11 = vand.u32 4294901760, %v3243_v30  ;;  %v3728_v45 = vand.u32 4294901760, %v3328_v24  ;;  %2229 = vmatprep.mubr.f32.mxu1 %v547_v42 }
  0x5c   : > { %3725 = vst [vmem:[#allocation25_spill] sm:$0xff] %v3407_v62  ;;  %v3729_v34 = vand.u32 4294901760, %v3213_v26  ;;  %v718_v3 = vand.u32 4294901760, %v717_v41  ;;  %v725_v55 = vand.u32 4294901760, %v724_v36  ;;  %v605_v15 = vand.u32 4294901760, %v3382_v49  ;;  %2569 = vmatprep.subr.bf16.mxu1 %v2568_v61  ;;  %2665 = vmatprep.subr.bf16.mxu0 %v2664_v53 }
  0x5d   : > { %v2668_v51 = vpack.c.bf16 %v3727_v11, %v3726_v58  ;;  %v586_v43 = vsub.f32 %v3328_v24, %v3728_v45  ;;  %v3420_v48 = vsub.f32 %v384_v10, %v3384_v50  ;;  %v3730_v56 = vand.u32 4294901760, %v3348_v47  ;;  %2230 = vmatmul.mubr.f32.gmra.mrb[6].mxu1 %v557_v57 }
  0x5e   : > { %2397 = vmatprep.mubr.f32.mxu0 %v3729_v34  ;;  %v738_v23 = vsub.f32 %v3353_v7, %v737_v59  ;;  %v744_v45 = vand.u32 4294901760, %v3391_v22  ;;  %v751_v42 = vand.u32 4294901760, %v3396_v16  ;;  %v3731_v34 = vand.u32 4294901760, %v3223_v35  ;;  %2571 = vmatpush3.bf16.msra.mxu1 %v2568_v61 }
  0x5f   : > { %v731_v60 = vsub.f32 %v3348_v47, %v3730_v56  ;;  %v577_v41 = vand.u32 4294901760, %v576_v33  ;;  %v596_v10 = vsub.f32 %v3365_v25, %v595_v27  ;;  %v615_v36 = vand.u32 4294901760, %v3405_v4  ;;  %2667 = vmatpush3.bf16.msra.mxu0 %v2664_v53  ;;  %2232 = vmatprep.mubr.f32.mxu1 %v567_v52 }
  0x60   : > { %2398 = vmatmul.mubr.f32.gmra.mrb[6].mxu0 %v3731_v34  ;;  %v3433_v58 = vsub.f32 %v385_v31, %v3407_v62  ;;  %v3732_v11 = vand.u32 4294901760, %v3290_v39  ;;  %v3733_v56 = vand.u32 4294901760, %v3295_v12  ;;  %v3734_v57 = vand.u32 4294901760, %v3268_v28  ;;  %2573 = vmatprep.subr.bf16.mxu1 %v2572_v1 }
  0x61   : > { %v587_v34 = vand.u32 4294901760, %v586_v43  ;;  %v2576_v33 = vpack.c.bf16 %v725_v55, %v718_v3  ;;  %v606_v25 = vsub.f32 %v3382_v49, %v605_v15  ;;  %v625_v35 = vand.u32 4294901760, %v3420_v48  ;;  %2669 = vmatprep.subr.bf16.mxu0 %v2668_v51  ;;  %2233 = vmatmul.mubr.f32.gmra.mrb[8].mxu1 %v577_v41 }
  0x62   : > { %v2672_v26 = vpack.c.bf16 %v3733_v56, %v3732_v11  ;;  %2400 = vmatprep.mubr.f32.mxu0 %v3734_v57  ;;  %v732_v31 = vand.u32 4294901760, %v731_v60  ;;  %v739_v61 = vand.u32 4294901760, %v738_v23  ;;  %v745_v53 = vsub.f32 %v3391_v22, %v744_v45  ;;  %2575 = vmatpush3.bf16.msra.mxu1 %v2572_v1 }
  0x63   : > { %v752_v62 = vsub.f32 %v3396_v16, %v751_v42  ;;  %v3735_v52 = vand.u32 4294901760, %v3303_v14  ;;  %v597_v11 = vand.u32 4294901760, %v596_v10  ;;  %v616_v43 = vsub.f32 %v3405_v4, %v615_v36  ;;  %2671 = vmatpush3.bf16.msra.mxu0 %v2668_v51  ;;  %2235 = vmatprep.mubr.f32.mxu1 %v587_v34 }
  0x64   : > { %v635_v55 = vand.u32 4294901760, %v3433_v58  ;;  %v3736_v3 = vand.u32 4294901760, %v3328_v24  ;;  %v607_v60 = vand.u32 4294901760, %v606_v25  ;;  %v626_v23 = vsub.f32 %v3420_v48, %v625_v35  ;;  %2577 = vmatprep.subr.bf16.mxu1 %v2576_v33  ;;  %2673 = vmatprep.subr.bf16.mxu0 %v2672_v26 }
  0x65   : > { %2401 = vmatmul.mubr.f32.gmra.mrb[8].mxu0 %v3735_v52  ;;  %v2580_v41 = vpack.c.bf16 %v739_v61, %v732_v31  ;;  %v3737_v56 = vand.u32 4294901760, %v3348_v47  ;;  %v746_v10 = vand.u32 4294901760, %v745_v53  ;;  %v753_v52 = vand.u32 4294901760, %v752_v62  ;;  %2236 = vmatmul.mubr.f32.gmra.mrb[10].mxu1 %v597_v11  ;;  %v3754_v62 = vld [vmem:[#allocation15_spill] sm:$0xff] }
  0x66   : > { %2403 = vmatprep.mubr.f32.mxu0 %v3736_v3  ;;  %v617_v4 = vand.u32 4294901760, %v616_v43  ;;  %v636_v1 = vsub.f32 %v3433_v58, %v635_v55  ;;  %2579 = vmatpush3.bf16.msra.mxu1 %v2576_v33  ;;  %v627_v25 = vand.u32 4294901760, %v626_v23  ;;  %v2680_v34 = vpack.c.bf16 %v751_v42, %v744_v45 }
  0x67   : > { %v2676_v57 = vpack.c.bf16 %v737_v59, %v3737_v56  ;;  %2675 = vmatpush3.bf16.msra.mxu0 %v2672_v26  ;;  %2238 = vmatprep.mubr.f32.mxu1 %v607_v60  ;;  %v2584_v51 = vpack.c.bf16 %v753_v52, %v746_v10  ;;  %v3745_v26 = vld [vmem:[#allocation12_spill] sm:$0xff] }
  0x68   : > { %2581 = vmatprep.subr.bf16.mxu1 %v2580_v41  ;;  %v637_v31 = vand.u32 4294901760, %v636_v1  ;;  %v3751_v59 = vld [vmem:[#allocation8_spill] sm:$0xff] }
  0x69   : > { %2404 = vmatmul.mubr.f32.gmra.mrb[10].mxu0 %v595_v27  ;;  %2677 = vmatprep.subr.bf16.mxu0 %v2676_v57  ;;  %v2588_v27 = vpack.c.bf16 %v3087_v0, %v3085_v63  ;;  %v2596_v63 = vpack.c.bf16 %v3133_v20, %v3128_v19  ;;  %v2604_v0 = vpack.c.bf16 %v3243_v30, %v3238_v13  ;;  %v3743_v19 = vld [vmem:[#allocation11_spill] sm:$0xff]  ;;  %v3747_v30 = vld [vmem:[#allocation14_spill] sm:$0xff] }
  0x6a   : > { %2406 = vmatprep.mubr.f32.mxu0 %v605_v15  ;;  %2239 = vmatmul.mubr.f32.gmra.mrb[12].mxu1 %v617_v4  ;;  %v2592_v4 = vpack.c.bf16 %v3098_v5, %v3092_v2  ;;  %v3739_v2 = vld [vmem:[#allocation16_spill] sm:$0xff]  ;;  %v3740_v5 = vld [vmem:[#allocation19_spill] sm:$0xff]  ;;  %v2612_v20 = vpack.c.bf16 %v3353_v7, %v3348_v47  ;;  %v3749_v47 = vld [vmem:[#allocation5_spill] sm:$0xff] }
  0x6b   : > { %2583 = vmatpush3.bf16.msra.mxu1 %v2580_v41  ;;  %2679 = vmatpush3.bf16.msra.mxu0 %v2676_v57  ;;  %v3746_v13 = vld [vmem:[#allocation23_spill] sm:$0xff] }
  0x6c   : > { %2241 = vmatprep.mubr.f32.mxu1 %v627_v25  ;;  %2585 = vmatprep.subr.bf16.mxu1 %v2584_v51  ;;  %v3750_v7 = vld [vmem:[#allocation7_spill] sm:$0xff] }
  0x6d   : > { %2407 = vmatmul.mubr.f32.gmra.mrb[12].mxu0 %v615_v36  ;;  %2681 = vmatprep.subr.bf16.mxu0 %v2680_v34 }
  0x6e   : > { %2409 = vmatprep.mubr.f32.mxu0 %v625_v35  ;;  %2242 = vmatmul.mubr.f32.gmra.mrb[14].mxu1 %v637_v31  ;;  %v2616_v35 = vpack.c.bf16 %v3396_v16, %v3391_v22  ;;  %v3752_v22 = vld [vmem:[#allocation10_spill] sm:$0xff]  ;;  %v3753_v16 = vld [vmem:[#allocation13_spill] sm:$0xff] }
  0x6f   : > { %2587 = vmatpush3.bf16.msra.mxu1 %v2584_v51  ;;  %2683 = vmatpush3.bf16.msra.mxu0 %v2680_v34 }
  0x70   : > { %2276 = vmatprep.mubr.f32.mxu1 %v2970_v17  ;;  %2589 = vmatprep.subr.bf16.mxu1 %v2588_v27 }
  0x71   : > { %2410 = vmatmul.mubr.f32.gmra.mrb[14].mxu0 %v635_v55  ;;  %2685 = vmatprep.subr.bf16.mxu0 %v2988_v29 }
  0x72   : > { %2444 = vmatprep.mubr.f32.mxu0 %v2970_v17  ;;  %2277 = vmatmul.mubr.f32.vlgmr.msra.gmra.mrb[0].mxu1 %v3028_v44 }
  0x73   : > { %2591 = vmatpush3.bf16.msra.mxu1 %v2588_v27  ;;  %2279 = vmatprep.mubr.f32.mxu1 %v3032_v46 }
  0x74   : > { %2593 = vmatprep.subr.bf16.mxu1 %v2592_v4 }
  0x75   : > { %2445 = vmatmul.mubr.f32.vlgmr.msra.gmra.mrb[0].mxu0 %v3028_v44 }
  0x76   : > { %2687 = vmatpush3.bf16.msra.mxu0 %v2988_v29  ;;  %2447 = vmatprep.mubr.f32.mxu0 %v3032_v46  ;;  %v2600_v29 = vpack.c.bf16 %v3204_v9, %v3189_v8  ;;  %v2608_v8 = vpack.c.bf16 %v3295_v12, %v3290_v39  ;;  %v3742_v9 = vld [vmem:[#allocation20_spill] sm:$0xff]  ;;  %v3744_v12 = vld [vmem:[#allocation21_spill] sm:$0xff] }
  0x77   : > { %2689 = vmatprep.subr.bf16.mxu0 %v2992_v32  ;;  %2280 = vmatmul.mubr.f32.gmra.mrb[2].mxu1 %v3056_v54  ;;  %v3748_v39 = vld [vmem:[#allocation25_spill] sm:$0xff] }
  0x78   : > { %2595 = vmatpush3.bf16.msra.mxu1 %v2592_v4  ;;  %2282 = vmatprep.mubr.f32.mxu1 %v3100_v6 }
  0x79   : > { %2448 = vmatmul.mubr.f32.gmra.mrb[2].mxu0 %v3056_v54  ;;  %2597 = vmatprep.subr.bf16.mxu1 %v2596_v63 }
  0x7a   : > { %2691 = vmatpush3.bf16.msra.mxu0 %v2992_v32  ;;  %2450 = vmatprep.mubr.f32.mxu0 %v3100_v6  ;;  %v3738_v32 = vld [vmem:[#allocation6_spill] sm:$0xff] }
  0x7b   : > { %2693 = vmatprep.subr.bf16.mxu0 %v3014_v37  ;;  %2283 = vmatmul.mubr.f32.gmra.mrb[4].mxu1 %v3123_v18 }
  0x7c   : > { %2599 = vmatpush3.bf16.msra.mxu1 %v2596_v63  ;;  %2285 = vmatprep.mubr.f32.mxu1 %v3174_v40 }
  0x7d   : > { %2451 = vmatmul.mubr.f32.gmra.mrb[4].mxu0 %v3123_v18  ;;  %2601 = vmatprep.subr.bf16.mxu1 %v2600_v29 }
  0x7e   : > { %2695 = vmatpush3.bf16.msra.mxu0 %v3014_v37  ;;  %2453 = vmatprep.mubr.f32.mxu0 %v3174_v40  ;;  %v3741_v37 = vld [vmem:[#allocation9_spill] sm:$0xff] }
  0x7f   : > { %2697 = vmatprep.subr.bf16.mxu0 %v3738_v32  ;;  %2286 = vmatmul.mubr.f32.gmra.mrb[6].mxu1 %v3739_v2 }
  0x80   : > { %2603 = vmatpush3.bf16.msra.mxu1 %v2600_v29  ;;  %2288 = vmatprep.mubr.f32.mxu1 %v3740_v5 }
  0x81   : > { %2454 = vmatmul.mubr.f32.gmra.mrb[6].mxu0 %v3739_v2  ;;  %2605 = vmatprep.subr.bf16.mxu1 %v2604_v0 }
  0x82   : > { %2699 = vmatpush3.bf16.msra.mxu0 %v3738_v32  ;;  %2456 = vmatprep.mubr.f32.mxu0 %v3740_v5 }
  0x83   : > { %2701 = vmatprep.subr.bf16.mxu0 %v3741_v37  ;;  %2289 = vmatmul.mubr.f32.gmra.mrb[8].mxu1 %v3261_v38 }
  0x84   : > { %2607 = vmatpush3.bf16.msra.mxu1 %v2604_v0  ;;  %2291 = vmatprep.mubr.f32.mxu1 %v3742_v9 }
  0x85   : > { %2457 = vmatmul.mubr.f32.gmra.mrb[8].mxu0 %v3261_v38  ;;  %2609 = vmatprep.subr.bf16.mxu1 %v2608_v8 }
  0x86   : > { %2703 = vmatpush3.bf16.msra.mxu0 %v3741_v37  ;;  %2459 = vmatprep.mubr.f32.mxu0 %v3742_v9 }
  0x87   : > { %2705 = vmatprep.subr.bf16.mxu0 %v3743_v19  ;;  %2292 = vmatmul.mubr.f32.gmra.mrb[10].mxu1 %v3318_v21 }
  0x88   : > { %2611 = vmatpush3.bf16.msra.mxu1 %v2608_v8  ;;  %2294 = vmatprep.mubr.f32.mxu1 %v3744_v12 }
  0x89   : > { %2460 = vmatmul.mubr.f32.gmra.mrb[10].mxu0 %v3318_v21  ;;  %2613 = vmatprep.subr.bf16.mxu1 %v2612_v20 }
  0x8a   : > { %2707 = vmatpush3.bf16.msra.mxu0 %v3743_v19  ;;  %2462 = vmatprep.mubr.f32.mxu0 %v3744_v12 }
  0x8b   : > { %2709 = vmatprep.subr.bf16.mxu0 %v3745_v26  ;;  %2295 = vmatmul.mubr.f32.gmra.mrb[12].mxu1 %v3746_v13 }
  0x8c   : > { %2615 = vmatpush3.bf16.msra.mxu1 %v2612_v20  ;;  %2297 = vmatprep.mubr.f32.mxu1 %v3384_v50 }
  0x8d   : > { %2463 = vmatmul.mubr.f32.gmra.mrb[12].mxu0 %v3746_v13  ;;  %2617 = vmatprep.subr.bf16.mxu1 %v2616_v35 }
  0x8e   : > { %2711 = vmatpush3.bf16.msra.mxu0 %v3745_v26  ;;  %2465 = vmatprep.mubr.f32.mxu0 %v3384_v50 }
  0x8f   : > { %2713 = vmatprep.subr.bf16.mxu0 %v3747_v30  ;;  %2298 = vmatmul.mubr.f32.gmra.mrb[14].mxu1 %v3748_v39 }
  0x90   : > { %2619 = vmatpush3.bf16.msra.mxu1 %v2616_v35  ;;  %2332 = vmatprep.mubr.f32.mxu1 %v3749_v47 }
  0x91   : > { %2466 = vmatmul.mubr.f32.gmra.mrb[14].mxu0 %v3748_v39 }
  0x92   : > { %2715 = vmatpush3.bf16.msra.mxu0 %v3747_v30  ;;  %2500 = vmatprep.mubr.f32.mxu0 %v2970_v17  ;;  %v3755_v17 = vld [vmem:[#allocation17_spill] sm:$0xff] }
  0x93   : > { %2333 = vmatmul.mubr.f32.vlgmr.msra.gmra.mrb[0].mxu1 %v3750_v7 }
  0x94   : > { %2335 = vmatprep.mubr.f32.mxu1 %v3751_v59 }
  0x95   : > { %2501 = vmatmul.mubr.f32.vlgmr.msra.gmra.mrb[0].mxu0 %v3028_v44  ;;  %v3756_v44 = vld [vmem:[#allocation18_spill] sm:$0xff] }
  0x96   : > { %2503 = vmatprep.mubr.f32.mxu0 %v3032_v46  ;;  %v3757_v46 = vld [vmem:[#allocation22_spill] sm:$0xff] }
  0x97   : > { %2336 = vmatmul.mubr.f32.gmra.mrb[2].mxu1 %v3752_v22 }
  0x98   : > { %2338 = vmatprep.mubr.f32.mxu1 %v3753_v16 }
  0x99   : > { %2504 = vmatmul.mubr.f32.gmra.mrb[2].mxu0 %v3056_v54 }
  0x9a   : > { %2506 = vmatprep.mubr.f32.mxu0 %v3100_v6 }
  0x9b   : > { %2339 = vmatmul.mubr.f32.gmra.mrb[4].mxu1 %v3754_v62 }
  0x9c   : > { %2341 = vmatprep.mubr.f32.mxu1 %v3755_v17 }
  0x9d   : > { %2507 = vmatmul.mubr.f32.gmra.mrb[4].mxu0 %v3123_v18  ;;  %v3556_v18 = vld [vmem:[%s332_s29] ss:$0 sm:$0xff] }
  0x9e   : > { %2509 = vmatprep.mubr.f32.mxu0 %v3174_v40 }
  0x9f   : > { %2342 = vmatmul.mubr.f32.gmra.mrb[6].mxu1 %v3756_v44 }
  0xa0   : > { %2344 = vmatprep.mubr.f32.mxu1 %v3268_v28  ;;  %v3758_v28 = vld [vmem:[#allocation24_spill] sm:$0xff] }
  0xa1   : > { %2510 = vmatmul.mubr.f32.gmra.mrb[6].mxu0 %v3739_v2 }
  0xa2   : > { %2512 = vmatprep.mubr.f32.mxu0 %v3740_v5 }
  0xa3   : > { %2345 = vmatmul.mubr.f32.gmra.mrb[8].mxu1 %v3303_v14 }
  0xa4   : > { %2347 = vmatprep.mubr.f32.mxu1 %v3328_v24 }
  0xa5   : > { %2513 = vmatmul.mubr.f32.gmra.mrb[8].mxu0 %v3261_v38 }
  0xa6   : > { %2515 = vmatprep.mubr.f32.mxu0 %v3742_v9 }
  0xa7   : > { %2348 = vmatmul.mubr.f32.gmra.mrb[10].mxu1 %v3757_v46 }
  0xa8   : > { %2350 = vmatprep.mubr.f32.mxu1 %v3382_v49 }
  0xa9   : > { %2516 = vmatmul.mubr.f32.gmra.mrb[10].mxu0 %v3318_v21 }
  0xaa   : > { %2518 = vmatprep.mubr.f32.mxu0 %v3744_v12 }
  0xab   : > { %2351 = vmatmul.mubr.f32.gmra.mrb[12].mxu1 %v3758_v28 }
  0xac   : > { %2353 = vmatprep.mubr.f32.mxu1 %v3420_v48 }
  0xad   : > { %2519 = vmatmul.mubr.f32.gmra.mrb[12].mxu0 %v3746_v13 }
  0xae   : > { %2521 = vmatprep.mubr.f32.mxu0 %v3384_v50 }
  0xaf   : > { %2354 = vmatmul.mubr.f32.gmra.mrb[14].mxu1 %v3433_v58 }
  0xb1   : > { %2522 = vmatmul.mubr.f32.gmra.mrb[14].mxu0 %v3748_v39 }
 0x166   : > { %v2334_v54 = vpop.f32.mrb[0].mxu1 }
 0x167   : > { %v984_v38 = vpop.f32.mrb[1].mxu1 }
 0x168   : > { %v2502_v6 = vpop.f32.mrb[0].mxu0 }
 0x169   : > { %v2716_v40 = vadd.f32 %v2502_v6, %v2334_v54  ;;  %v1594_v14 = vpop.f32.mrb[1].mxu0 }
 0x16a   : > { %v2717_v21 = vadd.f32 %v1594_v14, %v984_v38  ;;  %v2337_v50 = vpop.f32.mrb[2].mxu1 }
 0x16b   : > { %v1747_v24 = vadd.f32 %v2716_v40, %v3556_v18  ;;  %v998_v45 = vpop.f32.mrb[3].mxu1 }
 0x16c   : > { %v1746_v49 = vadd.f32 %v2717_v21, %v3556_v18  ;;  %v2505_v15 = vpop.f32.mrb[2].mxu0 }
 0x16d   : > { %1763 = vst [vmem:[%s3561_s30 + $0x8] sm:$0xff] %v1747_v24  ;;  %v2718_v48 = vadd.f32 %v2505_v15, %v2337_v50  ;;  %v1606_v42 = vpop.f32.mrb[3].mxu0 }
 0x16e   : > { %1762 = vst [vmem:[%s3561_s30] sm:$0xff] %v1746_v49  ;;  %v2719_v36 = vadd.f32 %v1606_v42, %v998_v45  ;;  %v2340_v61 = vpop.f32.mrb[4].mxu1 }
 0x16f   : > { %v1749_v58 = vadd.f32 %v2718_v48, %v3556_v18  ;;  %v1012_v43 = vpop.f32.mrb[5].mxu1 }
 0x170   : > { %v1748_v33 = vadd.f32 %v2719_v36, %v3556_v18  ;;  %v2508_v53 = vpop.f32.mrb[4].mxu0 }
 0x171   : > { %1765 = vst [vmem:[%s3561_s30 + $0x18] sm:$0xff] %v1749_v58  ;;  %v2720_v11 = vadd.f32 %v2508_v53, %v2340_v61  ;;  %v1618_v55 = vpop.f32.mrb[5].mxu0 }
 0x172   : > { %1764 = vst [vmem:[%s3561_s30 + $0x10] sm:$0xff] %v1748_v33  ;;  %v2721_v3 = vadd.f32 %v1618_v55, %v1012_v43  ;;  %v2343_v41 = vpop.f32.mrb[6].mxu1 }
 0x173   : > { %v1751_v60 = vadd.f32 %v2720_v11, %v3556_v18  ;;  %v1026_v10 = vpop.f32.mrb[7].mxu1 }
 0x174   : > { %v1750_v23 = vadd.f32 %v2721_v3, %v3556_v18  ;;  %v2511_v56 = vpop.f32.mrb[6].mxu0  ;;  %v1849_v40 = vld [vmem:[%s3561_s30 + $0x8] sm:$0xff] (%p2931_p6) }
 0x175   : > { %1767 = vst [vmem:[%s3561_s30 + $0x28] sm:$0xff] %v1751_v60  ;;  %v2722_v57 = vadd.f32 %v2511_v56, %v2343_v41  ;;  %v1630_v52 = vpop.f32.mrb[7].mxu0  ;;  %v1847_v6 = vld [vmem:[%s3561_s30] sm:$0xff] (%p2931_p6)  ;;  %1850 = vst [vmem:[%s1789_s7 + $0x10] sm:$0xff] (%p2931_p6), %v1849_v40 }
 0x176   : > { %1766 = vst [vmem:[%s3561_s30 + $0x20] sm:$0xff] %v1750_v23  ;;  %v2723_v1 = vadd.f32 %v1630_v52, %v1026_v10  ;;  %v2346_v34 = vpop.f32.mrb[8].mxu1  ;;  %1848 = vst [vmem:[%s1789_s7] sm:$0xff] (%p2931_p6), %v1847_v6 }
 0x177   : > { %v1753_v25 = vadd.f32 %v2722_v57, %v3556_v18  ;;  %v1040_v4 = vpop.f32.mrb[9].mxu1 }
 0x178   : > { %v1752_v51 = vadd.f32 %v2723_v1, %v3556_v18  ;;  %v2514_v31 = vpop.f32.mrb[8].mxu0 }
 0x179   : > { %1769 = vst [vmem:[%s3561_s30 + $0x38] sm:$0xff] %v1753_v25  ;;  %v2724_v27 = vadd.f32 %v2514_v31, %v2346_v34  ;;  %v1642_v63 = vpop.f32.mrb[9].mxu0  ;;  %v1851_v38 = vld [vmem:[%s3561_s30 + $0x10] sm:$0xff] (%p2931_p6) }
 0x17a   : > { %1768 = vst [vmem:[%s3561_s30 + $0x30] sm:$0xff] %v1752_v51  ;;  %v2725_v29 = vadd.f32 %v1642_v63, %v1040_v4  ;;  %v2349_v2 = vpop.f32.mrb[10].mxu1  ;;  %1852 = vst [vmem:[%s1789_s7 + $0x20] sm:$0xff] (%p2931_p6), %v1851_v38 }
 0x17b   : > { %v1755_v32 = vadd.f32 %v2724_v27, %v3556_v18  ;;  %v1054_v8 = vpop.f32.mrb[11].mxu1 }
 0x17c   : > { %v1754_v0 = vadd.f32 %v2725_v29, %v3556_v18  ;;  %v2517_v5 = vpop.f32.mrb[10].mxu0  ;;  %v1857_v21 = vld [vmem:[%s3561_s30 + $0x28] sm:$0xff] (%p2931_p6) }
 0x17d   : > { %1771 = vst [vmem:[%s3561_s30 + $0x48] sm:$0xff] %v1755_v32  ;;  %v2726_v37 = vadd.f32 %v2517_v5, %v2349_v2  ;;  %v1654_v9 = vpop.f32.mrb[11].mxu0  ;;  %v1855_v14 = vld [vmem:[%s3561_s30 + $0x20] sm:$0xff] (%p2931_p6)  ;;  %1858 = vst [vmem:[%s1789_s7 + $0x50] sm:$0xff] (%p2931_p6), %v1857_v21 }
 0x17e   : > { %1770 = vst [vmem:[%s3561_s30 + $0x40] sm:$0xff] %v1754_v0  ;;  %v2727_v19 = vadd.f32 %v1654_v9, %v1054_v8  ;;  %v2352_v26 = vpop.f32.mrb[12].mxu1  ;;  %1856 = vst [vmem:[%s1789_s7 + $0x40] sm:$0xff] (%p2931_p6), %v1855_v14 }
 0x17f   : > { %v1757_v20 = vadd.f32 %v2726_v37, %v3556_v18  ;;  %v1068_v30 = vpop.f32.mrb[13].mxu1 }
 0x180   : > { %v1756_v12 = vadd.f32 %v2727_v19, %v3556_v18  ;;  %v2520_v35 = vpop.f32.mrb[12].mxu0  ;;  %v1861_v49 = vld [vmem:[%s3561_s30 + $0x38] sm:$0xff] (%p2931_p6) }
 0x181   : > { %1773 = vst [vmem:[%s3561_s30 + $0x58] sm:$0xff] %v1757_v20  ;;  %v2728_v13 = vadd.f32 %v2520_v35, %v2352_v26  ;;  %v1666_v39 = vpop.f32.mrb[13].mxu0  ;;  %v1859_v24 = vld [vmem:[%s3561_s30 + $0x30] sm:$0xff] (%p2931_p6)  ;;  %1862 = vst [vmem:[%s1789_s7 + $0x70] sm:$0xff] (%p2931_p6), %v1861_v49 }
 0x182   : > { %1772 = vst [vmem:[%s3561_s30 + $0x50] sm:$0xff] %v1756_v12  ;;  %v2729_v47 = vadd.f32 %v1666_v39, %v1068_v30  ;;  %v2355_v22 = vpop.f32.mrb[14].mxu1  ;;  %1860 = vst [vmem:[%s1789_s7 + $0x60] sm:$0xff] (%p2931_p6), %v1859_v24 }
 0x183   : > { %v1759_v7 = vadd.f32 %v2728_v13, %v3556_v18  ;;  %v1082_v17 = vpop.f32.mrb[15].mxu1 }
 0x184   : > { %v1758_v59 = vadd.f32 %v2729_v47, %v3556_v18  ;;  %v2523_v16 = vpop.f32.mrb[14].mxu0  ;;  %1784 = sbr.rel (!%p2931_p6) target bundleno = 403 (0x193), region = 82  ;;  %v1865_v15 = vld [vmem:[%s3561_s30 + $0x48] sm:$0xff] (%p2931_p6) }
 0x185   : > { %1775 = vst [vmem:[%s3561_s30 + $0x68] sm:$0xff] %v1759_v7  ;;  %v2730_v62 = vadd.f32 %v2523_v16, %v2355_v22  ;;  %v1678_v44 = vpop.f32.mrb[15].mxu0  ;;  %v1863_v50 = vld [vmem:[%s3561_s30 + $0x40] sm:$0xff] (%p2931_p6)  ;;  %1866 = vst [vmem:[%s1789_s7 + $0x90] sm:$0xff] (%p2931_p6), %v1865_v15 }
 0x186   : > { %1774 = vst [vmem:[%s3561_s30 + $0x60] sm:$0xff] %v1758_v59  ;;  %v2731_v46 = vadd.f32 %v1678_v44, %v1082_v17  ;;  %1864 = vst [vmem:[%s1789_s7 + $0x80] sm:$0xff] (%p2931_p6), %v1863_v50 }
 0x187   : > { %v1761_v28 = vadd.f32 %v2730_v62, %v3556_v18 }
 0x188   : > { %v1760_v54 = vadd.f32 %v2731_v46, %v3556_v18  ;;  %v1853_v18 = vld [vmem:[%s3561_s30 + $0x18] sm:$0xff] (%p2931_p6) }
 0x189   : > { %1777 = vst [vmem:[%s3561_s30 + $0x78] sm:$0xff] %v1761_v28  ;;  %1854 = vst [vmem:[%s1789_s7 + $0x30] sm:$0xff] (%p2931_p6), %v1853_v18  ;;  %v1867_v48 = vld [vmem:[%s3561_s30 + $0x50] sm:$0xff] (%p2931_p6)  ;;  %v1869_v45 = vld [vmem:[%s3561_s30 + $0x58] sm:$0xff] (%p2931_p6) }
 0x18a   : > { %1776 = vst [vmem:[%s3561_s30 + $0x70] sm:$0xff] %v1760_v54  ;;  %1868 = vst [vmem:[%s1789_s7 + $0xa0] sm:$0xff] (%p2931_p6), %v1867_v48 }
 0x18b   : > { %1870 = vst [vmem:[%s1789_s7 + $0xb0] sm:$0xff] %v1869_v45 }
 0x18c   : > { %v1873_v36 = vld [vmem:[%s3561_s30 + $0x68] sm:$0xff] }
 0x18d   : > { %v1871_v42 = vld [vmem:[%s3561_s30 + $0x60] sm:$0xff]  ;;  %1874 = vst [vmem:[%s1789_s7 + $0xd0] sm:$0xff] %v1873_v36 }
 0x18e   : > { %1872 = vst [vmem:[%s1789_s7 + $0xc0] sm:$0xff] %v1871_v42 }
 0x190   : > { %v1877_v33 = vld [vmem:[%s3561_s30 + $0x78] sm:$0xff] }
 0x191   : > { %v1875_v58 = vld [vmem:[%s3561_s30 + $0x70] sm:$0xff]  ;;  %1878 = vst [vmem:[%s1789_s7 + $0xf0] sm:$0xff] %v1877_v33 }
 0x192   : > { %1876 = vst [vmem:[%s1789_s7 + $0xe0] sm:$0xff] %v1875_v58 }
 0x193 PF: > { %s13_s16 = sadd.s32 1, %s2874_s16   ;;  %s3759_s12 = smov %s2862_s13 }
 0x194   : > { %p10_p12 = scmp.ge.s32.totalorder %s13_s16, 4   ;;  %s3760_s13 = smov %s2936_s22 }
 0x195   : > { %s3761_s14 = smov %s2870_s15  ;;  %s3762_s15 = smov %s3764_s17 }
 0x196   :  { %12 = sbr.rel (!%p10_p12) target bundleno = 3 (0x3), region = 157 }

// kernel: stage_block_forward.26
= control target key start
LH: loop header
LB: loop body
LE: loop exit
PB: predicated region body
PF: predicated region fallthrough
CT: control target
= control target key end

     0   :  { %s502_s12 = smov 0   ;;  %s693_s0 = inlined_call_operand.vmem [shape: f32[2,1,64], index: 0, kind: input, shape index: {}]   ;;  %s694_s1 = inlined_call_operand.vmem [shape: f32[2,256,64], index: 1, kind: input, shape index: {}]   ;;  %s695_s2 = inlined_call_operand.vmem [shape: f32[2,256,64], index: 2, kind: input, shape index: {}]   ;;  %s696_s3 = inlined_call_operand.vmem [shape: f32[2,256,64], index: 3, kind: output, shape index: {}]  }
   0x1 LB: > { %s449_s13 = sadd.s32 4294967295, %s480_s12   ;;  %p453_p0 = scmp.ge.s32.totalorder %s480_s12, 1  ;;  %s480_s12 = sphi %s502_s12, %s13_s12  }
   0x2   : > { %p155_p1 = scmp.lt.s32.totalorder %s480_s12, 3 }
   0x4   : > { %p156_p2 = pnand %p453_p0, %p155_p1 }
   0x5   : > { %p187_p3 = scmp.lt.s32.totalorder (!%p156_p2), %s449_s13, 1  ;;  %vm340_vm0 = vcmask (!%p156_p2), 523264  }
   0x6   : > { %159 = sbr.rel (%p156_p2) target bundleno = 44 (0x2c), region = 32 }
   0xd   : > { %s698_s13 = smov (!%p187_p3, %s449_s13), 1 }
   0xe   : > { %s189_s16 = scalar_lea.vmem %s693_s0, %s698_s13  ;;  %s463_s17 = sshll.u32 %s698_s13, 8 }
   0xf   : > { %s516_s20 = scalar_lea.vmem %s694_s1, %s463_s17  ;;  %s521_s23 = scalar_lea.vmem %s695_s2, %s463_s17  ;;  %v523_v0 = vld [vmem:[%s189_s16] ss:$0 sm:$0xff] }
  0x10   : > { %v206_v1 = vld [vmem:[%s516_s20] sm:$0xff]  ;;  %v207_v3 = vld [vmem:[%s516_s20 + $0x8] sm:$0xff]  ;;  %v208_v7 = vld [vmem:[%s516_s20 + $0x10] sm:$0xff]  ;;  %s536_s26 = scalar_lea.vmem %s696_s3, %s463_s17 }
  0x11   : > { %v238_v2 = vld [vmem:[%s521_s23] sm:$0xff]  ;;  %v276_v4 = vmul.f32 %v523_v0, %v206_v1  ;;  %v239_v5 = vld [vmem:[%s521_s23 + $0x8] sm:$0xff]  ;;  %v277_v6 = vmul.f32 %v523_v0, %v207_v3  ;;  %v240_v8 = vld [vmem:[%s521_s23 + $0x10] sm:$0xff]  ;;  %v278_v9 = vmul.f32 %v523_v0, %v208_v7 }
  0x12   : > { %v209_v10 = vld [vmem:[%s516_s20 + $0x18] sm:$0xff]  ;;  %v210_v12 = vld [vmem:[%s516_s20 + $0x20] sm:$0xff]  ;;  %v211_v18 = vld [vmem:[%s516_s20 + $0x28] sm:$0xff] }
  0x13   : > { %v241_v11 = vld [vmem:[%s521_s23 + $0x18] sm:$0xff]  ;;  %v308_v13 = vadd.f32 %v276_v4, %v238_v2  ;;  %v309_v14 = vadd.f32 %v277_v6, %v239_v5  ;;  %v279_v15 = vmul.f32 %v523_v0, %v209_v10  ;;  %v242_v16 = vld [vmem:[%s521_s23 + $0x20] sm:$0xff]  ;;  %v280_v17 = vmul.f32 %v523_v0, %v210_v12  ;;  %v243_v19 = vld [vmem:[%s521_s23 + $0x28] sm:$0xff] }
  0x14   : > { %v310_v20 = vadd.f32 %v278_v9, %v240_v8  ;;  %v281_v21 = vmul.f32 %v523_v0, %v211_v18  ;;  %v212_v22 = vld [vmem:[%s516_s20 + $0x30] sm:$0xff]  ;;  %v213_v24 = vld [vmem:[%s516_s20 + $0x38] sm:$0xff]  ;;  %v214_v30 = vld [vmem:[%s516_s20 + $0x40] sm:$0xff] }
  0x15   : > { %v244_v23 = vld [vmem:[%s521_s23 + $0x30] sm:$0xff]  ;;  %341 = vst.msk [vmem:[%s536_s26] sm:$0xff] %vm340_vm0, %v308_v13  ;;  %342 = vst.msk [vmem:[%s536_s26 + $0x8] sm:$0xff] %vm340_vm0, %v309_v14  ;;  %v311_v25 = vadd.f32 %v279_v15, %v241_v11  ;;  %v312_v26 = vadd.f32 %v280_v17, %v242_v16  ;;  %v282_v27 = vmul.f32 %v523_v0, %v212_v22  ;;  %v245_v28 = vld [vmem:[%s521_s23 + $0x38] sm:$0xff] }
  0x16   : > { %v283_v29 = vmul.f32 %v523_v0, %v213_v24  ;;  %v246_v31 = vld [vmem:[%s521_s23 + $0x40] sm:$0xff]  ;;  %343 = vst.msk [vmem:[%s536_s26 + $0x10] sm:$0xff] %vm340_vm0, %v310_v20  ;;  %v313_v32 = vadd.f32 %v281_v21, %v243_v19  ;;  %v284_v33 = vmul.f32 %v523_v0, %v214_v30  ;;  %v215_v34 = vld [vmem:[%s516_s20 + $0x48] sm:$0xff]  ;;  %v216_v36 = vld [vmem:[%s516_s20 + $0x50] sm:$0xff] }
  0x17   : > { %v247_v35 = vld [vmem:[%s521_s23 + $0x48] sm:$0xff]  ;;  %344 = vst.msk [vmem:[%s536_s26 + $0x18] sm:$0xff] %vm340_vm0, %v311_v25  ;;  %345 = vst.msk [vmem:[%s536_s26 + $0x20] sm:$0xff] %vm340_vm0, %v312_v26  ;;  %v314_v37 = vadd.f32 %v282_v27, %v244_v23  ;;  %v285_v39 = vmul.f32 %v523_v0, %v215_v34  ;;  %v248_v40 = vld [vmem:[%s521_s23 + $0x50] sm:$0xff]  ;;  %v286_v41 = vmul.f32 %v523_v0, %v216_v36 }
  0x18   : > { %v315_v38 = vadd.f32 %v283_v29, %v245_v28  ;;  %v217_v42 = vld [vmem:[%s516_s20 + $0x58] sm:$0xff]  ;;  %346 = vst.msk [vmem:[%s536_s26 + $0x28] sm:$0xff] %vm340_vm0, %v313_v32  ;;  %v316_v44 = vadd.f32 %v284_v33, %v246_v31  ;;  %v218_v46 = vld [vmem:[%s516_s20 + $0x60] sm:$0xff]  ;;  %v219_v48 = vld [vmem:[%s516_s20 + $0x68] sm:$0xff] }
  0x19   : > { %v249_v43 = vld [vmem:[%s521_s23 + $0x58] sm:$0xff]  ;;  %v287_v45 = vmul.f32 %v523_v0, %v217_v42  ;;  %v250_v47 = vld [vmem:[%s521_s23 + $0x60] sm:$0xff]  ;;  %347 = vst.msk [vmem:[%s536_s26 + $0x30] sm:$0xff] %vm340_vm0, %v314_v37  ;;  %v317_v49 = vadd.f32 %v285_v39, %v247_v35  ;;  %v318_v50 = vadd.f32 %v286_v41, %v248_v40  ;;  %v288_v51 = vmul.f32 %v523_v0, %v218_v46  ;;  %v251_v52 = vld [vmem:[%s521_s23 + $0x68] sm:$0xff] }
  0x1a   : > { %348 = vst.msk [vmem:[%s536_s26 + $0x38] sm:$0xff] %vm340_vm0, %v315_v38  ;;  %v289_v53 = vmul.f32 %v523_v0, %v219_v48  ;;  %v220_v54 = vld [vmem:[%s516_s20 + $0x70] sm:$0xff]  ;;  %349 = vst.msk [vmem:[%s536_s26 + $0x40] sm:$0xff] %vm340_vm0, %v316_v44  ;;  %v221_v58 = vld [vmem:[%s516_s20 + $0x78] sm:$0xff] }
  0x1b   : > { %v252_v55 = vld [vmem:[%s521_s23 + $0x70] sm:$0xff]  ;;  %v319_v56 = vadd.f32 %v287_v45, %v249_v43  ;;  %v290_v57 = vmul.f32 %v523_v0, %v220_v54  ;;  %v253_v59 = vld [vmem:[%s521_s23 + $0x78] sm:$0xff]  ;;  %v222_v60 = vld [vmem:[%s516_s20 + $0x80] sm:$0xff]  ;;  %350 = vst.msk [vmem:[%s536_s26 + $0x48] sm:$0xff] %vm340_vm0, %v317_v49  ;;  %v320_v61 = vadd.f32 %v288_v51, %v250_v47  ;;  %v291_v63 = vmul.f32 %v523_v0, %v221_v58 }
  0x1c   : > { %351 = vst.msk [vmem:[%s536_s26 + $0x50] sm:$0xff] %vm340_vm0, %v318_v50  ;;  %v321_v62 = vadd.f32 %v289_v53, %v251_v52  ;;  %v254_v1 = vld [vmem:[%s521_s23 + $0x80] sm:$0xff]  ;;  %v292_v2 = vmul.f32 %v523_v0, %v222_v60  ;;  %v223_v3 = vld [vmem:[%s516_s20 + $0x88] sm:$0xff]  ;;  %v224_v7 = vld [vmem:[%s516_s20 + $0x90] sm:$0xff] }
  0x1d   : > { %v255_v4 = vld [vmem:[%s521_s23 + $0x88] sm:$0xff]  ;;  %352 = vst.msk [vmem:[%s536_s26 + $0x58] sm:$0xff] %vm340_vm0, %v319_v56  ;;  %v322_v5 = vadd.f32 %v290_v57, %v252_v55  ;;  %v293_v6 = vmul.f32 %v523_v0, %v223_v3  ;;  %v256_v8 = vld [vmem:[%s521_s23 + $0x90] sm:$0xff]  ;;  %v225_v9 = vld [vmem:[%s516_s20 + $0x98] sm:$0xff]  ;;  %v323_v10 = vadd.f32 %v291_v63, %v253_v59  ;;  %v294_v12 = vmul.f32 %v523_v0, %v224_v7 }
  0x1e   : > { %353 = vst.msk [vmem:[%s536_s26 + $0x60] sm:$0xff] %vm340_vm0, %v320_v61  ;;  %354 = vst.msk [vmem:[%s536_s26 + $0x68] sm:$0xff] %vm340_vm0, %v321_v62  ;;  %v324_v11 = vadd.f32 %v292_v2, %v254_v1  ;;  %v257_v13 = vld [vmem:[%s521_s23 + $0x98] sm:$0xff]  ;;  %v295_v14 = vmul.f32 %v523_v0, %v225_v9  ;;  %v226_v15 = vld [vmem:[%s516_s20 + $0xa0] sm:$0xff] }
  0x1f   : > { %v258_v16 = vld [vmem:[%s521_s23 + $0xa0] sm:$0xff]  ;;  %355 = vst.msk [vmem:[%s536_s26 + $0x70] sm:$0xff] %vm340_vm0, %v322_v5  ;;  %v325_v17 = vadd.f32 %v293_v6, %v255_v4  ;;  %v296_v18 = vmul.f32 %v523_v0, %v226_v15  ;;  %v227_v19 = vld [vmem:[%s516_s20 + $0xa8] sm:$0xff]  ;;  %v228_v21 = vld [vmem:[%s516_s20 + $0xb0] sm:$0xff]  ;;  %v326_v22 = vadd.f32 %v294_v12, %v256_v8 }
  0x20   : > { %v259_v20 = vld [vmem:[%s521_s23 + $0xa8] sm:$0xff]  ;;  %356 = vst.msk [vmem:[%s536_s26 + $0x78] sm:$0xff] %vm340_vm0, %v323_v10  ;;  %357 = vst.msk [vmem:[%s536_s26 + $0x80] sm:$0xff] %vm340_vm0, %v324_v11  ;;  %v327_v23 = vadd.f32 %v295_v14, %v257_v13  ;;  %v297_v24 = vmul.f32 %v523_v0, %v227_v19  ;;  %v260_v25 = vld [vmem:[%s521_s23 + $0xb0] sm:$0xff]  ;;  %v298_v26 = vmul.f32 %v523_v0, %v228_v21 }
  0x21   : > { %v229_v27 = vld [vmem:[%s516_s20 + $0xb8] sm:$0xff]  ;;  %358 = vst.msk [vmem:[%s536_s26 + $0x88] sm:$0xff] %vm340_vm0, %v325_v17  ;;  %v328_v29 = vadd.f32 %v296_v18, %v258_v16  ;;  %v230_v31 = vld [vmem:[%s516_s20 + $0xc0] sm:$0xff]  ;;  %v231_v33 = vld [vmem:[%s516_s20 + $0xc8] sm:$0xff] }
  0x22   : > { %v261_v28 = vld [vmem:[%s521_s23 + $0xb8] sm:$0xff]  ;;  %v299_v30 = vmul.f32 %v523_v0, %v229_v27  ;;  %v262_v32 = vld [vmem:[%s521_s23 + $0xc0] sm:$0xff]  ;;  %359 = vst.msk [vmem:[%s536_s26 + $0x90] sm:$0xff] %vm340_vm0, %v326_v22  ;;  %360 = vst.msk [vmem:[%s536_s26 + $0x98] sm:$0xff] %vm340_vm0, %v327_v23  ;;  %v329_v34 = vadd.f32 %v297_v24, %v259_v20  ;;  %v330_v35 = vadd.f32 %v298_v26, %v260_v25 }
  0x23   : > { %v300_v36 = vmul.f32 %v523_v0, %v230_v31  ;;  %v263_v37 = vld [vmem:[%s521_s23 + $0xc8] sm:$0xff]  ;;  %v301_v38 = vmul.f32 %v523_v0, %v231_v33  ;;  %v232_v39 = vld [vmem:[%s516_s20 + $0xd0] sm:$0xff]  ;;  %361 = vst.msk [vmem:[%s536_s26 + $0xa0] sm:$0xff] %vm340_vm0, %v328_v29  ;;  %v233_v43 = vld [vmem:[%s516_s20 + $0xd8] sm:$0xff] }
  0x24   : > { %v264_v40 = vld [vmem:[%s521_s23 + $0xd0] sm:$0xff]  ;;  %v331_v41 = vadd.f32 %v299_v30, %v261_v28  ;;  %v302_v42 = vmul.f32 %v523_v0, %v232_v39  ;;  %v265_v44 = vld [vmem:[%s521_s23 + $0xd8] sm:$0xff]  ;;  %v234_v45 = vld [vmem:[%s516_s20 + $0xe0] sm:$0xff]  ;;  %362 = vst.msk [vmem:[%s536_s26 + $0xa8] sm:$0xff] %vm340_vm0, %v329_v34  ;;  %v303_v48 = vmul.f32 %v523_v0, %v233_v43 }
  0x25   : > { %363 = vst.msk [vmem:[%s536_s26 + $0xb0] sm:$0xff] %vm340_vm0, %v330_v35  ;;  %v332_v46 = vadd.f32 %v300_v36, %v262_v32  ;;  %v333_v47 = vadd.f32 %v301_v38, %v263_v37  ;;  %v266_v49 = vld [vmem:[%s521_s23 + $0xe0] sm:$0xff]  ;;  %v304_v50 = vmul.f32 %v523_v0, %v234_v45  ;;  %v235_v51 = vld [vmem:[%s516_s20 + $0xe8] sm:$0xff]  ;;  %v236_v55 = vld [vmem:[%s516_s20 + $0xf0] sm:$0xff] }
  0x26   : > { %v267_v52 = vld [vmem:[%s521_s23 + $0xe8] sm:$0xff]  ;;  %364 = vst.msk [vmem:[%s536_s26 + $0xb8] sm:$0xff] %vm340_vm0, %v331_v41  ;;  %v334_v53 = vadd.f32 %v302_v42, %v264_v40  ;;  %v305_v54 = vmul.f32 %v523_v0, %v235_v51  ;;  %v268_v56 = vld [vmem:[%s521_s23 + $0xf0] sm:$0xff]  ;;  %v237_v57 = vld [vmem:[%s516_s20 + $0xf8] sm:$0xff]  ;;  %v335_v58 = vadd.f32 %v303_v48, %v265_v44  ;;  %v306_v60 = vmul.f32 %v523_v0, %v236_v55 }
  0x27   : > { %365 = vst.msk [vmem:[%s536_s26 + $0xc0] sm:$0xff] %vm340_vm0, %v332_v46  ;;  %366 = vst.msk [vmem:[%s536_s26 + $0xc8] sm:$0xff] %vm340_vm0, %v333_v47  ;;  %v336_v59 = vadd.f32 %v304_v50, %v266_v49  ;;  %v269_v61 = vld [vmem:[%s521_s23 + $0xf8] sm:$0xff]  ;;  %v307_v62 = vmul.f32 %v523_v0, %v237_v57 }
  0x28   : > { %367 = vst.msk [vmem:[%s536_s26 + $0xd0] sm:$0xff] %vm340_vm0, %v334_v53  ;;  %v337_v63 = vadd.f32 %v305_v54, %v267_v52  ;;  %368 = vst.msk [vmem:[%s536_s26 + $0xd8] sm:$0xff] %vm340_vm0, %v335_v58  ;;  %v338_v1 = vadd.f32 %v306_v60, %v268_v56 }
  0x29   : > { %369 = vst.msk [vmem:[%s536_s26 + $0xe0] sm:$0xff] %vm340_vm0, %v336_v59  ;;  %v339_v2 = vadd.f32 %v307_v62, %v269_v61 }
  0x2a   : > { %370 = vst.msk [vmem:[%s536_s26 + $0xe8] sm:$0xff] %vm340_vm0, %v337_v63  ;;  %371 = vst.msk [vmem:[%s536_s26 + $0xf0] sm:$0xff] %vm340_vm0, %v338_v1 }
  0x2b   : > { %372 = vst.msk [vmem:[%s536_s26 + $0xf8] sm:$0xff] %vm340_vm0, %v339_v2 }
  0x2c PF: > { %s13_s12 = sadd.s32 1, %s480_s12  }
  0x2d   : > { %p10_p4 = scmp.ge.s32.totalorder %s13_s12, 4  }
  0x2f   :  { %12 = sbr.rel (!%p10_p4) target bundleno = 1 (0x1), region = 68 }

// kernel: stage_block_forward.24
= control target key start
LH: loop header
LB: loop body
LE: loop exit
PB: predicated region body
PF: predicated region fallthrough
CT: control target
= control target key end

     0   :  { %s2973_s1 = inlined_call_operand.vmem [shape: f32[128,128], index: 1, kind: input, shape index: {}]   ;;  %s2974_s0 = inlined_call_operand.vmem [shape: f32[128,128], index: 0, kind: input, shape index: {}]   ;;  %s2975_s2 = inlined_call_operand.vmem [shape: f32[1,128], index: 2, kind: input, shape index: {}]   ;;  %s2976_s3 = inlined_call_operand.vmem [shape: f32[128,128], index: 3, kind: output, shape index: {}]  }
   0x1   :  { %v66_v0 = vld [vmem:[%s2973_s1] sm:$0xff]  ;;  %v67_v1 = vld [vmem:[%s2973_s1 + $0x8] sm:$0xff]  ;;  %v68_v2 = vld [vmem:[%s2973_s1 + $0x10] sm:$0xff] }
   0x2   :  { %v83_v3 = vand.u32 4294901760, %v66_v0  ;;  %v86_v4 = vand.u32 4294901760, %v67_v1  ;;  %v69_v5 = vld [vmem:[%s2973_s1 + $0x18] sm:$0xff]  ;;  %v89_v6 = vand.u32 4294901760, %v68_v2  ;;  %v2314_v7 = vld [vmem:[%s2973_s1 + $0x20] sm:$0xff]  ;;  %v2319_v8 = vld [vmem:[%s2973_s1 + $0x28] sm:$0xff] }
   0x3   :  { %v92_v9 = vand.u32 4294901760, %v69_v5  ;;  %v95_v11 = vand.u32 4294901760, %v2314_v7  ;;  %v98_v12 = vand.u32 4294901760, %v2319_v8  ;;  %v2330_v14 = vld [vmem:[%s2973_s1 + $0x30] sm:$0xff]  ;;  %v2335_v15 = vld [vmem:[%s2973_s1 + $0x38] sm:$0xff]  ;;  %v50_v16 = vld [vmem:[%s2974_s0] sm:$0xff] }
   0x4   :  { %v2321_v10 = vpack.c.bf16 %v86_v4, %v83_v3  ;;  %v2344_v17 = vand.u32 4294901760, %v50_v16  ;;  %v101_v19 = vand.u32 4294901760, %v2330_v14  ;;  %v104_v20 = vand.u32 4294901760, %v2335_v15  ;;  %v51_v21 = vld [vmem:[%s2974_s0 + $0x8] sm:$0xff]  ;;  %v2362_v22 = vld [vmem:[%s2973_s1 + $0x40] sm:$0xff]  ;;  %v2390_v30 = vld [vmem:[%s2973_s1 + $0x50] sm:$0xff] }
   0x5   :  { %v2325_v13 = vpack.c.bf16 %v92_v9, %v89_v6  ;;  %v2352_v18 = vpack.c.bf16 %v98_v12, %v95_v11  ;;  %v2367_v23 = vld [vmem:[%s2973_s1 + $0x48] sm:$0xff]  ;;  %v2375_v26 = vand.u32 4294901760, %v51_v21  ;;  %v2987_v28 = vand.u32 4294901760, %v2362_v22  ;;  %v52_v31 = vld [vmem:[%s2974_s0 + $0x10] sm:$0xff]  ;;  %v2398_v32 = vld [vmem:[%s2973_s1 + $0x58] sm:$0xff] }
   0x6   :  { %2008 = vmatprep.subr.bf16.mxu1 %v2321_v10  ;;  %2104 = vmatprep.subr.bf16.mxu0 %v2321_v10  ;;  %v2370_v24 = vsub.f32 %v50_v16, %v2344_v17  ;;  %v2383_v27 = vpack.c.bf16 %v104_v20, %v101_v19  ;;  %v2985_v29 = vand.u32 4294901760, %v2367_v23  ;;  %v53_v34 = vld [vmem:[%s2974_s0 + $0x18] sm:$0xff]  ;;  %v2404_v35 = vsub.f32 %v66_v0, %v83_v3  ;;  %v2414_v38 = vld [vmem:[%s2973_s1 + $0x60] sm:$0xff]  ;;  %v2419_v39 = vld [vmem:[%s2973_s1 + $0x68] sm:$0xff] }
   0x7   :  { %2010 = vmatpush3.bf16.msra.mxu1 %v2321_v10  ;;  %2106 = vmatpush3.bf16.msra.mxu0 %v2321_v10  ;;  %v2406_v36 = vsub.f32 %v67_v1, %v86_v4  ;;  %v2984_v37 = vand.u32 4294901760, %v2390_v30  ;;  %v2422_v41 = vsub.f32 %v51_v21, %v2375_v26  ;;  %v2424_v42 = vand.u32 4294901760, %v52_v31  ;;  %v2438_v45 = vld [vmem:[%s2973_s1 + $0x70] sm:$0xff]  ;;  %v2443_v46 = vld [vmem:[%s2973_s1 + $0x78] sm:$0xff]  ;;  %v54_v50 = vld [vmem:[%s2974_s0 + $0x20] sm:$0xff] }
   0x8   :  { %2012 = vmatprep.subr.bf16.mxu1 %v2325_v13  ;;  %2108 = vmatprep.subr.bf16.mxu0 %v2325_v13  ;;  %3020 = vst [vmem:[#allocation3_spill] sm:$0xff] %v2370_v24  ;;  %v165_v25 = vand.u32 4294901760, %v2370_v24  ;;  %3021 = vst [vmem:[#allocation4_spill] sm:$0xff] %v2383_v27  ;;  %v2432_v43 = vpack.c.bf16 %v2985_v29, %v2987_v28  ;;  %v2982_v44 = vand.u32 4294901760, %v2398_v32  ;;  %v2445_v47 = vand.u32 4294901760, %v53_v34  ;;  %v55_v55 = vld [vmem:[%s2974_s0 + $0x28] sm:$0xff] }
   0x9   :  { %3022 = vst [vmem:[#allocation5_spill] sm:$0xff] %v2422_v41  ;;  %v2447_v48 = vsub.f32 %v68_v2, %v89_v6  ;;  %v2449_v49 = vsub.f32 %v69_v5, %v92_v9  ;;  %v2980_v51 = vand.u32 4294901760, %v2414_v38  ;;  %v2979_v52 = vand.u32 4294901760, %v2419_v39  ;;  %v56_v2 = vld [vmem:[%s2974_s0 + $0x30] sm:$0xff]  ;;  %v57_v9 = vld [vmem:[%s2974_s0 + $0x38] sm:$0xff] }
   0xa   :  { %v166_v33 = vsub.f32 %v2370_v24, %v165_v25  ;;  %1871 = vmatprep.mubr.f32.mxu0 %v165_v25  ;;  %3023 = vst [vmem:[#allocation6_spill] sm:$0xff] %v2432_v43  ;;  %v326_v53 = vand.u32 4294901760, %v2404_v35  ;;  %v333_v54 = vand.u32 4294901760, %v2406_v36  ;;  %v2978_v56 = vand.u32 4294901760, %v2438_v45 }
   0xb   :  { %2014 = vmatpush3.bf16.msra.mxu1 %v2325_v13  ;;  %2110 = vmatpush3.bf16.msra.mxu0 %v2325_v13  ;;  %v2977_v57 = vand.u32 4294901760, %v2443_v46  ;;  %v2981_v58 = vand.u32 4294901760, %v2422_v41  ;;  %v2467_v59 = vsub.f32 %v52_v31, %v2424_v42  ;;  %v2475_v60 = vpack.c.bf16 %v2982_v44, %v2984_v37 }
   0xc   :  { %2016 = vmatprep.subr.bf16.mxu1 %v2352_v18  ;;  %2112 = vmatprep.subr.bf16.mxu0 %v2352_v18  ;;  %v167_v40 = vand.u32 4294901760, %v166_v33  ;;  %v2478_v61 = vsub.f32 %v53_v34, %v2445_v47  ;;  %v340_v62 = vand.u32 4294901760, %v2447_v48  ;;  %v2481_v63 = vand.u32 4294901760, %v54_v50 }
   0xd   :  { %3024 = vst [vmem:[#allocation7_spill] sm:$0xff] %v2467_v59  ;;  %3025 = vst [vmem:[#allocation8_spill] sm:$0xff] %v2475_v60  ;;  %v347_v0 = vand.u32 4294901760, %v2449_v49  ;;  %v2484_v1 = vand.u32 4294901760, %v55_v55  ;;  %v327_v3 = vsub.f32 %v2404_v35, %v326_v53  ;;  %v334_v4 = vsub.f32 %v2406_v36, %v333_v54 }
   0xe   :  { %1703 = vmatprep.mubr.f32.mxu1 %v167_v40  ;;  %3026 = vst [vmem:[#allocation9_spill] sm:$0xff] %v2478_v61  ;;  %v2494_v5 = vsub.f32 %v2314_v7, %v95_v11  ;;  %v2499_v6 = vsub.f32 %v2319_v8, %v98_v12  ;;  %v2510_v16 = vpack.c.bf16 %v2979_v52, %v2980_v51  ;;  %v2983_v11 = vand.u32 4294901760, %v2467_v59 }
   0xf   :  { %2018 = vmatpush3.bf16.msra.mxu1 %v2352_v18  ;;  %2114 = vmatpush3.bf16.msra.mxu0 %v2352_v18  ;;  %v2516_v7 = vpack.c.bf16 %v2977_v57, %v2978_v56  ;;  %v2521_v8 = vsub.f32 %v2422_v41, %v2981_v58  ;;  %v2986_v12 = vand.u32 4294901760, %v2478_v61  ;;  %v341_v21 = vsub.f32 %v2447_v48, %v340_v62 }
  0x10   :  { %2020 = vmatprep.subr.bf16.mxu1 %v2383_v27  ;;  %2116 = vmatprep.subr.bf16.mxu0 %v2383_v27  ;;  %3027 = vst [vmem:[#allocation10_spill] sm:$0xff] %v2510_v16  ;;  %v2529_v25 = vsub.f32 %v54_v50, %v2481_v63  ;;  %v2531_v31 = vand.u32 4294901760, %v56_v2  ;;  %v348_v33 = vsub.f32 %v2449_v49, %v347_v0  ;;  %v2537_v40 = vand.u32 4294901760, %v57_v9 }
  0x11   :  { %3028 = vst [vmem:[#allocation11_spill] sm:$0xff] %v2516_v7  ;;  %v2535_v34 = vsub.f32 %v55_v55, %v2484_v1  ;;  %v2542_v57 = vsub.f32 %v2330_v14, %v101_v19  ;;  %v328_v56 = vand.u32 4294901760, %v327_v3  ;;  %v335_v52 = vand.u32 4294901760, %v334_v4  ;;  %v58_v19 = vld [vmem:[%s2974_s0 + $0x40] sm:$0xff] }
  0x12   :  { %3029 = vst [vmem:[#allocation12_spill] sm:$0xff] %v2529_v25  ;;  %3030 = vst [vmem:[#allocation13_spill] sm:$0xff] %v2531_v31  ;;  %v354_v51 = vand.u32 4294901760, %v2494_v5  ;;  %v361_v50 = vand.u32 4294901760, %v2499_v6  ;;  %v177_v55 = vand.u32 4294901760, %v2521_v8  ;;  %v2549_v58 = vpack.c.bf16 %v333_v54, %v326_v53 }
  0x13   :  { %2022 = vmatpush3.bf16.msra.mxu1 %v2383_v27  ;;  %2118 = vmatpush3.bf16.msra.mxu0 %v2383_v27  ;;  %3031 = vst [vmem:[#allocation14_spill] sm:$0xff] %v2535_v34  ;;  %3032 = vst [vmem:[#allocation15_spill] sm:$0xff] %v2537_v40  ;;  %v2554_v44 = vsub.f32 %v2467_v59, %v2983_v11  ;;  %v2559_v14 = vsub.f32 %v2335_v15, %v104_v20  ;;  %v342_v54 = vand.u32 4294901760, %v341_v21 }
  0x14   :  { %2024 = vmatprep.subr.bf16.mxu1 %v2432_v43  ;;  %2120 = vmatprep.subr.bf16.mxu0 %v2432_v43  ;;  %v2569_v53 = vsub.f32 %v2478_v61, %v2986_v12  ;;  %v2991_v3 = vand.u32 4294901760, %v2529_v25  ;;  %v2573_v4 = vsub.f32 %v56_v2, %v2531_v31  ;;  %v349_v15 = vand.u32 4294901760, %v348_v33 }
  0x15   :  { %v2577_v8 = vsub.f32 %v57_v9, %v2537_v40  ;;  %v2039_v37 = vpack.c.bf16 %v335_v52, %v328_v56  ;;  %v355_v29 = vsub.f32 %v2494_v5, %v354_v51  ;;  %v362_v12 = vsub.f32 %v2499_v6, %v361_v50  ;;  %v59_v9 = vld [vmem:[%s2974_s0 + $0x48] sm:$0xff] }
  0x16   :  { %3033 = vst [vmem:[#allocation16_spill] sm:$0xff] %v2573_v4  ;;  %v2582_v28 = vand.u32 4294901760, %v58_v19  ;;  %v187_v2 = vand.u32 4294901760, %v2554_v44  ;;  %v375_v21 = vand.u32 4294901760, %v2559_v14  ;;  %v3036_v52 = vand.u32 4294901760, %v2362_v22 }
  0x17   :  { %2026 = vmatpush3.bf16.msra.mxu1 %v2432_v43  ;;  %2122 = vmatpush3.bf16.msra.mxu0 %v2432_v43  ;;  %3034 = vst [vmem:[#allocation17_spill] sm:$0xff] %v2577_v8  ;;  %v3037_v33 = vand.u32 4294901760, %v2367_v23  ;;  %v197_v44 = vand.u32 4294901760, %v2569_v53  ;;  %v2139_v20 = vpack.c.bf16 %v347_v0, %v340_v62  ;;  %v2607_v24 = vsub.f32 %v2529_v25, %v2991_v3 }
  0x18   :  { %2028 = vmatprep.subr.bf16.mxu1 %v2475_v60  ;;  %2124 = vmatprep.subr.bf16.mxu0 %v2475_v60  ;;  %3035 = vst [vmem:[#allocation18_spill] sm:$0xff] %v2582_v28  ;;  %v2594_v56 = vsub.f32 %v2362_v22, %v3036_v52  ;;  %v60_v52 = vld [vmem:[%s2974_s0 + $0x50] sm:$0xff]  ;;  %v3039_v62 = vand.u32 4294901760, %v2542_v57  ;;  %v356_v3 = vand.u32 4294901760, %v355_v29  ;;  %v2623_v22 = vsub.f32 %v58_v19, %v2582_v28  ;;  %v61_v29 = vld [vmem:[%s2974_s0 + $0x58] sm:$0xff] }
  0x19   :  { %v2599_v11 = vsub.f32 %v2367_v23, %v3037_v33  ;;  %v2043_v23 = vpack.c.bf16 %v349_v15, %v342_v54  ;;  %v3038_v33 = vand.u32 4294901760, %v2535_v34  ;;  %v2625_v43 = vand.u32 4294901760, %v59_v9 }
  0x1a   :  { %v369_v0 = vsub.f32 %v2542_v57, %v3039_v62  ;;  %v376_v54 = vsub.f32 %v2559_v14, %v375_v21  ;;  %v2632_v53 = vand.u32 4294901760, %v60_v52  ;;  %v2639_v19 = vpack.c.bf16 %v361_v50, %v354_v51 }
  0x1b   :  { %2030 = vmatpush3.bf16.msra.mxu1 %v2475_v60  ;;  %2126 = vmatpush3.bf16.msra.mxu0 %v2475_v60  ;;  %v363_v60 = vand.u32 4294901760, %v362_v12  ;;  %v207_v12 = vand.u32 4294901760, %v2607_v24  ;;  %v3040_v62 = vand.u32 4294901760, %v2573_v4  ;;  %v3042_v40 = vand.u32 4294901760, %v2577_v8 }
  0x1c   :  { %2032 = vmatprep.subr.bf16.mxu1 %v2510_v16  ;;  %2128 = vmatprep.subr.bf16.mxu0 %v2510_v16  ;;  %v370_v24 = vand.u32 4294901760, %v369_v0  ;;  %v3043_v51 = vand.u32 4294901760, %v2398_v32  ;;  %v2671_v0 = vand.u32 4294901760, %v61_v29 }
  0x1d   :  { %v2655_v27 = vsub.f32 %v2577_v8, %v3042_v40  ;;  %v2669_v40 = vsub.f32 %v59_v9, %v2625_v43 }
  0x1e   :  { %v2660_v50 = vsub.f32 %v2398_v32, %v3043_v51  ;;  %v377_v32 = vand.u32 4294901760, %v376_v54  ;;  %v3045_v51 = vand.u32 4294901760, %v2594_v56 }
  0x1f   :  { %2034 = vmatpush3.bf16.msra.mxu1 %v2510_v16  ;;  %2130 = vmatpush3.bf16.msra.mxu0 %v2510_v16  ;;  %v2616_v16 = vsub.f32 %v2535_v34, %v3038_v33  ;;  %v3041_v33 = vand.u32 4294901760, %v2390_v30 }
  0x20   :  { %2036 = vmatprep.subr.bf16.mxu1 %v2516_v7  ;;  %2132 = vmatprep.subr.bf16.mxu0 %v2516_v7  ;;  %v383_v31 = vsub.f32 %v2594_v56, %v3045_v51  ;;  %v3048_v51 = vand.u32 4294901760, %v2414_v38 }
  0x21   :  { %v2649_v15 = vsub.f32 %v2390_v30, %v3041_v33  ;;  %v217_v28 = vand.u32 4294901760, %v2616_v16  ;;  %v3044_v30 = vand.u32 4294901760, %v2422_v41  ;;  %v2047_v16 = vpack.c.bf16 %v363_v60, %v356_v3  ;;  %v63_v3 = vld [vmem:[%s2974_s0 + $0x68] sm:$0xff] }
  0x22   :  { %v2681_v60 = vsub.f32 %v60_v52, %v2632_v53  ;;  %v237_v52 = vand.u32 4294901760, %v2655_v27  ;;  %v3052_v27 = vand.u32 4294901760, %v2623_v22 }
  0x23   :  { %2038 = vmatpush3.bf16.msra.mxu1 %v2516_v7  ;;  %2134 = vmatpush3.bf16.msra.mxu0 %v2516_v7  ;;  %v2644_v7 = vsub.f32 %v2573_v4, %v3040_v62  ;;  %v62_v62 = vld [vmem:[%s2974_s0 + $0x60] sm:$0xff] }
  0x24   :  { %2040 = vmatprep.subr.bf16.mxu1 %v2039_v37  ;;  %2136 = vmatprep.subr.bf16.mxu0 %v2549_v58  ;;  %v2690_v54 = vand.u32 4294901760, %v62_v62 }
  0x26   :  { %1704 = vmatmul.mubr.f32.vlgmr.msra.gmra.mrb[0].mxu1 %v177_v55  ;;  %1872 = vmatmul.mubr.f32.vlgmr.msra.gmra.mrb[0].mxu0 %v3044_v30  ;;  %v3046_v55 = vand.u32 4294901760, %v2599_v11 }
  0x27   :  { %2042 = vmatpush3.bf16.msra.mxu1 %v2039_v37  ;;  %2138 = vmatpush3.bf16.msra.mxu0 %v2549_v58  ;;  %v3047_v37 = vand.u32 4294901760, %v2467_v59  ;;  %v227_v58 = vand.u32 4294901760, %v2644_v7  ;;  %v3050_v7 = vand.u32 4294901760, %v2419_v39  ;;  %v64_v59 = vld [vmem:[%s2974_s0 + $0x70] sm:$0xff] }
  0x28   :  { %v390_v30 = vsub.f32 %v2599_v11, %v3046_v55  ;;  %1706 = vmatprep.mubr.f32.mxu1 %v187_v2  ;;  %v2695_v55 = vsub.f32 %v2414_v38, %v3048_v51  ;;  %2044 = vmatprep.subr.bf16.mxu1 %v2043_v23  ;;  %v3049_v2 = vand.u32 4294901760, %v2542_v57  ;;  %v3051_v38 = vand.u32 4294901760, %v2478_v61 }
  0x29   :  { %1874 = vmatprep.mubr.f32.mxu0 %v3047_v37  ;;  %2140 = vmatprep.subr.bf16.mxu0 %v2139_v20  ;;  %v2704_v9 = vsub.f32 %v2419_v39, %v3050_v7  ;;  %v246_v51 = vsub.f32 %v2623_v22, %v3052_v27  ;;  %v2718_v37 = vand.u32 4294901760, %v63_v3  ;;  %v2051_v39 = vpack.c.bf16 %v377_v32, %v370_v24 }
  0x2a   :  { %v2147_v33 = vpack.c.bf16 %v375_v21, %v3049_v2  ;;  %1707 = vmatmul.mubr.f32.gmra.mrb[2].mxu1 %v197_v44  ;;  %1875 = vmatmul.mubr.f32.gmra.mrb[2].mxu0 %v3051_v38  ;;  %v2716_v2 = vsub.f32 %v61_v29, %v2671_v0  ;;  %v384_v7 = vand.u32 4294901760, %v383_v31  ;;  %v391_v41 = vand.u32 4294901760, %v390_v30  ;;  %v65_v38 = vld [vmem:[%s2974_s0 + $0x78] sm:$0xff] }
  0x2b   :  { %3054 = vst [vmem:[#allocation20_spill] sm:$0xff] %v2718_v37  ;;  %2046 = vmatpush3.bf16.msra.mxu1 %v2043_v23  ;;  %2142 = vmatpush3.bf16.msra.mxu0 %v2139_v20  ;;  %v3055_v27 = vand.u32 4294901760, %v2529_v25  ;;  %v3056_v29 = vand.u32 4294901760, %v2649_v15  ;;  %v2730_v23 = vsub.f32 %v62_v62, %v2690_v54  ;;  %v2733_v20 = vand.u32 4294901760, %v64_v59 }
  0x2c   :  { %3053 = vst [vmem:[#allocation19_spill] sm:$0xff] %v2716_v2  ;;  %1709 = vmatprep.mubr.f32.mxu1 %v207_v12  ;;  %2048 = vmatprep.subr.bf16.mxu1 %v2047_v16  ;;  %v3059_v24 = vand.u32 4294901760, %v2660_v50  ;;  %v417_v32 = vand.u32 4294901760, %v2704_v9  ;;  %v3060_v30 = vand.u32 4294901760, %v2438_v45  ;;  %v3061_v62 = vand.u32 4294901760, %v2443_v46 }
  0x2d   :  { %1877 = vmatprep.mubr.f32.mxu0 %v3055_v27  ;;  %v397_v21 = vsub.f32 %v2649_v15, %v3056_v29  ;;  %3057 = vst [vmem:[#allocation21_spill] sm:$0xff] %v2730_v23  ;;  %3058 = vst [vmem:[#allocation22_spill] sm:$0xff] %v2733_v20  ;;  %2144 = vmatprep.subr.bf16.mxu0 %v2639_v19  ;;  %v3062_v31 = vand.u32 4294901760, %v2535_v34  ;;  %v3063_v44 = vand.u32 4294901760, %v2669_v40  ;;  %v275_v25 = vand.u32 4294901760, %v2716_v2 }
  0x2e   :  { %v404_v12 = vsub.f32 %v2660_v50, %v3059_v24  ;;  %v2743_v27 = vsub.f32 %v2438_v45, %v3060_v30  ;;  %v2748_v29 = vsub.f32 %v2443_v46, %v3061_v62  ;;  %1710 = vmatmul.mubr.f32.gmra.mrb[4].mxu1 %v217_v28  ;;  %v2757_v61 = vsub.f32 %v63_v3, %v2718_v37 }
  0x2f   :  { %1878 = vmatmul.mubr.f32.gmra.mrb[4].mxu0 %v3062_v31  ;;  %v256_v24 = vsub.f32 %v2669_v40, %v3063_v44  ;;  %v2759_v45 = vand.u32 4294901760, %v65_v38  ;;  %2050 = vmatpush3.bf16.msra.mxu1 %v2047_v16  ;;  %v247_v46 = vand.u32 4294901760, %v246_v51  ;;  %v2055_v30 = vpack.c.bf16 %v391_v41, %v384_v7 }
  0x30   :  { %3064 = vst [vmem:[#allocation23_spill] sm:$0xff] %v2757_v61  ;;  %2146 = vmatpush3.bf16.msra.mxu0 %v2639_v19  ;;  %v3065_v28 = vand.u32 4294901760, %v2594_v56  ;;  %v3066_v31 = vand.u32 4294901760, %v2599_v11  ;;  %v3067_v34 = vand.u32 4294901760, %v2681_v60  ;;  %1712 = vmatprep.mubr.f32.mxu1 %v227_v58  ;;  %v3068_v3 = vand.u32 4294901760, %v2573_v4 }
  0x31   :  { %v398_v37 = vand.u32 4294901760, %v397_v21  ;;  %v285_v16 = vand.u32 4294901760, %v2730_v23  ;;  %v3069_v19 = vand.u32 4294901760, %v2695_v55  ;;  %v2776_v51 = vsub.f32 %v64_v59, %v2733_v20  ;;  %2052 = vmatprep.subr.bf16.mxu1 %v2051_v39  ;;  %2148 = vmatprep.subr.bf16.mxu0 %v2147_v33 }
  0x32   :  { %v2151_v62 = vpack.c.bf16 %v3066_v31, %v3065_v28  ;;  %v266_v44 = vsub.f32 %v2681_v60, %v3067_v34  ;;  %1880 = vmatprep.mubr.f32.mxu0 %v3068_v3  ;;  %v405_v7 = vand.u32 4294901760, %v404_v12  ;;  %v418_v28 = vsub.f32 %v2704_v9, %v417_v32  ;;  %1713 = vmatmul.mubr.f32.gmra.mrb[6].mxu1 %v237_v52 }
  0x33   :  { %v411_v41 = vsub.f32 %v2695_v55, %v3069_v19  ;;  %v424_v34 = vand.u32 4294901760, %v2743_v27  ;;  %v431_v58 = vand.u32 4294901760, %v2748_v29  ;;  %v3070_v21 = vand.u32 4294901760, %v2577_v8  ;;  %2054 = vmatpush3.bf16.msra.mxu1 %v2051_v39  ;;  %1715 = vmatprep.mubr.f32.mxu1 %v247_v46 }
  0x34   :  { %v257_v31 = vand.u32 4294901760, %v256_v24  ;;  %v276_v3 = vsub.f32 %v2716_v2, %v275_v25  ;;  %v295_v19 = vand.u32 4294901760, %v2757_v61  ;;  %v2786_v59 = vsub.f32 %v65_v38, %v2759_v45  ;;  %2150 = vmatpush3.bf16.msra.mxu0 %v2147_v33  ;;  %2056 = vmatprep.subr.bf16.mxu1 %v2055_v30 }
  0x35   :  { %1881 = vmatmul.mubr.f32.gmra.mrb[6].mxu0 %v3070_v21  ;;  %v267_v12 = vand.u32 4294901760, %v266_v44  ;;  %v3071_v4 = vand.u32 4294901760, %v2623_v22  ;;  %v3072_v52 = vand.u32 4294901760, %v2649_v15  ;;  %v3073_v8 = vand.u32 4294901760, %v2660_v50  ;;  %2152 = vmatprep.subr.bf16.mxu0 %v2151_v62 }
  0x36   :  { %v286_v24 = vsub.f32 %v2730_v23, %v285_v16  ;;  %v412_v2 = vand.u32 4294901760, %v411_v41  ;;  %v305_v20 = vand.u32 4294901760, %v2776_v51  ;;  %v2059_v38 = vpack.c.bf16 %v405_v7, %v398_v37  ;;  %1716 = vmatmul.mubr.f32.gmra.mrb[8].mxu1 %v257_v31 }
  0x37   :  { %1883 = vmatprep.mubr.f32.mxu0 %v3071_v4  ;;  %v2155_v21 = vpack.c.bf16 %v3073_v8, %v3072_v52  ;;  %v419_v39 = vand.u32 4294901760, %v418_v28  ;;  %v425_v33 = vsub.f32 %v2743_v27, %v424_v34  ;;  %v432_v46 = vsub.f32 %v2748_v29, %v431_v58  ;;  %2058 = vmatpush3.bf16.msra.mxu1 %v2055_v30 }
  0x38   :  { %v3074_v4 = vand.u32 4294901760, %v2669_v40  ;;  %v277_v44 = vand.u32 4294901760, %v276_v3  ;;  %v296_v8 = vsub.f32 %v2757_v61, %v295_v19  ;;  %v315_v52 = vand.u32 4294901760, %v2786_v59  ;;  %2154 = vmatpush3.bf16.msra.mxu0 %v2151_v62  ;;  %1718 = vmatprep.mubr.f32.mxu1 %v267_v12 }
  0x39   :  { %v3075_v41 = vand.u32 4294901760, %v2681_v60  ;;  %v287_v37 = vand.u32 4294901760, %v286_v24  ;;  %v306_v7 = vsub.f32 %v2776_v51, %v305_v20  ;;  %2060 = vmatprep.subr.bf16.mxu1 %v2059_v38  ;;  %2156 = vmatprep.subr.bf16.mxu0 %v2155_v21  ;;  %v2063_v28 = vpack.c.bf16 %v419_v39, %v412_v2 }
  0x3a   :  { %1884 = vmatmul.mubr.f32.gmra.mrb[8].mxu0 %v3074_v4  ;;  %v3076_v31 = vand.u32 4294901760, %v2695_v55  ;;  %v426_v3 = vand.u32 4294901760, %v425_v33  ;;  %v433_v23 = vand.u32 4294901760, %v432_v46  ;;  %1719 = vmatmul.mubr.f32.gmra.mrb[10].mxu1 %v277_v44  ;;  %v297_v61 = vand.u32 4294901760, %v296_v8 }
  0x3b   :  { %1886 = vmatprep.mubr.f32.mxu0 %v3075_v41  ;;  %v316_v30 = vsub.f32 %v2786_v59, %v315_v52  ;;  %2062 = vmatpush3.bf16.msra.mxu1 %v2059_v38  ;;  %v307_v62 = vand.u32 4294901760, %v306_v7  ;;  %v2163_v24 = vpack.c.bf16 %v431_v58, %v424_v34 }
  0x3c   :  { %v2159_v4 = vpack.c.bf16 %v417_v32, %v3076_v31  ;;  %2158 = vmatpush3.bf16.msra.mxu0 %v2155_v21  ;;  %1721 = vmatprep.mubr.f32.mxu1 %v287_v37  ;;  %v2067_v12 = vpack.c.bf16 %v433_v23, %v426_v3  ;;  %v3088_v23 = vld [vmem:[#allocation5_spill] sm:$0xff] }
  0x3d   :  { %2064 = vmatprep.subr.bf16.mxu1 %v2063_v28  ;;  %v317_v2 = vand.u32 4294901760, %v316_v30  ;;  %v3090_v32 = vld [vmem:[#allocation9_spill] sm:$0xff] }
  0x3e   :  { %1887 = vmatmul.mubr.f32.gmra.mrb[10].mxu0 %v275_v25  ;;  %2160 = vmatprep.subr.bf16.mxu0 %v2159_v4  ;;  %v2071_v25 = vpack.c.bf16 %v2406_v36, %v2404_v35  ;;  %v2079_v35 = vpack.c.bf16 %v2499_v6, %v2494_v5  ;;  %v3077_v36 = vld [vmem:[#allocation13_spill] sm:$0xff]  ;;  %v2091_v5 = vpack.c.bf16 %v2660_v50, %v2649_v15  ;;  %v3082_v6 = vld [vmem:[#allocation8_spill] sm:$0xff]  ;;  %v3085_v50 = vld [vmem:[#allocation22_spill] sm:$0xff] }
  0x3f   :  { %1889 = vmatprep.mubr.f32.mxu0 %v285_v16  ;;  %1722 = vmatmul.mubr.f32.gmra.mrb[12].mxu1 %v297_v61  ;;  %v2075_v61 = vpack.c.bf16 %v2449_v49, %v2447_v48  ;;  %v2087_v48 = vpack.c.bf16 %v2599_v11, %v2594_v56  ;;  %v3079_v49 = vld [vmem:[#allocation15_spill] sm:$0xff]  ;;  %v2095_v11 = vpack.c.bf16 %v2704_v9, %v2695_v55  ;;  %v3084_v15 = vld [vmem:[#allocation20_spill] sm:$0xff] }
  0x40   :  { %2066 = vmatpush3.bf16.msra.mxu1 %v2063_v28  ;;  %2162 = vmatpush3.bf16.msra.mxu0 %v2159_v4  ;;  %v2099_v56 = vpack.c.bf16 %v2748_v29, %v2743_v27  ;;  %v3086_v9 = vld [vmem:[#allocation11_spill] sm:$0xff]  ;;  %v3091_v27 = vld [vmem:[#allocation12_spill] sm:$0xff]  ;;  %v3092_v29 = vld [vmem:[#allocation14_spill] sm:$0xff] }
  0x41   :  { %1724 = vmatprep.mubr.f32.mxu1 %v307_v62  ;;  %2068 = vmatprep.subr.bf16.mxu1 %v2067_v12  ;;  %v3087_v55 = vld [vmem:[#allocation3_spill] sm:$0xff] }
  0x42   :  { %1890 = vmatmul.mubr.f32.gmra.mrb[12].mxu0 %v295_v19  ;;  %2164 = vmatprep.subr.bf16.mxu0 %v2163_v24 }
  0x43   :  { %1892 = vmatprep.mubr.f32.mxu0 %v305_v20  ;;  %1725 = vmatmul.mubr.f32.gmra.mrb[14].mxu1 %v317_v2  ;;  %v3089_v20 = vld [vmem:[#allocation7_spill] sm:$0xff] }
  0x44   :  { %2070 = vmatpush3.bf16.msra.mxu1 %v2067_v12  ;;  %2166 = vmatpush3.bf16.msra.mxu0 %v2163_v24 }
  0x45   :  { %1759 = vmatprep.mubr.f32.mxu1 %v2344_v17  ;;  %2072 = vmatprep.subr.bf16.mxu1 %v2071_v25 }
  0x46   :  { %1893 = vmatmul.mubr.f32.gmra.mrb[14].mxu0 %v315_v52  ;;  %2168 = vmatprep.subr.bf16.mxu0 %v2321_v10 }
  0x47   :  { %1927 = vmatprep.mubr.f32.mxu0 %v2344_v17  ;;  %1760 = vmatmul.mubr.f32.vlgmr.msra.gmra.mrb[0].mxu1 %v2375_v26 }
  0x48   :  { %2074 = vmatpush3.bf16.msra.mxu1 %v2071_v25  ;;  %1762 = vmatprep.mubr.f32.mxu1 %v2424_v42 }
  0x49   :  { %2076 = vmatprep.subr.bf16.mxu1 %v2075_v61 }
  0x4a   :  { %1928 = vmatmul.mubr.f32.vlgmr.msra.gmra.mrb[0].mxu0 %v2375_v26 }
  0x4b   :  { %2170 = vmatpush3.bf16.msra.mxu0 %v2321_v10  ;;  %1930 = vmatprep.mubr.f32.mxu0 %v2424_v42  ;;  %v2083_v10 = vpack.c.bf16 %v2559_v14, %v2542_v57  ;;  %v3080_v57 = vld [vmem:[#allocation18_spill] sm:$0xff] }
  0x4c   :  { %2172 = vmatprep.subr.bf16.mxu0 %v2325_v13  ;;  %1763 = vmatmul.mubr.f32.gmra.mrb[2].mxu1 %v2445_v47  ;;  %v3083_v14 = vld [vmem:[#allocation10_spill] sm:$0xff] }
  0x4d   :  { %2078 = vmatpush3.bf16.msra.mxu1 %v2075_v61  ;;  %1765 = vmatprep.mubr.f32.mxu1 %v2481_v63 }
  0x4e   :  { %1931 = vmatmul.mubr.f32.gmra.mrb[2].mxu0 %v2445_v47  ;;  %2080 = vmatprep.subr.bf16.mxu1 %v2079_v35 }
  0x4f   :  { %2174 = vmatpush3.bf16.msra.mxu0 %v2325_v13  ;;  %1933 = vmatprep.mubr.f32.mxu0 %v2481_v63  ;;  %v3078_v13 = vld [vmem:[#allocation4_spill] sm:$0xff] }
  0x50   :  { %2176 = vmatprep.subr.bf16.mxu0 %v2352_v18  ;;  %1766 = vmatmul.mubr.f32.gmra.mrb[4].mxu1 %v2484_v1 }
  0x51   :  { %2082 = vmatpush3.bf16.msra.mxu1 %v2079_v35  ;;  %1768 = vmatprep.mubr.f32.mxu1 %v3077_v36 }
  0x52   :  { %1934 = vmatmul.mubr.f32.gmra.mrb[4].mxu0 %v2484_v1  ;;  %2084 = vmatprep.subr.bf16.mxu1 %v2083_v10 }
  0x53   :  { %2178 = vmatpush3.bf16.msra.mxu0 %v2352_v18  ;;  %1936 = vmatprep.mubr.f32.mxu0 %v3077_v36  ;;  %v3081_v18 = vld [vmem:[#allocation6_spill] sm:$0xff] }
  0x54   :  { %2180 = vmatprep.subr.bf16.mxu0 %v3078_v13  ;;  %1769 = vmatmul.mubr.f32.gmra.mrb[6].mxu1 %v3079_v49 }
  0x55   :  { %2086 = vmatpush3.bf16.msra.mxu1 %v2083_v10  ;;  %1771 = vmatprep.mubr.f32.mxu1 %v3080_v57 }
  0x56   :  { %1937 = vmatmul.mubr.f32.gmra.mrb[6].mxu0 %v3079_v49  ;;  %2088 = vmatprep.subr.bf16.mxu1 %v2087_v48 }
  0x57   :  { %2182 = vmatpush3.bf16.msra.mxu0 %v3078_v13  ;;  %1939 = vmatprep.mubr.f32.mxu0 %v3080_v57 }
  0x58   :  { %2184 = vmatprep.subr.bf16.mxu0 %v3081_v18  ;;  %1772 = vmatmul.mubr.f32.gmra.mrb[8].mxu1 %v2625_v43 }
  0x59   :  { %2090 = vmatpush3.bf16.msra.mxu1 %v2087_v48  ;;  %1774 = vmatprep.mubr.f32.mxu1 %v2632_v53 }
  0x5a   :  { %1940 = vmatmul.mubr.f32.gmra.mrb[8].mxu0 %v2625_v43  ;;  %2092 = vmatprep.subr.bf16.mxu1 %v2091_v5 }
  0x5b   :  { %2186 = vmatpush3.bf16.msra.mxu0 %v3081_v18  ;;  %1942 = vmatprep.mubr.f32.mxu0 %v2632_v53 }
  0x5c   :  { %2188 = vmatprep.subr.bf16.mxu0 %v3082_v6  ;;  %1775 = vmatmul.mubr.f32.gmra.mrb[10].mxu1 %v2671_v0 }
  0x5d   :  { %2094 = vmatpush3.bf16.msra.mxu1 %v2091_v5  ;;  %1777 = vmatprep.mubr.f32.mxu1 %v2690_v54 }
  0x5e   :  { %1943 = vmatmul.mubr.f32.gmra.mrb[10].mxu0 %v2671_v0  ;;  %2096 = vmatprep.subr.bf16.mxu1 %v2095_v11 }
  0x5f   :  { %2190 = vmatpush3.bf16.msra.mxu0 %v3082_v6  ;;  %1945 = vmatprep.mubr.f32.mxu0 %v2690_v54 }
  0x60   :  { %2192 = vmatprep.subr.bf16.mxu0 %v3083_v14  ;;  %1778 = vmatmul.mubr.f32.gmra.mrb[12].mxu1 %v3084_v15 }
  0x61   :  { %2098 = vmatpush3.bf16.msra.mxu1 %v2095_v11  ;;  %1780 = vmatprep.mubr.f32.mxu1 %v3085_v50 }
  0x62   :  { %1946 = vmatmul.mubr.f32.gmra.mrb[12].mxu0 %v3084_v15  ;;  %2100 = vmatprep.subr.bf16.mxu1 %v2099_v56 }
  0x63   :  { %2194 = vmatpush3.bf16.msra.mxu0 %v3083_v14  ;;  %1948 = vmatprep.mubr.f32.mxu0 %v3085_v50 }
  0x64   :  { %2196 = vmatprep.subr.bf16.mxu0 %v3086_v9  ;;  %1781 = vmatmul.mubr.f32.gmra.mrb[14].mxu1 %v2759_v45 }
  0x65   :  { %2102 = vmatpush3.bf16.msra.mxu1 %v2099_v56  ;;  %1815 = vmatprep.mubr.f32.mxu1 %v3087_v55 }
  0x66   :  { %1949 = vmatmul.mubr.f32.gmra.mrb[14].mxu0 %v2759_v45 }
  0x67   :  { %2198 = vmatpush3.bf16.msra.mxu0 %v3086_v9  ;;  %1983 = vmatprep.mubr.f32.mxu0 %v2344_v17  ;;  %v3093_v17 = vld [vmem:[#allocation16_spill] sm:$0xff] }
  0x68   :  { %1816 = vmatmul.mubr.f32.vlgmr.msra.gmra.mrb[0].mxu1 %v3088_v23 }
  0x69   :  { %1818 = vmatprep.mubr.f32.mxu1 %v3089_v20 }
  0x6a   :  { %1984 = vmatmul.mubr.f32.vlgmr.msra.gmra.mrb[0].mxu0 %v2375_v26  ;;  %v3094_v26 = vld [vmem:[#allocation17_spill] sm:$0xff] }
  0x6b   :  { %1986 = vmatprep.mubr.f32.mxu0 %v2424_v42  ;;  %v3095_v42 = vld [vmem:[#allocation19_spill] sm:$0xff] }
  0x6c   :  { %1819 = vmatmul.mubr.f32.gmra.mrb[2].mxu1 %v3090_v32 }
  0x6d   :  { %1821 = vmatprep.mubr.f32.mxu1 %v3091_v27 }
  0x6e   :  { %1987 = vmatmul.mubr.f32.gmra.mrb[2].mxu0 %v2445_v47  ;;  %v3096_v47 = vld [vmem:[#allocation21_spill] sm:$0xff] }
  0x6f   :  { %1989 = vmatprep.mubr.f32.mxu0 %v2481_v63  ;;  %v3097_v63 = vld [vmem:[#allocation23_spill] sm:$0xff] }
  0x70   :  { %1822 = vmatmul.mubr.f32.gmra.mrb[4].mxu1 %v3092_v29 }
  0x71   :  { %1824 = vmatprep.mubr.f32.mxu1 %v3093_v17 }
  0x72   :  { %1990 = vmatmul.mubr.f32.gmra.mrb[4].mxu0 %v2484_v1 }
  0x73   :  { %1992 = vmatprep.mubr.f32.mxu0 %v3077_v36 }
  0x74   :  { %1825 = vmatmul.mubr.f32.gmra.mrb[6].mxu1 %v3094_v26 }
  0x75   :  { %1827 = vmatprep.mubr.f32.mxu1 %v2623_v22  ;;  %v2907_v22 = vld [vmem:[%s2975_s2] ss:$0 sm:$0xff] }
  0x76   :  { %1993 = vmatmul.mubr.f32.gmra.mrb[6].mxu0 %v3079_v49 }
  0x77   :  { %1995 = vmatprep.mubr.f32.mxu0 %v3080_v57 }
  0x78   :  { %1828 = vmatmul.mubr.f32.gmra.mrb[8].mxu1 %v2669_v40 }
  0x79   :  { %1830 = vmatprep.mubr.f32.mxu1 %v2681_v60 }
  0x7a   :  { %1996 = vmatmul.mubr.f32.gmra.mrb[8].mxu0 %v2625_v43 }
  0x7b   :  { %1998 = vmatprep.mubr.f32.mxu0 %v2632_v53 }
  0x7c   :  { %1831 = vmatmul.mubr.f32.gmra.mrb[10].mxu1 %v3095_v42 }
  0x7d   :  { %1833 = vmatprep.mubr.f32.mxu1 %v3096_v47 }
  0x7e   :  { %1999 = vmatmul.mubr.f32.gmra.mrb[10].mxu0 %v2671_v0 }
  0x7f   :  { %2001 = vmatprep.mubr.f32.mxu0 %v2690_v54 }
  0x80   :  { %1834 = vmatmul.mubr.f32.gmra.mrb[12].mxu1 %v3097_v63 }
  0x81   :  { %1836 = vmatprep.mubr.f32.mxu1 %v2776_v51 }
  0x82   :  { %2002 = vmatmul.mubr.f32.gmra.mrb[12].mxu0 %v3084_v15 }
  0x83   :  { %2004 = vmatprep.mubr.f32.mxu0 %v3085_v50 }
  0x84   :  { %1837 = vmatmul.mubr.f32.gmra.mrb[14].mxu1 %v2786_v59 }
  0x86   :  { %2005 = vmatmul.mubr.f32.gmra.mrb[14].mxu0 %v2759_v45 }
 0x13b   :  { %v1817_v43 = vpop.f32.mrb[0].mxu1 }
 0x13c   :  { %v664_v40 = vpop.f32.mrb[1].mxu1 }
 0x13d   :  { %v1985_v1 = vpop.f32.mrb[0].mxu0 }
 0x13e   :  { %v2199_v53 = vadd.f32 %v1985_v1, %v1817_v43  ;;  %v1274_v0 = vpop.f32.mrb[1].mxu0 }
 0x13f   :  { %v2200_v60 = vadd.f32 %v1274_v0, %v664_v40  ;;  %v1820_v51 = vpop.f32.mrb[2].mxu1 }
 0x140   :  { %v1427_v54 = vadd.f32 %v2199_v53, %v2907_v22  ;;  %v678_v45 = vpop.f32.mrb[3].mxu1 }
 0x141   :  { %v1426_v16 = vadd.f32 %v2200_v60, %v2907_v22  ;;  %v1988_v34 = vpop.f32.mrb[2].mxu0 }
 0x142   :  { %v1443_v58 = vmax.f32 %v1427_v54, 0.0  ;;  %v2201_v19 = vadd.f32 %v1988_v34, %v1820_v51  ;;  %v1286_v59 = vpop.f32.mrb[3].mxu0 }
 0x143   :  { %v1442_v21 = vmax.f32 %v1426_v16, 0.0  ;;  %v2202_v38 = vadd.f32 %v1286_v59, %v678_v45  ;;  %v1823_v46 = vpop.f32.mrb[4].mxu1 }
 0x144   :  { %1459 = vst [vmem:[%s2976_s3 + $0x8] sm:$0xff] %v1443_v58  ;;  %v1429_v39 = vadd.f32 %v2201_v19, %v2907_v22  ;;  %v692_v41 = vpop.f32.mrb[5].mxu1 }
 0x145   :  { %1458 = vst [vmem:[%s2976_s3] sm:$0xff] %v1442_v21  ;;  %v1428_v33 = vadd.f32 %v2202_v38, %v2907_v22  ;;  %v1991_v44 = vpop.f32.mrb[4].mxu0 }
 0x146   :  { %v1445_v8 = vmax.f32 %v1429_v39, 0.0  ;;  %v2203_v52 = vadd.f32 %v1991_v44, %v1823_v46  ;;  %v1298_v37 = vpop.f32.mrb[5].mxu0 }
 0x147   :  { %v1444_v7 = vmax.f32 %v1428_v33, 0.0  ;;  %v2204_v28 = vadd.f32 %v1298_v37, %v692_v41  ;;  %v1826_v3 = vpop.f32.mrb[6].mxu1 }
 0x148   :  { %1461 = vst [vmem:[%s2976_s3 + $0x18] sm:$0xff] %v1445_v8  ;;  %v1431_v31 = vadd.f32 %v2203_v52, %v2907_v22  ;;  %v706_v24 = vpop.f32.mrb[7].mxu1 }
 0x149   :  { %1460 = vst [vmem:[%s2976_s3 + $0x10] sm:$0xff] %v1444_v7  ;;  %v1430_v4 = vadd.f32 %v2204_v28, %v2907_v22  ;;  %v1994_v30 = vpop.f32.mrb[6].mxu0 }
 0x14a   :  { %v1447_v62 = vmax.f32 %v1431_v31, 0.0  ;;  %v2205_v12 = vadd.f32 %v1994_v30, %v1826_v3  ;;  %v1310_v2 = vpop.f32.mrb[7].mxu0 }
 0x14b   :  { %v1446_v25 = vmax.f32 %v1430_v4, 0.0  ;;  %v2206_v61 = vadd.f32 %v1310_v2, %v706_v24  ;;  %v1829_v36 = vpop.f32.mrb[8].mxu1 }
 0x14c   :  { %1463 = vst [vmem:[%s2976_s3 + $0x28] sm:$0xff] %v1447_v62  ;;  %v1433_v35 = vadd.f32 %v2205_v12, %v2907_v22  ;;  %v720_v57 = vpop.f32.mrb[9].mxu1 }
 0x14d   :  { %1462 = vst [vmem:[%s2976_s3 + $0x20] sm:$0xff] %v1446_v25  ;;  %v1432_v10 = vadd.f32 %v2206_v61, %v2907_v22  ;;  %v1997_v13 = vpop.f32.mrb[8].mxu0 }
 0x14e   :  { %v1449_v48 = vmax.f32 %v1433_v35, 0.0  ;;  %v2207_v49 = vadd.f32 %v1997_v13, %v1829_v36  ;;  %v1322_v18 = vpop.f32.mrb[9].mxu0 }
 0x14f   :  { %v1448_v5 = vmax.f32 %v1432_v10, 0.0  ;;  %v2208_v6 = vadd.f32 %v1322_v18, %v720_v57  ;;  %v1832_v56 = vpop.f32.mrb[10].mxu1 }
 0x150   :  { %1465 = vst [vmem:[%s2976_s3 + $0x38] sm:$0xff] %v1449_v48  ;;  %v1435_v11 = vadd.f32 %v2207_v49, %v2907_v22  ;;  %v734_v55 = vpop.f32.mrb[11].mxu1 }
 0x151   :  { %1464 = vst [vmem:[%s2976_s3 + $0x30] sm:$0xff] %v1448_v5  ;;  %v1434_v14 = vadd.f32 %v2208_v6, %v2907_v22  ;;  %v2000_v15 = vpop.f32.mrb[10].mxu0 }
 0x152   :  { %v1451_v50 = vmax.f32 %v1435_v11, 0.0  ;;  %v2209_v9 = vadd.f32 %v2000_v15, %v1832_v56  ;;  %v1334_v23 = vpop.f32.mrb[11].mxu0 }
 0x153   :  { %v1450_v20 = vmax.f32 %v1434_v14, 0.0  ;;  %v2210_v32 = vadd.f32 %v1334_v23, %v734_v55  ;;  %v1835_v17 = vpop.f32.mrb[12].mxu1 }
 0x154   :  { %1467 = vst [vmem:[%s2976_s3 + $0x48] sm:$0xff] %v1451_v50  ;;  %v1437_v27 = vadd.f32 %v2209_v9, %v2907_v22  ;;  %v748_v63 = vpop.f32.mrb[13].mxu1 }
 0x155   :  { %1466 = vst [vmem:[%s2976_s3 + $0x40] sm:$0xff] %v1450_v20  ;;  %v1436_v29 = vadd.f32 %v2210_v32, %v2907_v22  ;;  %v2003_v26 = vpop.f32.mrb[12].mxu0 }
 0x156   :  { %v1453_v42 = vmax.f32 %v1437_v27, 0.0  ;;  %v2211_v47 = vadd.f32 %v2003_v26, %v1835_v17  ;;  %v1346_v43 = vpop.f32.mrb[13].mxu0 }
 0x157   :  { %v1452_v1 = vmax.f32 %v1436_v29, 0.0  ;;  %v2212_v53 = vadd.f32 %v1346_v43, %v748_v63  ;;  %v1838_v60 = vpop.f32.mrb[14].mxu1 }
 0x158   :  { %1469 = vst [vmem:[%s2976_s3 + $0x58] sm:$0xff] %v1453_v42  ;;  %v1439_v40 = vadd.f32 %v2211_v47, %v2907_v22  ;;  %v762_v34 = vpop.f32.mrb[15].mxu1 }
 0x159   :  { %1468 = vst [vmem:[%s2976_s3 + $0x50] sm:$0xff] %v1452_v1  ;;  %v1438_v0 = vadd.f32 %v2212_v53, %v2907_v22  ;;  %v2006_v54 = vpop.f32.mrb[14].mxu0 }
 0x15a   :  { %v1455_v16 = vmax.f32 %v1439_v40, 0.0  ;;  %v2213_v51 = vadd.f32 %v2006_v54, %v1838_v60  ;;  %v1358_v58 = vpop.f32.mrb[15].mxu0 }
 0x15b   :  { %v1454_v19 = vmax.f32 %v1438_v0, 0.0  ;;  %v2214_v45 = vadd.f32 %v1358_v58, %v762_v34 }
 0x15c   :  { %1471 = vst [vmem:[%s2976_s3 + $0x68] sm:$0xff] %v1455_v16  ;;  %v1441_v59 = vadd.f32 %v2213_v51, %v2907_v22 }
 0x15d   :  { %1470 = vst [vmem:[%s2976_s3 + $0x60] sm:$0xff] %v1454_v19  ;;  %v1440_v21 = vadd.f32 %v2214_v45, %v2907_v22 }
 0x15e   :  { %v1457_v38 = vmax.f32 %v1441_v59, 0.0 }
 0x15f   :  { %v1456_v39 = vmax.f32 %v1440_v21, 0.0 }
 0x160   :  { %1473 = vst [vmem:[%s2976_s3 + $0x78] sm:$0xff] %v1457_v38 }
 0x161   :  { %1472 = vst [vmem:[%s2976_s3 + $0x70] sm:$0xff] %v1456_v39 }

// kernel: stage_block_forward.25
= control target key start
LH: loop header
LB: loop body
LE: loop exit
PB: predicated region body
PF: predicated region fallthrough
CT: control target
= control target key end

     0   :  { %s3117_s1 = inlined_call_operand.vmem [shape: f32[128,128], index: 1, kind: input, shape index: {}]   ;;  %s3118_s0 = inlined_call_operand.vmem [shape: f32[128,128], index: 0, kind: input, shape index: {}]   ;;  %s3119_s2 = inlined_call_operand.vmem [shape: f32[1,128], index: 2, kind: input, shape index: {}]   ;;  %s3120_s3 = inlined_call_operand.vmem [shape: f32[128,128], index: 3, kind: output, shape index: {}]  }
   0x1   :  { %v66_v0 = vld [vmem:[%s3117_s1] sm:$0xff]  ;;  %v67_v1 = vld [vmem:[%s3117_s1 + $0x8] sm:$0xff]  ;;  %v68_v2 = vld [vmem:[%s3117_s1 + $0x10] sm:$0xff] }
   0x2   :  { %v83_v3 = vand.u32 4294901760, %v66_v0  ;;  %v86_v4 = vand.u32 4294901760, %v67_v1  ;;  %v69_v5 = vld [vmem:[%s3117_s1 + $0x18] sm:$0xff]  ;;  %v89_v6 = vand.u32 4294901760, %v68_v2  ;;  %v2458_v7 = vld [vmem:[%s3117_s1 + $0x20] sm:$0xff]  ;;  %v2463_v8 = vld [vmem:[%s3117_s1 + $0x28] sm:$0xff] }
   0x3   :  { %v92_v9 = vand.u32 4294901760, %v69_v5  ;;  %v95_v11 = vand.u32 4294901760, %v2458_v7  ;;  %v98_v12 = vand.u32 4294901760, %v2463_v8  ;;  %v2474_v14 = vld [vmem:[%s3117_s1 + $0x30] sm:$0xff]  ;;  %v2479_v15 = vld [vmem:[%s3117_s1 + $0x38] sm:$0xff]  ;;  %v50_v16 = vld [vmem:[%s3118_s0] sm:$0xff] }
   0x4   :  { %v2465_v10 = vpack.c.bf16 %v86_v4, %v83_v3  ;;  %v2488_v17 = vand.u32 4294901760, %v50_v16  ;;  %v101_v19 = vand.u32 4294901760, %v2474_v14  ;;  %v104_v20 = vand.u32 4294901760, %v2479_v15  ;;  %v51_v21 = vld [vmem:[%s3118_s0 + $0x8] sm:$0xff]  ;;  %v2506_v22 = vld [vmem:[%s3117_s1 + $0x40] sm:$0xff]  ;;  %v2534_v30 = vld [vmem:[%s3117_s1 + $0x50] sm:$0xff] }
   0x5   :  { %v2469_v13 = vpack.c.bf16 %v92_v9, %v89_v6  ;;  %v2496_v18 = vpack.c.bf16 %v98_v12, %v95_v11  ;;  %v2511_v23 = vld [vmem:[%s3117_s1 + $0x48] sm:$0xff]  ;;  %v2519_v26 = vand.u32 4294901760, %v51_v21  ;;  %v3131_v28 = vand.u32 4294901760, %v2506_v22  ;;  %v52_v31 = vld [vmem:[%s3118_s0 + $0x10] sm:$0xff]  ;;  %v2542_v32 = vld [vmem:[%s3117_s1 + $0x58] sm:$0xff] }
   0x6   :  { %2088 = vmatprep.subr.bf16.mxu1 %v2465_v10  ;;  %2184 = vmatprep.subr.bf16.mxu0 %v2465_v10  ;;  %v2514_v24 = vsub.f32 %v50_v16, %v2488_v17  ;;  %v2527_v27 = vpack.c.bf16 %v104_v20, %v101_v19  ;;  %v3129_v29 = vand.u32 4294901760, %v2511_v23  ;;  %v53_v34 = vld [vmem:[%s3118_s0 + $0x18] sm:$0xff]  ;;  %v2548_v35 = vsub.f32 %v66_v0, %v83_v3  ;;  %v2558_v38 = vld [vmem:[%s3117_s1 + $0x60] sm:$0xff]  ;;  %v2563_v39 = vld [vmem:[%s3117_s1 + $0x68] sm:$0xff] }
   0x7   :  { %2090 = vmatpush3.bf16.msra.mxu1 %v2465_v10  ;;  %2186 = vmatpush3.bf16.msra.mxu0 %v2465_v10  ;;  %v2550_v36 = vsub.f32 %v67_v1, %v86_v4  ;;  %v3128_v37 = vand.u32 4294901760, %v2534_v30  ;;  %v2566_v41 = vsub.f32 %v51_v21, %v2519_v26  ;;  %v2568_v42 = vand.u32 4294901760, %v52_v31  ;;  %v2582_v45 = vld [vmem:[%s3117_s1 + $0x70] sm:$0xff]  ;;  %v2587_v46 = vld [vmem:[%s3117_s1 + $0x78] sm:$0xff]  ;;  %v54_v50 = vld [vmem:[%s3118_s0 + $0x20] sm:$0xff] }
   0x8   :  { %2092 = vmatprep.subr.bf16.mxu1 %v2469_v13  ;;  %2188 = vmatprep.subr.bf16.mxu0 %v2469_v13  ;;  %3164 = vst [vmem:[#allocation3_spill] sm:$0xff] %v2514_v24  ;;  %v165_v25 = vand.u32 4294901760, %v2514_v24  ;;  %3165 = vst [vmem:[#allocation4_spill] sm:$0xff] %v2527_v27  ;;  %v2576_v43 = vpack.c.bf16 %v3129_v29, %v3131_v28  ;;  %v3126_v44 = vand.u32 4294901760, %v2542_v32  ;;  %v2589_v47 = vand.u32 4294901760, %v53_v34  ;;  %v55_v55 = vld [vmem:[%s3118_s0 + $0x28] sm:$0xff] }
   0x9   :  { %3166 = vst [vmem:[#allocation5_spill] sm:$0xff] %v2566_v41  ;;  %v2591_v48 = vsub.f32 %v68_v2, %v89_v6  ;;  %v2593_v49 = vsub.f32 %v69_v5, %v92_v9  ;;  %v3124_v51 = vand.u32 4294901760, %v2558_v38  ;;  %v3123_v52 = vand.u32 4294901760, %v2563_v39  ;;  %v56_v2 = vld [vmem:[%s3118_s0 + $0x30] sm:$0xff]  ;;  %v57_v9 = vld [vmem:[%s3118_s0 + $0x38] sm:$0xff] }
   0xa   :  { %v166_v33 = vsub.f32 %v2514_v24, %v165_v25  ;;  %1951 = vmatprep.mubr.f32.mxu0 %v165_v25  ;;  %3167 = vst [vmem:[#allocation6_spill] sm:$0xff] %v2576_v43  ;;  %v326_v53 = vand.u32 4294901760, %v2548_v35  ;;  %v333_v54 = vand.u32 4294901760, %v2550_v36  ;;  %v3122_v56 = vand.u32 4294901760, %v2582_v45 }
   0xb   :  { %2094 = vmatpush3.bf16.msra.mxu1 %v2469_v13  ;;  %2190 = vmatpush3.bf16.msra.mxu0 %v2469_v13  ;;  %v3121_v57 = vand.u32 4294901760, %v2587_v46  ;;  %v3125_v58 = vand.u32 4294901760, %v2566_v41  ;;  %v2611_v59 = vsub.f32 %v52_v31, %v2568_v42  ;;  %v2619_v60 = vpack.c.bf16 %v3126_v44, %v3128_v37 }
   0xc   :  { %2096 = vmatprep.subr.bf16.mxu1 %v2496_v18  ;;  %2192 = vmatprep.subr.bf16.mxu0 %v2496_v18  ;;  %v167_v40 = vand.u32 4294901760, %v166_v33  ;;  %v2622_v61 = vsub.f32 %v53_v34, %v2589_v47  ;;  %v340_v62 = vand.u32 4294901760, %v2591_v48  ;;  %v2625_v63 = vand.u32 4294901760, %v54_v50 }
   0xd   :  { %3168 = vst [vmem:[#allocation7_spill] sm:$0xff] %v2611_v59  ;;  %3169 = vst [vmem:[#allocation8_spill] sm:$0xff] %v2619_v60  ;;  %v347_v0 = vand.u32 4294901760, %v2593_v49  ;;  %v2628_v1 = vand.u32 4294901760, %v55_v55  ;;  %v327_v3 = vsub.f32 %v2548_v35, %v326_v53  ;;  %v334_v4 = vsub.f32 %v2550_v36, %v333_v54 }
   0xe   :  { %1783 = vmatprep.mubr.f32.mxu1 %v167_v40  ;;  %3170 = vst [vmem:[#allocation9_spill] sm:$0xff] %v2622_v61  ;;  %v2638_v5 = vsub.f32 %v2458_v7, %v95_v11  ;;  %v2643_v6 = vsub.f32 %v2463_v8, %v98_v12  ;;  %v2654_v16 = vpack.c.bf16 %v3123_v52, %v3124_v51  ;;  %v3127_v11 = vand.u32 4294901760, %v2611_v59 }
   0xf   :  { %2098 = vmatpush3.bf16.msra.mxu1 %v2496_v18  ;;  %2194 = vmatpush3.bf16.msra.mxu0 %v2496_v18  ;;  %v2660_v7 = vpack.c.bf16 %v3121_v57, %v3122_v56  ;;  %v2665_v8 = vsub.f32 %v2566_v41, %v3125_v58  ;;  %v3130_v12 = vand.u32 4294901760, %v2622_v61  ;;  %v341_v21 = vsub.f32 %v2591_v48, %v340_v62 }
  0x10   :  { %2100 = vmatprep.subr.bf16.mxu1 %v2527_v27  ;;  %2196 = vmatprep.subr.bf16.mxu0 %v2527_v27  ;;  %3171 = vst [vmem:[#allocation10_spill] sm:$0xff] %v2654_v16  ;;  %v2673_v25 = vsub.f32 %v54_v50, %v2625_v63  ;;  %v2675_v31 = vand.u32 4294901760, %v56_v2  ;;  %v348_v33 = vsub.f32 %v2593_v49, %v347_v0  ;;  %v2681_v40 = vand.u32 4294901760, %v57_v9 }
  0x11   :  { %3172 = vst [vmem:[#allocation11_spill] sm:$0xff] %v2660_v7  ;;  %v2679_v34 = vsub.f32 %v55_v55, %v2628_v1  ;;  %v2686_v57 = vsub.f32 %v2474_v14, %v101_v19  ;;  %v328_v56 = vand.u32 4294901760, %v327_v3  ;;  %v335_v52 = vand.u32 4294901760, %v334_v4  ;;  %v58_v19 = vld [vmem:[%s3118_s0 + $0x40] sm:$0xff] }
  0x12   :  { %3173 = vst [vmem:[#allocation12_spill] sm:$0xff] %v2673_v25  ;;  %3174 = vst [vmem:[#allocation13_spill] sm:$0xff] %v2675_v31  ;;  %v354_v51 = vand.u32 4294901760, %v2638_v5  ;;  %v361_v50 = vand.u32 4294901760, %v2643_v6  ;;  %v177_v55 = vand.u32 4294901760, %v2665_v8  ;;  %v2693_v58 = vpack.c.bf16 %v333_v54, %v326_v53 }
  0x13   :  { %2102 = vmatpush3.bf16.msra.mxu1 %v2527_v27  ;;  %2198 = vmatpush3.bf16.msra.mxu0 %v2527_v27  ;;  %3175 = vst [vmem:[#allocation14_spill] sm:$0xff] %v2679_v34  ;;  %3176 = vst [vmem:[#allocation15_spill] sm:$0xff] %v2681_v40  ;;  %v2698_v44 = vsub.f32 %v2611_v59, %v3127_v11  ;;  %v2703_v14 = vsub.f32 %v2479_v15, %v104_v20  ;;  %v342_v54 = vand.u32 4294901760, %v341_v21 }
  0x14   :  { %2104 = vmatprep.subr.bf16.mxu1 %v2576_v43  ;;  %2200 = vmatprep.subr.bf16.mxu0 %v2576_v43  ;;  %v2713_v53 = vsub.f32 %v2622_v61, %v3130_v12  ;;  %v3135_v3 = vand.u32 4294901760, %v2673_v25  ;;  %v2717_v4 = vsub.f32 %v56_v2, %v2675_v31  ;;  %v349_v15 = vand.u32 4294901760, %v348_v33 }
  0x15   :  { %v2721_v8 = vsub.f32 %v57_v9, %v2681_v40  ;;  %v2119_v37 = vpack.c.bf16 %v335_v52, %v328_v56  ;;  %v355_v29 = vsub.f32 %v2638_v5, %v354_v51  ;;  %v362_v12 = vsub.f32 %v2643_v6, %v361_v50  ;;  %v59_v9 = vld [vmem:[%s3118_s0 + $0x48] sm:$0xff] }
  0x16   :  { %3177 = vst [vmem:[#allocation16_spill] sm:$0xff] %v2717_v4  ;;  %v2726_v28 = vand.u32 4294901760, %v58_v19  ;;  %v187_v2 = vand.u32 4294901760, %v2698_v44  ;;  %v375_v21 = vand.u32 4294901760, %v2703_v14  ;;  %v3180_v52 = vand.u32 4294901760, %v2506_v22 }
  0x17   :  { %2106 = vmatpush3.bf16.msra.mxu1 %v2576_v43  ;;  %2202 = vmatpush3.bf16.msra.mxu0 %v2576_v43  ;;  %3178 = vst [vmem:[#allocation17_spill] sm:$0xff] %v2721_v8  ;;  %v3181_v33 = vand.u32 4294901760, %v2511_v23  ;;  %v197_v44 = vand.u32 4294901760, %v2713_v53  ;;  %v2219_v20 = vpack.c.bf16 %v347_v0, %v340_v62  ;;  %v2751_v24 = vsub.f32 %v2673_v25, %v3135_v3 }
  0x18   :  { %2108 = vmatprep.subr.bf16.mxu1 %v2619_v60  ;;  %2204 = vmatprep.subr.bf16.mxu0 %v2619_v60  ;;  %3179 = vst [vmem:[#allocation18_spill] sm:$0xff] %v2726_v28  ;;  %v2738_v56 = vsub.f32 %v2506_v22, %v3180_v52  ;;  %v60_v52 = vld [vmem:[%s3118_s0 + $0x50] sm:$0xff]  ;;  %v3183_v62 = vand.u32 4294901760, %v2686_v57  ;;  %v356_v3 = vand.u32 4294901760, %v355_v29  ;;  %v2767_v22 = vsub.f32 %v58_v19, %v2726_v28  ;;  %v61_v29 = vld [vmem:[%s3118_s0 + $0x58] sm:$0xff] }
  0x19   :  { %v2743_v11 = vsub.f32 %v2511_v23, %v3181_v33  ;;  %v2123_v23 = vpack.c.bf16 %v349_v15, %v342_v54  ;;  %v3182_v33 = vand.u32 4294901760, %v2679_v34  ;;  %v2769_v43 = vand.u32 4294901760, %v59_v9 }
  0x1a   :  { %v369_v0 = vsub.f32 %v2686_v57, %v3183_v62  ;;  %v376_v54 = vsub.f32 %v2703_v14, %v375_v21  ;;  %v2776_v53 = vand.u32 4294901760, %v60_v52  ;;  %v2783_v19 = vpack.c.bf16 %v361_v50, %v354_v51 }
  0x1b   :  { %2110 = vmatpush3.bf16.msra.mxu1 %v2619_v60  ;;  %2206 = vmatpush3.bf16.msra.mxu0 %v2619_v60  ;;  %v363_v60 = vand.u32 4294901760, %v362_v12  ;;  %v207_v12 = vand.u32 4294901760, %v2751_v24  ;;  %v3184_v62 = vand.u32 4294901760, %v2717_v4  ;;  %v3186_v40 = vand.u32 4294901760, %v2721_v8 }
  0x1c   :  { %2112 = vmatprep.subr.bf16.mxu1 %v2654_v16  ;;  %2208 = vmatprep.subr.bf16.mxu0 %v2654_v16  ;;  %v370_v24 = vand.u32 4294901760, %v369_v0  ;;  %v3187_v51 = vand.u32 4294901760, %v2542_v32  ;;  %v2815_v0 = vand.u32 4294901760, %v61_v29 }
  0x1d   :  { %v2799_v27 = vsub.f32 %v2721_v8, %v3186_v40  ;;  %v2813_v40 = vsub.f32 %v59_v9, %v2769_v43 }
  0x1e   :  { %v2804_v50 = vsub.f32 %v2542_v32, %v3187_v51  ;;  %v377_v32 = vand.u32 4294901760, %v376_v54  ;;  %v3189_v51 = vand.u32 4294901760, %v2738_v56 }
  0x1f   :  { %2114 = vmatpush3.bf16.msra.mxu1 %v2654_v16  ;;  %2210 = vmatpush3.bf16.msra.mxu0 %v2654_v16  ;;  %v2760_v16 = vsub.f32 %v2679_v34, %v3182_v33  ;;  %v3185_v33 = vand.u32 4294901760, %v2534_v30 }
  0x20   :  { %2116 = vmatprep.subr.bf16.mxu1 %v2660_v7  ;;  %2212 = vmatprep.subr.bf16.mxu0 %v2660_v7  ;;  %v383_v31 = vsub.f32 %v2738_v56, %v3189_v51  ;;  %v3192_v51 = vand.u32 4294901760, %v2558_v38 }
  0x21   :  { %v2793_v15 = vsub.f32 %v2534_v30, %v3185_v33  ;;  %v217_v28 = vand.u32 4294901760, %v2760_v16  ;;  %v3188_v30 = vand.u32 4294901760, %v2566_v41  ;;  %v2127_v16 = vpack.c.bf16 %v363_v60, %v356_v3  ;;  %v63_v3 = vld [vmem:[%s3118_s0 + $0x68] sm:$0xff] }
  0x22   :  { %v2825_v60 = vsub.f32 %v60_v52, %v2776_v53  ;;  %v237_v52 = vand.u32 4294901760, %v2799_v27  ;;  %v3196_v27 = vand.u32 4294901760, %v2767_v22 }
  0x23   :  { %2118 = vmatpush3.bf16.msra.mxu1 %v2660_v7  ;;  %2214 = vmatpush3.bf16.msra.mxu0 %v2660_v7  ;;  %v2788_v7 = vsub.f32 %v2717_v4, %v3184_v62  ;;  %v62_v62 = vld [vmem:[%s3118_s0 + $0x60] sm:$0xff] }
  0x24   :  { %2120 = vmatprep.subr.bf16.mxu1 %v2119_v37  ;;  %2216 = vmatprep.subr.bf16.mxu0 %v2693_v58  ;;  %v2834_v54 = vand.u32 4294901760, %v62_v62 }
  0x26   :  { %1784 = vmatmul.mubr.f32.vlgmr.msra.gmra.mrb[0].mxu1 %v177_v55  ;;  %1952 = vmatmul.mubr.f32.vlgmr.msra.gmra.mrb[0].mxu0 %v3188_v30  ;;  %v3190_v55 = vand.u32 4294901760, %v2743_v11 }
  0x27   :  { %2122 = vmatpush3.bf16.msra.mxu1 %v2119_v37  ;;  %2218 = vmatpush3.bf16.msra.mxu0 %v2693_v58  ;;  %v3191_v37 = vand.u32 4294901760, %v2611_v59  ;;  %v227_v58 = vand.u32 4294901760, %v2788_v7  ;;  %v3194_v7 = vand.u32 4294901760, %v2563_v39  ;;  %v64_v59 = vld [vmem:[%s3118_s0 + $0x70] sm:$0xff] }
  0x28   :  { %v390_v30 = vsub.f32 %v2743_v11, %v3190_v55  ;;  %1786 = vmatprep.mubr.f32.mxu1 %v187_v2  ;;  %v2839_v55 = vsub.f32 %v2558_v38, %v3192_v51  ;;  %2124 = vmatprep.subr.bf16.mxu1 %v2123_v23  ;;  %v3193_v2 = vand.u32 4294901760, %v2686_v57  ;;  %v3195_v38 = vand.u32 4294901760, %v2622_v61 }
  0x29   :  { %1954 = vmatprep.mubr.f32.mxu0 %v3191_v37  ;;  %2220 = vmatprep.subr.bf16.mxu0 %v2219_v20  ;;  %v2848_v9 = vsub.f32 %v2563_v39, %v3194_v7  ;;  %v246_v51 = vsub.f32 %v2767_v22, %v3196_v27  ;;  %v2862_v37 = vand.u32 4294901760, %v63_v3  ;;  %v2131_v39 = vpack.c.bf16 %v377_v32, %v370_v24 }
  0x2a   :  { %v2227_v33 = vpack.c.bf16 %v375_v21, %v3193_v2  ;;  %1787 = vmatmul.mubr.f32.gmra.mrb[2].mxu1 %v197_v44  ;;  %1955 = vmatmul.mubr.f32.gmra.mrb[2].mxu0 %v3195_v38  ;;  %v2860_v2 = vsub.f32 %v61_v29, %v2815_v0  ;;  %v384_v7 = vand.u32 4294901760, %v383_v31  ;;  %v391_v41 = vand.u32 4294901760, %v390_v30  ;;  %v65_v38 = vld [vmem:[%s3118_s0 + $0x78] sm:$0xff] }
  0x2b   :  { %3198 = vst [vmem:[#allocation20_spill] sm:$0xff] %v2862_v37  ;;  %2126 = vmatpush3.bf16.msra.mxu1 %v2123_v23  ;;  %2222 = vmatpush3.bf16.msra.mxu0 %v2219_v20  ;;  %v3199_v27 = vand.u32 4294901760, %v2673_v25  ;;  %v3200_v29 = vand.u32 4294901760, %v2793_v15  ;;  %v2874_v23 = vsub.f32 %v62_v62, %v2834_v54  ;;  %v2877_v20 = vand.u32 4294901760, %v64_v59 }
  0x2c   :  { %3197 = vst [vmem:[#allocation19_spill] sm:$0xff] %v2860_v2  ;;  %1789 = vmatprep.mubr.f32.mxu1 %v207_v12  ;;  %2128 = vmatprep.subr.bf16.mxu1 %v2127_v16  ;;  %v3203_v24 = vand.u32 4294901760, %v2804_v50  ;;  %v417_v32 = vand.u32 4294901760, %v2848_v9  ;;  %v3204_v30 = vand.u32 4294901760, %v2582_v45  ;;  %v3205_v62 = vand.u32 4294901760, %v2587_v46 }
  0x2d   :  { %1957 = vmatprep.mubr.f32.mxu0 %v3199_v27  ;;  %v397_v21 = vsub.f32 %v2793_v15, %v3200_v29  ;;  %3201 = vst [vmem:[#allocation21_spill] sm:$0xff] %v2874_v23  ;;  %3202 = vst [vmem:[#allocation22_spill] sm:$0xff] %v2877_v20  ;;  %2224 = vmatprep.subr.bf16.mxu0 %v2783_v19  ;;  %v3206_v31 = vand.u32 4294901760, %v2679_v34  ;;  %v3207_v44 = vand.u32 4294901760, %v2813_v40  ;;  %v275_v25 = vand.u32 4294901760, %v2860_v2 }
  0x2e   :  { %v404_v12 = vsub.f32 %v2804_v50, %v3203_v24  ;;  %v2887_v27 = vsub.f32 %v2582_v45, %v3204_v30  ;;  %v2892_v29 = vsub.f32 %v2587_v46, %v3205_v62  ;;  %1790 = vmatmul.mubr.f32.gmra.mrb[4].mxu1 %v217_v28  ;;  %v2901_v61 = vsub.f32 %v63_v3, %v2862_v37 }
  0x2f   :  { %1958 = vmatmul.mubr.f32.gmra.mrb[4].mxu0 %v3206_v31  ;;  %v256_v24 = vsub.f32 %v2813_v40, %v3207_v44  ;;  %v2903_v45 = vand.u32 4294901760, %v65_v38  ;;  %2130 = vmatpush3.bf16.msra.mxu1 %v2127_v16  ;;  %v247_v46 = vand.u32 4294901760, %v246_v51  ;;  %v2135_v30 = vpack.c.bf16 %v391_v41, %v384_v7 }
  0x30   :  { %3208 = vst [vmem:[#allocation23_spill] sm:$0xff] %v2901_v61  ;;  %2226 = vmatpush3.bf16.msra.mxu0 %v2783_v19  ;;  %v3209_v28 = vand.u32 4294901760, %v2738_v56  ;;  %v3210_v31 = vand.u32 4294901760, %v2743_v11  ;;  %v3211_v34 = vand.u32 4294901760, %v2825_v60  ;;  %1792 = vmatprep.mubr.f32.mxu1 %v227_v58  ;;  %v3212_v3 = vand.u32 4294901760, %v2717_v4 }
  0x31   :  { %v398_v37 = vand.u32 4294901760, %v397_v21  ;;  %v285_v16 = vand.u32 4294901760, %v2874_v23  ;;  %v3213_v19 = vand.u32 4294901760, %v2839_v55  ;;  %v2920_v51 = vsub.f32 %v64_v59, %v2877_v20  ;;  %2132 = vmatprep.subr.bf16.mxu1 %v2131_v39  ;;  %2228 = vmatprep.subr.bf16.mxu0 %v2227_v33 }
  0x32   :  { %v2231_v62 = vpack.c.bf16 %v3210_v31, %v3209_v28  ;;  %v266_v44 = vsub.f32 %v2825_v60, %v3211_v34  ;;  %1960 = vmatprep.mubr.f32.mxu0 %v3212_v3  ;;  %v405_v7 = vand.u32 4294901760, %v404_v12  ;;  %v418_v28 = vsub.f32 %v2848_v9, %v417_v32  ;;  %1793 = vmatmul.mubr.f32.gmra.mrb[6].mxu1 %v237_v52 }
  0x33   :  { %v411_v41 = vsub.f32 %v2839_v55, %v3213_v19  ;;  %v424_v34 = vand.u32 4294901760, %v2887_v27  ;;  %v431_v58 = vand.u32 4294901760, %v2892_v29  ;;  %v3214_v21 = vand.u32 4294901760, %v2721_v8  ;;  %2134 = vmatpush3.bf16.msra.mxu1 %v2131_v39  ;;  %1795 = vmatprep.mubr.f32.mxu1 %v247_v46 }
  0x34   :  { %v257_v31 = vand.u32 4294901760, %v256_v24  ;;  %v276_v3 = vsub.f32 %v2860_v2, %v275_v25  ;;  %v295_v19 = vand.u32 4294901760, %v2901_v61  ;;  %v2930_v59 = vsub.f32 %v65_v38, %v2903_v45  ;;  %2230 = vmatpush3.bf16.msra.mxu0 %v2227_v33  ;;  %2136 = vmatprep.subr.bf16.mxu1 %v2135_v30 }
  0x35   :  { %1961 = vmatmul.mubr.f32.gmra.mrb[6].mxu0 %v3214_v21  ;;  %v267_v12 = vand.u32 4294901760, %v266_v44  ;;  %v3215_v4 = vand.u32 4294901760, %v2767_v22  ;;  %v3216_v52 = vand.u32 4294901760, %v2793_v15  ;;  %v3217_v8 = vand.u32 4294901760, %v2804_v50  ;;  %2232 = vmatprep.subr.bf16.mxu0 %v2231_v62 }
  0x36   :  { %v286_v24 = vsub.f32 %v2874_v23, %v285_v16  ;;  %v412_v2 = vand.u32 4294901760, %v411_v41  ;;  %v305_v20 = vand.u32 4294901760, %v2920_v51  ;;  %v2139_v38 = vpack.c.bf16 %v405_v7, %v398_v37  ;;  %1796 = vmatmul.mubr.f32.gmra.mrb[8].mxu1 %v257_v31 }
  0x37   :  { %1963 = vmatprep.mubr.f32.mxu0 %v3215_v4  ;;  %v2235_v21 = vpack.c.bf16 %v3217_v8, %v3216_v52  ;;  %v419_v39 = vand.u32 4294901760, %v418_v28  ;;  %v425_v33 = vsub.f32 %v2887_v27, %v424_v34  ;;  %v432_v46 = vsub.f32 %v2892_v29, %v431_v58  ;;  %2138 = vmatpush3.bf16.msra.mxu1 %v2135_v30 }
  0x38   :  { %v3218_v4 = vand.u32 4294901760, %v2813_v40  ;;  %v277_v44 = vand.u32 4294901760, %v276_v3  ;;  %v296_v8 = vsub.f32 %v2901_v61, %v295_v19  ;;  %v315_v52 = vand.u32 4294901760, %v2930_v59  ;;  %2234 = vmatpush3.bf16.msra.mxu0 %v2231_v62  ;;  %1798 = vmatprep.mubr.f32.mxu1 %v267_v12 }
  0x39   :  { %v3219_v41 = vand.u32 4294901760, %v2825_v60  ;;  %v287_v37 = vand.u32 4294901760, %v286_v24  ;;  %v306_v7 = vsub.f32 %v2920_v51, %v305_v20  ;;  %2140 = vmatprep.subr.bf16.mxu1 %v2139_v38  ;;  %2236 = vmatprep.subr.bf16.mxu0 %v2235_v21  ;;  %v2143_v28 = vpack.c.bf16 %v419_v39, %v412_v2 }
  0x3a   :  { %1964 = vmatmul.mubr.f32.gmra.mrb[8].mxu0 %v3218_v4  ;;  %v3220_v31 = vand.u32 4294901760, %v2839_v55  ;;  %v426_v3 = vand.u32 4294901760, %v425_v33  ;;  %v433_v23 = vand.u32 4294901760, %v432_v46  ;;  %1799 = vmatmul.mubr.f32.gmra.mrb[10].mxu1 %v277_v44  ;;  %v297_v61 = vand.u32 4294901760, %v296_v8 }
  0x3b   :  { %1966 = vmatprep.mubr.f32.mxu0 %v3219_v41  ;;  %v316_v30 = vsub.f32 %v2930_v59, %v315_v52  ;;  %2142 = vmatpush3.bf16.msra.mxu1 %v2139_v38  ;;  %v307_v62 = vand.u32 4294901760, %v306_v7  ;;  %v2243_v24 = vpack.c.bf16 %v431_v58, %v424_v34 }
  0x3c   :  { %v2239_v4 = vpack.c.bf16 %v417_v32, %v3220_v31  ;;  %2238 = vmatpush3.bf16.msra.mxu0 %v2235_v21  ;;  %1801 = vmatprep.mubr.f32.mxu1 %v287_v37  ;;  %v2147_v12 = vpack.c.bf16 %v433_v23, %v426_v3  ;;  %v3232_v23 = vld [vmem:[#allocation5_spill] sm:$0xff] }
  0x3d   :  { %2144 = vmatprep.subr.bf16.mxu1 %v2143_v28  ;;  %v317_v2 = vand.u32 4294901760, %v316_v30  ;;  %v3234_v32 = vld [vmem:[#allocation9_spill] sm:$0xff] }
  0x3e   :  { %1967 = vmatmul.mubr.f32.gmra.mrb[10].mxu0 %v275_v25  ;;  %2240 = vmatprep.subr.bf16.mxu0 %v2239_v4  ;;  %v2151_v25 = vpack.c.bf16 %v2550_v36, %v2548_v35  ;;  %v2159_v35 = vpack.c.bf16 %v2643_v6, %v2638_v5  ;;  %v3221_v36 = vld [vmem:[#allocation13_spill] sm:$0xff]  ;;  %v2171_v5 = vpack.c.bf16 %v2804_v50, %v2793_v15  ;;  %v3226_v6 = vld [vmem:[#allocation8_spill] sm:$0xff]  ;;  %v3229_v50 = vld [vmem:[#allocation22_spill] sm:$0xff] }
  0x3f   :  { %1969 = vmatprep.mubr.f32.mxu0 %v285_v16  ;;  %1802 = vmatmul.mubr.f32.gmra.mrb[12].mxu1 %v297_v61  ;;  %v2155_v61 = vpack.c.bf16 %v2593_v49, %v2591_v48  ;;  %v2167_v48 = vpack.c.bf16 %v2743_v11, %v2738_v56  ;;  %v3223_v49 = vld [vmem:[#allocation15_spill] sm:$0xff]  ;;  %v2175_v11 = vpack.c.bf16 %v2848_v9, %v2839_v55  ;;  %v3228_v15 = vld [vmem:[#allocation20_spill] sm:$0xff] }
  0x40   :  { %2146 = vmatpush3.bf16.msra.mxu1 %v2143_v28  ;;  %2242 = vmatpush3.bf16.msra.mxu0 %v2239_v4  ;;  %v2179_v56 = vpack.c.bf16 %v2892_v29, %v2887_v27  ;;  %v3230_v9 = vld [vmem:[#allocation11_spill] sm:$0xff]  ;;  %v3235_v27 = vld [vmem:[#allocation12_spill] sm:$0xff]  ;;  %v3236_v29 = vld [vmem:[#allocation14_spill] sm:$0xff] }
  0x41   :  { %1804 = vmatprep.mubr.f32.mxu1 %v307_v62  ;;  %2148 = vmatprep.subr.bf16.mxu1 %v2147_v12  ;;  %v3231_v55 = vld [vmem:[#allocation3_spill] sm:$0xff] }
  0x42   :  { %1970 = vmatmul.mubr.f32.gmra.mrb[12].mxu0 %v295_v19  ;;  %2244 = vmatprep.subr.bf16.mxu0 %v2243_v24 }
  0x43   :  { %1972 = vmatprep.mubr.f32.mxu0 %v305_v20  ;;  %1805 = vmatmul.mubr.f32.gmra.mrb[14].mxu1 %v317_v2  ;;  %v3233_v20 = vld [vmem:[#allocation7_spill] sm:$0xff] }
  0x44   :  { %2150 = vmatpush3.bf16.msra.mxu1 %v2147_v12  ;;  %2246 = vmatpush3.bf16.msra.mxu0 %v2243_v24 }
  0x45   :  { %1839 = vmatprep.mubr.f32.mxu1 %v2488_v17  ;;  %2152 = vmatprep.subr.bf16.mxu1 %v2151_v25 }
  0x46   :  { %1973 = vmatmul.mubr.f32.gmra.mrb[14].mxu0 %v315_v52  ;;  %2248 = vmatprep.subr.bf16.mxu0 %v2465_v10 }
  0x47   :  { %2007 = vmatprep.mubr.f32.mxu0 %v2488_v17  ;;  %1840 = vmatmul.mubr.f32.vlgmr.msra.gmra.mrb[0].mxu1 %v2519_v26 }
  0x48   :  { %2154 = vmatpush3.bf16.msra.mxu1 %v2151_v25  ;;  %1842 = vmatprep.mubr.f32.mxu1 %v2568_v42 }
  0x49   :  { %2156 = vmatprep.subr.bf16.mxu1 %v2155_v61 }
  0x4a   :  { %2008 = vmatmul.mubr.f32.vlgmr.msra.gmra.mrb[0].mxu0 %v2519_v26 }
  0x4b   :  { %2250 = vmatpush3.bf16.msra.mxu0 %v2465_v10  ;;  %2010 = vmatprep.mubr.f32.mxu0 %v2568_v42  ;;  %v2163_v10 = vpack.c.bf16 %v2703_v14, %v2686_v57  ;;  %v3224_v57 = vld [vmem:[#allocation18_spill] sm:$0xff] }
  0x4c   :  { %2252 = vmatprep.subr.bf16.mxu0 %v2469_v13  ;;  %1843 = vmatmul.mubr.f32.gmra.mrb[2].mxu1 %v2589_v47  ;;  %v3227_v14 = vld [vmem:[#allocation10_spill] sm:$0xff] }
  0x4d   :  { %2158 = vmatpush3.bf16.msra.mxu1 %v2155_v61  ;;  %1845 = vmatprep.mubr.f32.mxu1 %v2625_v63 }
  0x4e   :  { %2011 = vmatmul.mubr.f32.gmra.mrb[2].mxu0 %v2589_v47  ;;  %2160 = vmatprep.subr.bf16.mxu1 %v2159_v35 }
  0x4f   :  { %2254 = vmatpush3.bf16.msra.mxu0 %v2469_v13  ;;  %2013 = vmatprep.mubr.f32.mxu0 %v2625_v63  ;;  %v3222_v13 = vld [vmem:[#allocation4_spill] sm:$0xff] }
  0x50   :  { %2256 = vmatprep.subr.bf16.mxu0 %v2496_v18  ;;  %1846 = vmatmul.mubr.f32.gmra.mrb[4].mxu1 %v2628_v1 }
  0x51   :  { %2162 = vmatpush3.bf16.msra.mxu1 %v2159_v35  ;;  %1848 = vmatprep.mubr.f32.mxu1 %v3221_v36 }
  0x52   :  { %2014 = vmatmul.mubr.f32.gmra.mrb[4].mxu0 %v2628_v1  ;;  %2164 = vmatprep.subr.bf16.mxu1 %v2163_v10 }
  0x53   :  { %2258 = vmatpush3.bf16.msra.mxu0 %v2496_v18  ;;  %2016 = vmatprep.mubr.f32.mxu0 %v3221_v36  ;;  %v3225_v18 = vld [vmem:[#allocation6_spill] sm:$0xff] }
  0x54   :  { %2260 = vmatprep.subr.bf16.mxu0 %v3222_v13  ;;  %1849 = vmatmul.mubr.f32.gmra.mrb[6].mxu1 %v3223_v49 }
  0x55   :  { %2166 = vmatpush3.bf16.msra.mxu1 %v2163_v10  ;;  %1851 = vmatprep.mubr.f32.mxu1 %v3224_v57 }
  0x56   :  { %2017 = vmatmul.mubr.f32.gmra.mrb[6].mxu0 %v3223_v49  ;;  %2168 = vmatprep.subr.bf16.mxu1 %v2167_v48 }
  0x57   :  { %2262 = vmatpush3.bf16.msra.mxu0 %v3222_v13  ;;  %2019 = vmatprep.mubr.f32.mxu0 %v3224_v57 }
  0x58   :  { %2264 = vmatprep.subr.bf16.mxu0 %v3225_v18  ;;  %1852 = vmatmul.mubr.f32.gmra.mrb[8].mxu1 %v2769_v43 }
  0x59   :  { %2170 = vmatpush3.bf16.msra.mxu1 %v2167_v48  ;;  %1854 = vmatprep.mubr.f32.mxu1 %v2776_v53 }
  0x5a   :  { %2020 = vmatmul.mubr.f32.gmra.mrb[8].mxu0 %v2769_v43  ;;  %2172 = vmatprep.subr.bf16.mxu1 %v2171_v5 }
  0x5b   :  { %2266 = vmatpush3.bf16.msra.mxu0 %v3225_v18  ;;  %2022 = vmatprep.mubr.f32.mxu0 %v2776_v53 }
  0x5c   :  { %2268 = vmatprep.subr.bf16.mxu0 %v3226_v6  ;;  %1855 = vmatmul.mubr.f32.gmra.mrb[10].mxu1 %v2815_v0 }
  0x5d   :  { %2174 = vmatpush3.bf16.msra.mxu1 %v2171_v5  ;;  %1857 = vmatprep.mubr.f32.mxu1 %v2834_v54 }
  0x5e   :  { %2023 = vmatmul.mubr.f32.gmra.mrb[10].mxu0 %v2815_v0  ;;  %2176 = vmatprep.subr.bf16.mxu1 %v2175_v11 }
  0x5f   :  { %2270 = vmatpush3.bf16.msra.mxu0 %v3226_v6  ;;  %2025 = vmatprep.mubr.f32.mxu0 %v2834_v54 }
  0x60   :  { %2272 = vmatprep.subr.bf16.mxu0 %v3227_v14  ;;  %1858 = vmatmul.mubr.f32.gmra.mrb[12].mxu1 %v3228_v15 }
  0x61   :  { %2178 = vmatpush3.bf16.msra.mxu1 %v2175_v11  ;;  %1860 = vmatprep.mubr.f32.mxu1 %v3229_v50 }
  0x62   :  { %2026 = vmatmul.mubr.f32.gmra.mrb[12].mxu0 %v3228_v15  ;;  %2180 = vmatprep.subr.bf16.mxu1 %v2179_v56 }
  0x63   :  { %2274 = vmatpush3.bf16.msra.mxu0 %v3227_v14  ;;  %2028 = vmatprep.mubr.f32.mxu0 %v3229_v50 }
  0x64   :  { %2276 = vmatprep.subr.bf16.mxu0 %v3230_v9  ;;  %1861 = vmatmul.mubr.f32.gmra.mrb[14].mxu1 %v2903_v45 }
  0x65   :  { %2182 = vmatpush3.bf16.msra.mxu1 %v2179_v56  ;;  %1895 = vmatprep.mubr.f32.mxu1 %v3231_v55 }
  0x66   :  { %2029 = vmatmul.mubr.f32.gmra.mrb[14].mxu0 %v2903_v45 }
  0x67   :  { %2278 = vmatpush3.bf16.msra.mxu0 %v3230_v9  ;;  %2063 = vmatprep.mubr.f32.mxu0 %v2488_v17  ;;  %v3237_v17 = vld [vmem:[#allocation16_spill] sm:$0xff] }
  0x68   :  { %1896 = vmatmul.mubr.f32.vlgmr.msra.gmra.mrb[0].mxu1 %v3232_v23 }
  0x69   :  { %1898 = vmatprep.mubr.f32.mxu1 %v3233_v20 }
  0x6a   :  { %2064 = vmatmul.mubr.f32.vlgmr.msra.gmra.mrb[0].mxu0 %v2519_v26  ;;  %v3238_v26 = vld [vmem:[#allocation17_spill] sm:$0xff] }
  0x6b   :  { %2066 = vmatprep.mubr.f32.mxu0 %v2568_v42  ;;  %v3239_v42 = vld [vmem:[#allocation19_spill] sm:$0xff] }
  0x6c   :  { %1899 = vmatmul.mubr.f32.gmra.mrb[2].mxu1 %v3234_v32 }
  0x6d   :  { %1901 = vmatprep.mubr.f32.mxu1 %v3235_v27 }
  0x6e   :  { %2067 = vmatmul.mubr.f32.gmra.mrb[2].mxu0 %v2589_v47  ;;  %v3240_v47 = vld [vmem:[#allocation21_spill] sm:$0xff] }
  0x6f   :  { %2069 = vmatprep.mubr.f32.mxu0 %v2625_v63  ;;  %v3241_v63 = vld [vmem:[#allocation23_spill] sm:$0xff] }
  0x70   :  { %1902 = vmatmul.mubr.f32.gmra.mrb[4].mxu1 %v3236_v29 }
  0x71   :  { %1904 = vmatprep.mubr.f32.mxu1 %v3237_v17 }
  0x72   :  { %2070 = vmatmul.mubr.f32.gmra.mrb[4].mxu0 %v2628_v1 }
  0x73   :  { %2072 = vmatprep.mubr.f32.mxu0 %v3221_v36 }
  0x74   :  { %1905 = vmatmul.mubr.f32.gmra.mrb[6].mxu1 %v3238_v26 }
  0x75   :  { %1907 = vmatprep.mubr.f32.mxu1 %v2767_v22  ;;  %v3051_v22 = vld [vmem:[%s3119_s2] ss:$0 sm:$0xff] }
  0x76   :  { %2073 = vmatmul.mubr.f32.gmra.mrb[6].mxu0 %v3223_v49 }
  0x77   :  { %2075 = vmatprep.mubr.f32.mxu0 %v3224_v57 }
  0x78   :  { %1908 = vmatmul.mubr.f32.gmra.mrb[8].mxu1 %v2813_v40 }
  0x79   :  { %1910 = vmatprep.mubr.f32.mxu1 %v2825_v60 }
  0x7a   :  { %2076 = vmatmul.mubr.f32.gmra.mrb[8].mxu0 %v2769_v43 }
  0x7b   :  { %2078 = vmatprep.mubr.f32.mxu0 %v2776_v53 }
  0x7c   :  { %1911 = vmatmul.mubr.f32.gmra.mrb[10].mxu1 %v3239_v42 }
  0x7d   :  { %1913 = vmatprep.mubr.f32.mxu1 %v3240_v47 }
  0x7e   :  { %2079 = vmatmul.mubr.f32.gmra.mrb[10].mxu0 %v2815_v0 }
  0x7f   :  { %2081 = vmatprep.mubr.f32.mxu0 %v2834_v54 }
  0x80   :  { %1914 = vmatmul.mubr.f32.gmra.mrb[12].mxu1 %v3241_v63 }
  0x81   :  { %1916 = vmatprep.mubr.f32.mxu1 %v2920_v51 }
  0x82   :  { %2082 = vmatmul.mubr.f32.gmra.mrb[12].mxu0 %v3228_v15 }
  0x83   :  { %2084 = vmatprep.mubr.f32.mxu0 %v3229_v50 }
  0x84   :  { %1917 = vmatmul.mubr.f32.gmra.mrb[14].mxu1 %v2930_v59 }
  0x86   :  { %2085 = vmatmul.mubr.f32.gmra.mrb[14].mxu0 %v2903_v45 }
 0x13b   :  { %v1897_v43 = vpop.f32.mrb[0].mxu1 }
 0x13c   :  { %v664_v40 = vpop.f32.mrb[1].mxu1 }
 0x13d   :  { %v2065_v1 = vpop.f32.mrb[0].mxu0 }
 0x13e   :  { %v2279_v53 = vadd.f32 %v2065_v1, %v1897_v43  ;;  %v1274_v0 = vpop.f32.mrb[1].mxu0 }
 0x13f   :  { %v2280_v60 = vadd.f32 %v1274_v0, %v664_v40  ;;  %v1900_v51 = vpop.f32.mrb[2].mxu1 }
 0x140   :  { %v1427_v54 = vadd.f32 %v2279_v53, %v3051_v22  ;;  %v678_v45 = vpop.f32.mrb[3].mxu1 }
 0x141   :  { %v1426_v16 = vadd.f32 %v2280_v60, %v3051_v22  ;;  %v2068_v34 = vpop.f32.mrb[2].mxu0 }
 0x142   :  { %v1443_v58 = vsub.f32 0.0, %v1427_v54  ;;  %v2281_v19 = vadd.f32 %v2068_v34, %v1900_v51  ;;  %v1286_v59 = vpop.f32.mrb[3].mxu0 }
 0x143   :  { %v1442_v21 = vsub.f32 0.0, %v1426_v16  ;;  %v2282_v38 = vadd.f32 %v1286_v59, %v678_v45  ;;  %v1903_v8 = vpop.f32.mrb[4].mxu1 }
 0x144   :  { %v1460_v39 = vmul.f32 1.442695, %v1443_v58  ;;  %v1429_v33 = vadd.f32 %v2281_v19, %v3051_v22  ;;  %v692_v7 = vpop.f32.mrb[5].mxu1 }
 0x145   :  { %v1458_v46 = vmul.f32 1.442695, %v1442_v21  ;;  %v1428_v44 = vadd.f32 %v2282_v38, %v3051_v22  ;;  %v2071_v52 = vpop.f32.mrb[4].mxu0 }
 0x146   :  { %2359 = vpow2.f32 %v1460_v39  ;;  %v1445_v41 = vsub.f32 0.0, %v1429_v33  ;;  %v2283_v37 = vadd.f32 %v2071_v52, %v1903_v8  ;;  %v1298_v28 = vpop.f32.mrb[5].mxu0 }
 0x147   :  { %2361 = vpow2.f32 %v1458_v46  ;;  %v1444_v31 = vsub.f32 0.0, %v1428_v44  ;;  %v2284_v4 = vadd.f32 %v1298_v28, %v692_v7  ;;  %v1906_v24 = vpop.f32.mrb[6].mxu1 }
 0x148   :  { %v1464_v3 = vmul.f32 1.442695, %v1445_v41  ;;  %v1431_v30 = vadd.f32 %v2283_v37, %v3051_v22  ;;  %v706_v35 = vpop.f32.mrb[7].mxu1 }
 0x149   :  { %v1462_v62 = vmul.f32 1.442695, %v1444_v31  ;;  %v1430_v12 = vadd.f32 %v2284_v4, %v3051_v22  ;;  %v2074_v2 = vpop.f32.mrb[6].mxu0 }
 0x14a   :  { %2363 = vpow2.f32 %v1464_v3  ;;  %v1447_v25 = vsub.f32 0.0, %v1431_v30  ;;  %v2285_v61 = vadd.f32 %v2074_v2, %v1906_v24  ;;  %v1310_v10 = vpop.f32.mrb[7].mxu0 }
 0x14b   :  { %2365 = vpow2.f32 %v1462_v62  ;;  %v1446_v36 = vsub.f32 0.0, %v1430_v12  ;;  %v2286_v13 = vadd.f32 %v1310_v10, %v706_v35  ;;  %v1909_v5 = vpop.f32.mrb[8].mxu1 }
 0x14c   :  { %v1468_v48 = vmul.f32 1.442695, %v1447_v25  ;;  %v1433_v49 = vadd.f32 %v2285_v61, %v3051_v22  ;;  %v720_v56 = vpop.f32.mrb[9].mxu1 }
 0x14d   :  { %v1466_v57 = vmul.f32 1.442695, %v1446_v36  ;;  %v1432_v18 = vadd.f32 %v2286_v13, %v3051_v22  ;;  %v2077_v6 = vpop.f32.mrb[8].mxu0 }
 0x14e   :  { %2367 = vpow2.f32 %v1468_v48  ;;  %v1449_v11 = vsub.f32 0.0, %v1433_v49  ;;  %v2287_v14 = vadd.f32 %v2077_v6, %v1909_v5  ;;  %v1322_v15 = vpop.f32.mrb[9].mxu0 }
 0x14f   :  { %2369 = vpow2.f32 %v1466_v57  ;;  %v1448_v50 = vsub.f32 0.0, %v1432_v18  ;;  %v2288_v9 = vadd.f32 %v1322_v15, %v720_v56  ;;  %v1912_v26 = vpop.f32.mrb[10].mxu1 }
 0x150   :  { %v2360_v55 = vpop.eup %2359  ;;  %v1472_v23 = vmul.f32 1.442695, %v1449_v11  ;;  %v1435_v20 = vadd.f32 %v2287_v14, %v3051_v22  ;;  %v734_v1 = vpop.f32.mrb[11].mxu1 }
 0x151   :  { %v2362_v32 = vpop.eup %2361  ;;  %v1491_v27 = vadd.f32 1.0, %v2360_v55  ;;  %v1470_v29 = vmul.f32 1.442695, %v1448_v50  ;;  %v1434_v17 = vadd.f32 %v2288_v9, %v3051_v22  ;;  %v2080_v42 = vpop.f32.mrb[10].mxu0 }
 0x152   :  { %v1490_v47 = vadd.f32 1.0, %v2362_v32  ;;  %2371 = vpow2.f32 %v1472_v23  ;;  %v1451_v63 = vsub.f32 0.0, %v1435_v20  ;;  %v2289_v43 = vadd.f32 %v2080_v42, %v1912_v26  ;;  %v1334_v53 = vpop.f32.mrb[11].mxu0 }
 0x153   :  { %2373 = vrcp.f32 %v1491_v27  ;;  %v1450_v40 = vsub.f32 0.0, %v1434_v17  ;;  %v2290_v0 = vadd.f32 %v1334_v53, %v734_v1  ;;  %v1915_v45 = vpop.f32.mrb[12].mxu1 }
 0x154   :  { %v2364_v60 = vpop.eup %2363  ;;  %2375 = vrcp.f32 %v1490_v47  ;;  %v1476_v54 = vmul.f32 1.442695, %v1451_v63  ;;  %v1437_v16 = vadd.f32 %v2289_v43, %v3051_v22  ;;  %v748_v33 = vpop.f32.mrb[13].mxu1 }
 0x155   :  { %v2366_v51 = vpop.eup %2365  ;;  %v1493_v34 = vadd.f32 1.0, %v2364_v60  ;;  %2377 = vpow2.f32 %v1470_v29  ;;  %v1474_v58 = vmul.f32 1.442695, %v1450_v40  ;;  %v1436_v19 = vadd.f32 %v2290_v0, %v3051_v22  ;;  %v2083_v59 = vpop.f32.mrb[12].mxu0 }
 0x156   :  { %v1492_v21 = vadd.f32 1.0, %v2366_v51  ;;  %2379 = vpow2.f32 %v1476_v54  ;;  %v1453_v38 = vsub.f32 0.0, %v1437_v16  ;;  %v2291_v39 = vadd.f32 %v2083_v59, %v1915_v45  ;;  %v1346_v46 = vpop.f32.mrb[13].mxu0 }
 0x157   :  { %2381 = vrcp.f32 %v1493_v34  ;;  %v1452_v44 = vsub.f32 0.0, %v1436_v19  ;;  %v2292_v8 = vadd.f32 %v1346_v46, %v748_v33  ;;  %v1918_v3 = vpop.f32.mrb[14].mxu1 }
 0x158   :  { %v2368_v52 = vpop.eup %2367  ;;  %2383 = vrcp.f32 %v1492_v21  ;;  %v1480_v41 = vmul.f32 1.442695, %v1453_v38  ;;  %v1439_v37 = vadd.f32 %v2291_v39, %v3051_v22  ;;  %v762_v2 = vpop.f32.mrb[15].mxu1 }
 0x159   :  { %v2370_v7 = vpop.eup %2369  ;;  %v1495_v28 = vadd.f32 1.0, %v2368_v52  ;;  %2385 = vpow2.f32 %v1474_v58  ;;  %v1478_v31 = vmul.f32 1.442695, %v1452_v44  ;;  %v1438_v4 = vadd.f32 %v2292_v8, %v3051_v22  ;;  %v2086_v30 = vpop.f32.mrb[14].mxu0 }
 0x15a   :  { %v1494_v62 = vadd.f32 1.0, %v2370_v7  ;;  %2387 = vpow2.f32 %v1480_v41  ;;  %v1455_v12 = vsub.f32 0.0, %v1439_v37  ;;  %v2293_v24 = vadd.f32 %v2086_v30, %v1918_v3  ;;  %v1358_v25 = vpop.f32.mrb[15].mxu0 }
 0x15b   :  { %2389 = vrcp.f32 %v1495_v28  ;;  %v1454_v61 = vsub.f32 0.0, %v1438_v4  ;;  %v2294_v35 = vadd.f32 %v1358_v25, %v762_v2 }
 0x15c   :  { %v2372_v10 = vpop.eup %2371  ;;  %2391 = vrcp.f32 %v1494_v62  ;;  %v1484_v36 = vmul.f32 1.442695, %v1455_v12  ;;  %v1441_v13 = vadd.f32 %v2293_v24, %v3051_v22 }
 0x15d   :  { %v2374_v48 = vpop.eup %2373  ;;  %v1497_v49 = vadd.f32 1.0, %v2372_v10  ;;  %2393 = vpow2.f32 %v1478_v31  ;;  %v1482_v57 = vmul.f32 1.442695, %v1454_v61  ;;  %v1440_v18 = vadd.f32 %v2294_v35, %v3051_v22 }
 0x15e   :  { %v2376_v5 = vpop.eup %2375  ;;  %1539 = vst [vmem:[%s3120_s3 + $0x8] sm:$0xff] %v2374_v48  ;;  %2395 = vpow2.f32 %v1484_v36  ;;  %v1457_v6 = vsub.f32 0.0, %v1441_v13 }
 0x15f   :  { %v2378_v11 = vpop.eup %2377  ;;  %1538 = vst [vmem:[%s3120_s3] sm:$0xff] %v2376_v5  ;;  %2397 = vrcp.f32 %v1497_v49  ;;  %v1456_v14 = vsub.f32 0.0, %v1440_v18 }
 0x160   :  { %v2380_v56 = vpop.eup %2379  ;;  %v1496_v15 = vadd.f32 1.0, %v2378_v11  ;;  %2399 = vpow2.f32 %v1482_v57  ;;  %v1488_v50 = vmul.f32 1.442695, %v1457_v6 }
 0x161   :  { %v2382_v9 = vpop.eup %2381  ;;  %v1499_v22 = vadd.f32 1.0, %v2380_v56  ;;  %v1486_v55 = vmul.f32 1.442695, %v1456_v14 }
 0x162   :  { %v2384_v23 = vpop.eup %2383  ;;  %1541 = vst [vmem:[%s3120_s3 + $0x18] sm:$0xff] %v2382_v9  ;;  %2401 = vrcp.f32 %v1496_v15 }
 0x163   :  { %v2386_v20 = vpop.eup %2385  ;;  %1540 = vst [vmem:[%s3120_s3 + $0x10] sm:$0xff] %v2384_v23  ;;  %2403 = vrcp.f32 %v1499_v22 }
 0x164   :  { %v2388_v32 = vpop.eup %2387  ;;  %v1498_v27 = vadd.f32 1.0, %v2386_v20  ;;  %2405 = vpow2.f32 %v1488_v50 }
 0x165   :  { %v2390_v29 = vpop.eup %2389  ;;  %v1501_v17 = vadd.f32 1.0, %v2388_v32  ;;  %2407 = vpow2.f32 %v1486_v55 }
 0x166   :  { %v2392_v26 = vpop.eup %2391  ;;  %1543 = vst [vmem:[%s3120_s3 + $0x28] sm:$0xff] %v2390_v29  ;;  %2409 = vrcp.f32 %v1498_v27 }
 0x167   :  { %v2394_v42 = vpop.eup %2393  ;;  %1542 = vst [vmem:[%s3120_s3 + $0x20] sm:$0xff] %v2392_v26  ;;  %2411 = vrcp.f32 %v1501_v17 }
 0x168   :  { %v2396_v47 = vpop.eup %2395  ;;  %v1500_v63 = vadd.f32 1.0, %v2394_v42 }
 0x169   :  { %v2398_v43 = vpop.eup %2397  ;;  %v1503_v1 = vadd.f32 1.0, %v2396_v47 }
 0x16a   :  { %v2400_v53 = vpop.eup %2399  ;;  %1545 = vst [vmem:[%s3120_s3 + $0x38] sm:$0xff] %v2398_v43  ;;  %2413 = vrcp.f32 %v1500_v63 }
 0x16b   :  { %2415 = vrcp.f32 %v1503_v1  ;;  %v1502_v40 = vadd.f32 1.0, %v2400_v53 }
 0x16c   :  { %v2402_v0 = vpop.eup %2401 }
 0x16d   :  { %v2404_v60 = vpop.eup %2403  ;;  %1544 = vst [vmem:[%s3120_s3 + $0x30] sm:$0xff] %v2402_v0  ;;  %2417 = vrcp.f32 %v1502_v40 }
 0x16e   :  { %v2406_v54 = vpop.eup %2405  ;;  %1547 = vst [vmem:[%s3120_s3 + $0x48] sm:$0xff] %v2404_v60 }
 0x16f   :  { %v2408_v16 = vpop.eup %2407  ;;  %v1505_v51 = vadd.f32 1.0, %v2406_v54 }
 0x170   :  { %v2410_v34 = vpop.eup %2409  ;;  %v1504_v58 = vadd.f32 1.0, %v2408_v16 }
 0x171   :  { %v2412_v19 = vpop.eup %2411  ;;  %1546 = vst [vmem:[%s3120_s3 + $0x40] sm:$0xff] %v2410_v34  ;;  %2419 = vrcp.f32 %v1505_v51 }
 0x172   :  { %1549 = vst [vmem:[%s3120_s3 + $0x58] sm:$0xff] %v2412_v19  ;;  %2421 = vrcp.f32 %v1504_v58 }
 0x174   :  { %v2414_v45 = vpop.eup %2413 }
 0x175   :  { %v2416_v59 = vpop.eup %2415  ;;  %1548 = vst [vmem:[%s3120_s3 + $0x50] sm:$0xff] %v2414_v45 }
 0x176   :  { %1551 = vst [vmem:[%s3120_s3 + $0x68] sm:$0xff] %v2416_v59 }
 0x177   :  { %v2418_v21 = vpop.eup %2417 }
 0x178   :  { %1550 = vst [vmem:[%s3120_s3 + $0x60] sm:$0xff] %v2418_v21 }
 0x17b   :  { %v2420_v38 = vpop.eup %2419 }
 0x17c   :  { %v2422_v39 = vpop.eup %2421  ;;  %1553 = vst [vmem:[%s3120_s3 + $0x78] sm:$0xff] %v2420_v38 }
 0x17d   :  { %1552 = vst [vmem:[%s3120_s3 + $0x70] sm:$0xff] %v2422_v39 }

// kernel: stage_block_forward.31
= control target key start
LH: loop header
LB: loop body
LE: loop exit
PB: predicated region body
PF: predicated region fallthrough
CT: control target
= control target key end

     0   :  { %7 = vsyncpa [#allocation3], 0  ;;  %s796_s0 = inlined_call_operand.vmem [shape: f32[2,256,64], index: 0, kind: input, shape index: {}]   ;;  %s797_s1 = inlined_call_operand.vmem [shape: f32[2,256,64], index: 1, kind: input, shape index: {}]   ;;  %s798_s2 = inlined_call_operand.hbm [shape: f32[2,256,64], index: 2, kind: output, shape index: {}]  }
   0x1   :  { %9 = vsyncpa [#allocation3 + $0x1], 0  ;;  %s551_s9 = smov 0   ;;  %s553_s10 = smov 0  }
   0x2   :  { %s555_s11 = smov 0   ;;  %s557_s12 = smov 0  }
   0x3 LB: > { %s572_s13 = sadd.s32 4294967295, %s531_s12   ;;  %s411_s14 = sadd.s32 4294967294, %s531_s12   ;;  %s531_s12 = sphi %s557_s12, %s804_s12   ;;  %s527_s11 = sphi %s555_s11, %s803_s11   ;;  %s523_s10 = sphi %s553_s10, %s802_s10   ;;  %s519_s9 = sphi %s551_s9, %s801_s9  }
   0x4   : > { %s576_s15 = sadd.s32 1, %s531_s12   ;;  %s74_s16 = sadd.s32 1, %s527_s11 }
   0x5   : > { %s71_s17 = ssub.s32 %s531_s12, %s576_s15  ;;  %p84_p0 = scmp.ne.s32.totalorder %s527_s11, %s523_s10 }
   0x6   : > { %p72_p1 = scmp.eq.s32.totalorder %s71_s17, 0  ;;  %p85_p2 = scmp.eq.s32.totalorder %s572_s13, 1 }
   0x7   : > { %p90_p3 = scmp.ne.s32.totalorder %s523_s10, %s519_s9  ;;  %p91_p4 = scmp.eq.s32.totalorder %s411_s14, 1 }
   0x8   : > { %s587_s18 = scalar_select %p72_p1, %s527_s11, %s74_s16  }
   0x9   : > { %p589_p5 = por %p85_p2, %p84_p0  ;;  %p593_p6 = por %p91_p4, %p90_p3 }
   0xa   : > { %p414_p7 = scmp.ge.s32.totalorder %s531_s12, 1  ;;  %p125_p8 = scmp.lt.s32.totalorder %s531_s12, 3 }
   0xc   : > { %p126_p9 = pnand %p414_p7, %p125_p8 }
   0xd   : > { %p152_p10 = scmp.lt.s32.totalorder (!%p126_p9), %s572_s13, 1  ;;  %s149_s21 = sand.u32 (!%p126_p9), 1, %s523_s10   ;;  %vm290_vm0 = vcmask (!%p126_p9), 523264  }
   0xe   : > { %129 = sbr.rel (%p126_p9) target bundleno = 69 (0x45), region = 28  ;;  %s415_s23 = sshll.u32 (!%p126_p9), %s149_s21, 8 }
   0xf   : > { %s629_s3 = scalar_lea.vmem (!%p126_p9), [#allocation2], %s415_s23  ;;  %s427_s4 = sshll.u32 (!%p126_p9), %s572_s13, 12 }
  0x10   : > { %s337_s5 = sshll.u32 (!%p126_p9), %s629_s3, 4  ;;  %s741_s8 = scalar_lea.hbm (!%p126_p9), %s798_s2, %s427_s4  ;;  %s743_s5 = int_to_ptr.vmem [resolvable:$true] %s337_s5 }
  0x11   : > { %s469_s14 = scalar_lea.vmem (!%p126_p9), %s743_s5, 4096  ;;  %s533_s16 = smov (!%p126_p9), [#allocation2]  }
  0x12   : > { %p470_p11 = scmp.ne.s32.totalorder (!%p126_p9), %s743_s5, %s469_s14  ;;  %s473_s17 = sshll.u32 (!%p126_p9), %s533_s16, 4  ;;  %s474_s17 = int_to_ptr.vmem [resolvable:$false] %s473_s17 }
  0x13   : > { %p476_p0 = scmp.lt.s32.totalorder (!%p126_p9), %s743_s5, %s474_s17 }
  0x14   : > { %p471_p12 = pnand (!%p126_p9), %p470_p11, %p589_p5 }
  0x15   : > { %s153_s22 = scalar_select %p152_p10, %s572_s13, 1 }
  0x16   : > { %s755_s13 = scalar_lea.sflag [#allocation3], %s149_s21  ;;  %p472_p13 = pneg %p471_p12 }
  0x17   : > { %s425_s24 = sshll.u32 %s153_s22, 8  ;;  %s475_s22 = scalar_lea.vmem %s474_s17, 8192 }
  0x18   : > { %s607_s27 = scalar_lea.vmem %s796_s0, %s425_s24  ;;  %s612_s30 = scalar_lea.vmem %s797_s1, %s425_s24 }
  0x19   : > { %v162_v0 = vld [vmem:[%s607_s27] sm:$0xff]  ;;  %v163_v2 = vld [vmem:[%s607_s27 + $0x8] sm:$0xff]  ;;  %v164_v5 = vld [vmem:[%s607_s27 + $0x10] sm:$0xff]  ;;  %p477_p1 = scmp.lt.s32.totalorder %s475_s22, %s469_s14 }
  0x1a   : > { %v194_v1 = vld [vmem:[%s612_s30] sm:$0xff]  ;;  %v195_v4 = vld [vmem:[%s612_s30 + $0x8] sm:$0xff]  ;;  %v196_v6 = vld [vmem:[%s612_s30 + $0x10] sm:$0xff] }
  0x1b   : > { %v226_v3 = vadd.f32 %v194_v1, %v162_v0  ;;  %v227_v7 = vadd.f32 %v195_v4, %v163_v2  ;;  %v228_v8 = vadd.f32 %v196_v6, %v164_v5  ;;  %v165_v9 = vld [vmem:[%s607_s27 + $0x18] sm:$0xff]  ;;  %v166_v11 = vld [vmem:[%s607_s27 + $0x20] sm:$0xff]  ;;  %v167_v15 = vld [vmem:[%s607_s27 + $0x28] sm:$0xff]  ;;  %p478_p2 = por %p477_p1, %p476_p0 }
  0x1c   : > { %v197_v10 = vld [vmem:[%s612_s30 + $0x18] sm:$0xff]  ;;  %v198_v14 = vld [vmem:[%s612_s30 + $0x20] sm:$0xff]  ;;  %v199_v16 = vld [vmem:[%s612_s30 + $0x28] sm:$0xff] }
  0x1d   : > { %v258_v12 = vmax.f32 %v226_v3, 0.0  ;;  %v229_v13 = vadd.f32 %v197_v10, %v165_v9  ;;  %v259_v17 = vmax.f32 %v227_v7, 0.0  ;;  %v260_v18 = vmax.f32 %v228_v8, 0.0  ;;  %v168_v21 = vld [vmem:[%s607_s27 + $0x30] sm:$0xff]  ;;  %v169_v23 = vld [vmem:[%s607_s27 + $0x38] sm:$0xff]  ;;  %v170_v27 = vld [vmem:[%s607_s27 + $0x40] sm:$0xff]  ;;  %p479_p3 = pnand %p478_p2, %p472_p13 }
  0x1e   : > { %v230_v19 = vadd.f32 %v198_v14, %v166_v11  ;;  %v231_v20 = vadd.f32 %v199_v16, %v167_v15  ;;  %v200_v22 = vld [vmem:[%s612_s30 + $0x30] sm:$0xff]  ;;  %v201_v26 = vld [vmem:[%s612_s30 + $0x38] sm:$0xff]  ;;  %v202_v28 = vld [vmem:[%s612_s30 + $0x40] sm:$0xff] }
  0x1f   : > { %291 = vst.msk [vmem:[%s629_s3] sm:$0xff] %vm290_vm0, %v258_v12  ;;  %v261_v24 = vmax.f32 %v229_v13, 0.0  ;;  %v232_v25 = vadd.f32 %v200_v22, %v168_v21  ;;  %292 = vst.msk [vmem:[%s629_s3 + $0x8] sm:$0xff] %vm290_vm0, %v259_v17  ;;  %v233_v31 = vadd.f32 %v201_v26, %v169_v23  ;;  %v234_v32 = vadd.f32 %v202_v28, %v170_v27  ;;  %v171_v33 = vld [vmem:[%s607_s27 + $0x48] sm:$0xff]  ;;  %v172_v35 = vld [vmem:[%s607_s27 + $0x50] sm:$0xff] }
  0x20   : > { %293 = vst.msk [vmem:[%s629_s3 + $0x10] sm:$0xff] %vm290_vm0, %v260_v18  ;;  %v262_v29 = vmax.f32 %v230_v19, 0.0  ;;  %v263_v30 = vmax.f32 %v231_v20, 0.0  ;;  %v203_v34 = vld [vmem:[%s612_s30 + $0x48] sm:$0xff]  ;;  %v204_v38 = vld [vmem:[%s612_s30 + $0x50] sm:$0xff]  ;;  %v173_v39 = vld [vmem:[%s607_s27 + $0x58] sm:$0xff] }
  0x21   : > { %294 = vst.msk [vmem:[%s629_s3 + $0x18] sm:$0xff] %vm290_vm0, %v261_v24  ;;  %v264_v36 = vmax.f32 %v232_v25, 0.0  ;;  %v235_v37 = vadd.f32 %v203_v34, %v171_v33  ;;  %v205_v40 = vld [vmem:[%s612_s30 + $0x58] sm:$0xff]  ;;  %v265_v41 = vmax.f32 %v233_v31, 0.0  ;;  %v266_v42 = vmax.f32 %v234_v32, 0.0  ;;  %v174_v45 = vld [vmem:[%s607_s27 + $0x60] sm:$0xff] }
  0x22   : > { %295 = vst.msk [vmem:[%s629_s3 + $0x20] sm:$0xff] %vm290_vm0, %v262_v29  ;;  %296 = vst.msk [vmem:[%s629_s3 + $0x28] sm:$0xff] %vm290_vm0, %v263_v30  ;;  %v236_v43 = vadd.f32 %v204_v38, %v172_v35  ;;  %v237_v44 = vadd.f32 %v205_v40, %v173_v39  ;;  %v206_v46 = vld [vmem:[%s612_s30 + $0x60] sm:$0xff]  ;;  %v175_v47 = vld [vmem:[%s607_s27 + $0x68] sm:$0xff] }
  0x23   : > { %297 = vst.msk [vmem:[%s629_s3 + $0x30] sm:$0xff] %vm290_vm0, %v264_v36  ;;  %v267_v48 = vmax.f32 %v235_v37, 0.0  ;;  %v238_v49 = vadd.f32 %v206_v46, %v174_v45  ;;  %v207_v50 = vld [vmem:[%s612_s30 + $0x68] sm:$0xff]  ;;  %v176_v51 = vld [vmem:[%s607_s27 + $0x70] sm:$0xff]  ;;  %298 = vst.msk [vmem:[%s629_s3 + $0x38] sm:$0xff] %vm290_vm0, %v265_v41 }
  0x24   : > { %v208_v52 = vld [vmem:[%s612_s30 + $0x70] sm:$0xff]  ;;  %299 = vst.msk [vmem:[%s629_s3 + $0x40] sm:$0xff] %vm290_vm0, %v266_v42  ;;  %v268_v53 = vmax.f32 %v236_v43, 0.0  ;;  %v269_v54 = vmax.f32 %v237_v44, 0.0  ;;  %v239_v55 = vadd.f32 %v207_v50, %v175_v47  ;;  %v177_v57 = vld [vmem:[%s607_s27 + $0x78] sm:$0xff]  ;;  %v178_v59 = vld [vmem:[%s607_s27 + $0x80] sm:$0xff] }
  0x25   : > { %v240_v56 = vadd.f32 %v208_v52, %v176_v51  ;;  %v209_v58 = vld [vmem:[%s612_s30 + $0x78] sm:$0xff]  ;;  %300 = vst.msk [vmem:[%s629_s3 + $0x48] sm:$0xff] %vm290_vm0, %v267_v48  ;;  %v270_v60 = vmax.f32 %v238_v49, 0.0  ;;  %v210_v62 = vld [vmem:[%s612_s30 + $0x80] sm:$0xff]  ;;  %v179_v63 = vld [vmem:[%s607_s27 + $0x88] sm:$0xff] }
  0x26   : > { %v241_v61 = vadd.f32 %v209_v58, %v177_v57  ;;  %v211_v0 = vld [vmem:[%s612_s30 + $0x88] sm:$0xff]  ;;  %301 = vst.msk [vmem:[%s629_s3 + $0x50] sm:$0xff] %vm290_vm0, %v268_v53  ;;  %302 = vst.msk [vmem:[%s629_s3 + $0x58] sm:$0xff] %vm290_vm0, %v269_v54  ;;  %v271_v1 = vmax.f32 %v239_v55, 0.0  ;;  %v242_v3 = vadd.f32 %v210_v62, %v178_v59  ;;  %v180_v5 = vld [vmem:[%s607_s27 + $0x90] sm:$0xff] }
  0x27   : > { %v272_v2 = vmax.f32 %v240_v56, 0.0  ;;  %v243_v4 = vadd.f32 %v211_v0, %v179_v63  ;;  %v212_v6 = vld [vmem:[%s612_s30 + $0x90] sm:$0xff]  ;;  %v181_v7 = vld [vmem:[%s607_s27 + $0x98] sm:$0xff]  ;;  %303 = vst.msk [vmem:[%s629_s3 + $0x60] sm:$0xff] %vm290_vm0, %v270_v60  ;;  %v182_v11 = vld [vmem:[%s607_s27 + $0xa0] sm:$0xff] }
  0x28   : > { %v273_v8 = vmax.f32 %v241_v61, 0.0  ;;  %v244_v9 = vadd.f32 %v212_v6, %v180_v5  ;;  %v213_v10 = vld [vmem:[%s612_s30 + $0x98] sm:$0xff]  ;;  %v214_v12 = vld [vmem:[%s612_s30 + $0xa0] sm:$0xff]  ;;  %304 = vst.msk [vmem:[%s629_s3 + $0x68] sm:$0xff] %vm290_vm0, %v271_v1  ;;  %v274_v13 = vmax.f32 %v242_v3, 0.0  ;;  %v183_v17 = vld [vmem:[%s607_s27 + $0xa8] sm:$0xff] }
  0x29   : > { %305 = vst.msk [vmem:[%s629_s3 + $0x70] sm:$0xff] %vm290_vm0, %v272_v2  ;;  %v275_v14 = vmax.f32 %v243_v4, 0.0  ;;  %v245_v15 = vadd.f32 %v213_v10, %v181_v7  ;;  %v246_v16 = vadd.f32 %v214_v12, %v182_v11  ;;  %v215_v18 = vld [vmem:[%s612_s30 + $0xa8] sm:$0xff]  ;;  %v184_v19 = vld [vmem:[%s607_s27 + $0xb0] sm:$0xff]  ;;  %v185_v23 = vld [vmem:[%s607_s27 + $0xb8] sm:$0xff] }
  0x2a   : > { %306 = vst.msk [vmem:[%s629_s3 + $0x78] sm:$0xff] %vm290_vm0, %v273_v8  ;;  %v276_v20 = vmax.f32 %v244_v9, 0.0  ;;  %v247_v21 = vadd.f32 %v215_v18, %v183_v17  ;;  %v216_v22 = vld [vmem:[%s612_s30 + $0xb0] sm:$0xff]  ;;  %v217_v24 = vld [vmem:[%s612_s30 + $0xb8] sm:$0xff]  ;;  %307 = vst.msk [vmem:[%s629_s3 + $0x80] sm:$0xff] %vm290_vm0, %v274_v13 }
  0x2b   : > { %308 = vst.msk [vmem:[%s629_s3 + $0x88] sm:$0xff] %vm290_vm0, %v275_v14  ;;  %v277_v25 = vmax.f32 %v245_v15, 0.0  ;;  %v278_v26 = vmax.f32 %v246_v16, 0.0  ;;  %v248_v27 = vadd.f32 %v216_v22, %v184_v19  ;;  %v249_v28 = vadd.f32 %v217_v24, %v185_v23  ;;  %v186_v29 = vld [vmem:[%s607_s27 + $0xc0] sm:$0xff]  ;;  %v187_v31 = vld [vmem:[%s607_s27 + $0xc8] sm:$0xff]  ;;  %v188_v35 = vld [vmem:[%s607_s27 + $0xd0] sm:$0xff] }
  0x2c   : > { %v218_v30 = vld [vmem:[%s612_s30 + $0xc0] sm:$0xff]  ;;  %309 = vst.msk [vmem:[%s629_s3 + $0x90] sm:$0xff] %vm290_vm0, %v276_v20  ;;  %v279_v32 = vmax.f32 %v247_v21, 0.0  ;;  %v219_v34 = vld [vmem:[%s612_s30 + $0xc8] sm:$0xff]  ;;  %v220_v36 = vld [vmem:[%s612_s30 + $0xd0] sm:$0xff] }
  0x2d   : > { %v250_v33 = vadd.f32 %v218_v30, %v186_v29  ;;  %310 = vst.msk [vmem:[%s629_s3 + $0x98] sm:$0xff] %vm290_vm0, %v277_v25  ;;  %311 = vst.msk [vmem:[%s629_s3 + $0xa0] sm:$0xff] %vm290_vm0, %v278_v26  ;;  %v280_v37 = vmax.f32 %v248_v27, 0.0  ;;  %v281_v38 = vmax.f32 %v249_v28, 0.0  ;;  %v251_v39 = vadd.f32 %v219_v34, %v187_v31  ;;  %v189_v41 = vld [vmem:[%s607_s27 + $0xd8] sm:$0xff]  ;;  %v190_v43 = vld [vmem:[%s607_s27 + $0xe0] sm:$0xff] }
  0x2e   : > { %v252_v40 = vadd.f32 %v220_v36, %v188_v35  ;;  %v221_v42 = vld [vmem:[%s612_s30 + $0xd8] sm:$0xff]  ;;  %312 = vst.msk [vmem:[%s629_s3 + $0xa8] sm:$0xff] %vm290_vm0, %v279_v32  ;;  %v222_v46 = vld [vmem:[%s612_s30 + $0xe0] sm:$0xff]  ;;  %v191_v47 = vld [vmem:[%s607_s27 + $0xe8] sm:$0xff] }
  0x2f   : > { %v282_v44 = vmax.f32 %v250_v33, 0.0  ;;  %v253_v45 = vadd.f32 %v221_v42, %v189_v41  ;;  %v223_v48 = vld [vmem:[%s612_s30 + $0xe8] sm:$0xff]  ;;  %313 = vst.msk [vmem:[%s629_s3 + $0xb0] sm:$0xff] %vm290_vm0, %v280_v37  ;;  %314 = vst.msk [vmem:[%s629_s3 + $0xb8] sm:$0xff] %vm290_vm0, %v281_v38  ;;  %v283_v49 = vmax.f32 %v251_v39, 0.0  ;;  %v254_v51 = vadd.f32 %v222_v46, %v190_v43  ;;  %v192_v53 = vld [vmem:[%s607_s27 + $0xf0] sm:$0xff] }
  0x30   : > { %v284_v50 = vmax.f32 %v252_v40, 0.0  ;;  %v255_v52 = vadd.f32 %v223_v48, %v191_v47  ;;  %v224_v54 = vld [vmem:[%s612_s30 + $0xf0] sm:$0xff]  ;;  %v193_v55 = vld [vmem:[%s607_s27 + $0xf8] sm:$0xff] }
  0x31   : > { %315 = vst.msk [vmem:[%s629_s3 + $0xc0] sm:$0xff] %vm290_vm0, %v282_v44  ;;  %v285_v56 = vmax.f32 %v253_v45, 0.0  ;;  %v256_v57 = vadd.f32 %v224_v54, %v192_v53  ;;  %v225_v58 = vld [vmem:[%s612_s30 + $0xf8] sm:$0xff]  ;;  %316 = vst.msk [vmem:[%s629_s3 + $0xc8] sm:$0xff] %vm290_vm0, %v283_v49  ;;  %v286_v59 = vmax.f32 %v254_v51, 0.0 }
  0x32   : > { %317 = vst.msk [vmem:[%s629_s3 + $0xd0] sm:$0xff] %vm290_vm0, %v284_v50  ;;  %v287_v60 = vmax.f32 %v255_v52, 0.0  ;;  %v257_v61 = vadd.f32 %v225_v58, %v193_v55 }
  0x33   : > { %318 = vst.msk [vmem:[%s629_s3 + $0xd8] sm:$0xff] %vm290_vm0, %v285_v56  ;;  %v288_v62 = vmax.f32 %v256_v57, 0.0  ;;  %319 = vst.msk [vmem:[%s629_s3 + $0xe0] sm:$0xff] %vm290_vm0, %v286_v59 }
  0x34   : > { %320 = vst.msk [vmem:[%s629_s3 + $0xe8] sm:$0xff] %vm290_vm0, %v287_v60  ;;  %v289_v63 = vmax.f32 %v257_v61, 0.0 }
  0x35   : > { %321 = vst.msk [vmem:[%s629_s3 + $0xf0] sm:$0xff] %vm290_vm0, %v288_v62 }
  0x36   : > { %322 = vst.msk [vmem:[%s629_s3 + $0xf8] sm:$0xff] %vm290_vm0, %v289_v63 }
  0x37   : > { %482 = shalt.err (!%p479_p3)
}
  0x38   : > { %s483_s21 = scalar_lea.hbm %s741_s8, 4096  ;;  %s487_s25 = scalar_lea.hbm %s798_s2, 8192 }
  0x39   : > { %p484_p4 = scmp.ne.s32.totalorder %s741_s8, %s483_s21  ;;  %p488_p9 = scmp.lt.u32.totalorder %s741_s8, %s798_s2 }
  0x3a   : > { %p489_p10 = scmp.lt.u32.totalorder %s487_s25, %s483_s21  ;;  %p491_p12 = scmp.lt.u32.totalorder %s483_s21, %s741_s8 }
  0x3b   : > { %p485_p7 = pnand %p484_p4, %p589_p5 }
  0x3c   : > { %p490_p11 = por %p489_p10, %p488_p9 }
  0x3d   : > { %p486_p8 = pneg %p485_p7 }
  0x3e   : > { %p492_p13 = por %p491_p12, %p490_p11 }
  0x40   : > { %p493_p0 = pnand %p492_p13, %p486_p8 }
  0x42   : > { %496 = shalt.err (!%p493_p0)
}
  0x43   : > { %s534_s28 = smov 128   ;;  %s535_s29 = smov 8  }
  0x44   : > { %428 = dma.vmem_to_hbm [thread:$0]  (%p589_p5), %s743_s5, 4096, %s741_s8, %s755_s13, %s534_s28, %s534_s28, %s535_s29  }
  0x45 PF: > { %p434_p1 = scmp.ge.s32.totalorder %s531_s12, 2  ;;  %s352_s30 = sand.u32 1, %s519_s9  }
  0x46   : > { %s353_s3 = scalar_lea.sflag [#allocation3], %s352_s30 }
  0x47   : > { %p431_p2 = pnand %p434_p1, %p593_p6 }
  0x49   : > { %514 = dma.done.wait (!%p431_p2), %s353_s3, 4096  }
  0x4a   : > { %516 = vsyncadd (!%p431_p2), %s353_s3, 4294963200  ;;  %p12_p3 = scmp.ge.s32.totalorder %s576_s15, 4   ;;  %s801_s9 = smov %s523_s10 }
  0x4b   : > { %s802_s10 = smov %s527_s11  ;;  %s803_s11 = smov %s587_s18 }
  0x4c   : > { %s804_s12 = smov %s576_s15  ;;  %14 = sbr.rel (!%p12_p3) target bundleno = 3 (0x3), region = 66 }
  0x53   :  { %358 = vsyncpa [#allocation3], 1 }
  0x54   :  { %360 = vsyncpa [#allocation3 + $0x1], 1 }

</bundles_post_ra>
